<compile_context>
chip_gen: v6e
topology: v6e:2x2x1
jax: 0.10.0
libtpu: 0.0.40
codegen_flags: <defaults>
</compile_context>

<pallas_src>
import functools

import jax
import jax.numpy as jnp
from jax import lax
from jax.experimental import pallas as pl
from jax.experimental.pallas import tpu as pltpu

NEG_SLOPE = 0.2          # GATv2Conv default negative_slope
NEG_BIG = -1e30
NT = (((1,), (1,)), ((), ()))   # "A @ B^T" dot_general dims (contract last dims)


def _sigmoid_exact(v):
    return 1.0 / (1.0 + jnp.exp(-v))


def _vmem_limit_bytes():
    """Per-generation scoped-VMEM limit (v5e/v6e: ~96 MiB, v7x: ~48 MiB)."""
    try:
        cap = int(getattr(pltpu.get_tpu_info(), "vmem_capacity_bytes",
                          64 * 1024 * 1024))
    except Exception:
        cap = 64 * 1024 * 1024
    return max(32 * 1024 * 1024, min(100 * 1024 * 1024, (3 * cap) // 4))


def _gatv2(x, adj_b, valid_col_f, valid_row_f, eye_b,
           wlt, wrt, b_l_row, b_logit_row, att_row, bias_row, src_chunk):
    """GATv2Conv, single head, add_self_loops=True.  Chunked over source nodes with an
    online softmax; logits built as lane-dense rank-2 [N, chunk] tiles."""
    n = adj_b.shape[0]
    f = wlt.shape[0]

    x16 = x.astype(jnp.bfloat16)
    # MXU in bf16 with f32 accumulation; elementwise math stays f32 (v5e has no bf16 VPU).
    xl = lax.dot_general(x16, wlt, NT, preferred_element_type=jnp.float32) + b_l_row       # [N,F]
    xr_l = lax.dot_general(x16, wrt, NT, preferred_element_type=jnp.float32) + b_logit_row  # [N,F]
    xlT = lax.dot_general(wlt, x16, NT, preferred_element_type=jnp.float32)                 # [F,N]
    xl16 = xl.astype(jnp.bfloat16)

    vcol_b = valid_col_f > 0.0                               # [N,1]
    att_neg_row = att_row * NEG_SLOPE
    # per-feature operands hoisted out of the source-chunk loop
    xr_cols = [xr_l[:, ff:ff + 1] for ff in range(f)]        # F x [N,1]
    a_pos = [att_row[:, ff:ff + 1] for ff in range(f)]       # F x [1,1]
    a_neg = [att_neg_row[:, ff:ff + 1] for ff in range(f)]

    # online-softmax accumulators (f32)
    m_i = jnp.full((n, 1), NEG_BIG, jnp.float32)
    l_i = jnp.zeros((n, 1), jnp.float32)
    acc = jnp.zeros((n, f), jnp.float32)

    for j0 in range(0, n, src_chunk):                        # static chunk loop (N static)
        j1 = min(j0 + src_chunk, n)
        adj_c = adj_b[:, j0:j1]                              # [N,JB] bool
        eye_c = eye_b[:, j0:j1]
        vrow_c = valid_row_f[:, j0:j1] > 0.0                 # [1,JB]

        # e[i, j] = sum_f att[f] * leaky_relu(xr_l[i, f] + xl[j, f])
        # source chunk j on lanes -> every VALU pass runs on fully-dense vregs.
        e = jnp.zeros((n, j1 - j0), jnp.float32)
        for ff in range(f):
            sf = xr_cols[ff] + xlT[ff:ff + 1, j0:j1]                        # [N,JB]
            e = e + jnp.where(sf > 0.0, a_pos[ff] * sf, a_neg[ff] * sf)

        # adjacency + exactly one self loop per still-valid node, fused boolean mask.
        mask = (adj_c | eye_c) & vcol_b & vrow_c
        e = jnp.where(mask, e, NEG_BIG)

        m_new = jnp.maximum(m_i, jnp.max(e, axis=1, keepdims=True))
        scale = jnp.exp(m_i - m_new)
        p = jnp.where(mask, jnp.exp(e - m_new), 0.0)
        l_i = scale * l_i + jnp.sum(p, axis=1, keepdims=True)
        acc = scale * acc + jnp.dot(p.astype(jnp.bfloat16), xl16[j0:j1, :],
                                    preferred_element_type=jnp.float32)
        m_i = m_new

    # dropped nodes: l_i == 0 and acc == 0; valid rows have l_i >= 1.
    inv_l = pl.reciprocal(jnp.maximum(l_i, 1e-9), approx=True)
    return acc * inv_l + bias_row


def _topk_pool(x, adj_b, valid_col_f, valid_row_f, eye_f, bmat, bmat_t,
               pw_col, pw_row, ratio, idx_i, idx_j):
    """TopKPooling(features, ratio, nonlinearity=sigmoid), multiplier = 1 (dense masks)."""
    inv_norm = lax.rsqrt(jnp.maximum(jnp.sum(pw_col * pw_col), 1e-12))
    # projection score in both orientations straight from the MXU (exact sigmoid:
    # approximate reciprocal could flip near-tied top-k selections).
    score_col = _sigmoid_exact(
        jnp.dot(x, pw_col, preferred_element_type=jnp.float32) * inv_norm)             # [N,1]
    score_row = _sigmoid_exact(
        lax.dot_general(pw_row, x, NT, preferred_element_type=jnp.float32) * inv_norm)  # [1,N]

    # per-graph count of currently valid nodes and k = ceil(ratio * n)
    n_g = jnp.dot(bmat, valid_col_f, preferred_element_type=jnp.float32)   # [G,1]
    k_g = jnp.ceil(ratio * n_g)                                            # [G,1]
    k_col = jnp.dot(bmat_t, k_g, preferred_element_type=jnp.float32)       # [N,1]

    # rank within own graph (descending score, deterministic index tie-break); the
    # same-graph restriction is an [N,N]x[N,G] MXU matmul, diagonal explicitly excluded.
    beats = jnp.where(
        (idx_j != idx_i)
        & ((score_row > score_col)
           | ((score_row == score_col) & (idx_j < idx_i))),
        1.0, 0.0)                                                          # [N,N]
    bv = bmat_t * valid_col_f                                              # [N,G]
    rank = jnp.sum(bmat_t * jnp.dot(beats, bv, preferred_element_type=jnp.float32),
                   axis=1, keepdims=True)                                  # [N,1]

    keep_col = jnp.where((valid_col_f > 0.0) & (rank < k_col), 1.0, 0.0)   # [N,1]
    # keep_row derived from keep_col with the identity trick so the row/col masks stay
    # exactly consistent (a transposed-LHS matmul is not reliably lowered by Mosaic).
    keep_row = jnp.sum(eye_f * keep_col, axis=0, keepdims=True)            # [1,N]

    x_new = x * (score_col * keep_col)          # x[perm] * score[perm]; dropped -> 0
    adj_new = adj_b & (keep_col > 0.0) & (keep_row > 0.0)                  # filter_adj
    return x_new, adj_new, keep_col, keep_row


def _model_kernel(ratio, src_chunk, x_ref, adj_ref, bmat_ref, bmatt_ref, *rest):
    prm = [r[...] for r in rest[:27]]
    out_ref, feat_ref = rest[27], rest[28]

    x = x_ref[0]                      # [N,C]
    adj_b = adj_ref[0] > 0.0          # [N,N] bool
    bmat = bmat_ref[0]                # [G,N]
    bmat_t = bmatt_ref[0]             # [N,G]
    n = x.shape[0]
    g = bmat.shape[0]
    f = prm[4].shape[1]               # att width = features

    idx_i = lax.broadcasted_iota(jnp.int32, (n, n), 0)
    idx_j = lax.broadcasted_iota(jnp.int32, (n, n), 1)
    eye_b = idx_i == idx_j
    eye_f = jnp.where(eye_b, 1.0, 0.0)

    valid_col_f = jnp.ones((n, 1), jnp.float32)
    valid_row_f = jnp.ones((1, n), jnp.float32)

    for layer in range(3):
        (wlt, wrt, b_l_row, b_logit_row,
         att_row, bias_row, pw_col, pw_row) = prm[8 * layer:8 * layer + 8]
        x = _gatv2(x, adj_b, valid_col_f, valid_row_f, eye_b,
                   wlt, wrt, b_l_row, b_logit_row, att_row, bias_row, src_chunk)
        x, adj_b, valid_col_f, valid_row_f = _topk_pool(
            x, adj_b, valid_col_f, valid_row_f, eye_f, bmat, bmat_t,
            pw_col, pw_row, ratio, idx_i, idx_j)
        x = jnp.maximum(x, 0.0)       # F.relu

    w_max, w_mean, b_out = prm[24], prm[25], prm[26]

    # ---- readout ----
    bk = bmat * valid_row_f                                               # [G,N]
    # global_mean_pool
    sums = jnp.dot(bk, x, preferred_element_type=jnp.float32)             # [G,F]
    cnt = jnp.sum(bk, axis=1, keepdims=True)                              # [G,1] (>= 1)
    gap = sums * pl.reciprocal(cnt, approx=True)
    # global_max_pool: per-graph masked max.  x >= 0 after ReLU and dropped-node rows
    # are exactly 0, so 0 is a valid identity.  Membership is a lane-slice of bmat_t
    # (no per-graph matmul); per-block G is small by design (scale-out = grid).
    g_iota = lax.broadcasted_iota(jnp.int32, (g, 1), 0)
    gmp = jnp.zeros((g, f), jnp.float32)
    for gg in range(g):
        member = bmat_t[:, gg:gg + 1] * valid_col_f                       # [N,1]
        mx = jnp.max(jnp.where(member > 0.0, x, 0.0), axis=0, keepdims=True)  # [1,F]
        onehot = jnp.where(g_iota == gg, 1.0, 0.0)                        # [G,1]
        gmp = gmp + onehot * mx

    logits = (jnp.dot(gmp, w_max, preferred_element_type=jnp.float32)
              + jnp.dot(gap, w_mean, preferred_element_type=jnp.float32)
              + b_out)
    out_ref[0] = _sigmoid_exact(logits)           # exact: output stays in [0, 1]
    # torch.cat([gmp, gap], dim=1)
    feat_ref[0, :, 0:f] = gmp
    feat_ref[0, :, f:2 * f] = gap


def _prep_kernel_params(params):
    """Torch-layout params -> kernel params: weights pre-transposed + pre-cast to bf16,
    biases/att in the row/column layouts the kernel consumes (no in-kernel transposes)."""
    kp = []
    for layer in range(3):
        w_l, b_l, w_r, b_r, att, b_conv, pw = params[7 * layer:7 * layer + 7]
        kp += [
            jnp.transpose(w_l).astype(jnp.bfloat16),   # [F,C] bf16
            jnp.transpose(w_r).astype(jnp.bfloat16),   # [F,C] bf16
            b_l,                                       # [1,F]
            b_l + b_r,                                 # [1,F] (logit bias, b_l folded in)
            att,                                       # [1,F]
            b_conv,                                    # [1,F]
            pw,                                        # [F,1]
            jnp.transpose(pw),                         # [1,F]
        ]
    kp += [params[21], params[22], params[23]]         # w_max [F,1], w_mean [F,1], b_out [1,1]
    return kp


@functools.partial(jax.jit, static_argnames=("ratio",))
def forward(x, adj, bmat, params, *, ratio):
    """x: [B,N,C], adj: [B,N,N], bmat: [B,G,N]; returns (out [B*G,1], feat [B*G,2F])."""
    b_blocks, n, c = x.shape
    g = bmat.shape[1]
    f = params[4].shape[1]
    bmat_t = jnp.transpose(bmat, (0, 2, 1))            # [B,N,G] host-side glue (tiny)

    limit = _vmem_limit_bytes()
    src_chunk = 256 if limit >= 64 * 1024 * 1024 else 128

    kparams = _prep_kernel_params(params)
    inputs = [x, adj, bmat, bmat_t] + kparams

    data_specs = [
        pl.BlockSpec((1, n, c), lambda i: (i, 0, 0)),
        pl.BlockSpec((1, n, n), lambda i: (i, 0, 0)),
        pl.BlockSpec((1, g, n), lambda i: (i, 0, 0)),
        pl.BlockSpec((1, n, g), lambda i: (i, 0, 0)),
    ]
    param_specs = [pl.BlockSpec(p.shape, lambda i, _nd=p.ndim: (0,) * _nd)
                   for p in kparams]

    out, feat = pl.pallas_call(
        functools.partial(_model_kernel, float(ratio), src_chunk),
        grid=(b_blocks,),
        out_shape=(
            jax.ShapeDtypeStruct((b_blocks, g, 1), jnp.float32),
            jax.ShapeDtypeStruct((b_blocks, g, 2 * f), jnp.float32),
        ),
        in_specs=data_specs + param_specs,
        out_specs=(
            pl.BlockSpec((1, g, 1), lambda i: (i, 0, 0)),
            pl.BlockSpec((1, g, 2 * f), lambda i: (i, 0, 0)),
        ),
        compiler_params=pltpu.CompilerParams(
            dimension_semantics=("parallel",),
            vmem_limit_bytes=limit),
    )(*inputs)
    return out.reshape(b_blocks * g, 1), feat.reshape(b_blocks * g, 2 * f)


def build_params(key, indim, features):
    # Deterministic synthetic parameters (shapes follow the torch module's __init__).
    f = features
    keys = jax.random.split(key, 14)
    params = []
    ki = 0
    for din in (indim, f, f):                          # conv1/2/3 + pool1/2/3
        sc = float(din) ** -0.5
        params.append(jax.random.normal(keys[ki], (din, f), jnp.float32) * sc); ki += 1   # W_l
        params.append(jnp.zeros((1, f), jnp.float32))                                     # b_l
        params.append(jax.random.normal(keys[ki], (din, f), jnp.float32) * sc); ki += 1   # W_r
        params.append(jnp.zeros((1, f), jnp.float32))                                     # b_r
        params.append(jax.random.normal(keys[ki], (1, f), jnp.float32) * (float(f) ** -0.5)); ki += 1  # att
        params.append(jnp.zeros((1, f), jnp.float32))                                     # conv bias
        params.append(jax.random.normal(keys[ki], (f, 1), jnp.float32)); ki += 1          # TopK weight
    sc_out = float(2 * f) ** -0.5
    params.append(jax.random.normal(keys[ki], (f, 1), jnp.float32) * sc_out); ki += 1     # out W (max half)
    params.append(jax.random.normal(keys[ki], (f, 1), jnp.float32) * sc_out); ki += 1     # out W (mean half)
    params.append(jnp.zeros((1, 1), jnp.float32))                                         # out bias
    return params


if __name__ == "__main__":
    B, G_PER_BLOCK, NODES_PER_GRAPH = 2, 2, 8
    N = G_PER_BLOCK * NODES_PER_GRAPH          # 16 nodes per block
    INDIM, FEATURES, RATIO = 8, 32, 0.5

    key = jax.random.PRNGKey(0)
    k_x, k_e, k_p = jax.random.split(key, 3)

    x = jax.random.normal(k_x, (B, N, INDIM), dtype=jnp.float32)
    batch_index = jnp.repeat(jnp.arange(G_PER_BLOCK), NODES_PER_GRAPH)           # [N]
    bmat1 = jnp.transpose(jax.nn.one_hot(batch_index, G_PER_BLOCK, dtype=jnp.float32))  # [G,N]
    bmat = jnp.broadcast_to(bmat1, (B, G_PER_BLOCK, N))

    same_graph = batch_index[:, None] == batch_index[None, :]
    eye = jnp.eye(N, dtype=bool)
    rand = jax.random.uniform(k_e, (B, N, N))
    adj = jnp.where(same_graph[None] & (~eye)[None] & (rand < 0.4), 1.0, 0.0).astype(jnp.float32)

    params = build_params(k_p, INDIM, FEATURES)

    out, feat = forward(x, adj, bmat, params, ratio=RATIO)
    jax.block_until_ready((out, feat))

    n_graphs = B * G_PER_BLOCK
    assert out.shape == (n_graphs, 1) and feat.shape == (n_graphs, 2 * FEATURES)
    assert bool(jnp.all(jnp.isfinite(out))) and bool(jnp.all(jnp.isfinite(feat)))
    assert bool(jnp.all((out >= 0.0) & (out <= 1.0)))
    print("KERNEL_OK")
</pallas_src>

<mosaic_0001>
module attributes {stable_mosaic.version = 11 : i64} {
  func.func @_model_kernel(%arg0: i32, %arg1: memref<1x16x8xf32, #tpu.memory_space<vmem>>, %arg2: memref<1x16x16xf32, #tpu.memory_space<vmem>>, %arg3: memref<1x2x16xf32, #tpu.memory_space<vmem>>, %arg4: memref<1x16x2xf32, #tpu.memory_space<vmem>>, %arg5: memref<32x8xbf16, #tpu.memory_space<vmem>>, %arg6: memref<32x8xbf16, #tpu.memory_space<vmem>>, %arg7: memref<1x32xf32, #tpu.memory_space<vmem>>, %arg8: memref<1x32xf32, #tpu.memory_space<vmem>>, %arg9: memref<1x32xf32, #tpu.memory_space<vmem>>, %arg10: memref<1x32xf32, #tpu.memory_space<vmem>>, %arg11: memref<32x1xf32, #tpu.memory_space<vmem>>, %arg12: memref<1x32xf32, #tpu.memory_space<vmem>>, %arg13: memref<32x32xbf16, #tpu.memory_space<vmem>>, %arg14: memref<32x32xbf16, #tpu.memory_space<vmem>>, %arg15: memref<1x32xf32, #tpu.memory_space<vmem>>, %arg16: memref<1x32xf32, #tpu.memory_space<vmem>>, %arg17: memref<1x32xf32, #tpu.memory_space<vmem>>, %arg18: memref<1x32xf32, #tpu.memory_space<vmem>>, %arg19: memref<32x1xf32, #tpu.memory_space<vmem>>, %arg20: memref<1x32xf32, #tpu.memory_space<vmem>>, %arg21: memref<32x32xbf16, #tpu.memory_space<vmem>>, %arg22: memref<32x32xbf16, #tpu.memory_space<vmem>>, %arg23: memref<1x32xf32, #tpu.memory_space<vmem>>, %arg24: memref<1x32xf32, #tpu.memory_space<vmem>>, %arg25: memref<1x32xf32, #tpu.memory_space<vmem>>, %arg26: memref<1x32xf32, #tpu.memory_space<vmem>>, %arg27: memref<32x1xf32, #tpu.memory_space<vmem>>, %arg28: memref<1x32xf32, #tpu.memory_space<vmem>>, %arg29: memref<32x1xf32, #tpu.memory_space<vmem>>, %arg30: memref<32x1xf32, #tpu.memory_space<vmem>>, %arg31: memref<1x1xf32, #tpu.memory_space<vmem>>, %arg32: memref<1x2x1xf32, #tpu.memory_space<vmem>>, %arg33: memref<1x2x64xf32, #tpu.memory_space<vmem>>) attributes {dimension_semantics = [#tpu.dimension_semantics<parallel>], iteration_bounds = array<i64: 2>, scalar_prefetch = 0 : i64, scratch_operands = 0 : i64, tpu.core_type = #tpu.core_type<tc>, window_params = [{transform_indices = @transform_0, window_bounds = array<i64: 1, 16, 8>}, {transform_indices = @transform_1, window_bounds = array<i64: 1, 16, 16>}, {transform_indices = @transform_2, window_bounds = array<i64: 1, 2, 16>}, {transform_indices = @transform_3, window_bounds = array<i64: 1, 16, 2>}, {pipeline_mode = #tpu.pipeline_mode<synchronous>, transform_indices = @transform_4, window_bounds = array<i64: 32, 8>}, {pipeline_mode = #tpu.pipeline_mode<synchronous>, transform_indices = @transform_5, window_bounds = array<i64: 32, 8>}, {pipeline_mode = #tpu.pipeline_mode<synchronous>, transform_indices = @transform_6, window_bounds = array<i64: 1, 32>}, {pipeline_mode = #tpu.pipeline_mode<synchronous>, transform_indices = @transform_7, window_bounds = array<i64: 1, 32>}, {pipeline_mode = #tpu.pipeline_mode<synchronous>, transform_indices = @transform_8, window_bounds = array<i64: 1, 32>}, {pipeline_mode = #tpu.pipeline_mode<synchronous>, transform_indices = @transform_9, window_bounds = array<i64: 1, 32>}, {pipeline_mode = #tpu.pipeline_mode<synchronous>, transform_indices = @transform_10, window_bounds = array<i64: 32, 1>}, {pipeline_mode = #tpu.pipeline_mode<synchronous>, transform_indices = @transform_11, window_bounds = array<i64: 1, 32>}, {pipeline_mode = #tpu.pipeline_mode<synchronous>, transform_indices = @transform_12, window_bounds = array<i64: 32, 32>}, {pipeline_mode = #tpu.pipeline_mode<synchronous>, transform_indices = @transform_13, window_bounds = array<i64: 32, 32>}, {pipeline_mode = #tpu.pipeline_mode<synchronous>, transform_indices = @transform_14, window_bounds = array<i64: 1, 32>}, {pipeline_mode = #tpu.pipeline_mode<synchronous>, transform_indices = @transform_15, window_bounds = array<i64: 1, 32>}, {pipeline_mode = #tpu.pipeline_mode<synchronous>, transform_indices = @transform_16, window_bounds = array<i64: 1, 32>}, {pipeline_mode = #tpu.pipeline_mode<synchronous>, transform_indices = @transform_17, window_bounds = array<i64: 1, 32>}, {pipeline_mode = #tpu.pipeline_mode<synchronous>, transform_indices = @transform_18, window_bounds = array<i64: 32, 1>}, {pipeline_mode = #tpu.pipeline_mode<synchronous>, transform_indices = @transform_19, window_bounds = array<i64: 1, 32>}, {pipeline_mode = #tpu.pipeline_mode<synchronous>, transform_indices = @transform_20, window_bounds = array<i64: 32, 32>}, {pipeline_mode = #tpu.pipeline_mode<synchronous>, transform_indices = @transform_21, window_bounds = array<i64: 32, 32>}, {pipeline_mode = #tpu.pipeline_mode<synchronous>, transform_indices = @transform_22, window_bounds = array<i64: 1, 32>}, {pipeline_mode = #tpu.pipeline_mode<synchronous>, transform_indices = @transform_23, window_bounds = array<i64: 1, 32>}, {pipeline_mode = #tpu.pipeline_mode<synchronous>, transform_indices = @transform_24, window_bounds = array<i64: 1, 32>}, {pipeline_mode = #tpu.pipeline_mode<synchronous>, transform_indices = @transform_25, window_bounds = array<i64: 1, 32>}, {pipeline_mode = #tpu.pipeline_mode<synchronous>, transform_indices = @transform_26, window_bounds = array<i64: 32, 1>}, {pipeline_mode = #tpu.pipeline_mode<synchronous>, transform_indices = @transform_27, window_bounds = array<i64: 1, 32>}, {pipeline_mode = #tpu.pipeline_mode<synchronous>, transform_indices = @transform_28, window_bounds = array<i64: 32, 1>}, {pipeline_mode = #tpu.pipeline_mode<synchronous>, transform_indices = @transform_29, window_bounds = array<i64: 32, 1>}, {pipeline_mode = #tpu.pipeline_mode<synchronous>, transform_indices = @transform_30, window_bounds = array<i64: 1, 1>}, {transform_indices = @transform_31, window_bounds = array<i64: 1, 2, 1>}, {transform_indices = @transform_32, window_bounds = array<i64: 1, 2, 64>}]} {
    %c0 = arith.constant 0 : index
    %c0_0 = arith.constant 0 : index
    %0 = vector.load %arg5[%c0, %c0_0] : memref<32x8xbf16, #tpu.memory_space<vmem>>, vector<32x8xbf16>
    %c0_1 = arith.constant 0 : index
    %c0_2 = arith.constant 0 : index
    %1 = vector.load %arg6[%c0_1, %c0_2] : memref<32x8xbf16, #tpu.memory_space<vmem>>, vector<32x8xbf16>
    %c0_3 = arith.constant 0 : index
    %c0_4 = arith.constant 0 : index
    %2 = vector.load %arg7[%c0_3, %c0_4] : memref<1x32xf32, #tpu.memory_space<vmem>>, vector<1x32xf32>
    %c0_5 = arith.constant 0 : index
    %c0_6 = arith.constant 0 : index
    %3 = vector.load %arg8[%c0_5, %c0_6] : memref<1x32xf32, #tpu.memory_space<vmem>>, vector<1x32xf32>
    %c0_7 = arith.constant 0 : index
    %c0_8 = arith.constant 0 : index
    %4 = vector.load %arg9[%c0_7, %c0_8] : memref<1x32xf32, #tpu.memory_space<vmem>>, vector<1x32xf32>
    %c0_9 = arith.constant 0 : index
    %c0_10 = arith.constant 0 : index
    %5 = vector.load %arg10[%c0_9, %c0_10] : memref<1x32xf32, #tpu.memory_space<vmem>>, vector<1x32xf32>
    %c0_11 = arith.constant 0 : index
    %c0_12 = arith.constant 0 : index
    %6 = vector.load %arg11[%c0_11, %c0_12] : memref<32x1xf32, #tpu.memory_space<vmem>>, vector<32x1xf32>
    %c0_13 = arith.constant 0 : index
    %c0_14 = arith.constant 0 : index
    %7 = vector.load %arg12[%c0_13, %c0_14] : memref<1x32xf32, #tpu.memory_space<vmem>>, vector<1x32xf32>
    %c0_15 = arith.constant 0 : index
    %c0_16 = arith.constant 0 : index
    %8 = vector.load %arg13[%c0_15, %c0_16] : memref<32x32xbf16, #tpu.memory_space<vmem>>, vector<32x32xbf16>
    %c0_17 = arith.constant 0 : index
    %c0_18 = arith.constant 0 : index
    %9 = vector.load %arg14[%c0_17, %c0_18] : memref<32x32xbf16, #tpu.memory_space<vmem>>, vector<32x32xbf16>
    %c0_19 = arith.constant 0 : index
    %c0_20 = arith.constant 0 : index
    %10 = vector.load %arg15[%c0_19, %c0_20] : memref<1x32xf32, #tpu.memory_space<vmem>>, vector<1x32xf32>
    %c0_21 = arith.constant 0 : index
    %c0_22 = arith.constant 0 : index
    %11 = vector.load %arg16[%c0_21, %c0_22] : memref<1x32xf32, #tpu.memory_space<vmem>>, vector<1x32xf32>
    %c0_23 = arith.constant 0 : index
    %c0_24 = arith.constant 0 : index
    %12 = vector.load %arg17[%c0_23, %c0_24] : memref<1x32xf32, #tpu.memory_space<vmem>>, vector<1x32xf32>
    %c0_25 = arith.constant 0 : index
    %c0_26 = arith.constant 0 : index
    %13 = vector.load %arg18[%c0_25, %c0_26] : memref<1x32xf32, #tpu.memory_space<vmem>>, vector<1x32xf32>
    %c0_27 = arith.constant 0 : index
    %c0_28 = arith.constant 0 : index
    %14 = vector.load %arg19[%c0_27, %c0_28] : memref<32x1xf32, #tpu.memory_space<vmem>>, vector<32x1xf32>
    %c0_29 = arith.constant 0 : index
    %c0_30 = arith.constant 0 : index
    %15 = vector.load %arg20[%c0_29, %c0_30] : memref<1x32xf32, #tpu.memory_space<vmem>>, vector<1x32xf32>
    %c0_31 = arith.constant 0 : index
    %c0_32 = arith.constant 0 : index
    %16 = vector.load %arg21[%c0_31, %c0_32] : memref<32x32xbf16, #tpu.memory_space<vmem>>, vector<32x32xbf16>
    %c0_33 = arith.constant 0 : index
    %c0_34 = arith.constant 0 : index
    %17 = vector.load %arg22[%c0_33, %c0_34] : memref<32x32xbf16, #tpu.memory_space<vmem>>, vector<32x32xbf16>
    %c0_35 = arith.constant 0 : index
    %c0_36 = arith.constant 0 : index
    %18 = vector.load %arg23[%c0_35, %c0_36] : memref<1x32xf32, #tpu.memory_space<vmem>>, vector<1x32xf32>
    %c0_37 = arith.constant 0 : index
    %c0_38 = arith.constant 0 : index
    %19 = vector.load %arg24[%c0_37, %c0_38] : memref<1x32xf32, #tpu.memory_space<vmem>>, vector<1x32xf32>
    %c0_39 = arith.constant 0 : index
    %c0_40 = arith.constant 0 : index
    %20 = vector.load %arg25[%c0_39, %c0_40] : memref<1x32xf32, #tpu.memory_space<vmem>>, vector<1x32xf32>
    %c0_41 = arith.constant 0 : index
    %c0_42 = arith.constant 0 : index
    %21 = vector.load %arg26[%c0_41, %c0_42] : memref<1x32xf32, #tpu.memory_space<vmem>>, vector<1x32xf32>
    %c0_43 = arith.constant 0 : index
    %c0_44 = arith.constant 0 : index
    %22 = vector.load %arg27[%c0_43, %c0_44] : memref<32x1xf32, #tpu.memory_space<vmem>>, vector<32x1xf32>
    %c0_45 = arith.constant 0 : index
    %c0_46 = arith.constant 0 : index
    %23 = vector.load %arg28[%c0_45, %c0_46] : memref<1x32xf32, #tpu.memory_space<vmem>>, vector<1x32xf32>
    %c0_47 = arith.constant 0 : index
    %c0_48 = arith.constant 0 : index
    %24 = vector.load %arg29[%c0_47, %c0_48] : memref<32x1xf32, #tpu.memory_space<vmem>>, vector<32x1xf32>
    %c0_49 = arith.constant 0 : index
    %c0_50 = arith.constant 0 : index
    %25 = vector.load %arg30[%c0_49, %c0_50] : memref<32x1xf32, #tpu.memory_space<vmem>>, vector<32x1xf32>
    %c0_51 = arith.constant 0 : index
    %c0_52 = arith.constant 0 : index
    %26 = vector.load %arg31[%c0_51, %c0_52] : memref<1x1xf32, #tpu.memory_space<vmem>>, vector<1x1xf32>
    %c0_53 = arith.constant 0 : index
    %c0_54 = arith.constant 0 : index
    %c0_55 = arith.constant 0 : index
    %27 = vector.load %arg1[%c0_53, %c0_54, %c0_55] : memref<1x16x8xf32, #tpu.memory_space<vmem>>, vector<1x16x8xf32>
    %28 = vector.shape_cast %27 : vector<1x16x8xf32> to vector<16x8xf32>
    %c0_56 = arith.constant 0 : index
    %c0_57 = arith.constant 0 : index
    %c0_58 = arith.constant 0 : index
    %29 = vector.load %arg2[%c0_56, %c0_57, %c0_58] : memref<1x16x16xf32, #tpu.memory_space<vmem>>, vector<1x16x16xf32>
    %30 = vector.shape_cast %29 : vector<1x16x16xf32> to vector<16x16xf32>
    %cst = arith.constant 0.000000e+00 : f32
    %31 = vector.broadcast %cst : f32 to vector<16x16xf32>
    %32 = arith.cmpf ogt, %30, %31 : vector<16x16xf32>
    %c0_59 = arith.constant 0 : index
    %c0_60 = arith.constant 0 : index
    %c0_61 = arith.constant 0 : index
    %33 = vector.load %arg3[%c0_59, %c0_60, %c0_61] : memref<1x2x16xf32, #tpu.memory_space<vmem>>, vector<1x2x16xf32>
    %34 = vector.shape_cast %33 : vector<1x2x16xf32> to vector<2x16xf32>
    %c0_62 = arith.constant 0 : index
    %c0_63 = arith.constant 0 : index
    %c0_64 = arith.constant 0 : index
    %35 = vector.load %arg4[%c0_62, %c0_63, %c0_64] : memref<1x16x2xf32, #tpu.memory_space<vmem>>, vector<1x16x2xf32>
    %36 = vector.shape_cast %35 : vector<1x16x2xf32> to vector<16x2xf32>
    %37 = tpu.iota {dimensions = array<i32: 0>} : vector<16x16xi32>
    %38 = tpu.iota {dimensions = array<i32: 1>} : vector<16x16xi32>
    %39 = arith.cmpi eq, %37, %38 : vector<16x16xi32>
    %cst_65 = arith.constant 1.000000e+00 : f32
    %cst_66 = arith.constant 0.000000e+00 : f32
    %40 = vector.broadcast %cst_65 : f32 to vector<16x16xf32>
    %41 = vector.broadcast %cst_66 : f32 to vector<16x16xf32>
    %42 = arith.select %39, %40, %41 : vector<16x16xi1>, vector<16x16xf32>
    %cst_67 = arith.constant 1.000000e+00 : f32
    %43 = vector.broadcast %cst_67 : f32 to vector<16x1xf32>
    %cst_68 = arith.constant 1.000000e+00 : f32
    %44 = vector.broadcast %cst_68 : f32 to vector<1x16xf32>
    %45 = arith.truncf %28 : vector<16x8xf32> to vector<16x8xbf16>
    %cst_69 = arith.constant dense<0.000000e+00> : vector<16x32xf32>
    %46 = tpu.matmul %45, %0, %cst_69 {dimension_numbers = #tpu.dot_dimension_numbers<[1], [1], [0], [0], [0, 0, 1, 0], [], []>} : vector<16x8xbf16>, vector<32x8xbf16>, vector<16x32xf32> -> vector<16x32xf32>
    %47 = vector.broadcast %2 : vector<1x32xf32> to vector<16x32xf32>
    %48 = arith.addf %46, %47 : vector<16x32xf32>
    %cst_70 = arith.constant dense<0.000000e+00> : vector<16x32xf32>
    %49 = tpu.matmul %45, %1, %cst_70 {dimension_numbers = #tpu.dot_dimension_numbers<[1], [1], [0], [0], [0, 0, 1, 0], [], []>} : vector<16x8xbf16>, vector<32x8xbf16>, vector<16x32xf32> -> vector<16x32xf32>
    %50 = vector.broadcast %3 : vector<1x32xf32> to vector<16x32xf32>
    %51 = arith.addf %49, %50 : vector<16x32xf32>
    %cst_71 = arith.constant dense<0.000000e+00> : vector<32x16xf32>
    %52 = tpu.matmul %0, %45, %cst_71 {dimension_numbers = #tpu.dot_dimension_numbers<[1], [1], [0], [0], [0, 0, 1, 0], [], []>} : vector<32x8xbf16>, vector<16x8xbf16>, vector<32x16xf32> -> vector<32x16xf32>
    %53 = arith.truncf %48 : vector<16x32xf32> to vector<16x32xbf16>
    %cst_72 = arith.constant 0.000000e+00 : f32
    %54 = vector.broadcast %cst_72 : f32 to vector<16x1xf32>
    %55 = arith.cmpf ogt, %43, %54 : vector<16x1xf32>
    %cst_73 = arith.constant 2.000000e-01 : f32
    %56 = vector.broadcast %cst_73 : f32 to vector<1x32xf32>
    %57 = arith.mulf %4, %56 : vector<1x32xf32>
    %58 = vector.extract_strided_slice %51 {offsets = [0, 0], sizes = [16, 1], strides = [1, 1]} : vector<16x32xf32> to vector<16x1xf32>
    %59 = vector.extract_strided_slice %51 {offsets = [0, 1], sizes = [16, 1], strides = [1, 1]} : vector<16x32xf32> to vector<16x1xf32>
    %60 = vector.extract_strided_slice %51 {offsets = [0, 2], sizes = [16, 1], strides = [1, 1]} : vector<16x32xf32> to vector<16x1xf32>
    %61 = vector.extract_strided_slice %51 {offsets = [0, 3], sizes = [16, 1], strides = [1, 1]} : vector<16x32xf32> to vector<16x1xf32>
    %62 = vector.extract_strided_slice %51 {offsets = [0, 4], sizes = [16, 1], strides = [1, 1]} : vector<16x32xf32> to vector<16x1xf32>
    %63 = vector.extract_strided_slice %51 {offsets = [0, 5], sizes = [16, 1], strides = [1, 1]} : vector<16x32xf32> to vector<16x1xf32>
    %64 = vector.extract_strided_slice %51 {offsets = [0, 6], sizes = [16, 1], strides = [1, 1]} : vector<16x32xf32> to vector<16x1xf32>
    %65 = vector.extract_strided_slice %51 {offsets = [0, 7], sizes = [16, 1], strides = [1, 1]} : vector<16x32xf32> to vector<16x1xf32>
    %66 = vector.extract_strided_slice %51 {offsets = [0, 8], sizes = [16, 1], strides = [1, 1]} : vector<16x32xf32> to vector<16x1xf32>
    %67 = vector.extract_strided_slice %51 {offsets = [0, 9], sizes = [16, 1], strides = [1, 1]} : vector<16x32xf32> to vector<16x1xf32>
    %68 = vector.extract_strided_slice %51 {offsets = [0, 10], sizes = [16, 1], strides = [1, 1]} : vector<16x32xf32> to vector<16x1xf32>
    %69 = vector.extract_strided_slice %51 {offsets = [0, 11], sizes = [16, 1], strides = [1, 1]} : vector<16x32xf32> to vector<16x1xf32>
    %70 = vector.extract_strided_slice %51 {offsets = [0, 12], sizes = [16, 1], strides = [1, 1]} : vector<16x32xf32> to vector<16x1xf32>
    %71 = vector.extract_strided_slice %51 {offsets = [0, 13], sizes = [16, 1], strides = [1, 1]} : vector<16x32xf32> to vector<16x1xf32>
    %72 = vector.extract_strided_slice %51 {offsets = [0, 14], sizes = [16, 1], strides = [1, 1]} : vector<16x32xf32> to vector<16x1xf32>
    %73 = vector.extract_strided_slice %51 {offsets = [0, 15], sizes = [16, 1], strides = [1, 1]} : vector<16x32xf32> to vector<16x1xf32>
    %74 = vector.extract_strided_slice %51 {offsets = [0, 16], sizes = [16, 1], strides = [1, 1]} : vector<16x32xf32> to vector<16x1xf32>
    %75 = vector.extract_strided_slice %51 {offsets = [0, 17], sizes = [16, 1], strides = [1, 1]} : vector<16x32xf32> to vector<16x1xf32>
    %76 = vector.extract_strided_slice %51 {offsets = [0, 18], sizes = [16, 1], strides = [1, 1]} : vector<16x32xf32> to vector<16x1xf32>
    %77 = vector.extract_strided_slice %51 {offsets = [0, 19], sizes = [16, 1], strides = [1, 1]} : vector<16x32xf32> to vector<16x1xf32>
    %78 = vector.extract_strided_slice %51 {offsets = [0, 20], sizes = [16, 1], strides = [1, 1]} : vector<16x32xf32> to vector<16x1xf32>
    %79 = vector.extract_strided_slice %51 {offsets = [0, 21], sizes = [16, 1], strides = [1, 1]} : vector<16x32xf32> to vector<16x1xf32>
    %80 = vector.extract_strided_slice %51 {offsets = [0, 22], sizes = [16, 1], strides = [1, 1]} : vector<16x32xf32> to vector<16x1xf32>
    %81 = vector.extract_strided_slice %51 {offsets = [0, 23], sizes = [16, 1], strides = [1, 1]} : vector<16x32xf32> to vector<16x1xf32>
    %82 = vector.extract_strided_slice %51 {offsets = [0, 24], sizes = [16, 1], strides = [1, 1]} : vector<16x32xf32> to vector<16x1xf32>
    %83 = vector.extract_strided_slice %51 {offsets = [0, 25], sizes = [16, 1], strides = [1, 1]} : vector<16x32xf32> to vector<16x1xf32>
    %84 = vector.extract_strided_slice %51 {offsets = [0, 26], sizes = [16, 1], strides = [1, 1]} : vector<16x32xf32> to vector<16x1xf32>
    %85 = vector.extract_strided_slice %51 {offsets = [0, 27], sizes = [16, 1], strides = [1, 1]} : vector<16x32xf32> to vector<16x1xf32>
    %86 = vector.extract_strided_slice %51 {offsets = [0, 28], sizes = [16, 1], strides = [1, 1]} : vector<16x32xf32> to vector<16x1xf32>
    %87 = vector.extract_strided_slice %51 {offsets = [0, 29], sizes = [16, 1], strides = [1, 1]} : vector<16x32xf32> to vector<16x1xf32>
    %88 = vector.extract_strided_slice %51 {offsets = [0, 30], sizes = [16, 1], strides = [1, 1]} : vector<16x32xf32> to vector<16x1xf32>
    %89 = vector.extract_strided_slice %51 {offsets = [0, 31], sizes = [16, 1], strides = [1, 1]} : vector<16x32xf32> to vector<16x1xf32>
    %90 = vector.extract_strided_slice %4 {offsets = [0, 0], sizes = [1, 1], strides = [1, 1]} : vector<1x32xf32> to vector<1x1xf32>
    %91 = vector.extract_strided_slice %4 {offsets = [0, 1], sizes = [1, 1], strides = [1, 1]} : vector<1x32xf32> to vector<1x1xf32>
    %92 = vector.extract_strided_slice %4 {offsets = [0, 2], sizes = [1, 1], strides = [1, 1]} : vector<1x32xf32> to vector<1x1xf32>
    %93 = vector.extract_strided_slice %4 {offsets = [0, 3], sizes = [1, 1], strides = [1, 1]} : vector<1x32xf32> to vector<1x1xf32>
    %94 = vector.extract_strided_slice %4 {offsets = [0, 4], sizes = [1, 1], strides = [1, 1]} : vector<1x32xf32> to vector<1x1xf32>
    %95 = vector.extract_strided_slice %4 {offsets = [0, 5], sizes = [1, 1], strides = [1, 1]} : vector<1x32xf32> to vector<1x1xf32>
    %96 = vector.extract_strided_slice %4 {offsets = [0, 6], sizes = [1, 1], strides = [1, 1]} : vector<1x32xf32> to vector<1x1xf32>
    %97 = vector.extract_strided_slice %4 {offsets = [0, 7], sizes = [1, 1], strides = [1, 1]} : vector<1x32xf32> to vector<1x1xf32>
    %98 = vector.extract_strided_slice %4 {offsets = [0, 8], sizes = [1, 1], strides = [1, 1]} : vector<1x32xf32> to vector<1x1xf32>
    %99 = vector.extract_strided_slice %4 {offsets = [0, 9], sizes = [1, 1], strides = [1, 1]} : vector<1x32xf32> to vector<1x1xf32>
    %100 = vector.extract_strided_slice %4 {offsets = [0, 10], sizes = [1, 1], strides = [1, 1]} : vector<1x32xf32> to vector<1x1xf32>
    %101 = vector.extract_strided_slice %4 {offsets = [0, 11], sizes = [1, 1], strides = [1, 1]} : vector<1x32xf32> to vector<1x1xf32>
    %102 = vector.extract_strided_slice %4 {offsets = [0, 12], sizes = [1, 1], strides = [1, 1]} : vector<1x32xf32> to vector<1x1xf32>
    %103 = vector.extract_strided_slice %4 {offsets = [0, 13], sizes = [1, 1], strides = [1, 1]} : vector<1x32xf32> to vector<1x1xf32>
    %104 = vector.extract_strided_slice %4 {offsets = [0, 14], sizes = [1, 1], strides = [1, 1]} : vector<1x32xf32> to vector<1x1xf32>
    %105 = vector.extract_strided_slice %4 {offsets = [0, 15], sizes = [1, 1], strides = [1, 1]} : vector<1x32xf32> to vector<1x1xf32>
    %106 = vector.extract_strided_slice %4 {offsets = [0, 16], sizes = [1, 1], strides = [1, 1]} : vector<1x32xf32> to vector<1x1xf32>
    %107 = vector.extract_strided_slice %4 {offsets = [0, 17], sizes = [1, 1], strides = [1, 1]} : vector<1x32xf32> to vector<1x1xf32>
    %108 = vector.extract_strided_slice %4 {offsets = [0, 18], sizes = [1, 1], strides = [1, 1]} : vector<1x32xf32> to vector<1x1xf32>
    %109 = vector.extract_strided_slice %4 {offsets = [0, 19], sizes = [1, 1], strides = [1, 1]} : vector<1x32xf32> to vector<1x1xf32>
    %110 = vector.extract_strided_slice %4 {offsets = [0, 20], sizes = [1, 1], strides = [1, 1]} : vector<1x32xf32> to vector<1x1xf32>
    %111 = vector.extract_strided_slice %4 {offsets = [0, 21], sizes = [1, 1], strides = [1, 1]} : vector<1x32xf32> to vector<1x1xf32>
    %112 = vector.extract_strided_slice %4 {offsets = [0, 22], sizes = [1, 1], strides = [1, 1]} : vector<1x32xf32> to vector<1x1xf32>
    %113 = vector.extract_strided_slice %4 {offsets = [0, 23], sizes = [1, 1], strides = [1, 1]} : vector<1x32xf32> to vector<1x1xf32>
    %114 = vector.extract_strided_slice %4 {offsets = [0, 24], sizes = [1, 1], strides = [1, 1]} : vector<1x32xf32> to vector<1x1xf32>
    %115 = vector.extract_strided_slice %4 {offsets = [0, 25], sizes = [1, 1], strides = [1, 1]} : vector<1x32xf32> to vector<1x1xf32>
    %116 = vector.extract_strided_slice %4 {offsets = [0, 26], sizes = [1, 1], strides = [1, 1]} : vector<1x32xf32> to vector<1x1xf32>
    %117 = vector.extract_strided_slice %4 {offsets = [0, 27], sizes = [1, 1], strides = [1, 1]} : vector<1x32xf32> to vector<1x1xf32>
    %118 = vector.extract_strided_slice %4 {offsets = [0, 28], sizes = [1, 1], strides = [1, 1]} : vector<1x32xf32> to vector<1x1xf32>
    %119 = vector.extract_strided_slice %4 {offsets = [0, 29], sizes = [1, 1], strides = [1, 1]} : vector<1x32xf32> to vector<1x1xf32>
    %120 = vector.extract_strided_slice %4 {offsets = [0, 30], sizes = [1, 1], strides = [1, 1]} : vector<1x32xf32> to vector<1x1xf32>
    %121 = vector.extract_strided_slice %4 {offsets = [0, 31], sizes = [1, 1], strides = [1, 1]} : vector<1x32xf32> to vector<1x1xf32>
    %122 = vector.extract_strided_slice %57 {offsets = [0, 0], sizes = [1, 1], strides = [1, 1]} : vector<1x32xf32> to vector<1x1xf32>
    %123 = vector.extract_strided_slice %57 {offsets = [0, 1], sizes = [1, 1], strides = [1, 1]} : vector<1x32xf32> to vector<1x1xf32>
    %124 = vector.extract_strided_slice %57 {offsets = [0, 2], sizes = [1, 1], strides = [1, 1]} : vector<1x32xf32> to vector<1x1xf32>
    %125 = vector.extract_strided_slice %57 {offsets = [0, 3], sizes = [1, 1], strides = [1, 1]} : vector<1x32xf32> to vector<1x1xf32>
    %126 = vector.extract_strided_slice %57 {offsets = [0, 4], sizes = [1, 1], strides = [1, 1]} : vector<1x32xf32> to vector<1x1xf32>
    %127 = vector.extract_strided_slice %57 {offsets = [0, 5], sizes = [1, 1], strides = [1, 1]} : vector<1x32xf32> to vector<1x1xf32>
    %128 = vector.extract_strided_slice %57 {offsets = [0, 6], sizes = [1, 1], strides = [1, 1]} : vector<1x32xf32> to vector<1x1xf32>
    %129 = vector.extract_strided_slice %57 {offsets = [0, 7], sizes = [1, 1], strides = [1, 1]} : vector<1x32xf32> to vector<1x1xf32>
    %130 = vector.extract_strided_slice %57 {offsets = [0, 8], sizes = [1, 1], strides = [1, 1]} : vector<1x32xf32> to vector<1x1xf32>
    %131 = vector.extract_strided_slice %57 {offsets = [0, 9], sizes = [1, 1], strides = [1, 1]} : vector<1x32xf32> to vector<1x1xf32>
    %132 = vector.extract_strided_slice %57 {offsets = [0, 10], sizes = [1, 1], strides = [1, 1]} : vector<1x32xf32> to vector<1x1xf32>
    %133 = vector.extract_strided_slice %57 {offsets = [0, 11], sizes = [1, 1], strides = [1, 1]} : vector<1x32xf32> to vector<1x1xf32>
    %134 = vector.extract_strided_slice %57 {offsets = [0, 12], sizes = [1, 1], strides = [1, 1]} : vector<1x32xf32> to vector<1x1xf32>
    %135 = vector.extract_strided_slice %57 {offsets = [0, 13], sizes = [1, 1], strides = [1, 1]} : vector<1x32xf32> to vector<1x1xf32>
    %136 = vector.extract_strided_slice %57 {offsets = [0, 14], sizes = [1, 1], strides = [1, 1]} : vector<1x32xf32> to vector<1x1xf32>
    %137 = vector.extract_strided_slice %57 {offsets = [0, 15], sizes = [1, 1], strides = [1, 1]} : vector<1x32xf32> to vector<1x1xf32>
    %138 = vector.extract_strided_slice %57 {offsets = [0, 16], sizes = [1, 1], strides = [1, 1]} : vector<1x32xf32> to vector<1x1xf32>
    %139 = vector.extract_strided_slice %57 {offsets = [0, 17], sizes = [1, 1], strides = [1, 1]} : vector<1x32xf32> to vector<1x1xf32>
    %140 = vector.extract_strided_slice %57 {offsets = [0, 18], sizes = [1, 1], strides = [1, 1]} : vector<1x32xf32> to vector<1x1xf32>
    %141 = vector.extract_strided_slice %57 {offsets = [0, 19], sizes = [1, 1], strides = [1, 1]} : vector<1x32xf32> to vector<1x1xf32>
    %142 = vector.extract_strided_slice %57 {offsets = [0, 20], sizes = [1, 1], strides = [1, 1]} : vector<1x32xf32> to vector<1x1xf32>
    %143 = vector.extract_strided_slice %57 {offsets = [0, 21], sizes = [1, 1], strides = [1, 1]} : vector<1x32xf32> to vector<1x1xf32>
    %144 = vector.extract_strided_slice %57 {offsets = [0, 22], sizes = [1, 1], strides = [1, 1]} : vector<1x32xf32> to vector<1x1xf32>
    %145 = vector.extract_strided_slice %57 {offsets = [0, 23], sizes = [1, 1], strides = [1, 1]} : vector<1x32xf32> to vector<1x1xf32>
    %146 = vector.extract_strided_slice %57 {offsets = [0, 24], sizes = [1, 1], strides = [1, 1]} : vector<1x32xf32> to vector<1x1xf32>
    %147 = vector.extract_strided_slice %57 {offsets = [0, 25], sizes = [1, 1], strides = [1, 1]} : vector<1x32xf32> to vector<1x1xf32>
    %148 = vector.extract_strided_slice %57 {offsets = [0, 26], sizes = [1, 1], strides = [1, 1]} : vector<1x32xf32> to vector<1x1xf32>
    %149 = vector.extract_strided_slice %57 {offsets = [0, 27], sizes = [1, 1], strides = [1, 1]} : vector<1x32xf32> to vector<1x1xf32>
    %150 = vector.extract_strided_slice %57 {offsets = [0, 28], sizes = [1, 1], strides = [1, 1]} : vector<1x32xf32> to vector<1x1xf32>
    %151 = vector.extract_strided_slice %57 {offsets = [0, 29], sizes = [1, 1], strides = [1, 1]} : vector<1x32xf32> to vector<1x1xf32>
    %152 = vector.extract_strided_slice %57 {offsets = [0, 30], sizes = [1, 1], strides = [1, 1]} : vector<1x32xf32> to vector<1x1xf32>
    %153 = vector.extract_strided_slice %57 {offsets = [0, 31], sizes = [1, 1], strides = [1, 1]} : vector<1x32xf32> to vector<1x1xf32>
    %cst_74 = arith.constant -1.000000e+30 : f32
    %154 = vector.broadcast %cst_74 : f32 to vector<16x1xf32>
    %cst_75 = arith.constant 0.000000e+00 : f32
    %155 = vector.broadcast %cst_75 : f32 to vector<16x1xf32>
    %cst_76 = arith.constant 0.000000e+00 : f32
    %156 = vector.broadcast %cst_76 : f32 to vector<16x32xf32>
    %cst_77 = arith.constant 0.000000e+00 : f32
    %157 = vector.broadcast %cst_77 : f32 to vector<1x16xf32>
    %158 = arith.cmpf ogt, %44, %157 : vector<1x16xf32>
    %cst_78 = arith.constant 0.000000e+00 : f32
    %159 = vector.broadcast %cst_78 : f32 to vector<16x16xf32>
    %160 = vector.extract_strided_slice %52 {offsets = [0, 0], sizes = [1, 16], strides = [1, 1]} : vector<32x16xf32> to vector<1x16xf32>
    %161 = vector.broadcast %58 : vector<16x1xf32> to vector<16x16xf32>
    %162 = vector.broadcast %160 : vector<1x16xf32> to vector<16x16xf32>
    %163 = arith.addf %161, %162 : vector<16x16xf32>
    %cst_79 = arith.constant 0.000000e+00 : f32
    %164 = vector.broadcast %cst_79 : f32 to vector<16x16xf32>
    %165 = arith.cmpf ogt, %163, %164 : vector<16x16xf32>
    %166 = vector.broadcast %90 : vector<1x1xf32> to vector<16x16xf32>
    %167 = arith.mulf %166, %163 : vector<16x16xf32>
    %168 = vector.broadcast %122 : vector<1x1xf32> to vector<16x16xf32>
    %169 = arith.mulf %168, %163 : vector<16x16xf32>
    %170 = arith.select %165, %167, %169 : vector<16x16xi1>, vector<16x16xf32>
    %171 = arith.addf %159, %170 : vector<16x16xf32>
    %172 = vector.extract_strided_slice %52 {offsets = [1, 0], sizes = [1, 16], strides = [1, 1]} : vector<32x16xf32> to vector<1x16xf32>
    %173 = vector.broadcast %59 : vector<16x1xf32> to vector<16x16xf32>
    %174 = vector.broadcast %172 : vector<1x16xf32> to vector<16x16xf32>
    %175 = arith.addf %173, %174 : vector<16x16xf32>
    %cst_80 = arith.constant 0.000000e+00 : f32
    %176 = vector.broadcast %cst_80 : f32 to vector<16x16xf32>
    %177 = arith.cmpf ogt, %175, %176 : vector<16x16xf32>
    %178 = vector.broadcast %91 : vector<1x1xf32> to vector<16x16xf32>
    %179 = arith.mulf %178, %175 : vector<16x16xf32>
    %180 = vector.broadcast %123 : vector<1x1xf32> to vector<16x16xf32>
    %181 = arith.mulf %180, %175 : vector<16x16xf32>
    %182 = arith.select %177, %179, %181 : vector<16x16xi1>, vector<16x16xf32>
    %183 = arith.addf %171, %182 : vector<16x16xf32>
    %184 = vector.extract_strided_slice %52 {offsets = [2, 0], sizes = [1, 16], strides = [1, 1]} : vector<32x16xf32> to vector<1x16xf32>
    %185 = vector.broadcast %60 : vector<16x1xf32> to vector<16x16xf32>
    %186 = vector.broadcast %184 : vector<1x16xf32> to vector<16x16xf32>
    %187 = arith.addf %185, %186 : vector<16x16xf32>
    %cst_81 = arith.constant 0.000000e+00 : f32
    %188 = vector.broadcast %cst_81 : f32 to vector<16x16xf32>
    %189 = arith.cmpf ogt, %187, %188 : vector<16x16xf32>
    %190 = vector.broadcast %92 : vector<1x1xf32> to vector<16x16xf32>
    %191 = arith.mulf %190, %187 : vector<16x16xf32>
    %192 = vector.broadcast %124 : vector<1x1xf32> to vector<16x16xf32>
    %193 = arith.mulf %192, %187 : vector<16x16xf32>
    %194 = arith.select %189, %191, %193 : vector<16x16xi1>, vector<16x16xf32>
    %195 = arith.addf %183, %194 : vector<16x16xf32>
    %196 = vector.extract_strided_slice %52 {offsets = [3, 0], sizes = [1, 16], strides = [1, 1]} : vector<32x16xf32> to vector<1x16xf32>
    %197 = vector.broadcast %61 : vector<16x1xf32> to vector<16x16xf32>
    %198 = vector.broadcast %196 : vector<1x16xf32> to vector<16x16xf32>
    %199 = arith.addf %197, %198 : vector<16x16xf32>
    %cst_82 = arith.constant 0.000000e+00 : f32
    %200 = vector.broadcast %cst_82 : f32 to vector<16x16xf32>
    %201 = arith.cmpf ogt, %199, %200 : vector<16x16xf32>
    %202 = vector.broadcast %93 : vector<1x1xf32> to vector<16x16xf32>
    %203 = arith.mulf %202, %199 : vector<16x16xf32>
    %204 = vector.broadcast %125 : vector<1x1xf32> to vector<16x16xf32>
    %205 = arith.mulf %204, %199 : vector<16x16xf32>
    %206 = arith.select %201, %203, %205 : vector<16x16xi1>, vector<16x16xf32>
    %207 = arith.addf %195, %206 : vector<16x16xf32>
    %208 = vector.extract_strided_slice %52 {offsets = [4, 0], sizes = [1, 16], strides = [1, 1]} : vector<32x16xf32> to vector<1x16xf32>
    %209 = vector.broadcast %62 : vector<16x1xf32> to vector<16x16xf32>
    %210 = vector.broadcast %208 : vector<1x16xf32> to vector<16x16xf32>
    %211 = arith.addf %209, %210 : vector<16x16xf32>
    %cst_83 = arith.constant 0.000000e+00 : f32
    %212 = vector.broadcast %cst_83 : f32 to vector<16x16xf32>
    %213 = arith.cmpf ogt, %211, %212 : vector<16x16xf32>
    %214 = vector.broadcast %94 : vector<1x1xf32> to vector<16x16xf32>
    %215 = arith.mulf %214, %211 : vector<16x16xf32>
    %216 = vector.broadcast %126 : vector<1x1xf32> to vector<16x16xf32>
    %217 = arith.mulf %216, %211 : vector<16x16xf32>
    %218 = arith.select %213, %215, %217 : vector<16x16xi1>, vector<16x16xf32>
    %219 = arith.addf %207, %218 : vector<16x16xf32>
    %220 = vector.extract_strided_slice %52 {offsets = [5, 0], sizes = [1, 16], strides = [1, 1]} : vector<32x16xf32> to vector<1x16xf32>
    %221 = vector.broadcast %63 : vector<16x1xf32> to vector<16x16xf32>
    %222 = vector.broadcast %220 : vector<1x16xf32> to vector<16x16xf32>
    %223 = arith.addf %221, %222 : vector<16x16xf32>
    %cst_84 = arith.constant 0.000000e+00 : f32
    %224 = vector.broadcast %cst_84 : f32 to vector<16x16xf32>
    %225 = arith.cmpf ogt, %223, %224 : vector<16x16xf32>
    %226 = vector.broadcast %95 : vector<1x1xf32> to vector<16x16xf32>
    %227 = arith.mulf %226, %223 : vector<16x16xf32>
    %228 = vector.broadcast %127 : vector<1x1xf32> to vector<16x16xf32>
    %229 = arith.mulf %228, %223 : vector<16x16xf32>
    %230 = arith.select %225, %227, %229 : vector<16x16xi1>, vector<16x16xf32>
    %231 = arith.addf %219, %230 : vector<16x16xf32>
    %232 = vector.extract_strided_slice %52 {offsets = [6, 0], sizes = [1, 16], strides = [1, 1]} : vector<32x16xf32> to vector<1x16xf32>
    %233 = vector.broadcast %64 : vector<16x1xf32> to vector<16x16xf32>
    %234 = vector.broadcast %232 : vector<1x16xf32> to vector<16x16xf32>
    %235 = arith.addf %233, %234 : vector<16x16xf32>
    %cst_85 = arith.constant 0.000000e+00 : f32
    %236 = vector.broadcast %cst_85 : f32 to vector<16x16xf32>
    %237 = arith.cmpf ogt, %235, %236 : vector<16x16xf32>
    %238 = vector.broadcast %96 : vector<1x1xf32> to vector<16x16xf32>
    %239 = arith.mulf %238, %235 : vector<16x16xf32>
    %240 = vector.broadcast %128 : vector<1x1xf32> to vector<16x16xf32>
    %241 = arith.mulf %240, %235 : vector<16x16xf32>
    %242 = arith.select %237, %239, %241 : vector<16x16xi1>, vector<16x16xf32>
    %243 = arith.addf %231, %242 : vector<16x16xf32>
    %244 = vector.extract_strided_slice %52 {offsets = [7, 0], sizes = [1, 16], strides = [1, 1]} : vector<32x16xf32> to vector<1x16xf32>
    %245 = vector.broadcast %65 : vector<16x1xf32> to vector<16x16xf32>
    %246 = vector.broadcast %244 : vector<1x16xf32> to vector<16x16xf32>
    %247 = arith.addf %245, %246 : vector<16x16xf32>
    %cst_86 = arith.constant 0.000000e+00 : f32
    %248 = vector.broadcast %cst_86 : f32 to vector<16x16xf32>
    %249 = arith.cmpf ogt, %247, %248 : vector<16x16xf32>
    %250 = vector.broadcast %97 : vector<1x1xf32> to vector<16x16xf32>
    %251 = arith.mulf %250, %247 : vector<16x16xf32>
    %252 = vector.broadcast %129 : vector<1x1xf32> to vector<16x16xf32>
    %253 = arith.mulf %252, %247 : vector<16x16xf32>
    %254 = arith.select %249, %251, %253 : vector<16x16xi1>, vector<16x16xf32>
    %255 = arith.addf %243, %254 : vector<16x16xf32>
    %256 = vector.extract_strided_slice %52 {offsets = [8, 0], sizes = [1, 16], strides = [1, 1]} : vector<32x16xf32> to vector<1x16xf32>
    %257 = vector.broadcast %66 : vector<16x1xf32> to vector<16x16xf32>
    %258 = vector.broadcast %256 : vector<1x16xf32> to vector<16x16xf32>
    %259 = arith.addf %257, %258 : vector<16x16xf32>
    %cst_87 = arith.constant 0.000000e+00 : f32
    %260 = vector.broadcast %cst_87 : f32 to vector<16x16xf32>
    %261 = arith.cmpf ogt, %259, %260 : vector<16x16xf32>
    %262 = vector.broadcast %98 : vector<1x1xf32> to vector<16x16xf32>
    %263 = arith.mulf %262, %259 : vector<16x16xf32>
    %264 = vector.broadcast %130 : vector<1x1xf32> to vector<16x16xf32>
    %265 = arith.mulf %264, %259 : vector<16x16xf32>
    %266 = arith.select %261, %263, %265 : vector<16x16xi1>, vector<16x16xf32>
    %267 = arith.addf %255, %266 : vector<16x16xf32>
    %268 = vector.extract_strided_slice %52 {offsets = [9, 0], sizes = [1, 16], strides = [1, 1]} : vector<32x16xf32> to vector<1x16xf32>
    %269 = vector.broadcast %67 : vector<16x1xf32> to vector<16x16xf32>
    %270 = vector.broadcast %268 : vector<1x16xf32> to vector<16x16xf32>
    %271 = arith.addf %269, %270 : vector<16x16xf32>
    %cst_88 = arith.constant 0.000000e+00 : f32
    %272 = vector.broadcast %cst_88 : f32 to vector<16x16xf32>
    %273 = arith.cmpf ogt, %271, %272 : vector<16x16xf32>
    %274 = vector.broadcast %99 : vector<1x1xf32> to vector<16x16xf32>
    %275 = arith.mulf %274, %271 : vector<16x16xf32>
    %276 = vector.broadcast %131 : vector<1x1xf32> to vector<16x16xf32>
    %277 = arith.mulf %276, %271 : vector<16x16xf32>
    %278 = arith.select %273, %275, %277 : vector<16x16xi1>, vector<16x16xf32>
    %279 = arith.addf %267, %278 : vector<16x16xf32>
    %280 = vector.extract_strided_slice %52 {offsets = [10, 0], sizes = [1, 16], strides = [1, 1]} : vector<32x16xf32> to vector<1x16xf32>
    %281 = vector.broadcast %68 : vector<16x1xf32> to vector<16x16xf32>
    %282 = vector.broadcast %280 : vector<1x16xf32> to vector<16x16xf32>
    %283 = arith.addf %281, %282 : vector<16x16xf32>
    %cst_89 = arith.constant 0.000000e+00 : f32
    %284 = vector.broadcast %cst_89 : f32 to vector<16x16xf32>
    %285 = arith.cmpf ogt, %283, %284 : vector<16x16xf32>
    %286 = vector.broadcast %100 : vector<1x1xf32> to vector<16x16xf32>
    %287 = arith.mulf %286, %283 : vector<16x16xf32>
    %288 = vector.broadcast %132 : vector<1x1xf32> to vector<16x16xf32>
    %289 = arith.mulf %288, %283 : vector<16x16xf32>
    %290 = arith.select %285, %287, %289 : vector<16x16xi1>, vector<16x16xf32>
    %291 = arith.addf %279, %290 : vector<16x16xf32>
    %292 = vector.extract_strided_slice %52 {offsets = [11, 0], sizes = [1, 16], strides = [1, 1]} : vector<32x16xf32> to vector<1x16xf32>
    %293 = vector.broadcast %69 : vector<16x1xf32> to vector<16x16xf32>
    %294 = vector.broadcast %292 : vector<1x16xf32> to vector<16x16xf32>
    %295 = arith.addf %293, %294 : vector<16x16xf32>
    %cst_90 = arith.constant 0.000000e+00 : f32
    %296 = vector.broadcast %cst_90 : f32 to vector<16x16xf32>
    %297 = arith.cmpf ogt, %295, %296 : vector<16x16xf32>
    %298 = vector.broadcast %101 : vector<1x1xf32> to vector<16x16xf32>
    %299 = arith.mulf %298, %295 : vector<16x16xf32>
    %300 = vector.broadcast %133 : vector<1x1xf32> to vector<16x16xf32>
    %301 = arith.mulf %300, %295 : vector<16x16xf32>
    %302 = arith.select %297, %299, %301 : vector<16x16xi1>, vector<16x16xf32>
    %303 = arith.addf %291, %302 : vector<16x16xf32>
    %304 = vector.extract_strided_slice %52 {offsets = [12, 0], sizes = [1, 16], strides = [1, 1]} : vector<32x16xf32> to vector<1x16xf32>
    %305 = vector.broadcast %70 : vector<16x1xf32> to vector<16x16xf32>
    %306 = vector.broadcast %304 : vector<1x16xf32> to vector<16x16xf32>
    %307 = arith.addf %305, %306 : vector<16x16xf32>
    %cst_91 = arith.constant 0.000000e+00 : f32
    %308 = vector.broadcast %cst_91 : f32 to vector<16x16xf32>
    %309 = arith.cmpf ogt, %307, %308 : vector<16x16xf32>
    %310 = vector.broadcast %102 : vector<1x1xf32> to vector<16x16xf32>
    %311 = arith.mulf %310, %307 : vector<16x16xf32>
    %312 = vector.broadcast %134 : vector<1x1xf32> to vector<16x16xf32>
    %313 = arith.mulf %312, %307 : vector<16x16xf32>
    %314 = arith.select %309, %311, %313 : vector<16x16xi1>, vector<16x16xf32>
    %315 = arith.addf %303, %314 : vector<16x16xf32>
    %316 = vector.extract_strided_slice %52 {offsets = [13, 0], sizes = [1, 16], strides = [1, 1]} : vector<32x16xf32> to vector<1x16xf32>
    %317 = vector.broadcast %71 : vector<16x1xf32> to vector<16x16xf32>
    %318 = vector.broadcast %316 : vector<1x16xf32> to vector<16x16xf32>
    %319 = arith.addf %317, %318 : vector<16x16xf32>
    %cst_92 = arith.constant 0.000000e+00 : f32
    %320 = vector.broadcast %cst_92 : f32 to vector<16x16xf32>
    %321 = arith.cmpf ogt, %319, %320 : vector<16x16xf32>
    %322 = vector.broadcast %103 : vector<1x1xf32> to vector<16x16xf32>
    %323 = arith.mulf %322, %319 : vector<16x16xf32>
    %324 = vector.broadcast %135 : vector<1x1xf32> to vector<16x16xf32>
    %325 = arith.mulf %324, %319 : vector<16x16xf32>
    %326 = arith.select %321, %323, %325 : vector<16x16xi1>, vector<16x16xf32>
    %327 = arith.addf %315, %326 : vector<16x16xf32>
    %328 = vector.extract_strided_slice %52 {offsets = [14, 0], sizes = [1, 16], strides = [1, 1]} : vector<32x16xf32> to vector<1x16xf32>
    %329 = vector.broadcast %72 : vector<16x1xf32> to vector<16x16xf32>
    %330 = vector.broadcast %328 : vector<1x16xf32> to vector<16x16xf32>
    %331 = arith.addf %329, %330 : vector<16x16xf32>
    %cst_93 = arith.constant 0.000000e+00 : f32
    %332 = vector.broadcast %cst_93 : f32 to vector<16x16xf32>
    %333 = arith.cmpf ogt, %331, %332 : vector<16x16xf32>
    %334 = vector.broadcast %104 : vector<1x1xf32> to vector<16x16xf32>
    %335 = arith.mulf %334, %331 : vector<16x16xf32>
    %336 = vector.broadcast %136 : vector<1x1xf32> to vector<16x16xf32>
    %337 = arith.mulf %336, %331 : vector<16x16xf32>
    %338 = arith.select %333, %335, %337 : vector<16x16xi1>, vector<16x16xf32>
    %339 = arith.addf %327, %338 : vector<16x16xf32>
    %340 = vector.extract_strided_slice %52 {offsets = [15, 0], sizes = [1, 16], strides = [1, 1]} : vector<32x16xf32> to vector<1x16xf32>
    %341 = vector.broadcast %73 : vector<16x1xf32> to vector<16x16xf32>
    %342 = vector.broadcast %340 : vector<1x16xf32> to vector<16x16xf32>
    %343 = arith.addf %341, %342 : vector<16x16xf32>
    %cst_94 = arith.constant 0.000000e+00 : f32
    %344 = vector.broadcast %cst_94 : f32 to vector<16x16xf32>
    %345 = arith.cmpf ogt, %343, %344 : vector<16x16xf32>
    %346 = vector.broadcast %105 : vector<1x1xf32> to vector<16x16xf32>
    %347 = arith.mulf %346, %343 : vector<16x16xf32>
    %348 = vector.broadcast %137 : vector<1x1xf32> to vector<16x16xf32>
    %349 = arith.mulf %348, %343 : vector<16x16xf32>
    %350 = arith.select %345, %347, %349 : vector<16x16xi1>, vector<16x16xf32>
    %351 = arith.addf %339, %350 : vector<16x16xf32>
    %352 = vector.extract_strided_slice %52 {offsets = [16, 0], sizes = [1, 16], strides = [1, 1]} : vector<32x16xf32> to vector<1x16xf32>
    %353 = vector.broadcast %74 : vector<16x1xf32> to vector<16x16xf32>
    %354 = vector.broadcast %352 : vector<1x16xf32> to vector<16x16xf32>
    %355 = arith.addf %353, %354 : vector<16x16xf32>
    %cst_95 = arith.constant 0.000000e+00 : f32
    %356 = vector.broadcast %cst_95 : f32 to vector<16x16xf32>
    %357 = arith.cmpf ogt, %355, %356 : vector<16x16xf32>
    %358 = vector.broadcast %106 : vector<1x1xf32> to vector<16x16xf32>
    %359 = arith.mulf %358, %355 : vector<16x16xf32>
    %360 = vector.broadcast %138 : vector<1x1xf32> to vector<16x16xf32>
    %361 = arith.mulf %360, %355 : vector<16x16xf32>
    %362 = arith.select %357, %359, %361 : vector<16x16xi1>, vector<16x16xf32>
    %363 = arith.addf %351, %362 : vector<16x16xf32>
    %364 = vector.extract_strided_slice %52 {offsets = [17, 0], sizes = [1, 16], strides = [1, 1]} : vector<32x16xf32> to vector<1x16xf32>
    %365 = vector.broadcast %75 : vector<16x1xf32> to vector<16x16xf32>
    %366 = vector.broadcast %364 : vector<1x16xf32> to vector<16x16xf32>
    %367 = arith.addf %365, %366 : vector<16x16xf32>
    %cst_96 = arith.constant 0.000000e+00 : f32
    %368 = vector.broadcast %cst_96 : f32 to vector<16x16xf32>
    %369 = arith.cmpf ogt, %367, %368 : vector<16x16xf32>
    %370 = vector.broadcast %107 : vector<1x1xf32> to vector<16x16xf32>
    %371 = arith.mulf %370, %367 : vector<16x16xf32>
    %372 = vector.broadcast %139 : vector<1x1xf32> to vector<16x16xf32>
    %373 = arith.mulf %372, %367 : vector<16x16xf32>
    %374 = arith.select %369, %371, %373 : vector<16x16xi1>, vector<16x16xf32>
    %375 = arith.addf %363, %374 : vector<16x16xf32>
    %376 = vector.extract_strided_slice %52 {offsets = [18, 0], sizes = [1, 16], strides = [1, 1]} : vector<32x16xf32> to vector<1x16xf32>
    %377 = vector.broadcast %76 : vector<16x1xf32> to vector<16x16xf32>
    %378 = vector.broadcast %376 : vector<1x16xf32> to vector<16x16xf32>
    %379 = arith.addf %377, %378 : vector<16x16xf32>
    %cst_97 = arith.constant 0.000000e+00 : f32
    %380 = vector.broadcast %cst_97 : f32 to vector<16x16xf32>
    %381 = arith.cmpf ogt, %379, %380 : vector<16x16xf32>
    %382 = vector.broadcast %108 : vector<1x1xf32> to vector<16x16xf32>
    %383 = arith.mulf %382, %379 : vector<16x16xf32>
    %384 = vector.broadcast %140 : vector<1x1xf32> to vector<16x16xf32>
    %385 = arith.mulf %384, %379 : vector<16x16xf32>
    %386 = arith.select %381, %383, %385 : vector<16x16xi1>, vector<16x16xf32>
    %387 = arith.addf %375, %386 : vector<16x16xf32>
    %388 = vector.extract_strided_slice %52 {offsets = [19, 0], sizes = [1, 16], strides = [1, 1]} : vector<32x16xf32> to vector<1x16xf32>
    %389 = vector.broadcast %77 : vector<16x1xf32> to vector<16x16xf32>
    %390 = vector.broadcast %388 : vector<1x16xf32> to vector<16x16xf32>
    %391 = arith.addf %389, %390 : vector<16x16xf32>
    %cst_98 = arith.constant 0.000000e+00 : f32
    %392 = vector.broadcast %cst_98 : f32 to vector<16x16xf32>
    %393 = arith.cmpf ogt, %391, %392 : vector<16x16xf32>
    %394 = vector.broadcast %109 : vector<1x1xf32> to vector<16x16xf32>
    %395 = arith.mulf %394, %391 : vector<16x16xf32>
    %396 = vector.broadcast %141 : vector<1x1xf32> to vector<16x16xf32>
    %397 = arith.mulf %396, %391 : vector<16x16xf32>
    %398 = arith.select %393, %395, %397 : vector<16x16xi1>, vector<16x16xf32>
    %399 = arith.addf %387, %398 : vector<16x16xf32>
    %400 = vector.extract_strided_slice %52 {offsets = [20, 0], sizes = [1, 16], strides = [1, 1]} : vector<32x16xf32> to vector<1x16xf32>
    %401 = vector.broadcast %78 : vector<16x1xf32> to vector<16x16xf32>
    %402 = vector.broadcast %400 : vector<1x16xf32> to vector<16x16xf32>
    %403 = arith.addf %401, %402 : vector<16x16xf32>
    %cst_99 = arith.constant 0.000000e+00 : f32
    %404 = vector.broadcast %cst_99 : f32 to vector<16x16xf32>
    %405 = arith.cmpf ogt, %403, %404 : vector<16x16xf32>
    %406 = vector.broadcast %110 : vector<1x1xf32> to vector<16x16xf32>
    %407 = arith.mulf %406, %403 : vector<16x16xf32>
    %408 = vector.broadcast %142 : vector<1x1xf32> to vector<16x16xf32>
    %409 = arith.mulf %408, %403 : vector<16x16xf32>
    %410 = arith.select %405, %407, %409 : vector<16x16xi1>, vector<16x16xf32>
    %411 = arith.addf %399, %410 : vector<16x16xf32>
    %412 = vector.extract_strided_slice %52 {offsets = [21, 0], sizes = [1, 16], strides = [1, 1]} : vector<32x16xf32> to vector<1x16xf32>
    %413 = vector.broadcast %79 : vector<16x1xf32> to vector<16x16xf32>
    %414 = vector.broadcast %412 : vector<1x16xf32> to vector<16x16xf32>
    %415 = arith.addf %413, %414 : vector<16x16xf32>
    %cst_100 = arith.constant 0.000000e+00 : f32
    %416 = vector.broadcast %cst_100 : f32 to vector<16x16xf32>
    %417 = arith.cmpf ogt, %415, %416 : vector<16x16xf32>
    %418 = vector.broadcast %111 : vector<1x1xf32> to vector<16x16xf32>
    %419 = arith.mulf %418, %415 : vector<16x16xf32>
    %420 = vector.broadcast %143 : vector<1x1xf32> to vector<16x16xf32>
    %421 = arith.mulf %420, %415 : vector<16x16xf32>
    %422 = arith.select %417, %419, %421 : vector<16x16xi1>, vector<16x16xf32>
    %423 = arith.addf %411, %422 : vector<16x16xf32>
    %424 = vector.extract_strided_slice %52 {offsets = [22, 0], sizes = [1, 16], strides = [1, 1]} : vector<32x16xf32> to vector<1x16xf32>
    %425 = vector.broadcast %80 : vector<16x1xf32> to vector<16x16xf32>
    %426 = vector.broadcast %424 : vector<1x16xf32> to vector<16x16xf32>
    %427 = arith.addf %425, %426 : vector<16x16xf32>
    %cst_101 = arith.constant 0.000000e+00 : f32
    %428 = vector.broadcast %cst_101 : f32 to vector<16x16xf32>
    %429 = arith.cmpf ogt, %427, %428 : vector<16x16xf32>
    %430 = vector.broadcast %112 : vector<1x1xf32> to vector<16x16xf32>
    %431 = arith.mulf %430, %427 : vector<16x16xf32>
    %432 = vector.broadcast %144 : vector<1x1xf32> to vector<16x16xf32>
    %433 = arith.mulf %432, %427 : vector<16x16xf32>
    %434 = arith.select %429, %431, %433 : vector<16x16xi1>, vector<16x16xf32>
    %435 = arith.addf %423, %434 : vector<16x16xf32>
    %436 = vector.extract_strided_slice %52 {offsets = [23, 0], sizes = [1, 16], strides = [1, 1]} : vector<32x16xf32> to vector<1x16xf32>
    %437 = vector.broadcast %81 : vector<16x1xf32> to vector<16x16xf32>
    %438 = vector.broadcast %436 : vector<1x16xf32> to vector<16x16xf32>
    %439 = arith.addf %437, %438 : vector<16x16xf32>
    %cst_102 = arith.constant 0.000000e+00 : f32
    %440 = vector.broadcast %cst_102 : f32 to vector<16x16xf32>
    %441 = arith.cmpf ogt, %439, %440 : vector<16x16xf32>
    %442 = vector.broadcast %113 : vector<1x1xf32> to vector<16x16xf32>
    %443 = arith.mulf %442, %439 : vector<16x16xf32>
    %444 = vector.broadcast %145 : vector<1x1xf32> to vector<16x16xf32>
    %445 = arith.mulf %444, %439 : vector<16x16xf32>
    %446 = arith.select %441, %443, %445 : vector<16x16xi1>, vector<16x16xf32>
    %447 = arith.addf %435, %446 : vector<16x16xf32>
    %448 = vector.extract_strided_slice %52 {offsets = [24, 0], sizes = [1, 16], strides = [1, 1]} : vector<32x16xf32> to vector<1x16xf32>
    %449 = vector.broadcast %82 : vector<16x1xf32> to vector<16x16xf32>
    %450 = vector.broadcast %448 : vector<1x16xf32> to vector<16x16xf32>
    %451 = arith.addf %449, %450 : vector<16x16xf32>
    %cst_103 = arith.constant 0.000000e+00 : f32
    %452 = vector.broadcast %cst_103 : f32 to vector<16x16xf32>
    %453 = arith.cmpf ogt, %451, %452 : vector<16x16xf32>
    %454 = vector.broadcast %114 : vector<1x1xf32> to vector<16x16xf32>
    %455 = arith.mulf %454, %451 : vector<16x16xf32>
    %456 = vector.broadcast %146 : vector<1x1xf32> to vector<16x16xf32>
    %457 = arith.mulf %456, %451 : vector<16x16xf32>
    %458 = arith.select %453, %455, %457 : vector<16x16xi1>, vector<16x16xf32>
    %459 = arith.addf %447, %458 : vector<16x16xf32>
    %460 = vector.extract_strided_slice %52 {offsets = [25, 0], sizes = [1, 16], strides = [1, 1]} : vector<32x16xf32> to vector<1x16xf32>
    %461 = vector.broadcast %83 : vector<16x1xf32> to vector<16x16xf32>
    %462 = vector.broadcast %460 : vector<1x16xf32> to vector<16x16xf32>
    %463 = arith.addf %461, %462 : vector<16x16xf32>
    %cst_104 = arith.constant 0.000000e+00 : f32
    %464 = vector.broadcast %cst_104 : f32 to vector<16x16xf32>
    %465 = arith.cmpf ogt, %463, %464 : vector<16x16xf32>
    %466 = vector.broadcast %115 : vector<1x1xf32> to vector<16x16xf32>
    %467 = arith.mulf %466, %463 : vector<16x16xf32>
    %468 = vector.broadcast %147 : vector<1x1xf32> to vector<16x16xf32>
    %469 = arith.mulf %468, %463 : vector<16x16xf32>
    %470 = arith.select %465, %467, %469 : vector<16x16xi1>, vector<16x16xf32>
    %471 = arith.addf %459, %470 : vector<16x16xf32>
    %472 = vector.extract_strided_slice %52 {offsets = [26, 0], sizes = [1, 16], strides = [1, 1]} : vector<32x16xf32> to vector<1x16xf32>
    %473 = vector.broadcast %84 : vector<16x1xf32> to vector<16x16xf32>
    %474 = vector.broadcast %472 : vector<1x16xf32> to vector<16x16xf32>
    %475 = arith.addf %473, %474 : vector<16x16xf32>
    %cst_105 = arith.constant 0.000000e+00 : f32
    %476 = vector.broadcast %cst_105 : f32 to vector<16x16xf32>
    %477 = arith.cmpf ogt, %475, %476 : vector<16x16xf32>
    %478 = vector.broadcast %116 : vector<1x1xf32> to vector<16x16xf32>
    %479 = arith.mulf %478, %475 : vector<16x16xf32>
    %480 = vector.broadcast %148 : vector<1x1xf32> to vector<16x16xf32>
    %481 = arith.mulf %480, %475 : vector<16x16xf32>
    %482 = arith.select %477, %479, %481 : vector<16x16xi1>, vector<16x16xf32>
    %483 = arith.addf %471, %482 : vector<16x16xf32>
    %484 = vector.extract_strided_slice %52 {offsets = [27, 0], sizes = [1, 16], strides = [1, 1]} : vector<32x16xf32> to vector<1x16xf32>
    %485 = vector.broadcast %85 : vector<16x1xf32> to vector<16x16xf32>
    %486 = vector.broadcast %484 : vector<1x16xf32> to vector<16x16xf32>
    %487 = arith.addf %485, %486 : vector<16x16xf32>
    %cst_106 = arith.constant 0.000000e+00 : f32
    %488 = vector.broadcast %cst_106 : f32 to vector<16x16xf32>
    %489 = arith.cmpf ogt, %487, %488 : vector<16x16xf32>
    %490 = vector.broadcast %117 : vector<1x1xf32> to vector<16x16xf32>
    %491 = arith.mulf %490, %487 : vector<16x16xf32>
    %492 = vector.broadcast %149 : vector<1x1xf32> to vector<16x16xf32>
    %493 = arith.mulf %492, %487 : vector<16x16xf32>
    %494 = arith.select %489, %491, %493 : vector<16x16xi1>, vector<16x16xf32>
    %495 = arith.addf %483, %494 : vector<16x16xf32>
    %496 = vector.extract_strided_slice %52 {offsets = [28, 0], sizes = [1, 16], strides = [1, 1]} : vector<32x16xf32> to vector<1x16xf32>
    %497 = vector.broadcast %86 : vector<16x1xf32> to vector<16x16xf32>
    %498 = vector.broadcast %496 : vector<1x16xf32> to vector<16x16xf32>
    %499 = arith.addf %497, %498 : vector<16x16xf32>
    %cst_107 = arith.constant 0.000000e+00 : f32
    %500 = vector.broadcast %cst_107 : f32 to vector<16x16xf32>
    %501 = arith.cmpf ogt, %499, %500 : vector<16x16xf32>
    %502 = vector.broadcast %118 : vector<1x1xf32> to vector<16x16xf32>
    %503 = arith.mulf %502, %499 : vector<16x16xf32>
    %504 = vector.broadcast %150 : vector<1x1xf32> to vector<16x16xf32>
    %505 = arith.mulf %504, %499 : vector<16x16xf32>
    %506 = arith.select %501, %503, %505 : vector<16x16xi1>, vector<16x16xf32>
    %507 = arith.addf %495, %506 : vector<16x16xf32>
    %508 = vector.extract_strided_slice %52 {offsets = [29, 0], sizes = [1, 16], strides = [1, 1]} : vector<32x16xf32> to vector<1x16xf32>
    %509 = vector.broadcast %87 : vector<16x1xf32> to vector<16x16xf32>
    %510 = vector.broadcast %508 : vector<1x16xf32> to vector<16x16xf32>
    %511 = arith.addf %509, %510 : vector<16x16xf32>
    %cst_108 = arith.constant 0.000000e+00 : f32
    %512 = vector.broadcast %cst_108 : f32 to vector<16x16xf32>
    %513 = arith.cmpf ogt, %511, %512 : vector<16x16xf32>
    %514 = vector.broadcast %119 : vector<1x1xf32> to vector<16x16xf32>
    %515 = arith.mulf %514, %511 : vector<16x16xf32>
    %516 = vector.broadcast %151 : vector<1x1xf32> to vector<16x16xf32>
    %517 = arith.mulf %516, %511 : vector<16x16xf32>
    %518 = arith.select %513, %515, %517 : vector<16x16xi1>, vector<16x16xf32>
    %519 = arith.addf %507, %518 : vector<16x16xf32>
    %520 = vector.extract_strided_slice %52 {offsets = [30, 0], sizes = [1, 16], strides = [1, 1]} : vector<32x16xf32> to vector<1x16xf32>
    %521 = vector.broadcast %88 : vector<16x1xf32> to vector<16x16xf32>
    %522 = vector.broadcast %520 : vector<1x16xf32> to vector<16x16xf32>
    %523 = arith.addf %521, %522 : vector<16x16xf32>
    %cst_109 = arith.constant 0.000000e+00 : f32
    %524 = vector.broadcast %cst_109 : f32 to vector<16x16xf32>
    %525 = arith.cmpf ogt, %523, %524 : vector<16x16xf32>
    %526 = vector.broadcast %120 : vector<1x1xf32> to vector<16x16xf32>
    %527 = arith.mulf %526, %523 : vector<16x16xf32>
    %528 = vector.broadcast %152 : vector<1x1xf32> to vector<16x16xf32>
    %529 = arith.mulf %528, %523 : vector<16x16xf32>
    %530 = arith.select %525, %527, %529 : vector<16x16xi1>, vector<16x16xf32>
    %531 = arith.addf %519, %530 : vector<16x16xf32>
    %532 = vector.extract_strided_slice %52 {offsets = [31, 0], sizes = [1, 16], strides = [1, 1]} : vector<32x16xf32> to vector<1x16xf32>
    %533 = vector.broadcast %89 : vector<16x1xf32> to vector<16x16xf32>
    %534 = vector.broadcast %532 : vector<1x16xf32> to vector<16x16xf32>
    %535 = arith.addf %533, %534 : vector<16x16xf32>
    %cst_110 = arith.constant 0.000000e+00 : f32
    %536 = vector.broadcast %cst_110 : f32 to vector<16x16xf32>
    %537 = arith.cmpf ogt, %535, %536 : vector<16x16xf32>
    %538 = vector.broadcast %121 : vector<1x1xf32> to vector<16x16xf32>
    %539 = arith.mulf %538, %535 : vector<16x16xf32>
    %540 = vector.broadcast %153 : vector<1x1xf32> to vector<16x16xf32>
    %541 = arith.mulf %540, %535 : vector<16x16xf32>
    %542 = arith.select %537, %539, %541 : vector<16x16xi1>, vector<16x16xf32>
    %543 = arith.addf %531, %542 : vector<16x16xf32>
    %544 = arith.ori %32, %39 : vector<16x16xi1>
    %545 = vector.broadcast %55 : vector<16x1xi1> to vector<16x16xi1>
    %546 = arith.andi %544, %545 : vector<16x16xi1>
    %547 = vector.broadcast %158 : vector<1x16xi1> to vector<16x16xi1>
    %548 = arith.andi %546, %547 : vector<16x16xi1>
    %cst_111 = arith.constant -1.000000e+30 : f32
    %549 = vector.broadcast %cst_111 : f32 to vector<16x16xf32>
    %550 = arith.select %548, %543, %549 : vector<16x16xi1>, vector<16x16xf32>
    %cst_112 = arith.constant dense<0xFF800000> : vector<16xf32>
    %551 = vector.multi_reduction <maximumf>, %550, %cst_112 [1] : vector<16x16xf32> to vector<16xf32>
    %552 = vector.shape_cast %551 : vector<16xf32> to vector<16x1xf32>
    %553 = arith.maximumf %154, %552 : vector<16x1xf32>
    %554 = arith.subf %154, %553 : vector<16x1xf32>
    %555 = math.exp %554 : vector<16x1xf32>
    %556 = vector.broadcast %553 : vector<16x1xf32> to vector<16x16xf32>
    %557 = arith.subf %550, %556 : vector<16x16xf32>
    %558 = math.exp %557 : vector<16x16xf32>
    %cst_113 = arith.constant 0.000000e+00 : f32
    %559 = vector.broadcast %cst_113 : f32 to vector<16x16xf32>
    %560 = arith.select %548, %558, %559 : vector<16x16xi1>, vector<16x16xf32>
    %561 = arith.mulf %555, %155 : vector<16x1xf32>
    %cst_114 = arith.constant dense<0.000000e+00> : vector<16xf32>
    %562 = vector.multi_reduction <add>, %560, %cst_114 [1] : vector<16x16xf32> to vector<16xf32>
    %563 = vector.shape_cast %562 : vector<16xf32> to vector<16x1xf32>
    %564 = arith.addf %561, %563 : vector<16x1xf32>
    %565 = vector.broadcast %555 : vector<16x1xf32> to vector<16x32xf32>
    %566 = arith.mulf %565, %156 : vector<16x32xf32>
    %567 = arith.truncf %560 : vector<16x16xf32> to vector<16x16xbf16>
    %cst_115 = arith.constant dense<0.000000e+00> : vector<16x32xf32>
    %568 = tpu.matmul %567, %53, %cst_115 {dimension_numbers = #tpu.dot_dimension_numbers<[1], [0], [0], [1], [0, 0, 1, 1], [], []>} : vector<16x16xbf16>, vector<16x32xbf16>, vector<16x32xf32> -> vector<16x32xf32>
    %569 = arith.addf %566, %568 : vector<16x32xf32>
    %cst_116 = arith.constant 9.99999971E-10 : f32
    %570 = vector.broadcast %cst_116 : f32 to vector<16x1xf32>
    %571 = arith.maximumf %564, %570 : vector<16x1xf32>
    %572 = tpu.reciprocal %571 {approx = true} : vector<16x1xf32> -> vector<16x1xf32>
    %573 = vector.broadcast %572 : vector<16x1xf32> to vector<16x32xf32>
    %574 = arith.mulf %569, %573 : vector<16x32xf32>
    %575 = vector.broadcast %5 : vector<1x32xf32> to vector<16x32xf32>
    %576 = arith.addf %574, %575 : vector<16x32xf32>
    %577 = arith.mulf %6, %6 : vector<32x1xf32>
    %578 = vector.shape_cast %577 : vector<32x1xf32> to vector<1x32x1xf32>
    %cst_117 = arith.constant dense<0.000000e+00> : vector<1xf32>
    %579 = vector.multi_reduction <add>, %578, %cst_117 [1, 2] : vector<1x32x1xf32> to vector<1xf32>
    %580 = vector.shape_cast %579 : vector<1xf32> to vector<1x1x1xf32>
    %581 = vector.extract %580[0, 0, 0] : f32 from vector<1x1x1xf32>
    %cst_118 = arith.constant 9.99999996E-13 : f32
    %582 = arith.maximumf %581, %cst_118 : f32
    %583 = math.rsqrt %582 : f32
    %cst_119 = arith.constant dense<0.000000e+00> : vector<16x1xf32>
    %584 = tpu.matmul %576, %6, %cst_119 {dimension_numbers = #tpu.dot_dimension_numbers<[1], [0], [0], [1], [0, 0, 1, 1], [], []>} : vector<16x32xf32>, vector<32x1xf32>, vector<16x1xf32> -> vector<16x1xf32>
    %585 = vector.broadcast %583 : f32 to vector<16x1xf32>
    %586 = arith.mulf %584, %585 : vector<16x1xf32>
    %cst_120 = arith.constant 0.000000e+00 : f32
    %587 = vector.broadcast %cst_120 : f32 to vector<16x1xf32>
    %588 = arith.subf %587, %586 : vector<16x1xf32>
    %589 = math.exp %588 : vector<16x1xf32>
    %cst_121 = arith.constant 1.000000e+00 : f32
    %590 = vector.broadcast %cst_121 : f32 to vector<16x1xf32>
    %591 = arith.addf %590, %589 : vector<16x1xf32>
    %cst_122 = arith.constant 1.000000e+00 : f32
    %592 = vector.broadcast %cst_122 : f32 to vector<16x1xf32>
    %593 = arith.divf %592, %591 : vector<16x1xf32>
    %cst_123 = arith.constant dense<0.000000e+00> : vector<1x16xf32>
    %594 = tpu.matmul %7, %576, %cst_123 {dimension_numbers = #tpu.dot_dimension_numbers<[1], [1], [0], [0], [0, 0, 1, 0], [], []>} : vector<1x32xf32>, vector<16x32xf32>, vector<1x16xf32> -> vector<1x16xf32>
    %595 = vector.broadcast %583 : f32 to vector<1x16xf32>
    %596 = arith.mulf %594, %595 : vector<1x16xf32>
    %cst_124 = arith.constant 0.000000e+00 : f32
    %597 = vector.broadcast %cst_124 : f32 to vector<1x16xf32>
    %598 = arith.subf %597, %596 : vector<1x16xf32>
    %599 = math.exp %598 : vector<1x16xf32>
    %cst_125 = arith.constant 1.000000e+00 : f32
    %600 = vector.broadcast %cst_125 : f32 to vector<1x16xf32>
    %601 = arith.addf %600, %599 : vector<1x16xf32>
    %cst_126 = arith.constant 1.000000e+00 : f32
    %602 = vector.broadcast %cst_126 : f32 to vector<1x16xf32>
    %603 = arith.divf %602, %601 : vector<1x16xf32>
    %cst_127 = arith.constant dense<0.000000e+00> : vector<2x1xf32>
    %604 = tpu.matmul %34, %43, %cst_127 {dimension_numbers = #tpu.dot_dimension_numbers<[1], [0], [0], [1], [0, 0, 1, 1], [], []>} : vector<2x16xf32>, vector<16x1xf32>, vector<2x1xf32> -> vector<2x1xf32>
    %cst_128 = arith.constant 5.000000e-01 : f32
    %605 = vector.broadcast %cst_128 : f32 to vector<2x1xf32>
    %606 = arith.mulf %605, %604 : vector<2x1xf32>
    %607 = math.ceil %606 : vector<2x1xf32>
    %cst_129 = arith.constant dense<0.000000e+00> : vector<16x1xf32>
    %608 = tpu.matmul %36, %607, %cst_129 {dimension_numbers = #tpu.dot_dimension_numbers<[1], [0], [0], [1], [0, 0, 1, 1], [], []>} : vector<16x2xf32>, vector<2x1xf32>, vector<16x1xf32> -> vector<16x1xf32>
    %609 = arith.cmpi ne, %38, %37 : vector<16x16xi32>
    %610 = vector.broadcast %603 : vector<1x16xf32> to vector<16x16xf32>
    %611 = vector.broadcast %593 : vector<16x1xf32> to vector<16x16xf32>
    %612 = arith.cmpf ogt, %610, %611 : vector<16x16xf32>
    %613 = vector.broadcast %603 : vector<1x16xf32> to vector<16x16xf32>
    %614 = vector.broadcast %593 : vector<16x1xf32> to vector<16x16xf32>
    %615 = arith.cmpf oeq, %613, %614 : vector<16x16xf32>
    %616 = arith.cmpi slt, %38, %37 : vector<16x16xi32>
    %617 = arith.andi %615, %616 : vector<16x16xi1>
    %618 = arith.ori %612, %617 : vector<16x16xi1>
    %619 = arith.andi %609, %618 : vector<16x16xi1>
    %cst_130 = arith.constant 1.000000e+00 : f32
    %cst_131 = arith.constant 0.000000e+00 : f32
    %620 = vector.broadcast %cst_130 : f32 to vector<16x16xf32>
    %621 = vector.broadcast %cst_131 : f32 to vector<16x16xf32>
    %622 = arith.select %619, %620, %621 : vector<16x16xi1>, vector<16x16xf32>
    %623 = vector.broadcast %43 : vector<16x1xf32> to vector<16x2xf32>
    %624 = arith.mulf %36, %623 : vector<16x2xf32>
    %cst_132 = arith.constant dense<0.000000e+00> : vector<16x2xf32>
    %625 = tpu.matmul %622, %624, %cst_132 {dimension_numbers = #tpu.dot_dimension_numbers<[1], [0], [0], [1], [0, 0, 1, 1], [], []>} : vector<16x16xf32>, vector<16x2xf32>, vector<16x2xf32> -> vector<16x2xf32>
    %626 = arith.mulf %36, %625 : vector<16x2xf32>
    %cst_133 = arith.constant dense<0.000000e+00> : vector<16xf32>
    %627 = vector.multi_reduction <add>, %626, %cst_133 [1] : vector<16x2xf32> to vector<16xf32>
    %628 = vector.shape_cast %627 : vector<16xf32> to vector<16x1xf32>
    %cst_134 = arith.constant 0.000000e+00 : f32
    %629 = vector.broadcast %cst_134 : f32 to vector<16x1xf32>
    %630 = arith.cmpf ogt, %43, %629 : vector<16x1xf32>
    %631 = arith.cmpf olt, %628, %608 : vector<16x1xf32>
    %632 = arith.andi %630, %631 : vector<16x1xi1>
    %cst_135 = arith.constant 1.000000e+00 : f32
    %cst_136 = arith.constant 0.000000e+00 : f32
    %633 = vector.broadcast %cst_135 : f32 to vector<16x1xf32>
    %634 = vector.broadcast %cst_136 : f32 to vector<16x1xf32>
    %635 = arith.select %632, %633, %634 : vector<16x1xi1>, vector<16x1xf32>
    %636 = vector.broadcast %635 : vector<16x1xf32> to vector<16x16xf32>
    %637 = arith.mulf %42, %636 : vector<16x16xf32>
    %cst_137 = arith.constant dense<0.000000e+00> : vector<16xf32>
    %638 = vector.multi_reduction <add>, %637, %cst_137 [0] : vector<16x16xf32> to vector<16xf32>
    %639 = vector.shape_cast %638 : vector<16xf32> to vector<1x16xf32>
    %640 = arith.mulf %593, %635 : vector<16x1xf32>
    %641 = vector.broadcast %640 : vector<16x1xf32> to vector<16x32xf32>
    %642 = arith.mulf %576, %641 : vector<16x32xf32>
    %cst_138 = arith.constant 0.000000e+00 : f32
    %643 = vector.broadcast %cst_138 : f32 to vector<16x1xf32>
    %644 = arith.cmpf ogt, %635, %643 : vector<16x1xf32>
    %645 = vector.broadcast %644 : vector<16x1xi1> to vector<16x16xi1>
    %646 = arith.andi %32, %645 : vector<16x16xi1>
    %cst_139 = arith.constant 0.000000e+00 : f32
    %647 = vector.broadcast %cst_139 : f32 to vector<1x16xf32>
    %648 = arith.cmpf ogt, %639, %647 : vector<1x16xf32>
    %649 = vector.broadcast %648 : vector<1x16xi1> to vector<16x16xi1>
    %650 = arith.andi %646, %649 : vector<16x16xi1>
    %cst_140 = arith.constant 0.000000e+00 : f32
    %651 = vector.broadcast %cst_140 : f32 to vector<16x32xf32>
    %652 = arith.maximumf %642, %651 : vector<16x32xf32>
    %653 = arith.truncf %652 : vector<16x32xf32> to vector<16x32xbf16>
    %cst_141 = arith.constant dense<0.000000e+00> : vector<16x32xf32>
    %654 = tpu.matmul %653, %8, %cst_141 {dimension_numbers = #tpu.dot_dimension_numbers<[1], [1], [0], [0], [0, 0, 1, 0], [], []>} : vector<16x32xbf16>, vector<32x32xbf16>, vector<16x32xf32> -> vector<16x32xf32>
    %655 = vector.broadcast %10 : vector<1x32xf32> to vector<16x32xf32>
    %656 = arith.addf %654, %655 : vector<16x32xf32>
    %cst_142 = arith.constant dense<0.000000e+00> : vector<16x32xf32>
    %657 = tpu.matmul %653, %9, %cst_142 {dimension_numbers = #tpu.dot_dimension_numbers<[1], [1], [0], [0], [0, 0, 1, 0], [], []>} : vector<16x32xbf16>, vector<32x32xbf16>, vector<16x32xf32> -> vector<16x32xf32>
    %658 = vector.broadcast %11 : vector<1x32xf32> to vector<16x32xf32>
    %659 = arith.addf %657, %658 : vector<16x32xf32>
    %cst_143 = arith.constant dense<0.000000e+00> : vector<32x16xf32>
    %660 = tpu.matmul %8, %653, %cst_143 {dimension_numbers = #tpu.dot_dimension_numbers<[1], [1], [0], [0], [0, 0, 1, 0], [], []>} : vector<32x32xbf16>, vector<16x32xbf16>, vector<32x16xf32> -> vector<32x16xf32>
    %661 = arith.truncf %656 : vector<16x32xf32> to vector<16x32xbf16>
    %cst_144 = arith.constant 0.000000e+00 : f32
    %662 = vector.broadcast %cst_144 : f32 to vector<16x1xf32>
    %663 = arith.cmpf ogt, %635, %662 : vector<16x1xf32>
    %cst_145 = arith.constant 2.000000e-01 : f32
    %664 = vector.broadcast %cst_145 : f32 to vector<1x32xf32>
    %665 = arith.mulf %12, %664 : vector<1x32xf32>
    %666 = vector.extract_strided_slice %659 {offsets = [0, 0], sizes = [16, 1], strides = [1, 1]} : vector<16x32xf32> to vector<16x1xf32>
    %667 = vector.extract_strided_slice %659 {offsets = [0, 1], sizes = [16, 1], strides = [1, 1]} : vector<16x32xf32> to vector<16x1xf32>
    %668 = vector.extract_strided_slice %659 {offsets = [0, 2], sizes = [16, 1], strides = [1, 1]} : vector<16x32xf32> to vector<16x1xf32>
    %669 = vector.extract_strided_slice %659 {offsets = [0, 3], sizes = [16, 1], strides = [1, 1]} : vector<16x32xf32> to vector<16x1xf32>
    %670 = vector.extract_strided_slice %659 {offsets = [0, 4], sizes = [16, 1], strides = [1, 1]} : vector<16x32xf32> to vector<16x1xf32>
    %671 = vector.extract_strided_slice %659 {offsets = [0, 5], sizes = [16, 1], strides = [1, 1]} : vector<16x32xf32> to vector<16x1xf32>
    %672 = vector.extract_strided_slice %659 {offsets = [0, 6], sizes = [16, 1], strides = [1, 1]} : vector<16x32xf32> to vector<16x1xf32>
    %673 = vector.extract_strided_slice %659 {offsets = [0, 7], sizes = [16, 1], strides = [1, 1]} : vector<16x32xf32> to vector<16x1xf32>
    %674 = vector.extract_strided_slice %659 {offsets = [0, 8], sizes = [16, 1], strides = [1, 1]} : vector<16x32xf32> to vector<16x1xf32>
    %675 = vector.extract_strided_slice %659 {offsets = [0, 9], sizes = [16, 1], strides = [1, 1]} : vector<16x32xf32> to vector<16x1xf32>
    %676 = vector.extract_strided_slice %659 {offsets = [0, 10], sizes = [16, 1], strides = [1, 1]} : vector<16x32xf32> to vector<16x1xf32>
    %677 = vector.extract_strided_slice %659 {offsets = [0, 11], sizes = [16, 1], strides = [1, 1]} : vector<16x32xf32> to vector<16x1xf32>
    %678 = vector.extract_strided_slice %659 {offsets = [0, 12], sizes = [16, 1], strides = [1, 1]} : vector<16x32xf32> to vector<16x1xf32>
    %679 = vector.extract_strided_slice %659 {offsets = [0, 13], sizes = [16, 1], strides = [1, 1]} : vector<16x32xf32> to vector<16x1xf32>
    %680 = vector.extract_strided_slice %659 {offsets = [0, 14], sizes = [16, 1], strides = [1, 1]} : vector<16x32xf32> to vector<16x1xf32>
    %681 = vector.extract_strided_slice %659 {offsets = [0, 15], sizes = [16, 1], strides = [1, 1]} : vector<16x32xf32> to vector<16x1xf32>
    %682 = vector.extract_strided_slice %659 {offsets = [0, 16], sizes = [16, 1], strides = [1, 1]} : vector<16x32xf32> to vector<16x1xf32>
    %683 = vector.extract_strided_slice %659 {offsets = [0, 17], sizes = [16, 1], strides = [1, 1]} : vector<16x32xf32> to vector<16x1xf32>
    %684 = vector.extract_strided_slice %659 {offsets = [0, 18], sizes = [16, 1], strides = [1, 1]} : vector<16x32xf32> to vector<16x1xf32>
    %685 = vector.extract_strided_slice %659 {offsets = [0, 19], sizes = [16, 1], strides = [1, 1]} : vector<16x32xf32> to vector<16x1xf32>
    %686 = vector.extract_strided_slice %659 {offsets = [0, 20], sizes = [16, 1], strides = [1, 1]} : vector<16x32xf32> to vector<16x1xf32>
    %687 = vector.extract_strided_slice %659 {offsets = [0, 21], sizes = [16, 1], strides = [1, 1]} : vector<16x32xf32> to vector<16x1xf32>
    %688 = vector.extract_strided_slice %659 {offsets = [0, 22], sizes = [16, 1], strides = [1, 1]} : vector<16x32xf32> to vector<16x1xf32>
    %689 = vector.extract_strided_slice %659 {offsets = [0, 23], sizes = [16, 1], strides = [1, 1]} : vector<16x32xf32> to vector<16x1xf32>
    %690 = vector.extract_strided_slice %659 {offsets = [0, 24], sizes = [16, 1], strides = [1, 1]} : vector<16x32xf32> to vector<16x1xf32>
    %691 = vector.extract_strided_slice %659 {offsets = [0, 25], sizes = [16, 1], strides = [1, 1]} : vector<16x32xf32> to vector<16x1xf32>
    %692 = vector.extract_strided_slice %659 {offsets = [0, 26], sizes = [16, 1], strides = [1, 1]} : vector<16x32xf32> to vector<16x1xf32>
    %693 = vector.extract_strided_slice %659 {offsets = [0, 27], sizes = [16, 1], strides = [1, 1]} : vector<16x32xf32> to vector<16x1xf32>
    %694 = vector.extract_strided_slice %659 {offsets = [0, 28], sizes = [16, 1], strides = [1, 1]} : vector<16x32xf32> to vector<16x1xf32>
    %695 = vector.extract_strided_slice %659 {offsets = [0, 29], sizes = [16, 1], strides = [1, 1]} : vector<16x32xf32> to vector<16x1xf32>
    %696 = vector.extract_strided_slice %659 {offsets = [0, 30], sizes = [16, 1], strides = [1, 1]} : vector<16x32xf32> to vector<16x1xf32>
    %697 = vector.extract_strided_slice %659 {offsets = [0, 31], sizes = [16, 1], strides = [1, 1]} : vector<16x32xf32> to vector<16x1xf32>
    %698 = vector.extract_strided_slice %12 {offsets = [0, 0], sizes = [1, 1], strides = [1, 1]} : vector<1x32xf32> to vector<1x1xf32>
    %699 = vector.extract_strided_slice %12 {offsets = [0, 1], sizes = [1, 1], strides = [1, 1]} : vector<1x32xf32> to vector<1x1xf32>
    %700 = vector.extract_strided_slice %12 {offsets = [0, 2], sizes = [1, 1], strides = [1, 1]} : vector<1x32xf32> to vector<1x1xf32>
    %701 = vector.extract_strided_slice %12 {offsets = [0, 3], sizes = [1, 1], strides = [1, 1]} : vector<1x32xf32> to vector<1x1xf32>
    %702 = vector.extract_strided_slice %12 {offsets = [0, 4], sizes = [1, 1], strides = [1, 1]} : vector<1x32xf32> to vector<1x1xf32>
    %703 = vector.extract_strided_slice %12 {offsets = [0, 5], sizes = [1, 1], strides = [1, 1]} : vector<1x32xf32> to vector<1x1xf32>
    %704 = vector.extract_strided_slice %12 {offsets = [0, 6], sizes = [1, 1], strides = [1, 1]} : vector<1x32xf32> to vector<1x1xf32>
    %705 = vector.extract_strided_slice %12 {offsets = [0, 7], sizes = [1, 1], strides = [1, 1]} : vector<1x32xf32> to vector<1x1xf32>
    %706 = vector.extract_strided_slice %12 {offsets = [0, 8], sizes = [1, 1], strides = [1, 1]} : vector<1x32xf32> to vector<1x1xf32>
    %707 = vector.extract_strided_slice %12 {offsets = [0, 9], sizes = [1, 1], strides = [1, 1]} : vector<1x32xf32> to vector<1x1xf32>
    %708 = vector.extract_strided_slice %12 {offsets = [0, 10], sizes = [1, 1], strides = [1, 1]} : vector<1x32xf32> to vector<1x1xf32>
    %709 = vector.extract_strided_slice %12 {offsets = [0, 11], sizes = [1, 1], strides = [1, 1]} : vector<1x32xf32> to vector<1x1xf32>
    %710 = vector.extract_strided_slice %12 {offsets = [0, 12], sizes = [1, 1], strides = [1, 1]} : vector<1x32xf32> to vector<1x1xf32>
    %711 = vector.extract_strided_slice %12 {offsets = [0, 13], sizes = [1, 1], strides = [1, 1]} : vector<1x32xf32> to vector<1x1xf32>
    %712 = vector.extract_strided_slice %12 {offsets = [0, 14], sizes = [1, 1], strides = [1, 1]} : vector<1x32xf32> to vector<1x1xf32>
    %713 = vector.extract_strided_slice %12 {offsets = [0, 15], sizes = [1, 1], strides = [1, 1]} : vector<1x32xf32> to vector<1x1xf32>
    %714 = vector.extract_strided_slice %12 {offsets = [0, 16], sizes = [1, 1], strides = [1, 1]} : vector<1x32xf32> to vector<1x1xf32>
    %715 = vector.extract_strided_slice %12 {offsets = [0, 17], sizes = [1, 1], strides = [1, 1]} : vector<1x32xf32> to vector<1x1xf32>
    %716 = vector.extract_strided_slice %12 {offsets = [0, 18], sizes = [1, 1], strides = [1, 1]} : vector<1x32xf32> to vector<1x1xf32>
    %717 = vector.extract_strided_slice %12 {offsets = [0, 19], sizes = [1, 1], strides = [1, 1]} : vector<1x32xf32> to vector<1x1xf32>
    %718 = vector.extract_strided_slice %12 {offsets = [0, 20], sizes = [1, 1], strides = [1, 1]} : vector<1x32xf32> to vector<1x1xf32>
    %719 = vector.extract_strided_slice %12 {offsets = [0, 21], sizes = [1, 1], strides = [1, 1]} : vector<1x32xf32> to vector<1x1xf32>
    %720 = vector.extract_strided_slice %12 {offsets = [0, 22], sizes = [1, 1], strides = [1, 1]} : vector<1x32xf32> to vector<1x1xf32>
    %721 = vector.extract_strided_slice %12 {offsets = [0, 23], sizes = [1, 1], strides = [1, 1]} : vector<1x32xf32> to vector<1x1xf32>
    %722 = vector.extract_strided_slice %12 {offsets = [0, 24], sizes = [1, 1], strides = [1, 1]} : vector<1x32xf32> to vector<1x1xf32>
    %723 = vector.extract_strided_slice %12 {offsets = [0, 25], sizes = [1, 1], strides = [1, 1]} : vector<1x32xf32> to vector<1x1xf32>
    %724 = vector.extract_strided_slice %12 {offsets = [0, 26], sizes = [1, 1], strides = [1, 1]} : vector<1x32xf32> to vector<1x1xf32>
    %725 = vector.extract_strided_slice %12 {offsets = [0, 27], sizes = [1, 1], strides = [1, 1]} : vector<1x32xf32> to vector<1x1xf32>
    %726 = vector.extract_strided_slice %12 {offsets = [0, 28], sizes = [1, 1], strides = [1, 1]} : vector<1x32xf32> to vector<1x1xf32>
    %727 = vector.extract_strided_slice %12 {offsets = [0, 29], sizes = [1, 1], strides = [1, 1]} : vector<1x32xf32> to vector<1x1xf32>
    %728 = vector.extract_strided_slice %12 {offsets = [0, 30], sizes = [1, 1], strides = [1, 1]} : vector<1x32xf32> to vector<1x1xf32>
    %729 = vector.extract_strided_slice %12 {offsets = [0, 31], sizes = [1, 1], strides = [1, 1]} : vector<1x32xf32> to vector<1x1xf32>
    %730 = vector.extract_strided_slice %665 {offsets = [0, 0], sizes = [1, 1], strides = [1, 1]} : vector<1x32xf32> to vector<1x1xf32>
    %731 = vector.extract_strided_slice %665 {offsets = [0, 1], sizes = [1, 1], strides = [1, 1]} : vector<1x32xf32> to vector<1x1xf32>
    %732 = vector.extract_strided_slice %665 {offsets = [0, 2], sizes = [1, 1], strides = [1, 1]} : vector<1x32xf32> to vector<1x1xf32>
    %733 = vector.extract_strided_slice %665 {offsets = [0, 3], sizes = [1, 1], strides = [1, 1]} : vector<1x32xf32> to vector<1x1xf32>
    %734 = vector.extract_strided_slice %665 {offsets = [0, 4], sizes = [1, 1], strides = [1, 1]} : vector<1x32xf32> to vector<1x1xf32>
    %735 = vector.extract_strided_slice %665 {offsets = [0, 5], sizes = [1, 1], strides = [1, 1]} : vector<1x32xf32> to vector<1x1xf32>
    %736 = vector.extract_strided_slice %665 {offsets = [0, 6], sizes = [1, 1], strides = [1, 1]} : vector<1x32xf32> to vector<1x1xf32>
    %737 = vector.extract_strided_slice %665 {offsets = [0, 7], sizes = [1, 1], strides = [1, 1]} : vector<1x32xf32> to vector<1x1xf32>
    %738 = vector.extract_strided_slice %665 {offsets = [0, 8], sizes = [1, 1], strides = [1, 1]} : vector<1x32xf32> to vector<1x1xf32>
    %739 = vector.extract_strided_slice %665 {offsets = [0, 9], sizes = [1, 1], strides = [1, 1]} : vector<1x32xf32> to vector<1x1xf32>
    %740 = vector.extract_strided_slice %665 {offsets = [0, 10], sizes = [1, 1], strides = [1, 1]} : vector<1x32xf32> to vector<1x1xf32>
    %741 = vector.extract_strided_slice %665 {offsets = [0, 11], sizes = [1, 1], strides = [1, 1]} : vector<1x32xf32> to vector<1x1xf32>
    %742 = vector.extract_strided_slice %665 {offsets = [0, 12], sizes = [1, 1], strides = [1, 1]} : vector<1x32xf32> to vector<1x1xf32>
    %743 = vector.extract_strided_slice %665 {offsets = [0, 13], sizes = [1, 1], strides = [1, 1]} : vector<1x32xf32> to vector<1x1xf32>
    %744 = vector.extract_strided_slice %665 {offsets = [0, 14], sizes = [1, 1], strides = [1, 1]} : vector<1x32xf32> to vector<1x1xf32>
    %745 = vector.extract_strided_slice %665 {offsets = [0, 15], sizes = [1, 1], strides = [1, 1]} : vector<1x32xf32> to vector<1x1xf32>
    %746 = vector.extract_strided_slice %665 {offsets = [0, 16], sizes = [1, 1], strides = [1, 1]} : vector<1x32xf32> to vector<1x1xf32>
    %747 = vector.extract_strided_slice %665 {offsets = [0, 17], sizes = [1, 1], strides = [1, 1]} : vector<1x32xf32> to vector<1x1xf32>
    %748 = vector.extract_strided_slice %665 {offsets = [0, 18], sizes = [1, 1], strides = [1, 1]} : vector<1x32xf32> to vector<1x1xf32>
    %749 = vector.extract_strided_slice %665 {offsets = [0, 19], sizes = [1, 1], strides = [1, 1]} : vector<1x32xf32> to vector<1x1xf32>
    %750 = vector.extract_strided_slice %665 {offsets = [0, 20], sizes = [1, 1], strides = [1, 1]} : vector<1x32xf32> to vector<1x1xf32>
    %751 = vector.extract_strided_slice %665 {offsets = [0, 21], sizes = [1, 1], strides = [1, 1]} : vector<1x32xf32> to vector<1x1xf32>
    %752 = vector.extract_strided_slice %665 {offsets = [0, 22], sizes = [1, 1], strides = [1, 1]} : vector<1x32xf32> to vector<1x1xf32>
    %753 = vector.extract_strided_slice %665 {offsets = [0, 23], sizes = [1, 1], strides = [1, 1]} : vector<1x32xf32> to vector<1x1xf32>
    %754 = vector.extract_strided_slice %665 {offsets = [0, 24], sizes = [1, 1], strides = [1, 1]} : vector<1x32xf32> to vector<1x1xf32>
    %755 = vector.extract_strided_slice %665 {offsets = [0, 25], sizes = [1, 1], strides = [1, 1]} : vector<1x32xf32> to vector<1x1xf32>
    %756 = vector.extract_strided_slice %665 {offsets = [0, 26], sizes = [1, 1], strides = [1, 1]} : vector<1x32xf32> to vector<1x1xf32>
    %757 = vector.extract_strided_slice %665 {offsets = [0, 27], sizes = [1, 1], strides = [1, 1]} : vector<1x32xf32> to vector<1x1xf32>
    %758 = vector.extract_strided_slice %665 {offsets = [0, 28], sizes = [1, 1], strides = [1, 1]} : vector<1x32xf32> to vector<1x1xf32>
    %759 = vector.extract_strided_slice %665 {offsets = [0, 29], sizes = [1, 1], strides = [1, 1]} : vector<1x32xf32> to vector<1x1xf32>
    %760 = vector.extract_strided_slice %665 {offsets = [0, 30], sizes = [1, 1], strides = [1, 1]} : vector<1x32xf32> to vector<1x1xf32>
    %761 = vector.extract_strided_slice %665 {offsets = [0, 31], sizes = [1, 1], strides = [1, 1]} : vector<1x32xf32> to vector<1x1xf32>
    %cst_146 = arith.constant -1.000000e+30 : f32
    %762 = vector.broadcast %cst_146 : f32 to vector<16x1xf32>
    %cst_147 = arith.constant 0.000000e+00 : f32
    %763 = vector.broadcast %cst_147 : f32 to vector<16x1xf32>
    %cst_148 = arith.constant 0.000000e+00 : f32
    %764 = vector.broadcast %cst_148 : f32 to vector<16x32xf32>
    %cst_149 = arith.constant 0.000000e+00 : f32
    %765 = vector.broadcast %cst_149 : f32 to vector<1x16xf32>
    %766 = arith.cmpf ogt, %639, %765 : vector<1x16xf32>
    %cst_150 = arith.constant 0.000000e+00 : f32
    %767 = vector.broadcast %cst_150 : f32 to vector<16x16xf32>
    %768 = vector.extract_strided_slice %660 {offsets = [0, 0], sizes = [1, 16], strides = [1, 1]} : vector<32x16xf32> to vector<1x16xf32>
    %769 = vector.broadcast %666 : vector<16x1xf32> to vector<16x16xf32>
    %770 = vector.broadcast %768 : vector<1x16xf32> to vector<16x16xf32>
    %771 = arith.addf %769, %770 : vector<16x16xf32>
    %cst_151 = arith.constant 0.000000e+00 : f32
    %772 = vector.broadcast %cst_151 : f32 to vector<16x16xf32>
    %773 = arith.cmpf ogt, %771, %772 : vector<16x16xf32>
    %774 = vector.broadcast %698 : vector<1x1xf32> to vector<16x16xf32>
    %775 = arith.mulf %774, %771 : vector<16x16xf32>
    %776 = vector.broadcast %730 : vector<1x1xf32> to vector<16x16xf32>
    %777 = arith.mulf %776, %771 : vector<16x16xf32>
    %778 = arith.select %773, %775, %777 : vector<16x16xi1>, vector<16x16xf32>
    %779 = arith.addf %767, %778 : vector<16x16xf32>
    %780 = vector.extract_strided_slice %660 {offsets = [1, 0], sizes = [1, 16], strides = [1, 1]} : vector<32x16xf32> to vector<1x16xf32>
    %781 = vector.broadcast %667 : vector<16x1xf32> to vector<16x16xf32>
    %782 = vector.broadcast %780 : vector<1x16xf32> to vector<16x16xf32>
    %783 = arith.addf %781, %782 : vector<16x16xf32>
    %cst_152 = arith.constant 0.000000e+00 : f32
    %784 = vector.broadcast %cst_152 : f32 to vector<16x16xf32>
    %785 = arith.cmpf ogt, %783, %784 : vector<16x16xf32>
    %786 = vector.broadcast %699 : vector<1x1xf32> to vector<16x16xf32>
    %787 = arith.mulf %786, %783 : vector<16x16xf32>
    %788 = vector.broadcast %731 : vector<1x1xf32> to vector<16x16xf32>
    %789 = arith.mulf %788, %783 : vector<16x16xf32>
    %790 = arith.select %785, %787, %789 : vector<16x16xi1>, vector<16x16xf32>
    %791 = arith.addf %779, %790 : vector<16x16xf32>
    %792 = vector.extract_strided_slice %660 {offsets = [2, 0], sizes = [1, 16], strides = [1, 1]} : vector<32x16xf32> to vector<1x16xf32>
    %793 = vector.broadcast %668 : vector<16x1xf32> to vector<16x16xf32>
    %794 = vector.broadcast %792 : vector<1x16xf32> to vector<16x16xf32>
    %795 = arith.addf %793, %794 : vector<16x16xf32>
    %cst_153 = arith.constant 0.000000e+00 : f32
    %796 = vector.broadcast %cst_153 : f32 to vector<16x16xf32>
    %797 = arith.cmpf ogt, %795, %796 : vector<16x16xf32>
    %798 = vector.broadcast %700 : vector<1x1xf32> to vector<16x16xf32>
    %799 = arith.mulf %798, %795 : vector<16x16xf32>
    %800 = vector.broadcast %732 : vector<1x1xf32> to vector<16x16xf32>
    %801 = arith.mulf %800, %795 : vector<16x16xf32>
    %802 = arith.select %797, %799, %801 : vector<16x16xi1>, vector<16x16xf32>
    %803 = arith.addf %791, %802 : vector<16x16xf32>
    %804 = vector.extract_strided_slice %660 {offsets = [3, 0], sizes = [1, 16], strides = [1, 1]} : vector<32x16xf32> to vector<1x16xf32>
    %805 = vector.broadcast %669 : vector<16x1xf32> to vector<16x16xf32>
    %806 = vector.broadcast %804 : vector<1x16xf32> to vector<16x16xf32>
    %807 = arith.addf %805, %806 : vector<16x16xf32>
    %cst_154 = arith.constant 0.000000e+00 : f32
    %808 = vector.broadcast %cst_154 : f32 to vector<16x16xf32>
    %809 = arith.cmpf ogt, %807, %808 : vector<16x16xf32>
    %810 = vector.broadcast %701 : vector<1x1xf32> to vector<16x16xf32>
    %811 = arith.mulf %810, %807 : vector<16x16xf32>
    %812 = vector.broadcast %733 : vector<1x1xf32> to vector<16x16xf32>
    %813 = arith.mulf %812, %807 : vector<16x16xf32>
    %814 = arith.select %809, %811, %813 : vector<16x16xi1>, vector<16x16xf32>
    %815 = arith.addf %803, %814 : vector<16x16xf32>
    %816 = vector.extract_strided_slice %660 {offsets = [4, 0], sizes = [1, 16], strides = [1, 1]} : vector<32x16xf32> to vector<1x16xf32>
    %817 = vector.broadcast %670 : vector<16x1xf32> to vector<16x16xf32>
    %818 = vector.broadcast %816 : vector<1x16xf32> to vector<16x16xf32>
    %819 = arith.addf %817, %818 : vector<16x16xf32>
    %cst_155 = arith.constant 0.000000e+00 : f32
    %820 = vector.broadcast %cst_155 : f32 to vector<16x16xf32>
    %821 = arith.cmpf ogt, %819, %820 : vector<16x16xf32>
    %822 = vector.broadcast %702 : vector<1x1xf32> to vector<16x16xf32>
    %823 = arith.mulf %822, %819 : vector<16x16xf32>
    %824 = vector.broadcast %734 : vector<1x1xf32> to vector<16x16xf32>
    %825 = arith.mulf %824, %819 : vector<16x16xf32>
    %826 = arith.select %821, %823, %825 : vector<16x16xi1>, vector<16x16xf32>
    %827 = arith.addf %815, %826 : vector<16x16xf32>
    %828 = vector.extract_strided_slice %660 {offsets = [5, 0], sizes = [1, 16], strides = [1, 1]} : vector<32x16xf32> to vector<1x16xf32>
    %829 = vector.broadcast %671 : vector<16x1xf32> to vector<16x16xf32>
    %830 = vector.broadcast %828 : vector<1x16xf32> to vector<16x16xf32>
    %831 = arith.addf %829, %830 : vector<16x16xf32>
    %cst_156 = arith.constant 0.000000e+00 : f32
    %832 = vector.broadcast %cst_156 : f32 to vector<16x16xf32>
    %833 = arith.cmpf ogt, %831, %832 : vector<16x16xf32>
    %834 = vector.broadcast %703 : vector<1x1xf32> to vector<16x16xf32>
    %835 = arith.mulf %834, %831 : vector<16x16xf32>
    %836 = vector.broadcast %735 : vector<1x1xf32> to vector<16x16xf32>
    %837 = arith.mulf %836, %831 : vector<16x16xf32>
    %838 = arith.select %833, %835, %837 : vector<16x16xi1>, vector<16x16xf32>
    %839 = arith.addf %827, %838 : vector<16x16xf32>
    %840 = vector.extract_strided_slice %660 {offsets = [6, 0], sizes = [1, 16], strides = [1, 1]} : vector<32x16xf32> to vector<1x16xf32>
    %841 = vector.broadcast %672 : vector<16x1xf32> to vector<16x16xf32>
    %842 = vector.broadcast %840 : vector<1x16xf32> to vector<16x16xf32>
    %843 = arith.addf %841, %842 : vector<16x16xf32>
    %cst_157 = arith.constant 0.000000e+00 : f32
    %844 = vector.broadcast %cst_157 : f32 to vector<16x16xf32>
    %845 = arith.cmpf ogt, %843, %844 : vector<16x16xf32>
    %846 = vector.broadcast %704 : vector<1x1xf32> to vector<16x16xf32>
    %847 = arith.mulf %846, %843 : vector<16x16xf32>
    %848 = vector.broadcast %736 : vector<1x1xf32> to vector<16x16xf32>
    %849 = arith.mulf %848, %843 : vector<16x16xf32>
    %850 = arith.select %845, %847, %849 : vector<16x16xi1>, vector<16x16xf32>
    %851 = arith.addf %839, %850 : vector<16x16xf32>
    %852 = vector.extract_strided_slice %660 {offsets = [7, 0], sizes = [1, 16], strides = [1, 1]} : vector<32x16xf32> to vector<1x16xf32>
    %853 = vector.broadcast %673 : vector<16x1xf32> to vector<16x16xf32>
    %854 = vector.broadcast %852 : vector<1x16xf32> to vector<16x16xf32>
    %855 = arith.addf %853, %854 : vector<16x16xf32>
    %cst_158 = arith.constant 0.000000e+00 : f32
    %856 = vector.broadcast %cst_158 : f32 to vector<16x16xf32>
    %857 = arith.cmpf ogt, %855, %856 : vector<16x16xf32>
    %858 = vector.broadcast %705 : vector<1x1xf32> to vector<16x16xf32>
    %859 = arith.mulf %858, %855 : vector<16x16xf32>
    %860 = vector.broadcast %737 : vector<1x1xf32> to vector<16x16xf32>
    %861 = arith.mulf %860, %855 : vector<16x16xf32>
    %862 = arith.select %857, %859, %861 : vector<16x16xi1>, vector<16x16xf32>
    %863 = arith.addf %851, %862 : vector<16x16xf32>
    %864 = vector.extract_strided_slice %660 {offsets = [8, 0], sizes = [1, 16], strides = [1, 1]} : vector<32x16xf32> to vector<1x16xf32>
    %865 = vector.broadcast %674 : vector<16x1xf32> to vector<16x16xf32>
    %866 = vector.broadcast %864 : vector<1x16xf32> to vector<16x16xf32>
    %867 = arith.addf %865, %866 : vector<16x16xf32>
    %cst_159 = arith.constant 0.000000e+00 : f32
    %868 = vector.broadcast %cst_159 : f32 to vector<16x16xf32>
    %869 = arith.cmpf ogt, %867, %868 : vector<16x16xf32>
    %870 = vector.broadcast %706 : vector<1x1xf32> to vector<16x16xf32>
    %871 = arith.mulf %870, %867 : vector<16x16xf32>
    %872 = vector.broadcast %738 : vector<1x1xf32> to vector<16x16xf32>
    %873 = arith.mulf %872, %867 : vector<16x16xf32>
    %874 = arith.select %869, %871, %873 : vector<16x16xi1>, vector<16x16xf32>
    %875 = arith.addf %863, %874 : vector<16x16xf32>
    %876 = vector.extract_strided_slice %660 {offsets = [9, 0], sizes = [1, 16], strides = [1, 1]} : vector<32x16xf32> to vector<1x16xf32>
    %877 = vector.broadcast %675 : vector<16x1xf32> to vector<16x16xf32>
    %878 = vector.broadcast %876 : vector<1x16xf32> to vector<16x16xf32>
    %879 = arith.addf %877, %878 : vector<16x16xf32>
    %cst_160 = arith.constant 0.000000e+00 : f32
    %880 = vector.broadcast %cst_160 : f32 to vector<16x16xf32>
    %881 = arith.cmpf ogt, %879, %880 : vector<16x16xf32>
    %882 = vector.broadcast %707 : vector<1x1xf32> to vector<16x16xf32>
    %883 = arith.mulf %882, %879 : vector<16x16xf32>
    %884 = vector.broadcast %739 : vector<1x1xf32> to vector<16x16xf32>
    %885 = arith.mulf %884, %879 : vector<16x16xf32>
    %886 = arith.select %881, %883, %885 : vector<16x16xi1>, vector<16x16xf32>
    %887 = arith.addf %875, %886 : vector<16x16xf32>
    %888 = vector.extract_strided_slice %660 {offsets = [10, 0], sizes = [1, 16], strides = [1, 1]} : vector<32x16xf32> to vector<1x16xf32>
    %889 = vector.broadcast %676 : vector<16x1xf32> to vector<16x16xf32>
    %890 = vector.broadcast %888 : vector<1x16xf32> to vector<16x16xf32>
    %891 = arith.addf %889, %890 : vector<16x16xf32>
    %cst_161 = arith.constant 0.000000e+00 : f32
    %892 = vector.broadcast %cst_161 : f32 to vector<16x16xf32>
    %893 = arith.cmpf ogt, %891, %892 : vector<16x16xf32>
    %894 = vector.broadcast %708 : vector<1x1xf32> to vector<16x16xf32>
    %895 = arith.mulf %894, %891 : vector<16x16xf32>
    %896 = vector.broadcast %740 : vector<1x1xf32> to vector<16x16xf32>
    %897 = arith.mulf %896, %891 : vector<16x16xf32>
    %898 = arith.select %893, %895, %897 : vector<16x16xi1>, vector<16x16xf32>
    %899 = arith.addf %887, %898 : vector<16x16xf32>
    %900 = vector.extract_strided_slice %660 {offsets = [11, 0], sizes = [1, 16], strides = [1, 1]} : vector<32x16xf32> to vector<1x16xf32>
    %901 = vector.broadcast %677 : vector<16x1xf32> to vector<16x16xf32>
    %902 = vector.broadcast %900 : vector<1x16xf32> to vector<16x16xf32>
    %903 = arith.addf %901, %902 : vector<16x16xf32>
    %cst_162 = arith.constant 0.000000e+00 : f32
    %904 = vector.broadcast %cst_162 : f32 to vector<16x16xf32>
    %905 = arith.cmpf ogt, %903, %904 : vector<16x16xf32>
    %906 = vector.broadcast %709 : vector<1x1xf32> to vector<16x16xf32>
    %907 = arith.mulf %906, %903 : vector<16x16xf32>
    %908 = vector.broadcast %741 : vector<1x1xf32> to vector<16x16xf32>
    %909 = arith.mulf %908, %903 : vector<16x16xf32>
    %910 = arith.select %905, %907, %909 : vector<16x16xi1>, vector<16x16xf32>
    %911 = arith.addf %899, %910 : vector<16x16xf32>
    %912 = vector.extract_strided_slice %660 {offsets = [12, 0], sizes = [1, 16], strides = [1, 1]} : vector<32x16xf32> to vector<1x16xf32>
    %913 = vector.broadcast %678 : vector<16x1xf32> to vector<16x16xf32>
    %914 = vector.broadcast %912 : vector<1x16xf32> to vector<16x16xf32>
    %915 = arith.addf %913, %914 : vector<16x16xf32>
    %cst_163 = arith.constant 0.000000e+00 : f32
    %916 = vector.broadcast %cst_163 : f32 to vector<16x16xf32>
    %917 = arith.cmpf ogt, %915, %916 : vector<16x16xf32>
    %918 = vector.broadcast %710 : vector<1x1xf32> to vector<16x16xf32>
    %919 = arith.mulf %918, %915 : vector<16x16xf32>
    %920 = vector.broadcast %742 : vector<1x1xf32> to vector<16x16xf32>
    %921 = arith.mulf %920, %915 : vector<16x16xf32>
    %922 = arith.select %917, %919, %921 : vector<16x16xi1>, vector<16x16xf32>
    %923 = arith.addf %911, %922 : vector<16x16xf32>
    %924 = vector.extract_strided_slice %660 {offsets = [13, 0], sizes = [1, 16], strides = [1, 1]} : vector<32x16xf32> to vector<1x16xf32>
    %925 = vector.broadcast %679 : vector<16x1xf32> to vector<16x16xf32>
    %926 = vector.broadcast %924 : vector<1x16xf32> to vector<16x16xf32>
    %927 = arith.addf %925, %926 : vector<16x16xf32>
    %cst_164 = arith.constant 0.000000e+00 : f32
    %928 = vector.broadcast %cst_164 : f32 to vector<16x16xf32>
    %929 = arith.cmpf ogt, %927, %928 : vector<16x16xf32>
    %930 = vector.broadcast %711 : vector<1x1xf32> to vector<16x16xf32>
    %931 = arith.mulf %930, %927 : vector<16x16xf32>
    %932 = vector.broadcast %743 : vector<1x1xf32> to vector<16x16xf32>
    %933 = arith.mulf %932, %927 : vector<16x16xf32>
    %934 = arith.select %929, %931, %933 : vector<16x16xi1>, vector<16x16xf32>
    %935 = arith.addf %923, %934 : vector<16x16xf32>
    %936 = vector.extract_strided_slice %660 {offsets = [14, 0], sizes = [1, 16], strides = [1, 1]} : vector<32x16xf32> to vector<1x16xf32>
    %937 = vector.broadcast %680 : vector<16x1xf32> to vector<16x16xf32>
    %938 = vector.broadcast %936 : vector<1x16xf32> to vector<16x16xf32>
    %939 = arith.addf %937, %938 : vector<16x16xf32>
    %cst_165 = arith.constant 0.000000e+00 : f32
    %940 = vector.broadcast %cst_165 : f32 to vector<16x16xf32>
    %941 = arith.cmpf ogt, %939, %940 : vector<16x16xf32>
    %942 = vector.broadcast %712 : vector<1x1xf32> to vector<16x16xf32>
    %943 = arith.mulf %942, %939 : vector<16x16xf32>
    %944 = vector.broadcast %744 : vector<1x1xf32> to vector<16x16xf32>
    %945 = arith.mulf %944, %939 : vector<16x16xf32>
    %946 = arith.select %941, %943, %945 : vector<16x16xi1>, vector<16x16xf32>
    %947 = arith.addf %935, %946 : vector<16x16xf32>
    %948 = vector.extract_strided_slice %660 {offsets = [15, 0], sizes = [1, 16], strides = [1, 1]} : vector<32x16xf32> to vector<1x16xf32>
    %949 = vector.broadcast %681 : vector<16x1xf32> to vector<16x16xf32>
    %950 = vector.broadcast %948 : vector<1x16xf32> to vector<16x16xf32>
    %951 = arith.addf %949, %950 : vector<16x16xf32>
    %cst_166 = arith.constant 0.000000e+00 : f32
    %952 = vector.broadcast %cst_166 : f32 to vector<16x16xf32>
    %953 = arith.cmpf ogt, %951, %952 : vector<16x16xf32>
    %954 = vector.broadcast %713 : vector<1x1xf32> to vector<16x16xf32>
    %955 = arith.mulf %954, %951 : vector<16x16xf32>
    %956 = vector.broadcast %745 : vector<1x1xf32> to vector<16x16xf32>
    %957 = arith.mulf %956, %951 : vector<16x16xf32>
    %958 = arith.select %953, %955, %957 : vector<16x16xi1>, vector<16x16xf32>
    %959 = arith.addf %947, %958 : vector<16x16xf32>
    %960 = vector.extract_strided_slice %660 {offsets = [16, 0], sizes = [1, 16], strides = [1, 1]} : vector<32x16xf32> to vector<1x16xf32>
    %961 = vector.broadcast %682 : vector<16x1xf32> to vector<16x16xf32>
    %962 = vector.broadcast %960 : vector<1x16xf32> to vector<16x16xf32>
    %963 = arith.addf %961, %962 : vector<16x16xf32>
    %cst_167 = arith.constant 0.000000e+00 : f32
    %964 = vector.broadcast %cst_167 : f32 to vector<16x16xf32>
    %965 = arith.cmpf ogt, %963, %964 : vector<16x16xf32>
    %966 = vector.broadcast %714 : vector<1x1xf32> to vector<16x16xf32>
    %967 = arith.mulf %966, %963 : vector<16x16xf32>
    %968 = vector.broadcast %746 : vector<1x1xf32> to vector<16x16xf32>
    %969 = arith.mulf %968, %963 : vector<16x16xf32>
    %970 = arith.select %965, %967, %969 : vector<16x16xi1>, vector<16x16xf32>
    %971 = arith.addf %959, %970 : vector<16x16xf32>
    %972 = vector.extract_strided_slice %660 {offsets = [17, 0], sizes = [1, 16], strides = [1, 1]} : vector<32x16xf32> to vector<1x16xf32>
    %973 = vector.broadcast %683 : vector<16x1xf32> to vector<16x16xf32>
    %974 = vector.broadcast %972 : vector<1x16xf32> to vector<16x16xf32>
    %975 = arith.addf %973, %974 : vector<16x16xf32>
    %cst_168 = arith.constant 0.000000e+00 : f32
    %976 = vector.broadcast %cst_168 : f32 to vector<16x16xf32>
    %977 = arith.cmpf ogt, %975, %976 : vector<16x16xf32>
    %978 = vector.broadcast %715 : vector<1x1xf32> to vector<16x16xf32>
    %979 = arith.mulf %978, %975 : vector<16x16xf32>
    %980 = vector.broadcast %747 : vector<1x1xf32> to vector<16x16xf32>
    %981 = arith.mulf %980, %975 : vector<16x16xf32>
    %982 = arith.select %977, %979, %981 : vector<16x16xi1>, vector<16x16xf32>
    %983 = arith.addf %971, %982 : vector<16x16xf32>
    %984 = vector.extract_strided_slice %660 {offsets = [18, 0], sizes = [1, 16], strides = [1, 1]} : vector<32x16xf32> to vector<1x16xf32>
    %985 = vector.broadcast %684 : vector<16x1xf32> to vector<16x16xf32>
    %986 = vector.broadcast %984 : vector<1x16xf32> to vector<16x16xf32>
    %987 = arith.addf %985, %986 : vector<16x16xf32>
    %cst_169 = arith.constant 0.000000e+00 : f32
    %988 = vector.broadcast %cst_169 : f32 to vector<16x16xf32>
    %989 = arith.cmpf ogt, %987, %988 : vector<16x16xf32>
    %990 = vector.broadcast %716 : vector<1x1xf32> to vector<16x16xf32>
    %991 = arith.mulf %990, %987 : vector<16x16xf32>
    %992 = vector.broadcast %748 : vector<1x1xf32> to vector<16x16xf32>
    %993 = arith.mulf %992, %987 : vector<16x16xf32>
    %994 = arith.select %989, %991, %993 : vector<16x16xi1>, vector<16x16xf32>
    %995 = arith.addf %983, %994 : vector<16x16xf32>
    %996 = vector.extract_strided_slice %660 {offsets = [19, 0], sizes = [1, 16], strides = [1, 1]} : vector<32x16xf32> to vector<1x16xf32>
    %997 = vector.broadcast %685 : vector<16x1xf32> to vector<16x16xf32>
    %998 = vector.broadcast %996 : vector<1x16xf32> to vector<16x16xf32>
    %999 = arith.addf %997, %998 : vector<16x16xf32>
    %cst_170 = arith.constant 0.000000e+00 : f32
    %1000 = vector.broadcast %cst_170 : f32 to vector<16x16xf32>
    %1001 = arith.cmpf ogt, %999, %1000 : vector<16x16xf32>
    %1002 = vector.broadcast %717 : vector<1x1xf32> to vector<16x16xf32>
    %1003 = arith.mulf %1002, %999 : vector<16x16xf32>
    %1004 = vector.broadcast %749 : vector<1x1xf32> to vector<16x16xf32>
    %1005 = arith.mulf %1004, %999 : vector<16x16xf32>
    %1006 = arith.select %1001, %1003, %1005 : vector<16x16xi1>, vector<16x16xf32>
    %1007 = arith.addf %995, %1006 : vector<16x16xf32>
    %1008 = vector.extract_strided_slice %660 {offsets = [20, 0], sizes = [1, 16], strides = [1, 1]} : vector<32x16xf32> to vector<1x16xf32>
    %1009 = vector.broadcast %686 : vector<16x1xf32> to vector<16x16xf32>
    %1010 = vector.broadcast %1008 : vector<1x16xf32> to vector<16x16xf32>
    %1011 = arith.addf %1009, %1010 : vector<16x16xf32>
    %cst_171 = arith.constant 0.000000e+00 : f32
    %1012 = vector.broadcast %cst_171 : f32 to vector<16x16xf32>
    %1013 = arith.cmpf ogt, %1011, %1012 : vector<16x16xf32>
    %1014 = vector.broadcast %718 : vector<1x1xf32> to vector<16x16xf32>
    %1015 = arith.mulf %1014, %1011 : vector<16x16xf32>
    %1016 = vector.broadcast %750 : vector<1x1xf32> to vector<16x16xf32>
    %1017 = arith.mulf %1016, %1011 : vector<16x16xf32>
    %1018 = arith.select %1013, %1015, %1017 : vector<16x16xi1>, vector<16x16xf32>
    %1019 = arith.addf %1007, %1018 : vector<16x16xf32>
    %1020 = vector.extract_strided_slice %660 {offsets = [21, 0], sizes = [1, 16], strides = [1, 1]} : vector<32x16xf32> to vector<1x16xf32>
    %1021 = vector.broadcast %687 : vector<16x1xf32> to vector<16x16xf32>
    %1022 = vector.broadcast %1020 : vector<1x16xf32> to vector<16x16xf32>
    %1023 = arith.addf %1021, %1022 : vector<16x16xf32>
    %cst_172 = arith.constant 0.000000e+00 : f32
    %1024 = vector.broadcast %cst_172 : f32 to vector<16x16xf32>
    %1025 = arith.cmpf ogt, %1023, %1024 : vector<16x16xf32>
    %1026 = vector.broadcast %719 : vector<1x1xf32> to vector<16x16xf32>
    %1027 = arith.mulf %1026, %1023 : vector<16x16xf32>
    %1028 = vector.broadcast %751 : vector<1x1xf32> to vector<16x16xf32>
    %1029 = arith.mulf %1028, %1023 : vector<16x16xf32>
    %1030 = arith.select %1025, %1027, %1029 : vector<16x16xi1>, vector<16x16xf32>
    %1031 = arith.addf %1019, %1030 : vector<16x16xf32>
    %1032 = vector.extract_strided_slice %660 {offsets = [22, 0], sizes = [1, 16], strides = [1, 1]} : vector<32x16xf32> to vector<1x16xf32>
    %1033 = vector.broadcast %688 : vector<16x1xf32> to vector<16x16xf32>
    %1034 = vector.broadcast %1032 : vector<1x16xf32> to vector<16x16xf32>
    %1035 = arith.addf %1033, %1034 : vector<16x16xf32>
    %cst_173 = arith.constant 0.000000e+00 : f32
    %1036 = vector.broadcast %cst_173 : f32 to vector<16x16xf32>
    %1037 = arith.cmpf ogt, %1035, %1036 : vector<16x16xf32>
    %1038 = vector.broadcast %720 : vector<1x1xf32> to vector<16x16xf32>
    %1039 = arith.mulf %1038, %1035 : vector<16x16xf32>
    %1040 = vector.broadcast %752 : vector<1x1xf32> to vector<16x16xf32>
    %1041 = arith.mulf %1040, %1035 : vector<16x16xf32>
    %1042 = arith.select %1037, %1039, %1041 : vector<16x16xi1>, vector<16x16xf32>
    %1043 = arith.addf %1031, %1042 : vector<16x16xf32>
    %1044 = vector.extract_strided_slice %660 {offsets = [23, 0], sizes = [1, 16], strides = [1, 1]} : vector<32x16xf32> to vector<1x16xf32>
    %1045 = vector.broadcast %689 : vector<16x1xf32> to vector<16x16xf32>
    %1046 = vector.broadcast %1044 : vector<1x16xf32> to vector<16x16xf32>
    %1047 = arith.addf %1045, %1046 : vector<16x16xf32>
    %cst_174 = arith.constant 0.000000e+00 : f32
    %1048 = vector.broadcast %cst_174 : f32 to vector<16x16xf32>
    %1049 = arith.cmpf ogt, %1047, %1048 : vector<16x16xf32>
    %1050 = vector.broadcast %721 : vector<1x1xf32> to vector<16x16xf32>
    %1051 = arith.mulf %1050, %1047 : vector<16x16xf32>
    %1052 = vector.broadcast %753 : vector<1x1xf32> to vector<16x16xf32>
    %1053 = arith.mulf %1052, %1047 : vector<16x16xf32>
    %1054 = arith.select %1049, %1051, %1053 : vector<16x16xi1>, vector<16x16xf32>
    %1055 = arith.addf %1043, %1054 : vector<16x16xf32>
    %1056 = vector.extract_strided_slice %660 {offsets = [24, 0], sizes = [1, 16], strides = [1, 1]} : vector<32x16xf32> to vector<1x16xf32>
    %1057 = vector.broadcast %690 : vector<16x1xf32> to vector<16x16xf32>
    %1058 = vector.broadcast %1056 : vector<1x16xf32> to vector<16x16xf32>
    %1059 = arith.addf %1057, %1058 : vector<16x16xf32>
    %cst_175 = arith.constant 0.000000e+00 : f32
    %1060 = vector.broadcast %cst_175 : f32 to vector<16x16xf32>
    %1061 = arith.cmpf ogt, %1059, %1060 : vector<16x16xf32>
    %1062 = vector.broadcast %722 : vector<1x1xf32> to vector<16x16xf32>
    %1063 = arith.mulf %1062, %1059 : vector<16x16xf32>
    %1064 = vector.broadcast %754 : vector<1x1xf32> to vector<16x16xf32>
    %1065 = arith.mulf %1064, %1059 : vector<16x16xf32>
    %1066 = arith.select %1061, %1063, %1065 : vector<16x16xi1>, vector<16x16xf32>
    %1067 = arith.addf %1055, %1066 : vector<16x16xf32>
    %1068 = vector.extract_strided_slice %660 {offsets = [25, 0], sizes = [1, 16], strides = [1, 1]} : vector<32x16xf32> to vector<1x16xf32>
    %1069 = vector.broadcast %691 : vector<16x1xf32> to vector<16x16xf32>
    %1070 = vector.broadcast %1068 : vector<1x16xf32> to vector<16x16xf32>
    %1071 = arith.addf %1069, %1070 : vector<16x16xf32>
    %cst_176 = arith.constant 0.000000e+00 : f32
    %1072 = vector.broadcast %cst_176 : f32 to vector<16x16xf32>
    %1073 = arith.cmpf ogt, %1071, %1072 : vector<16x16xf32>
    %1074 = vector.broadcast %723 : vector<1x1xf32> to vector<16x16xf32>
    %1075 = arith.mulf %1074, %1071 : vector<16x16xf32>
    %1076 = vector.broadcast %755 : vector<1x1xf32> to vector<16x16xf32>
    %1077 = arith.mulf %1076, %1071 : vector<16x16xf32>
    %1078 = arith.select %1073, %1075, %1077 : vector<16x16xi1>, vector<16x16xf32>
    %1079 = arith.addf %1067, %1078 : vector<16x16xf32>
    %1080 = vector.extract_strided_slice %660 {offsets = [26, 0], sizes = [1, 16], strides = [1, 1]} : vector<32x16xf32> to vector<1x16xf32>
    %1081 = vector.broadcast %692 : vector<16x1xf32> to vector<16x16xf32>
    %1082 = vector.broadcast %1080 : vector<1x16xf32> to vector<16x16xf32>
    %1083 = arith.addf %1081, %1082 : vector<16x16xf32>
    %cst_177 = arith.constant 0.000000e+00 : f32
    %1084 = vector.broadcast %cst_177 : f32 to vector<16x16xf32>
    %1085 = arith.cmpf ogt, %1083, %1084 : vector<16x16xf32>
    %1086 = vector.broadcast %724 : vector<1x1xf32> to vector<16x16xf32>
    %1087 = arith.mulf %1086, %1083 : vector<16x16xf32>
    %1088 = vector.broadcast %756 : vector<1x1xf32> to vector<16x16xf32>
    %1089 = arith.mulf %1088, %1083 : vector<16x16xf32>
    %1090 = arith.select %1085, %1087, %1089 : vector<16x16xi1>, vector<16x16xf32>
    %1091 = arith.addf %1079, %1090 : vector<16x16xf32>
    %1092 = vector.extract_strided_slice %660 {offsets = [27, 0], sizes = [1, 16], strides = [1, 1]} : vector<32x16xf32> to vector<1x16xf32>
    %1093 = vector.broadcast %693 : vector<16x1xf32> to vector<16x16xf32>
    %1094 = vector.broadcast %1092 : vector<1x16xf32> to vector<16x16xf32>
    %1095 = arith.addf %1093, %1094 : vector<16x16xf32>
    %cst_178 = arith.constant 0.000000e+00 : f32
    %1096 = vector.broadcast %cst_178 : f32 to vector<16x16xf32>
    %1097 = arith.cmpf ogt, %1095, %1096 : vector<16x16xf32>
    %1098 = vector.broadcast %725 : vector<1x1xf32> to vector<16x16xf32>
    %1099 = arith.mulf %1098, %1095 : vector<16x16xf32>
    %1100 = vector.broadcast %757 : vector<1x1xf32> to vector<16x16xf32>
    %1101 = arith.mulf %1100, %1095 : vector<16x16xf32>
    %1102 = arith.select %1097, %1099, %1101 : vector<16x16xi1>, vector<16x16xf32>
    %1103 = arith.addf %1091, %1102 : vector<16x16xf32>
    %1104 = vector.extract_strided_slice %660 {offsets = [28, 0], sizes = [1, 16], strides = [1, 1]} : vector<32x16xf32> to vector<1x16xf32>
    %1105 = vector.broadcast %694 : vector<16x1xf32> to vector<16x16xf32>
    %1106 = vector.broadcast %1104 : vector<1x16xf32> to vector<16x16xf32>
    %1107 = arith.addf %1105, %1106 : vector<16x16xf32>
    %cst_179 = arith.constant 0.000000e+00 : f32
    %1108 = vector.broadcast %cst_179 : f32 to vector<16x16xf32>
    %1109 = arith.cmpf ogt, %1107, %1108 : vector<16x16xf32>
    %1110 = vector.broadcast %726 : vector<1x1xf32> to vector<16x16xf32>
    %1111 = arith.mulf %1110, %1107 : vector<16x16xf32>
    %1112 = vector.broadcast %758 : vector<1x1xf32> to vector<16x16xf32>
    %1113 = arith.mulf %1112, %1107 : vector<16x16xf32>
    %1114 = arith.select %1109, %1111, %1113 : vector<16x16xi1>, vector<16x16xf32>
    %1115 = arith.addf %1103, %1114 : vector<16x16xf32>
    %1116 = vector.extract_strided_slice %660 {offsets = [29, 0], sizes = [1, 16], strides = [1, 1]} : vector<32x16xf32> to vector<1x16xf32>
    %1117 = vector.broadcast %695 : vector<16x1xf32> to vector<16x16xf32>
    %1118 = vector.broadcast %1116 : vector<1x16xf32> to vector<16x16xf32>
    %1119 = arith.addf %1117, %1118 : vector<16x16xf32>
    %cst_180 = arith.constant 0.000000e+00 : f32
    %1120 = vector.broadcast %cst_180 : f32 to vector<16x16xf32>
    %1121 = arith.cmpf ogt, %1119, %1120 : vector<16x16xf32>
    %1122 = vector.broadcast %727 : vector<1x1xf32> to vector<16x16xf32>
    %1123 = arith.mulf %1122, %1119 : vector<16x16xf32>
    %1124 = vector.broadcast %759 : vector<1x1xf32> to vector<16x16xf32>
    %1125 = arith.mulf %1124, %1119 : vector<16x16xf32>
    %1126 = arith.select %1121, %1123, %1125 : vector<16x16xi1>, vector<16x16xf32>
    %1127 = arith.addf %1115, %1126 : vector<16x16xf32>
    %1128 = vector.extract_strided_slice %660 {offsets = [30, 0], sizes = [1, 16], strides = [1, 1]} : vector<32x16xf32> to vector<1x16xf32>
    %1129 = vector.broadcast %696 : vector<16x1xf32> to vector<16x16xf32>
    %1130 = vector.broadcast %1128 : vector<1x16xf32> to vector<16x16xf32>
    %1131 = arith.addf %1129, %1130 : vector<16x16xf32>
    %cst_181 = arith.constant 0.000000e+00 : f32
    %1132 = vector.broadcast %cst_181 : f32 to vector<16x16xf32>
    %1133 = arith.cmpf ogt, %1131, %1132 : vector<16x16xf32>
    %1134 = vector.broadcast %728 : vector<1x1xf32> to vector<16x16xf32>
    %1135 = arith.mulf %1134, %1131 : vector<16x16xf32>
    %1136 = vector.broadcast %760 : vector<1x1xf32> to vector<16x16xf32>
    %1137 = arith.mulf %1136, %1131 : vector<16x16xf32>
    %1138 = arith.select %1133, %1135, %1137 : vector<16x16xi1>, vector<16x16xf32>
    %1139 = arith.addf %1127, %1138 : vector<16x16xf32>
    %1140 = vector.extract_strided_slice %660 {offsets = [31, 0], sizes = [1, 16], strides = [1, 1]} : vector<32x16xf32> to vector<1x16xf32>
    %1141 = vector.broadcast %697 : vector<16x1xf32> to vector<16x16xf32>
    %1142 = vector.broadcast %1140 : vector<1x16xf32> to vector<16x16xf32>
    %1143 = arith.addf %1141, %1142 : vector<16x16xf32>
    %cst_182 = arith.constant 0.000000e+00 : f32
    %1144 = vector.broadcast %cst_182 : f32 to vector<16x16xf32>
    %1145 = arith.cmpf ogt, %1143, %1144 : vector<16x16xf32>
    %1146 = vector.broadcast %729 : vector<1x1xf32> to vector<16x16xf32>
    %1147 = arith.mulf %1146, %1143 : vector<16x16xf32>
    %1148 = vector.broadcast %761 : vector<1x1xf32> to vector<16x16xf32>
    %1149 = arith.mulf %1148, %1143 : vector<16x16xf32>
    %1150 = arith.select %1145, %1147, %1149 : vector<16x16xi1>, vector<16x16xf32>
    %1151 = arith.addf %1139, %1150 : vector<16x16xf32>
    %1152 = arith.ori %650, %39 : vector<16x16xi1>
    %1153 = vector.broadcast %663 : vector<16x1xi1> to vector<16x16xi1>
    %1154 = arith.andi %1152, %1153 : vector<16x16xi1>
    %1155 = vector.broadcast %766 : vector<1x16xi1> to vector<16x16xi1>
    %1156 = arith.andi %1154, %1155 : vector<16x16xi1>
    %cst_183 = arith.constant -1.000000e+30 : f32
    %1157 = vector.broadcast %cst_183 : f32 to vector<16x16xf32>
    %1158 = arith.select %1156, %1151, %1157 : vector<16x16xi1>, vector<16x16xf32>
    %cst_184 = arith.constant dense<0xFF800000> : vector<16xf32>
    %1159 = vector.multi_reduction <maximumf>, %1158, %cst_184 [1] : vector<16x16xf32> to vector<16xf32>
    %1160 = vector.shape_cast %1159 : vector<16xf32> to vector<16x1xf32>
    %1161 = arith.maximumf %762, %1160 : vector<16x1xf32>
    %1162 = arith.subf %762, %1161 : vector<16x1xf32>
    %1163 = math.exp %1162 : vector<16x1xf32>
    %1164 = vector.broadcast %1161 : vector<16x1xf32> to vector<16x16xf32>
    %1165 = arith.subf %1158, %1164 : vector<16x16xf32>
    %1166 = math.exp %1165 : vector<16x16xf32>
    %cst_185 = arith.constant 0.000000e+00 : f32
    %1167 = vector.broadcast %cst_185 : f32 to vector<16x16xf32>
    %1168 = arith.select %1156, %1166, %1167 : vector<16x16xi1>, vector<16x16xf32>
    %1169 = arith.mulf %1163, %763 : vector<16x1xf32>
    %cst_186 = arith.constant dense<0.000000e+00> : vector<16xf32>
    %1170 = vector.multi_reduction <add>, %1168, %cst_186 [1] : vector<16x16xf32> to vector<16xf32>
    %1171 = vector.shape_cast %1170 : vector<16xf32> to vector<16x1xf32>
    %1172 = arith.addf %1169, %1171 : vector<16x1xf32>
    %1173 = vector.broadcast %1163 : vector<16x1xf32> to vector<16x32xf32>
    %1174 = arith.mulf %1173, %764 : vector<16x32xf32>
    %1175 = arith.truncf %1168 : vector<16x16xf32> to vector<16x16xbf16>
    %cst_187 = arith.constant dense<0.000000e+00> : vector<16x32xf32>
    %1176 = tpu.matmul %1175, %661, %cst_187 {dimension_numbers = #tpu.dot_dimension_numbers<[1], [0], [0], [1], [0, 0, 1, 1], [], []>} : vector<16x16xbf16>, vector<16x32xbf16>, vector<16x32xf32> -> vector<16x32xf32>
    %1177 = arith.addf %1174, %1176 : vector<16x32xf32>
    %cst_188 = arith.constant 9.99999971E-10 : f32
    %1178 = vector.broadcast %cst_188 : f32 to vector<16x1xf32>
    %1179 = arith.maximumf %1172, %1178 : vector<16x1xf32>
    %1180 = tpu.reciprocal %1179 {approx = true} : vector<16x1xf32> -> vector<16x1xf32>
    %1181 = vector.broadcast %1180 : vector<16x1xf32> to vector<16x32xf32>
    %1182 = arith.mulf %1177, %1181 : vector<16x32xf32>
    %1183 = vector.broadcast %13 : vector<1x32xf32> to vector<16x32xf32>
    %1184 = arith.addf %1182, %1183 : vector<16x32xf32>
    %1185 = arith.mulf %14, %14 : vector<32x1xf32>
    %1186 = vector.shape_cast %1185 : vector<32x1xf32> to vector<1x32x1xf32>
    %cst_189 = arith.constant dense<0.000000e+00> : vector<1xf32>
    %1187 = vector.multi_reduction <add>, %1186, %cst_189 [1, 2] : vector<1x32x1xf32> to vector<1xf32>
    %1188 = vector.shape_cast %1187 : vector<1xf32> to vector<1x1x1xf32>
    %1189 = vector.extract %1188[0, 0, 0] : f32 from vector<1x1x1xf32>
    %cst_190 = arith.constant 9.99999996E-13 : f32
    %1190 = arith.maximumf %1189, %cst_190 : f32
    %1191 = math.rsqrt %1190 : f32
    %cst_191 = arith.constant dense<0.000000e+00> : vector<16x1xf32>
    %1192 = tpu.matmul %1184, %14, %cst_191 {dimension_numbers = #tpu.dot_dimension_numbers<[1], [0], [0], [1], [0, 0, 1, 1], [], []>} : vector<16x32xf32>, vector<32x1xf32>, vector<16x1xf32> -> vector<16x1xf32>
    %1193 = vector.broadcast %1191 : f32 to vector<16x1xf32>
    %1194 = arith.mulf %1192, %1193 : vector<16x1xf32>
    %cst_192 = arith.constant 0.000000e+00 : f32
    %1195 = vector.broadcast %cst_192 : f32 to vector<16x1xf32>
    %1196 = arith.subf %1195, %1194 : vector<16x1xf32>
    %1197 = math.exp %1196 : vector<16x1xf32>
    %cst_193 = arith.constant 1.000000e+00 : f32
    %1198 = vector.broadcast %cst_193 : f32 to vector<16x1xf32>
    %1199 = arith.addf %1198, %1197 : vector<16x1xf32>
    %cst_194 = arith.constant 1.000000e+00 : f32
    %1200 = vector.broadcast %cst_194 : f32 to vector<16x1xf32>
    %1201 = arith.divf %1200, %1199 : vector<16x1xf32>
    %cst_195 = arith.constant dense<0.000000e+00> : vector<1x16xf32>
    %1202 = tpu.matmul %15, %1184, %cst_195 {dimension_numbers = #tpu.dot_dimension_numbers<[1], [1], [0], [0], [0, 0, 1, 0], [], []>} : vector<1x32xf32>, vector<16x32xf32>, vector<1x16xf32> -> vector<1x16xf32>
    %1203 = vector.broadcast %1191 : f32 to vector<1x16xf32>
    %1204 = arith.mulf %1202, %1203 : vector<1x16xf32>
    %cst_196 = arith.constant 0.000000e+00 : f32
    %1205 = vector.broadcast %cst_196 : f32 to vector<1x16xf32>
    %1206 = arith.subf %1205, %1204 : vector<1x16xf32>
    %1207 = math.exp %1206 : vector<1x16xf32>
    %cst_197 = arith.constant 1.000000e+00 : f32
    %1208 = vector.broadcast %cst_197 : f32 to vector<1x16xf32>
    %1209 = arith.addf %1208, %1207 : vector<1x16xf32>
    %cst_198 = arith.constant 1.000000e+00 : f32
    %1210 = vector.broadcast %cst_198 : f32 to vector<1x16xf32>
    %1211 = arith.divf %1210, %1209 : vector<1x16xf32>
    %cst_199 = arith.constant dense<0.000000e+00> : vector<2x1xf32>
    %1212 = tpu.matmul %34, %635, %cst_199 {dimension_numbers = #tpu.dot_dimension_numbers<[1], [0], [0], [1], [0, 0, 1, 1], [], []>} : vector<2x16xf32>, vector<16x1xf32>, vector<2x1xf32> -> vector<2x1xf32>
    %cst_200 = arith.constant 5.000000e-01 : f32
    %1213 = vector.broadcast %cst_200 : f32 to vector<2x1xf32>
    %1214 = arith.mulf %1213, %1212 : vector<2x1xf32>
    %1215 = math.ceil %1214 : vector<2x1xf32>
    %cst_201 = arith.constant dense<0.000000e+00> : vector<16x1xf32>
    %1216 = tpu.matmul %36, %1215, %cst_201 {dimension_numbers = #tpu.dot_dimension_numbers<[1], [0], [0], [1], [0, 0, 1, 1], [], []>} : vector<16x2xf32>, vector<2x1xf32>, vector<16x1xf32> -> vector<16x1xf32>
    %1217 = arith.cmpi ne, %38, %37 : vector<16x16xi32>
    %1218 = vector.broadcast %1211 : vector<1x16xf32> to vector<16x16xf32>
    %1219 = vector.broadcast %1201 : vector<16x1xf32> to vector<16x16xf32>
    %1220 = arith.cmpf ogt, %1218, %1219 : vector<16x16xf32>
    %1221 = vector.broadcast %1211 : vector<1x16xf32> to vector<16x16xf32>
    %1222 = vector.broadcast %1201 : vector<16x1xf32> to vector<16x16xf32>
    %1223 = arith.cmpf oeq, %1221, %1222 : vector<16x16xf32>
    %1224 = arith.cmpi slt, %38, %37 : vector<16x16xi32>
    %1225 = arith.andi %1223, %1224 : vector<16x16xi1>
    %1226 = arith.ori %1220, %1225 : vector<16x16xi1>
    %1227 = arith.andi %1217, %1226 : vector<16x16xi1>
    %cst_202 = arith.constant 1.000000e+00 : f32
    %cst_203 = arith.constant 0.000000e+00 : f32
    %1228 = vector.broadcast %cst_202 : f32 to vector<16x16xf32>
    %1229 = vector.broadcast %cst_203 : f32 to vector<16x16xf32>
    %1230 = arith.select %1227, %1228, %1229 : vector<16x16xi1>, vector<16x16xf32>
    %1231 = vector.broadcast %635 : vector<16x1xf32> to vector<16x2xf32>
    %1232 = arith.mulf %36, %1231 : vector<16x2xf32>
    %cst_204 = arith.constant dense<0.000000e+00> : vector<16x2xf32>
    %1233 = tpu.matmul %1230, %1232, %cst_204 {dimension_numbers = #tpu.dot_dimension_numbers<[1], [0], [0], [1], [0, 0, 1, 1], [], []>} : vector<16x16xf32>, vector<16x2xf32>, vector<16x2xf32> -> vector<16x2xf32>
    %1234 = arith.mulf %36, %1233 : vector<16x2xf32>
    %cst_205 = arith.constant dense<0.000000e+00> : vector<16xf32>
    %1235 = vector.multi_reduction <add>, %1234, %cst_205 [1] : vector<16x2xf32> to vector<16xf32>
    %1236 = vector.shape_cast %1235 : vector<16xf32> to vector<16x1xf32>
    %cst_206 = arith.constant 0.000000e+00 : f32
    %1237 = vector.broadcast %cst_206 : f32 to vector<16x1xf32>
    %1238 = arith.cmpf ogt, %635, %1237 : vector<16x1xf32>
    %1239 = arith.cmpf olt, %1236, %1216 : vector<16x1xf32>
    %1240 = arith.andi %1238, %1239 : vector<16x1xi1>
    %cst_207 = arith.constant 1.000000e+00 : f32
    %cst_208 = arith.constant 0.000000e+00 : f32
    %1241 = vector.broadcast %cst_207 : f32 to vector<16x1xf32>
    %1242 = vector.broadcast %cst_208 : f32 to vector<16x1xf32>
    %1243 = arith.select %1240, %1241, %1242 : vector<16x1xi1>, vector<16x1xf32>
    %1244 = vector.broadcast %1243 : vector<16x1xf32> to vector<16x16xf32>
    %1245 = arith.mulf %42, %1244 : vector<16x16xf32>
    %cst_209 = arith.constant dense<0.000000e+00> : vector<16xf32>
    %1246 = vector.multi_reduction <add>, %1245, %cst_209 [0] : vector<16x16xf32> to vector<16xf32>
    %1247 = vector.shape_cast %1246 : vector<16xf32> to vector<1x16xf32>
    %1248 = arith.mulf %1201, %1243 : vector<16x1xf32>
    %1249 = vector.broadcast %1248 : vector<16x1xf32> to vector<16x32xf32>
    %1250 = arith.mulf %1184, %1249 : vector<16x32xf32>
    %cst_210 = arith.constant 0.000000e+00 : f32
    %1251 = vector.broadcast %cst_210 : f32 to vector<16x1xf32>
    %1252 = arith.cmpf ogt, %1243, %1251 : vector<16x1xf32>
    %1253 = vector.broadcast %1252 : vector<16x1xi1> to vector<16x16xi1>
    %1254 = arith.andi %650, %1253 : vector<16x16xi1>
    %cst_211 = arith.constant 0.000000e+00 : f32
    %1255 = vector.broadcast %cst_211 : f32 to vector<1x16xf32>
    %1256 = arith.cmpf ogt, %1247, %1255 : vector<1x16xf32>
    %1257 = vector.broadcast %1256 : vector<1x16xi1> to vector<16x16xi1>
    %1258 = arith.andi %1254, %1257 : vector<16x16xi1>
    %cst_212 = arith.constant 0.000000e+00 : f32
    %1259 = vector.broadcast %cst_212 : f32 to vector<16x32xf32>
    %1260 = arith.maximumf %1250, %1259 : vector<16x32xf32>
    %1261 = arith.truncf %1260 : vector<16x32xf32> to vector<16x32xbf16>
    %cst_213 = arith.constant dense<0.000000e+00> : vector<16x32xf32>
    %1262 = tpu.matmul %1261, %16, %cst_213 {dimension_numbers = #tpu.dot_dimension_numbers<[1], [1], [0], [0], [0, 0, 1, 0], [], []>} : vector<16x32xbf16>, vector<32x32xbf16>, vector<16x32xf32> -> vector<16x32xf32>
    %1263 = vector.broadcast %18 : vector<1x32xf32> to vector<16x32xf32>
    %1264 = arith.addf %1262, %1263 : vector<16x32xf32>
    %cst_214 = arith.constant dense<0.000000e+00> : vector<16x32xf32>
    %1265 = tpu.matmul %1261, %17, %cst_214 {dimension_numbers = #tpu.dot_dimension_numbers<[1], [1], [0], [0], [0, 0, 1, 0], [], []>} : vector<16x32xbf16>, vector<32x32xbf16>, vector<16x32xf32> -> vector<16x32xf32>
    %1266 = vector.broadcast %19 : vector<1x32xf32> to vector<16x32xf32>
    %1267 = arith.addf %1265, %1266 : vector<16x32xf32>
    %cst_215 = arith.constant dense<0.000000e+00> : vector<32x16xf32>
    %1268 = tpu.matmul %16, %1261, %cst_215 {dimension_numbers = #tpu.dot_dimension_numbers<[1], [1], [0], [0], [0, 0, 1, 0], [], []>} : vector<32x32xbf16>, vector<16x32xbf16>, vector<32x16xf32> -> vector<32x16xf32>
    %1269 = arith.truncf %1264 : vector<16x32xf32> to vector<16x32xbf16>
    %cst_216 = arith.constant 0.000000e+00 : f32
    %1270 = vector.broadcast %cst_216 : f32 to vector<16x1xf32>
    %1271 = arith.cmpf ogt, %1243, %1270 : vector<16x1xf32>
    %cst_217 = arith.constant 2.000000e-01 : f32
    %1272 = vector.broadcast %cst_217 : f32 to vector<1x32xf32>
    %1273 = arith.mulf %20, %1272 : vector<1x32xf32>
    %1274 = vector.extract_strided_slice %1267 {offsets = [0, 0], sizes = [16, 1], strides = [1, 1]} : vector<16x32xf32> to vector<16x1xf32>
    %1275 = vector.extract_strided_slice %1267 {offsets = [0, 1], sizes = [16, 1], strides = [1, 1]} : vector<16x32xf32> to vector<16x1xf32>
    %1276 = vector.extract_strided_slice %1267 {offsets = [0, 2], sizes = [16, 1], strides = [1, 1]} : vector<16x32xf32> to vector<16x1xf32>
    %1277 = vector.extract_strided_slice %1267 {offsets = [0, 3], sizes = [16, 1], strides = [1, 1]} : vector<16x32xf32> to vector<16x1xf32>
    %1278 = vector.extract_strided_slice %1267 {offsets = [0, 4], sizes = [16, 1], strides = [1, 1]} : vector<16x32xf32> to vector<16x1xf32>
    %1279 = vector.extract_strided_slice %1267 {offsets = [0, 5], sizes = [16, 1], strides = [1, 1]} : vector<16x32xf32> to vector<16x1xf32>
    %1280 = vector.extract_strided_slice %1267 {offsets = [0, 6], sizes = [16, 1], strides = [1, 1]} : vector<16x32xf32> to vector<16x1xf32>
    %1281 = vector.extract_strided_slice %1267 {offsets = [0, 7], sizes = [16, 1], strides = [1, 1]} : vector<16x32xf32> to vector<16x1xf32>
    %1282 = vector.extract_strided_slice %1267 {offsets = [0, 8], sizes = [16, 1], strides = [1, 1]} : vector<16x32xf32> to vector<16x1xf32>
    %1283 = vector.extract_strided_slice %1267 {offsets = [0, 9], sizes = [16, 1], strides = [1, 1]} : vector<16x32xf32> to vector<16x1xf32>
    %1284 = vector.extract_strided_slice %1267 {offsets = [0, 10], sizes = [16, 1], strides = [1, 1]} : vector<16x32xf32> to vector<16x1xf32>
    %1285 = vector.extract_strided_slice %1267 {offsets = [0, 11], sizes = [16, 1], strides = [1, 1]} : vector<16x32xf32> to vector<16x1xf32>
    %1286 = vector.extract_strided_slice %1267 {offsets = [0, 12], sizes = [16, 1], strides = [1, 1]} : vector<16x32xf32> to vector<16x1xf32>
    %1287 = vector.extract_strided_slice %1267 {offsets = [0, 13], sizes = [16, 1], strides = [1, 1]} : vector<16x32xf32> to vector<16x1xf32>
    %1288 = vector.extract_strided_slice %1267 {offsets = [0, 14], sizes = [16, 1], strides = [1, 1]} : vector<16x32xf32> to vector<16x1xf32>
    %1289 = vector.extract_strided_slice %1267 {offsets = [0, 15], sizes = [16, 1], strides = [1, 1]} : vector<16x32xf32> to vector<16x1xf32>
    %1290 = vector.extract_strided_slice %1267 {offsets = [0, 16], sizes = [16, 1], strides = [1, 1]} : vector<16x32xf32> to vector<16x1xf32>
    %1291 = vector.extract_strided_slice %1267 {offsets = [0, 17], sizes = [16, 1], strides = [1, 1]} : vector<16x32xf32> to vector<16x1xf32>
    %1292 = vector.extract_strided_slice %1267 {offsets = [0, 18], sizes = [16, 1], strides = [1, 1]} : vector<16x32xf32> to vector<16x1xf32>
    %1293 = vector.extract_strided_slice %1267 {offsets = [0, 19], sizes = [16, 1], strides = [1, 1]} : vector<16x32xf32> to vector<16x1xf32>
    %1294 = vector.extract_strided_slice %1267 {offsets = [0, 20], sizes = [16, 1], strides = [1, 1]} : vector<16x32xf32> to vector<16x1xf32>
    %1295 = vector.extract_strided_slice %1267 {offsets = [0, 21], sizes = [16, 1], strides = [1, 1]} : vector<16x32xf32> to vector<16x1xf32>
    %1296 = vector.extract_strided_slice %1267 {offsets = [0, 22], sizes = [16, 1], strides = [1, 1]} : vector<16x32xf32> to vector<16x1xf32>
    %1297 = vector.extract_strided_slice %1267 {offsets = [0, 23], sizes = [16, 1], strides = [1, 1]} : vector<16x32xf32> to vector<16x1xf32>
    %1298 = vector.extract_strided_slice %1267 {offsets = [0, 24], sizes = [16, 1], strides = [1, 1]} : vector<16x32xf32> to vector<16x1xf32>
    %1299 = vector.extract_strided_slice %1267 {offsets = [0, 25], sizes = [16, 1], strides = [1, 1]} : vector<16x32xf32> to vector<16x1xf32>
    %1300 = vector.extract_strided_slice %1267 {offsets = [0, 26], sizes = [16, 1], strides = [1, 1]} : vector<16x32xf32> to vector<16x1xf32>
    %1301 = vector.extract_strided_slice %1267 {offsets = [0, 27], sizes = [16, 1], strides = [1, 1]} : vector<16x32xf32> to vector<16x1xf32>
    %1302 = vector.extract_strided_slice %1267 {offsets = [0, 28], sizes = [16, 1], strides = [1, 1]} : vector<16x32xf32> to vector<16x1xf32>
    %1303 = vector.extract_strided_slice %1267 {offsets = [0, 29], sizes = [16, 1], strides = [1, 1]} : vector<16x32xf32> to vector<16x1xf32>
    %1304 = vector.extract_strided_slice %1267 {offsets = [0, 30], sizes = [16, 1], strides = [1, 1]} : vector<16x32xf32> to vector<16x1xf32>
    %1305 = vector.extract_strided_slice %1267 {offsets = [0, 31], sizes = [16, 1], strides = [1, 1]} : vector<16x32xf32> to vector<16x1xf32>
    %1306 = vector.extract_strided_slice %20 {offsets = [0, 0], sizes = [1, 1], strides = [1, 1]} : vector<1x32xf32> to vector<1x1xf32>
    %1307 = vector.extract_strided_slice %20 {offsets = [0, 1], sizes = [1, 1], strides = [1, 1]} : vector<1x32xf32> to vector<1x1xf32>
    %1308 = vector.extract_strided_slice %20 {offsets = [0, 2], sizes = [1, 1], strides = [1, 1]} : vector<1x32xf32> to vector<1x1xf32>
    %1309 = vector.extract_strided_slice %20 {offsets = [0, 3], sizes = [1, 1], strides = [1, 1]} : vector<1x32xf32> to vector<1x1xf32>
    %1310 = vector.extract_strided_slice %20 {offsets = [0, 4], sizes = [1, 1], strides = [1, 1]} : vector<1x32xf32> to vector<1x1xf32>
    %1311 = vector.extract_strided_slice %20 {offsets = [0, 5], sizes = [1, 1], strides = [1, 1]} : vector<1x32xf32> to vector<1x1xf32>
    %1312 = vector.extract_strided_slice %20 {offsets = [0, 6], sizes = [1, 1], strides = [1, 1]} : vector<1x32xf32> to vector<1x1xf32>
    %1313 = vector.extract_strided_slice %20 {offsets = [0, 7], sizes = [1, 1], strides = [1, 1]} : vector<1x32xf32> to vector<1x1xf32>
    %1314 = vector.extract_strided_slice %20 {offsets = [0, 8], sizes = [1, 1], strides = [1, 1]} : vector<1x32xf32> to vector<1x1xf32>
    %1315 = vector.extract_strided_slice %20 {offsets = [0, 9], sizes = [1, 1], strides = [1, 1]} : vector<1x32xf32> to vector<1x1xf32>
    %1316 = vector.extract_strided_slice %20 {offsets = [0, 10], sizes = [1, 1], strides = [1, 1]} : vector<1x32xf32> to vector<1x1xf32>
    %1317 = vector.extract_strided_slice %20 {offsets = [0, 11], sizes = [1, 1], strides = [1, 1]} : vector<1x32xf32> to vector<1x1xf32>
    %1318 = vector.extract_strided_slice %20 {offsets = [0, 12], sizes = [1, 1], strides = [1, 1]} : vector<1x32xf32> to vector<1x1xf32>
    %1319 = vector.extract_strided_slice %20 {offsets = [0, 13], sizes = [1, 1], strides = [1, 1]} : vector<1x32xf32> to vector<1x1xf32>
    %1320 = vector.extract_strided_slice %20 {offsets = [0, 14], sizes = [1, 1], strides = [1, 1]} : vector<1x32xf32> to vector<1x1xf32>
    %1321 = vector.extract_strided_slice %20 {offsets = [0, 15], sizes = [1, 1], strides = [1, 1]} : vector<1x32xf32> to vector<1x1xf32>
    %1322 = vector.extract_strided_slice %20 {offsets = [0, 16], sizes = [1, 1], strides = [1, 1]} : vector<1x32xf32> to vector<1x1xf32>
    %1323 = vector.extract_strided_slice %20 {offsets = [0, 17], sizes = [1, 1], strides = [1, 1]} : vector<1x32xf32> to vector<1x1xf32>
    %1324 = vector.extract_strided_slice %20 {offsets = [0, 18], sizes = [1, 1], strides = [1, 1]} : vector<1x32xf32> to vector<1x1xf32>
    %1325 = vector.extract_strided_slice %20 {offsets = [0, 19], sizes = [1, 1], strides = [1, 1]} : vector<1x32xf32> to vector<1x1xf32>
    %1326 = vector.extract_strided_slice %20 {offsets = [0, 20], sizes = [1, 1], strides = [1, 1]} : vector<1x32xf32> to vector<1x1xf32>
    %1327 = vector.extract_strided_slice %20 {offsets = [0, 21], sizes = [1, 1], strides = [1, 1]} : vector<1x32xf32> to vector<1x1xf32>
    %1328 = vector.extract_strided_slice %20 {offsets = [0, 22], sizes = [1, 1], strides = [1, 1]} : vector<1x32xf32> to vector<1x1xf32>
    %1329 = vector.extract_strided_slice %20 {offsets = [0, 23], sizes = [1, 1], strides = [1, 1]} : vector<1x32xf32> to vector<1x1xf32>
    %1330 = vector.extract_strided_slice %20 {offsets = [0, 24], sizes = [1, 1], strides = [1, 1]} : vector<1x32xf32> to vector<1x1xf32>
    %1331 = vector.extract_strided_slice %20 {offsets = [0, 25], sizes = [1, 1], strides = [1, 1]} : vector<1x32xf32> to vector<1x1xf32>
    %1332 = vector.extract_strided_slice %20 {offsets = [0, 26], sizes = [1, 1], strides = [1, 1]} : vector<1x32xf32> to vector<1x1xf32>
    %1333 = vector.extract_strided_slice %20 {offsets = [0, 27], sizes = [1, 1], strides = [1, 1]} : vector<1x32xf32> to vector<1x1xf32>
    %1334 = vector.extract_strided_slice %20 {offsets = [0, 28], sizes = [1, 1], strides = [1, 1]} : vector<1x32xf32> to vector<1x1xf32>
    %1335 = vector.extract_strided_slice %20 {offsets = [0, 29], sizes = [1, 1], strides = [1, 1]} : vector<1x32xf32> to vector<1x1xf32>
    %1336 = vector.extract_strided_slice %20 {offsets = [0, 30], sizes = [1, 1], strides = [1, 1]} : vector<1x32xf32> to vector<1x1xf32>
    %1337 = vector.extract_strided_slice %20 {offsets = [0, 31], sizes = [1, 1], strides = [1, 1]} : vector<1x32xf32> to vector<1x1xf32>
    %1338 = vector.extract_strided_slice %1273 {offsets = [0, 0], sizes = [1, 1], strides = [1, 1]} : vector<1x32xf32> to vector<1x1xf32>
    %1339 = vector.extract_strided_slice %1273 {offsets = [0, 1], sizes = [1, 1], strides = [1, 1]} : vector<1x32xf32> to vector<1x1xf32>
    %1340 = vector.extract_strided_slice %1273 {offsets = [0, 2], sizes = [1, 1], strides = [1, 1]} : vector<1x32xf32> to vector<1x1xf32>
    %1341 = vector.extract_strided_slice %1273 {offsets = [0, 3], sizes = [1, 1], strides = [1, 1]} : vector<1x32xf32> to vector<1x1xf32>
    %1342 = vector.extract_strided_slice %1273 {offsets = [0, 4], sizes = [1, 1], strides = [1, 1]} : vector<1x32xf32> to vector<1x1xf32>
    %1343 = vector.extract_strided_slice %1273 {offsets = [0, 5], sizes = [1, 1], strides = [1, 1]} : vector<1x32xf32> to vector<1x1xf32>
    %1344 = vector.extract_strided_slice %1273 {offsets = [0, 6], sizes = [1, 1], strides = [1, 1]} : vector<1x32xf32> to vector<1x1xf32>
    %1345 = vector.extract_strided_slice %1273 {offsets = [0, 7], sizes = [1, 1], strides = [1, 1]} : vector<1x32xf32> to vector<1x1xf32>
    %1346 = vector.extract_strided_slice %1273 {offsets = [0, 8], sizes = [1, 1], strides = [1, 1]} : vector<1x32xf32> to vector<1x1xf32>
    %1347 = vector.extract_strided_slice %1273 {offsets = [0, 9], sizes = [1, 1], strides = [1, 1]} : vector<1x32xf32> to vector<1x1xf32>
    %1348 = vector.extract_strided_slice %1273 {offsets = [0, 10], sizes = [1, 1], strides = [1, 1]} : vector<1x32xf32> to vector<1x1xf32>
    %1349 = vector.extract_strided_slice %1273 {offsets = [0, 11], sizes = [1, 1], strides = [1, 1]} : vector<1x32xf32> to vector<1x1xf32>
    %1350 = vector.extract_strided_slice %1273 {offsets = [0, 12], sizes = [1, 1], strides = [1, 1]} : vector<1x32xf32> to vector<1x1xf32>
    %1351 = vector.extract_strided_slice %1273 {offsets = [0, 13], sizes = [1, 1], strides = [1, 1]} : vector<1x32xf32> to vector<1x1xf32>
    %1352 = vector.extract_strided_slice %1273 {offsets = [0, 14], sizes = [1, 1], strides = [1, 1]} : vector<1x32xf32> to vector<1x1xf32>
    %1353 = vector.extract_strided_slice %1273 {offsets = [0, 15], sizes = [1, 1], strides = [1, 1]} : vector<1x32xf32> to vector<1x1xf32>
    %1354 = vector.extract_strided_slice %1273 {offsets = [0, 16], sizes = [1, 1], strides = [1, 1]} : vector<1x32xf32> to vector<1x1xf32>
    %1355 = vector.extract_strided_slice %1273 {offsets = [0, 17], sizes = [1, 1], strides = [1, 1]} : vector<1x32xf32> to vector<1x1xf32>
    %1356 = vector.extract_strided_slice %1273 {offsets = [0, 18], sizes = [1, 1], strides = [1, 1]} : vector<1x32xf32> to vector<1x1xf32>
    %1357 = vector.extract_strided_slice %1273 {offsets = [0, 19], sizes = [1, 1], strides = [1, 1]} : vector<1x32xf32> to vector<1x1xf32>
    %1358 = vector.extract_strided_slice %1273 {offsets = [0, 20], sizes = [1, 1], strides = [1, 1]} : vector<1x32xf32> to vector<1x1xf32>
    %1359 = vector.extract_strided_slice %1273 {offsets = [0, 21], sizes = [1, 1], strides = [1, 1]} : vector<1x32xf32> to vector<1x1xf32>
    %1360 = vector.extract_strided_slice %1273 {offsets = [0, 22], sizes = [1, 1], strides = [1, 1]} : vector<1x32xf32> to vector<1x1xf32>
    %1361 = vector.extract_strided_slice %1273 {offsets = [0, 23], sizes = [1, 1], strides = [1, 1]} : vector<1x32xf32> to vector<1x1xf32>
    %1362 = vector.extract_strided_slice %1273 {offsets = [0, 24], sizes = [1, 1], strides = [1, 1]} : vector<1x32xf32> to vector<1x1xf32>
    %1363 = vector.extract_strided_slice %1273 {offsets = [0, 25], sizes = [1, 1], strides = [1, 1]} : vector<1x32xf32> to vector<1x1xf32>
    %1364 = vector.extract_strided_slice %1273 {offsets = [0, 26], sizes = [1, 1], strides = [1, 1]} : vector<1x32xf32> to vector<1x1xf32>
    %1365 = vector.extract_strided_slice %1273 {offsets = [0, 27], sizes = [1, 1], strides = [1, 1]} : vector<1x32xf32> to vector<1x1xf32>
    %1366 = vector.extract_strided_slice %1273 {offsets = [0, 28], sizes = [1, 1], strides = [1, 1]} : vector<1x32xf32> to vector<1x1xf32>
    %1367 = vector.extract_strided_slice %1273 {offsets = [0, 29], sizes = [1, 1], strides = [1, 1]} : vector<1x32xf32> to vector<1x1xf32>
    %1368 = vector.extract_strided_slice %1273 {offsets = [0, 30], sizes = [1, 1], strides = [1, 1]} : vector<1x32xf32> to vector<1x1xf32>
    %1369 = vector.extract_strided_slice %1273 {offsets = [0, 31], sizes = [1, 1], strides = [1, 1]} : vector<1x32xf32> to vector<1x1xf32>
    %cst_218 = arith.constant -1.000000e+30 : f32
    %1370 = vector.broadcast %cst_218 : f32 to vector<16x1xf32>
    %cst_219 = arith.constant 0.000000e+00 : f32
    %1371 = vector.broadcast %cst_219 : f32 to vector<16x1xf32>
    %cst_220 = arith.constant 0.000000e+00 : f32
    %1372 = vector.broadcast %cst_220 : f32 to vector<16x32xf32>
    %cst_221 = arith.constant 0.000000e+00 : f32
    %1373 = vector.broadcast %cst_221 : f32 to vector<1x16xf32>
    %1374 = arith.cmpf ogt, %1247, %1373 : vector<1x16xf32>
    %cst_222 = arith.constant 0.000000e+00 : f32
    %1375 = vector.broadcast %cst_222 : f32 to vector<16x16xf32>
    %1376 = vector.extract_strided_slice %1268 {offsets = [0, 0], sizes = [1, 16], strides = [1, 1]} : vector<32x16xf32> to vector<1x16xf32>
    %1377 = vector.broadcast %1274 : vector<16x1xf32> to vector<16x16xf32>
    %1378 = vector.broadcast %1376 : vector<1x16xf32> to vector<16x16xf32>
    %1379 = arith.addf %1377, %1378 : vector<16x16xf32>
    %cst_223 = arith.constant 0.000000e+00 : f32
    %1380 = vector.broadcast %cst_223 : f32 to vector<16x16xf32>
    %1381 = arith.cmpf ogt, %1379, %1380 : vector<16x16xf32>
    %1382 = vector.broadcast %1306 : vector<1x1xf32> to vector<16x16xf32>
    %1383 = arith.mulf %1382, %1379 : vector<16x16xf32>
    %1384 = vector.broadcast %1338 : vector<1x1xf32> to vector<16x16xf32>
    %1385 = arith.mulf %1384, %1379 : vector<16x16xf32>
    %1386 = arith.select %1381, %1383, %1385 : vector<16x16xi1>, vector<16x16xf32>
    %1387 = arith.addf %1375, %1386 : vector<16x16xf32>
    %1388 = vector.extract_strided_slice %1268 {offsets = [1, 0], sizes = [1, 16], strides = [1, 1]} : vector<32x16xf32> to vector<1x16xf32>
    %1389 = vector.broadcast %1275 : vector<16x1xf32> to vector<16x16xf32>
    %1390 = vector.broadcast %1388 : vector<1x16xf32> to vector<16x16xf32>
    %1391 = arith.addf %1389, %1390 : vector<16x16xf32>
    %cst_224 = arith.constant 0.000000e+00 : f32
    %1392 = vector.broadcast %cst_224 : f32 to vector<16x16xf32>
    %1393 = arith.cmpf ogt, %1391, %1392 : vector<16x16xf32>
    %1394 = vector.broadcast %1307 : vector<1x1xf32> to vector<16x16xf32>
    %1395 = arith.mulf %1394, %1391 : vector<16x16xf32>
    %1396 = vector.broadcast %1339 : vector<1x1xf32> to vector<16x16xf32>
    %1397 = arith.mulf %1396, %1391 : vector<16x16xf32>
    %1398 = arith.select %1393, %1395, %1397 : vector<16x16xi1>, vector<16x16xf32>
    %1399 = arith.addf %1387, %1398 : vector<16x16xf32>
    %1400 = vector.extract_strided_slice %1268 {offsets = [2, 0], sizes = [1, 16], strides = [1, 1]} : vector<32x16xf32> to vector<1x16xf32>
    %1401 = vector.broadcast %1276 : vector<16x1xf32> to vector<16x16xf32>
    %1402 = vector.broadcast %1400 : vector<1x16xf32> to vector<16x16xf32>
    %1403 = arith.addf %1401, %1402 : vector<16x16xf32>
    %cst_225 = arith.constant 0.000000e+00 : f32
    %1404 = vector.broadcast %cst_225 : f32 to vector<16x16xf32>
    %1405 = arith.cmpf ogt, %1403, %1404 : vector<16x16xf32>
    %1406 = vector.broadcast %1308 : vector<1x1xf32> to vector<16x16xf32>
    %1407 = arith.mulf %1406, %1403 : vector<16x16xf32>
    %1408 = vector.broadcast %1340 : vector<1x1xf32> to vector<16x16xf32>
    %1409 = arith.mulf %1408, %1403 : vector<16x16xf32>
    %1410 = arith.select %1405, %1407, %1409 : vector<16x16xi1>, vector<16x16xf32>
    %1411 = arith.addf %1399, %1410 : vector<16x16xf32>
    %1412 = vector.extract_strided_slice %1268 {offsets = [3, 0], sizes = [1, 16], strides = [1, 1]} : vector<32x16xf32> to vector<1x16xf32>
    %1413 = vector.broadcast %1277 : vector<16x1xf32> to vector<16x16xf32>
    %1414 = vector.broadcast %1412 : vector<1x16xf32> to vector<16x16xf32>
    %1415 = arith.addf %1413, %1414 : vector<16x16xf32>
    %cst_226 = arith.constant 0.000000e+00 : f32
    %1416 = vector.broadcast %cst_226 : f32 to vector<16x16xf32>
    %1417 = arith.cmpf ogt, %1415, %1416 : vector<16x16xf32>
    %1418 = vector.broadcast %1309 : vector<1x1xf32> to vector<16x16xf32>
    %1419 = arith.mulf %1418, %1415 : vector<16x16xf32>
    %1420 = vector.broadcast %1341 : vector<1x1xf32> to vector<16x16xf32>
    %1421 = arith.mulf %1420, %1415 : vector<16x16xf32>
    %1422 = arith.select %1417, %1419, %1421 : vector<16x16xi1>, vector<16x16xf32>
    %1423 = arith.addf %1411, %1422 : vector<16x16xf32>
    %1424 = vector.extract_strided_slice %1268 {offsets = [4, 0], sizes = [1, 16], strides = [1, 1]} : vector<32x16xf32> to vector<1x16xf32>
    %1425 = vector.broadcast %1278 : vector<16x1xf32> to vector<16x16xf32>
    %1426 = vector.broadcast %1424 : vector<1x16xf32> to vector<16x16xf32>
    %1427 = arith.addf %1425, %1426 : vector<16x16xf32>
    %cst_227 = arith.constant 0.000000e+00 : f32
    %1428 = vector.broadcast %cst_227 : f32 to vector<16x16xf32>
    %1429 = arith.cmpf ogt, %1427, %1428 : vector<16x16xf32>
    %1430 = vector.broadcast %1310 : vector<1x1xf32> to vector<16x16xf32>
    %1431 = arith.mulf %1430, %1427 : vector<16x16xf32>
    %1432 = vector.broadcast %1342 : vector<1x1xf32> to vector<16x16xf32>
    %1433 = arith.mulf %1432, %1427 : vector<16x16xf32>
    %1434 = arith.select %1429, %1431, %1433 : vector<16x16xi1>, vector<16x16xf32>
    %1435 = arith.addf %1423, %1434 : vector<16x16xf32>
    %1436 = vector.extract_strided_slice %1268 {offsets = [5, 0], sizes = [1, 16], strides = [1, 1]} : vector<32x16xf32> to vector<1x16xf32>
    %1437 = vector.broadcast %1279 : vector<16x1xf32> to vector<16x16xf32>
    %1438 = vector.broadcast %1436 : vector<1x16xf32> to vector<16x16xf32>
    %1439 = arith.addf %1437, %1438 : vector<16x16xf32>
    %cst_228 = arith.constant 0.000000e+00 : f32
    %1440 = vector.broadcast %cst_228 : f32 to vector<16x16xf32>
    %1441 = arith.cmpf ogt, %1439, %1440 : vector<16x16xf32>
    %1442 = vector.broadcast %1311 : vector<1x1xf32> to vector<16x16xf32>
    %1443 = arith.mulf %1442, %1439 : vector<16x16xf32>
    %1444 = vector.broadcast %1343 : vector<1x1xf32> to vector<16x16xf32>
    %1445 = arith.mulf %1444, %1439 : vector<16x16xf32>
    %1446 = arith.select %1441, %1443, %1445 : vector<16x16xi1>, vector<16x16xf32>
    %1447 = arith.addf %1435, %1446 : vector<16x16xf32>
    %1448 = vector.extract_strided_slice %1268 {offsets = [6, 0], sizes = [1, 16], strides = [1, 1]} : vector<32x16xf32> to vector<1x16xf32>
    %1449 = vector.broadcast %1280 : vector<16x1xf32> to vector<16x16xf32>
    %1450 = vector.broadcast %1448 : vector<1x16xf32> to vector<16x16xf32>
    %1451 = arith.addf %1449, %1450 : vector<16x16xf32>
    %cst_229 = arith.constant 0.000000e+00 : f32
    %1452 = vector.broadcast %cst_229 : f32 to vector<16x16xf32>
    %1453 = arith.cmpf ogt, %1451, %1452 : vector<16x16xf32>
    %1454 = vector.broadcast %1312 : vector<1x1xf32> to vector<16x16xf32>
    %1455 = arith.mulf %1454, %1451 : vector<16x16xf32>
    %1456 = vector.broadcast %1344 : vector<1x1xf32> to vector<16x16xf32>
    %1457 = arith.mulf %1456, %1451 : vector<16x16xf32>
    %1458 = arith.select %1453, %1455, %1457 : vector<16x16xi1>, vector<16x16xf32>
    %1459 = arith.addf %1447, %1458 : vector<16x16xf32>
    %1460 = vector.extract_strided_slice %1268 {offsets = [7, 0], sizes = [1, 16], strides = [1, 1]} : vector<32x16xf32> to vector<1x16xf32>
    %1461 = vector.broadcast %1281 : vector<16x1xf32> to vector<16x16xf32>
    %1462 = vector.broadcast %1460 : vector<1x16xf32> to vector<16x16xf32>
    %1463 = arith.addf %1461, %1462 : vector<16x16xf32>
    %cst_230 = arith.constant 0.000000e+00 : f32
    %1464 = vector.broadcast %cst_230 : f32 to vector<16x16xf32>
    %1465 = arith.cmpf ogt, %1463, %1464 : vector<16x16xf32>
    %1466 = vector.broadcast %1313 : vector<1x1xf32> to vector<16x16xf32>
    %1467 = arith.mulf %1466, %1463 : vector<16x16xf32>
    %1468 = vector.broadcast %1345 : vector<1x1xf32> to vector<16x16xf32>
    %1469 = arith.mulf %1468, %1463 : vector<16x16xf32>
    %1470 = arith.select %1465, %1467, %1469 : vector<16x16xi1>, vector<16x16xf32>
    %1471 = arith.addf %1459, %1470 : vector<16x16xf32>
    %1472 = vector.extract_strided_slice %1268 {offsets = [8, 0], sizes = [1, 16], strides = [1, 1]} : vector<32x16xf32> to vector<1x16xf32>
    %1473 = vector.broadcast %1282 : vector<16x1xf32> to vector<16x16xf32>
    %1474 = vector.broadcast %1472 : vector<1x16xf32> to vector<16x16xf32>
    %1475 = arith.addf %1473, %1474 : vector<16x16xf32>
    %cst_231 = arith.constant 0.000000e+00 : f32
    %1476 = vector.broadcast %cst_231 : f32 to vector<16x16xf32>
    %1477 = arith.cmpf ogt, %1475, %1476 : vector<16x16xf32>
    %1478 = vector.broadcast %1314 : vector<1x1xf32> to vector<16x16xf32>
    %1479 = arith.mulf %1478, %1475 : vector<16x16xf32>
    %1480 = vector.broadcast %1346 : vector<1x1xf32> to vector<16x16xf32>
    %1481 = arith.mulf %1480, %1475 : vector<16x16xf32>
    %1482 = arith.select %1477, %1479, %1481 : vector<16x16xi1>, vector<16x16xf32>
    %1483 = arith.addf %1471, %1482 : vector<16x16xf32>
    %1484 = vector.extract_strided_slice %1268 {offsets = [9, 0], sizes = [1, 16], strides = [1, 1]} : vector<32x16xf32> to vector<1x16xf32>
    %1485 = vector.broadcast %1283 : vector<16x1xf32> to vector<16x16xf32>
    %1486 = vector.broadcast %1484 : vector<1x16xf32> to vector<16x16xf32>
    %1487 = arith.addf %1485, %1486 : vector<16x16xf32>
    %cst_232 = arith.constant 0.000000e+00 : f32
    %1488 = vector.broadcast %cst_232 : f32 to vector<16x16xf32>
    %1489 = arith.cmpf ogt, %1487, %1488 : vector<16x16xf32>
    %1490 = vector.broadcast %1315 : vector<1x1xf32> to vector<16x16xf32>
    %1491 = arith.mulf %1490, %1487 : vector<16x16xf32>
    %1492 = vector.broadcast %1347 : vector<1x1xf32> to vector<16x16xf32>
    %1493 = arith.mulf %1492, %1487 : vector<16x16xf32>
    %1494 = arith.select %1489, %1491, %1493 : vector<16x16xi1>, vector<16x16xf32>
    %1495 = arith.addf %1483, %1494 : vector<16x16xf32>
    %1496 = vector.extract_strided_slice %1268 {offsets = [10, 0], sizes = [1, 16], strides = [1, 1]} : vector<32x16xf32> to vector<1x16xf32>
    %1497 = vector.broadcast %1284 : vector<16x1xf32> to vector<16x16xf32>
    %1498 = vector.broadcast %1496 : vector<1x16xf32> to vector<16x16xf32>
    %1499 = arith.addf %1497, %1498 : vector<16x16xf32>
    %cst_233 = arith.constant 0.000000e+00 : f32
    %1500 = vector.broadcast %cst_233 : f32 to vector<16x16xf32>
    %1501 = arith.cmpf ogt, %1499, %1500 : vector<16x16xf32>
    %1502 = vector.broadcast %1316 : vector<1x1xf32> to vector<16x16xf32>
    %1503 = arith.mulf %1502, %1499 : vector<16x16xf32>
    %1504 = vector.broadcast %1348 : vector<1x1xf32> to vector<16x16xf32>
    %1505 = arith.mulf %1504, %1499 : vector<16x16xf32>
    %1506 = arith.select %1501, %1503, %1505 : vector<16x16xi1>, vector<16x16xf32>
    %1507 = arith.addf %1495, %1506 : vector<16x16xf32>
    %1508 = vector.extract_strided_slice %1268 {offsets = [11, 0], sizes = [1, 16], strides = [1, 1]} : vector<32x16xf32> to vector<1x16xf32>
    %1509 = vector.broadcast %1285 : vector<16x1xf32> to vector<16x16xf32>
    %1510 = vector.broadcast %1508 : vector<1x16xf32> to vector<16x16xf32>
    %1511 = arith.addf %1509, %1510 : vector<16x16xf32>
    %cst_234 = arith.constant 0.000000e+00 : f32
    %1512 = vector.broadcast %cst_234 : f32 to vector<16x16xf32>
    %1513 = arith.cmpf ogt, %1511, %1512 : vector<16x16xf32>
    %1514 = vector.broadcast %1317 : vector<1x1xf32> to vector<16x16xf32>
    %1515 = arith.mulf %1514, %1511 : vector<16x16xf32>
    %1516 = vector.broadcast %1349 : vector<1x1xf32> to vector<16x16xf32>
    %1517 = arith.mulf %1516, %1511 : vector<16x16xf32>
    %1518 = arith.select %1513, %1515, %1517 : vector<16x16xi1>, vector<16x16xf32>
    %1519 = arith.addf %1507, %1518 : vector<16x16xf32>
    %1520 = vector.extract_strided_slice %1268 {offsets = [12, 0], sizes = [1, 16], strides = [1, 1]} : vector<32x16xf32> to vector<1x16xf32>
    %1521 = vector.broadcast %1286 : vector<16x1xf32> to vector<16x16xf32>
    %1522 = vector.broadcast %1520 : vector<1x16xf32> to vector<16x16xf32>
    %1523 = arith.addf %1521, %1522 : vector<16x16xf32>
    %cst_235 = arith.constant 0.000000e+00 : f32
    %1524 = vector.broadcast %cst_235 : f32 to vector<16x16xf32>
    %1525 = arith.cmpf ogt, %1523, %1524 : vector<16x16xf32>
    %1526 = vector.broadcast %1318 : vector<1x1xf32> to vector<16x16xf32>
    %1527 = arith.mulf %1526, %1523 : vector<16x16xf32>
    %1528 = vector.broadcast %1350 : vector<1x1xf32> to vector<16x16xf32>
    %1529 = arith.mulf %1528, %1523 : vector<16x16xf32>
    %1530 = arith.select %1525, %1527, %1529 : vector<16x16xi1>, vector<16x16xf32>
    %1531 = arith.addf %1519, %1530 : vector<16x16xf32>
    %1532 = vector.extract_strided_slice %1268 {offsets = [13, 0], sizes = [1, 16], strides = [1, 1]} : vector<32x16xf32> to vector<1x16xf32>
    %1533 = vector.broadcast %1287 : vector<16x1xf32> to vector<16x16xf32>
    %1534 = vector.broadcast %1532 : vector<1x16xf32> to vector<16x16xf32>
    %1535 = arith.addf %1533, %1534 : vector<16x16xf32>
    %cst_236 = arith.constant 0.000000e+00 : f32
    %1536 = vector.broadcast %cst_236 : f32 to vector<16x16xf32>
    %1537 = arith.cmpf ogt, %1535, %1536 : vector<16x16xf32>
    %1538 = vector.broadcast %1319 : vector<1x1xf32> to vector<16x16xf32>
    %1539 = arith.mulf %1538, %1535 : vector<16x16xf32>
    %1540 = vector.broadcast %1351 : vector<1x1xf32> to vector<16x16xf32>
    %1541 = arith.mulf %1540, %1535 : vector<16x16xf32>
    %1542 = arith.select %1537, %1539, %1541 : vector<16x16xi1>, vector<16x16xf32>
    %1543 = arith.addf %1531, %1542 : vector<16x16xf32>
    %1544 = vector.extract_strided_slice %1268 {offsets = [14, 0], sizes = [1, 16], strides = [1, 1]} : vector<32x16xf32> to vector<1x16xf32>
    %1545 = vector.broadcast %1288 : vector<16x1xf32> to vector<16x16xf32>
    %1546 = vector.broadcast %1544 : vector<1x16xf32> to vector<16x16xf32>
    %1547 = arith.addf %1545, %1546 : vector<16x16xf32>
    %cst_237 = arith.constant 0.000000e+00 : f32
    %1548 = vector.broadcast %cst_237 : f32 to vector<16x16xf32>
    %1549 = arith.cmpf ogt, %1547, %1548 : vector<16x16xf32>
    %1550 = vector.broadcast %1320 : vector<1x1xf32> to vector<16x16xf32>
    %1551 = arith.mulf %1550, %1547 : vector<16x16xf32>
    %1552 = vector.broadcast %1352 : vector<1x1xf32> to vector<16x16xf32>
    %1553 = arith.mulf %1552, %1547 : vector<16x16xf32>
    %1554 = arith.select %1549, %1551, %1553 : vector<16x16xi1>, vector<16x16xf32>
    %1555 = arith.addf %1543, %1554 : vector<16x16xf32>
    %1556 = vector.extract_strided_slice %1268 {offsets = [15, 0], sizes = [1, 16], strides = [1, 1]} : vector<32x16xf32> to vector<1x16xf32>
    %1557 = vector.broadcast %1289 : vector<16x1xf32> to vector<16x16xf32>
    %1558 = vector.broadcast %1556 : vector<1x16xf32> to vector<16x16xf32>
    %1559 = arith.addf %1557, %1558 : vector<16x16xf32>
    %cst_238 = arith.constant 0.000000e+00 : f32
    %1560 = vector.broadcast %cst_238 : f32 to vector<16x16xf32>
    %1561 = arith.cmpf ogt, %1559, %1560 : vector<16x16xf32>
    %1562 = vector.broadcast %1321 : vector<1x1xf32> to vector<16x16xf32>
    %1563 = arith.mulf %1562, %1559 : vector<16x16xf32>
    %1564 = vector.broadcast %1353 : vector<1x1xf32> to vector<16x16xf32>
    %1565 = arith.mulf %1564, %1559 : vector<16x16xf32>
    %1566 = arith.select %1561, %1563, %1565 : vector<16x16xi1>, vector<16x16xf32>
    %1567 = arith.addf %1555, %1566 : vector<16x16xf32>
    %1568 = vector.extract_strided_slice %1268 {offsets = [16, 0], sizes = [1, 16], strides = [1, 1]} : vector<32x16xf32> to vector<1x16xf32>
    %1569 = vector.broadcast %1290 : vector<16x1xf32> to vector<16x16xf32>
    %1570 = vector.broadcast %1568 : vector<1x16xf32> to vector<16x16xf32>
    %1571 = arith.addf %1569, %1570 : vector<16x16xf32>
    %cst_239 = arith.constant 0.000000e+00 : f32
    %1572 = vector.broadcast %cst_239 : f32 to vector<16x16xf32>
    %1573 = arith.cmpf ogt, %1571, %1572 : vector<16x16xf32>
    %1574 = vector.broadcast %1322 : vector<1x1xf32> to vector<16x16xf32>
    %1575 = arith.mulf %1574, %1571 : vector<16x16xf32>
    %1576 = vector.broadcast %1354 : vector<1x1xf32> to vector<16x16xf32>
    %1577 = arith.mulf %1576, %1571 : vector<16x16xf32>
    %1578 = arith.select %1573, %1575, %1577 : vector<16x16xi1>, vector<16x16xf32>
    %1579 = arith.addf %1567, %1578 : vector<16x16xf32>
    %1580 = vector.extract_strided_slice %1268 {offsets = [17, 0], sizes = [1, 16], strides = [1, 1]} : vector<32x16xf32> to vector<1x16xf32>
    %1581 = vector.broadcast %1291 : vector<16x1xf32> to vector<16x16xf32>
    %1582 = vector.broadcast %1580 : vector<1x16xf32> to vector<16x16xf32>
    %1583 = arith.addf %1581, %1582 : vector<16x16xf32>
    %cst_240 = arith.constant 0.000000e+00 : f32
    %1584 = vector.broadcast %cst_240 : f32 to vector<16x16xf32>
    %1585 = arith.cmpf ogt, %1583, %1584 : vector<16x16xf32>
    %1586 = vector.broadcast %1323 : vector<1x1xf32> to vector<16x16xf32>
    %1587 = arith.mulf %1586, %1583 : vector<16x16xf32>
    %1588 = vector.broadcast %1355 : vector<1x1xf32> to vector<16x16xf32>
    %1589 = arith.mulf %1588, %1583 : vector<16x16xf32>
    %1590 = arith.select %1585, %1587, %1589 : vector<16x16xi1>, vector<16x16xf32>
    %1591 = arith.addf %1579, %1590 : vector<16x16xf32>
    %1592 = vector.extract_strided_slice %1268 {offsets = [18, 0], sizes = [1, 16], strides = [1, 1]} : vector<32x16xf32> to vector<1x16xf32>
    %1593 = vector.broadcast %1292 : vector<16x1xf32> to vector<16x16xf32>
    %1594 = vector.broadcast %1592 : vector<1x16xf32> to vector<16x16xf32>
    %1595 = arith.addf %1593, %1594 : vector<16x16xf32>
    %cst_241 = arith.constant 0.000000e+00 : f32
    %1596 = vector.broadcast %cst_241 : f32 to vector<16x16xf32>
    %1597 = arith.cmpf ogt, %1595, %1596 : vector<16x16xf32>
    %1598 = vector.broadcast %1324 : vector<1x1xf32> to vector<16x16xf32>
    %1599 = arith.mulf %1598, %1595 : vector<16x16xf32>
    %1600 = vector.broadcast %1356 : vector<1x1xf32> to vector<16x16xf32>
    %1601 = arith.mulf %1600, %1595 : vector<16x16xf32>
    %1602 = arith.select %1597, %1599, %1601 : vector<16x16xi1>, vector<16x16xf32>
    %1603 = arith.addf %1591, %1602 : vector<16x16xf32>
    %1604 = vector.extract_strided_slice %1268 {offsets = [19, 0], sizes = [1, 16], strides = [1, 1]} : vector<32x16xf32> to vector<1x16xf32>
    %1605 = vector.broadcast %1293 : vector<16x1xf32> to vector<16x16xf32>
    %1606 = vector.broadcast %1604 : vector<1x16xf32> to vector<16x16xf32>
    %1607 = arith.addf %1605, %1606 : vector<16x16xf32>
    %cst_242 = arith.constant 0.000000e+00 : f32
    %1608 = vector.broadcast %cst_242 : f32 to vector<16x16xf32>
    %1609 = arith.cmpf ogt, %1607, %1608 : vector<16x16xf32>
    %1610 = vector.broadcast %1325 : vector<1x1xf32> to vector<16x16xf32>
    %1611 = arith.mulf %1610, %1607 : vector<16x16xf32>
    %1612 = vector.broadcast %1357 : vector<1x1xf32> to vector<16x16xf32>
    %1613 = arith.mulf %1612, %1607 : vector<16x16xf32>
    %1614 = arith.select %1609, %1611, %1613 : vector<16x16xi1>, vector<16x16xf32>
    %1615 = arith.addf %1603, %1614 : vector<16x16xf32>
    %1616 = vector.extract_strided_slice %1268 {offsets = [20, 0], sizes = [1, 16], strides = [1, 1]} : vector<32x16xf32> to vector<1x16xf32>
    %1617 = vector.broadcast %1294 : vector<16x1xf32> to vector<16x16xf32>
    %1618 = vector.broadcast %1616 : vector<1x16xf32> to vector<16x16xf32>
    %1619 = arith.addf %1617, %1618 : vector<16x16xf32>
    %cst_243 = arith.constant 0.000000e+00 : f32
    %1620 = vector.broadcast %cst_243 : f32 to vector<16x16xf32>
    %1621 = arith.cmpf ogt, %1619, %1620 : vector<16x16xf32>
    %1622 = vector.broadcast %1326 : vector<1x1xf32> to vector<16x16xf32>
    %1623 = arith.mulf %1622, %1619 : vector<16x16xf32>
    %1624 = vector.broadcast %1358 : vector<1x1xf32> to vector<16x16xf32>
    %1625 = arith.mulf %1624, %1619 : vector<16x16xf32>
    %1626 = arith.select %1621, %1623, %1625 : vector<16x16xi1>, vector<16x16xf32>
    %1627 = arith.addf %1615, %1626 : vector<16x16xf32>
    %1628 = vector.extract_strided_slice %1268 {offsets = [21, 0], sizes = [1, 16], strides = [1, 1]} : vector<32x16xf32> to vector<1x16xf32>
    %1629 = vector.broadcast %1295 : vector<16x1xf32> to vector<16x16xf32>
    %1630 = vector.broadcast %1628 : vector<1x16xf32> to vector<16x16xf32>
    %1631 = arith.addf %1629, %1630 : vector<16x16xf32>
    %cst_244 = arith.constant 0.000000e+00 : f32
    %1632 = vector.broadcast %cst_244 : f32 to vector<16x16xf32>
    %1633 = arith.cmpf ogt, %1631, %1632 : vector<16x16xf32>
    %1634 = vector.broadcast %1327 : vector<1x1xf32> to vector<16x16xf32>
    %1635 = arith.mulf %1634, %1631 : vector<16x16xf32>
    %1636 = vector.broadcast %1359 : vector<1x1xf32> to vector<16x16xf32>
    %1637 = arith.mulf %1636, %1631 : vector<16x16xf32>
    %1638 = arith.select %1633, %1635, %1637 : vector<16x16xi1>, vector<16x16xf32>
    %1639 = arith.addf %1627, %1638 : vector<16x16xf32>
    %1640 = vector.extract_strided_slice %1268 {offsets = [22, 0], sizes = [1, 16], strides = [1, 1]} : vector<32x16xf32> to vector<1x16xf32>
    %1641 = vector.broadcast %1296 : vector<16x1xf32> to vector<16x16xf32>
    %1642 = vector.broadcast %1640 : vector<1x16xf32> to vector<16x16xf32>
    %1643 = arith.addf %1641, %1642 : vector<16x16xf32>
    %cst_245 = arith.constant 0.000000e+00 : f32
    %1644 = vector.broadcast %cst_245 : f32 to vector<16x16xf32>
    %1645 = arith.cmpf ogt, %1643, %1644 : vector<16x16xf32>
    %1646 = vector.broadcast %1328 : vector<1x1xf32> to vector<16x16xf32>
    %1647 = arith.mulf %1646, %1643 : vector<16x16xf32>
    %1648 = vector.broadcast %1360 : vector<1x1xf32> to vector<16x16xf32>
    %1649 = arith.mulf %1648, %1643 : vector<16x16xf32>
    %1650 = arith.select %1645, %1647, %1649 : vector<16x16xi1>, vector<16x16xf32>
    %1651 = arith.addf %1639, %1650 : vector<16x16xf32>
    %1652 = vector.extract_strided_slice %1268 {offsets = [23, 0], sizes = [1, 16], strides = [1, 1]} : vector<32x16xf32> to vector<1x16xf32>
    %1653 = vector.broadcast %1297 : vector<16x1xf32> to vector<16x16xf32>
    %1654 = vector.broadcast %1652 : vector<1x16xf32> to vector<16x16xf32>
    %1655 = arith.addf %1653, %1654 : vector<16x16xf32>
    %cst_246 = arith.constant 0.000000e+00 : f32
    %1656 = vector.broadcast %cst_246 : f32 to vector<16x16xf32>
    %1657 = arith.cmpf ogt, %1655, %1656 : vector<16x16xf32>
    %1658 = vector.broadcast %1329 : vector<1x1xf32> to vector<16x16xf32>
    %1659 = arith.mulf %1658, %1655 : vector<16x16xf32>
    %1660 = vector.broadcast %1361 : vector<1x1xf32> to vector<16x16xf32>
    %1661 = arith.mulf %1660, %1655 : vector<16x16xf32>
    %1662 = arith.select %1657, %1659, %1661 : vector<16x16xi1>, vector<16x16xf32>
    %1663 = arith.addf %1651, %1662 : vector<16x16xf32>
    %1664 = vector.extract_strided_slice %1268 {offsets = [24, 0], sizes = [1, 16], strides = [1, 1]} : vector<32x16xf32> to vector<1x16xf32>
    %1665 = vector.broadcast %1298 : vector<16x1xf32> to vector<16x16xf32>
    %1666 = vector.broadcast %1664 : vector<1x16xf32> to vector<16x16xf32>
    %1667 = arith.addf %1665, %1666 : vector<16x16xf32>
    %cst_247 = arith.constant 0.000000e+00 : f32
    %1668 = vector.broadcast %cst_247 : f32 to vector<16x16xf32>
    %1669 = arith.cmpf ogt, %1667, %1668 : vector<16x16xf32>
    %1670 = vector.broadcast %1330 : vector<1x1xf32> to vector<16x16xf32>
    %1671 = arith.mulf %1670, %1667 : vector<16x16xf32>
    %1672 = vector.broadcast %1362 : vector<1x1xf32> to vector<16x16xf32>
    %1673 = arith.mulf %1672, %1667 : vector<16x16xf32>
    %1674 = arith.select %1669, %1671, %1673 : vector<16x16xi1>, vector<16x16xf32>
    %1675 = arith.addf %1663, %1674 : vector<16x16xf32>
    %1676 = vector.extract_strided_slice %1268 {offsets = [25, 0], sizes = [1, 16], strides = [1, 1]} : vector<32x16xf32> to vector<1x16xf32>
    %1677 = vector.broadcast %1299 : vector<16x1xf32> to vector<16x16xf32>
    %1678 = vector.broadcast %1676 : vector<1x16xf32> to vector<16x16xf32>
    %1679 = arith.addf %1677, %1678 : vector<16x16xf32>
    %cst_248 = arith.constant 0.000000e+00 : f32
    %1680 = vector.broadcast %cst_248 : f32 to vector<16x16xf32>
    %1681 = arith.cmpf ogt, %1679, %1680 : vector<16x16xf32>
    %1682 = vector.broadcast %1331 : vector<1x1xf32> to vector<16x16xf32>
    %1683 = arith.mulf %1682, %1679 : vector<16x16xf32>
    %1684 = vector.broadcast %1363 : vector<1x1xf32> to vector<16x16xf32>
    %1685 = arith.mulf %1684, %1679 : vector<16x16xf32>
    %1686 = arith.select %1681, %1683, %1685 : vector<16x16xi1>, vector<16x16xf32>
    %1687 = arith.addf %1675, %1686 : vector<16x16xf32>
    %1688 = vector.extract_strided_slice %1268 {offsets = [26, 0], sizes = [1, 16], strides = [1, 1]} : vector<32x16xf32> to vector<1x16xf32>
    %1689 = vector.broadcast %1300 : vector<16x1xf32> to vector<16x16xf32>
    %1690 = vector.broadcast %1688 : vector<1x16xf32> to vector<16x16xf32>
    %1691 = arith.addf %1689, %1690 : vector<16x16xf32>
    %cst_249 = arith.constant 0.000000e+00 : f32
    %1692 = vector.broadcast %cst_249 : f32 to vector<16x16xf32>
    %1693 = arith.cmpf ogt, %1691, %1692 : vector<16x16xf32>
    %1694 = vector.broadcast %1332 : vector<1x1xf32> to vector<16x16xf32>
    %1695 = arith.mulf %1694, %1691 : vector<16x16xf32>
    %1696 = vector.broadcast %1364 : vector<1x1xf32> to vector<16x16xf32>
    %1697 = arith.mulf %1696, %1691 : vector<16x16xf32>
    %1698 = arith.select %1693, %1695, %1697 : vector<16x16xi1>, vector<16x16xf32>
    %1699 = arith.addf %1687, %1698 : vector<16x16xf32>
    %1700 = vector.extract_strided_slice %1268 {offsets = [27, 0], sizes = [1, 16], strides = [1, 1]} : vector<32x16xf32> to vector<1x16xf32>
    %1701 = vector.broadcast %1301 : vector<16x1xf32> to vector<16x16xf32>
    %1702 = vector.broadcast %1700 : vector<1x16xf32> to vector<16x16xf32>
    %1703 = arith.addf %1701, %1702 : vector<16x16xf32>
    %cst_250 = arith.constant 0.000000e+00 : f32
    %1704 = vector.broadcast %cst_250 : f32 to vector<16x16xf32>
    %1705 = arith.cmpf ogt, %1703, %1704 : vector<16x16xf32>
    %1706 = vector.broadcast %1333 : vector<1x1xf32> to vector<16x16xf32>
    %1707 = arith.mulf %1706, %1703 : vector<16x16xf32>
    %1708 = vector.broadcast %1365 : vector<1x1xf32> to vector<16x16xf32>
    %1709 = arith.mulf %1708, %1703 : vector<16x16xf32>
    %1710 = arith.select %1705, %1707, %1709 : vector<16x16xi1>, vector<16x16xf32>
    %1711 = arith.addf %1699, %1710 : vector<16x16xf32>
    %1712 = vector.extract_strided_slice %1268 {offsets = [28, 0], sizes = [1, 16], strides = [1, 1]} : vector<32x16xf32> to vector<1x16xf32>
    %1713 = vector.broadcast %1302 : vector<16x1xf32> to vector<16x16xf32>
    %1714 = vector.broadcast %1712 : vector<1x16xf32> to vector<16x16xf32>
    %1715 = arith.addf %1713, %1714 : vector<16x16xf32>
    %cst_251 = arith.constant 0.000000e+00 : f32
    %1716 = vector.broadcast %cst_251 : f32 to vector<16x16xf32>
    %1717 = arith.cmpf ogt, %1715, %1716 : vector<16x16xf32>
    %1718 = vector.broadcast %1334 : vector<1x1xf32> to vector<16x16xf32>
    %1719 = arith.mulf %1718, %1715 : vector<16x16xf32>
    %1720 = vector.broadcast %1366 : vector<1x1xf32> to vector<16x16xf32>
    %1721 = arith.mulf %1720, %1715 : vector<16x16xf32>
    %1722 = arith.select %1717, %1719, %1721 : vector<16x16xi1>, vector<16x16xf32>
    %1723 = arith.addf %1711, %1722 : vector<16x16xf32>
    %1724 = vector.extract_strided_slice %1268 {offsets = [29, 0], sizes = [1, 16], strides = [1, 1]} : vector<32x16xf32> to vector<1x16xf32>
    %1725 = vector.broadcast %1303 : vector<16x1xf32> to vector<16x16xf32>
    %1726 = vector.broadcast %1724 : vector<1x16xf32> to vector<16x16xf32>
    %1727 = arith.addf %1725, %1726 : vector<16x16xf32>
    %cst_252 = arith.constant 0.000000e+00 : f32
    %1728 = vector.broadcast %cst_252 : f32 to vector<16x16xf32>
    %1729 = arith.cmpf ogt, %1727, %1728 : vector<16x16xf32>
    %1730 = vector.broadcast %1335 : vector<1x1xf32> to vector<16x16xf32>
    %1731 = arith.mulf %1730, %1727 : vector<16x16xf32>
    %1732 = vector.broadcast %1367 : vector<1x1xf32> to vector<16x16xf32>
    %1733 = arith.mulf %1732, %1727 : vector<16x16xf32>
    %1734 = arith.select %1729, %1731, %1733 : vector<16x16xi1>, vector<16x16xf32>
    %1735 = arith.addf %1723, %1734 : vector<16x16xf32>
    %1736 = vector.extract_strided_slice %1268 {offsets = [30, 0], sizes = [1, 16], strides = [1, 1]} : vector<32x16xf32> to vector<1x16xf32>
    %1737 = vector.broadcast %1304 : vector<16x1xf32> to vector<16x16xf32>
    %1738 = vector.broadcast %1736 : vector<1x16xf32> to vector<16x16xf32>
    %1739 = arith.addf %1737, %1738 : vector<16x16xf32>
    %cst_253 = arith.constant 0.000000e+00 : f32
    %1740 = vector.broadcast %cst_253 : f32 to vector<16x16xf32>
    %1741 = arith.cmpf ogt, %1739, %1740 : vector<16x16xf32>
    %1742 = vector.broadcast %1336 : vector<1x1xf32> to vector<16x16xf32>
    %1743 = arith.mulf %1742, %1739 : vector<16x16xf32>
    %1744 = vector.broadcast %1368 : vector<1x1xf32> to vector<16x16xf32>
    %1745 = arith.mulf %1744, %1739 : vector<16x16xf32>
    %1746 = arith.select %1741, %1743, %1745 : vector<16x16xi1>, vector<16x16xf32>
    %1747 = arith.addf %1735, %1746 : vector<16x16xf32>
    %1748 = vector.extract_strided_slice %1268 {offsets = [31, 0], sizes = [1, 16], strides = [1, 1]} : vector<32x16xf32> to vector<1x16xf32>
    %1749 = vector.broadcast %1305 : vector<16x1xf32> to vector<16x16xf32>
    %1750 = vector.broadcast %1748 : vector<1x16xf32> to vector<16x16xf32>
    %1751 = arith.addf %1749, %1750 : vector<16x16xf32>
    %cst_254 = arith.constant 0.000000e+00 : f32
    %1752 = vector.broadcast %cst_254 : f32 to vector<16x16xf32>
    %1753 = arith.cmpf ogt, %1751, %1752 : vector<16x16xf32>
    %1754 = vector.broadcast %1337 : vector<1x1xf32> to vector<16x16xf32>
    %1755 = arith.mulf %1754, %1751 : vector<16x16xf32>
    %1756 = vector.broadcast %1369 : vector<1x1xf32> to vector<16x16xf32>
    %1757 = arith.mulf %1756, %1751 : vector<16x16xf32>
    %1758 = arith.select %1753, %1755, %1757 : vector<16x16xi1>, vector<16x16xf32>
    %1759 = arith.addf %1747, %1758 : vector<16x16xf32>
    %1760 = arith.ori %1258, %39 : vector<16x16xi1>
    %1761 = vector.broadcast %1271 : vector<16x1xi1> to vector<16x16xi1>
    %1762 = arith.andi %1760, %1761 : vector<16x16xi1>
    %1763 = vector.broadcast %1374 : vector<1x16xi1> to vector<16x16xi1>
    %1764 = arith.andi %1762, %1763 : vector<16x16xi1>
    %cst_255 = arith.constant -1.000000e+30 : f32
    %1765 = vector.broadcast %cst_255 : f32 to vector<16x16xf32>
    %1766 = arith.select %1764, %1759, %1765 : vector<16x16xi1>, vector<16x16xf32>
    %cst_256 = arith.constant dense<0xFF800000> : vector<16xf32>
    %1767 = vector.multi_reduction <maximumf>, %1766, %cst_256 [1] : vector<16x16xf32> to vector<16xf32>
    %1768 = vector.shape_cast %1767 : vector<16xf32> to vector<16x1xf32>
    %1769 = arith.maximumf %1370, %1768 : vector<16x1xf32>
    %1770 = arith.subf %1370, %1769 : vector<16x1xf32>
    %1771 = math.exp %1770 : vector<16x1xf32>
    %1772 = vector.broadcast %1769 : vector<16x1xf32> to vector<16x16xf32>
    %1773 = arith.subf %1766, %1772 : vector<16x16xf32>
    %1774 = math.exp %1773 : vector<16x16xf32>
    %cst_257 = arith.constant 0.000000e+00 : f32
    %1775 = vector.broadcast %cst_257 : f32 to vector<16x16xf32>
    %1776 = arith.select %1764, %1774, %1775 : vector<16x16xi1>, vector<16x16xf32>
    %1777 = arith.mulf %1771, %1371 : vector<16x1xf32>
    %cst_258 = arith.constant dense<0.000000e+00> : vector<16xf32>
    %1778 = vector.multi_reduction <add>, %1776, %cst_258 [1] : vector<16x16xf32> to vector<16xf32>
    %1779 = vector.shape_cast %1778 : vector<16xf32> to vector<16x1xf32>
    %1780 = arith.addf %1777, %1779 : vector<16x1xf32>
    %1781 = vector.broadcast %1771 : vector<16x1xf32> to vector<16x32xf32>
    %1782 = arith.mulf %1781, %1372 : vector<16x32xf32>
    %1783 = arith.truncf %1776 : vector<16x16xf32> to vector<16x16xbf16>
    %cst_259 = arith.constant dense<0.000000e+00> : vector<16x32xf32>
    %1784 = tpu.matmul %1783, %1269, %cst_259 {dimension_numbers = #tpu.dot_dimension_numbers<[1], [0], [0], [1], [0, 0, 1, 1], [], []>} : vector<16x16xbf16>, vector<16x32xbf16>, vector<16x32xf32> -> vector<16x32xf32>
    %1785 = arith.addf %1782, %1784 : vector<16x32xf32>
    %cst_260 = arith.constant 9.99999971E-10 : f32
    %1786 = vector.broadcast %cst_260 : f32 to vector<16x1xf32>
    %1787 = arith.maximumf %1780, %1786 : vector<16x1xf32>
    %1788 = tpu.reciprocal %1787 {approx = true} : vector<16x1xf32> -> vector<16x1xf32>
    %1789 = vector.broadcast %1788 : vector<16x1xf32> to vector<16x32xf32>
    %1790 = arith.mulf %1785, %1789 : vector<16x32xf32>
    %1791 = vector.broadcast %21 : vector<1x32xf32> to vector<16x32xf32>
    %1792 = arith.addf %1790, %1791 : vector<16x32xf32>
    %1793 = arith.mulf %22, %22 : vector<32x1xf32>
    %1794 = vector.shape_cast %1793 : vector<32x1xf32> to vector<1x32x1xf32>
    %cst_261 = arith.constant dense<0.000000e+00> : vector<1xf32>
    %1795 = vector.multi_reduction <add>, %1794, %cst_261 [1, 2] : vector<1x32x1xf32> to vector<1xf32>
    %1796 = vector.shape_cast %1795 : vector<1xf32> to vector<1x1x1xf32>
    %1797 = vector.extract %1796[0, 0, 0] : f32 from vector<1x1x1xf32>
    %cst_262 = arith.constant 9.99999996E-13 : f32
    %1798 = arith.maximumf %1797, %cst_262 : f32
    %1799 = math.rsqrt %1798 : f32
    %cst_263 = arith.constant dense<0.000000e+00> : vector<16x1xf32>
    %1800 = tpu.matmul %1792, %22, %cst_263 {dimension_numbers = #tpu.dot_dimension_numbers<[1], [0], [0], [1], [0, 0, 1, 1], [], []>} : vector<16x32xf32>, vector<32x1xf32>, vector<16x1xf32> -> vector<16x1xf32>
    %1801 = vector.broadcast %1799 : f32 to vector<16x1xf32>
    %1802 = arith.mulf %1800, %1801 : vector<16x1xf32>
    %cst_264 = arith.constant 0.000000e+00 : f32
    %1803 = vector.broadcast %cst_264 : f32 to vector<16x1xf32>
    %1804 = arith.subf %1803, %1802 : vector<16x1xf32>
    %1805 = math.exp %1804 : vector<16x1xf32>
    %cst_265 = arith.constant 1.000000e+00 : f32
    %1806 = vector.broadcast %cst_265 : f32 to vector<16x1xf32>
    %1807 = arith.addf %1806, %1805 : vector<16x1xf32>
    %cst_266 = arith.constant 1.000000e+00 : f32
    %1808 = vector.broadcast %cst_266 : f32 to vector<16x1xf32>
    %1809 = arith.divf %1808, %1807 : vector<16x1xf32>
    %cst_267 = arith.constant dense<0.000000e+00> : vector<1x16xf32>
    %1810 = tpu.matmul %23, %1792, %cst_267 {dimension_numbers = #tpu.dot_dimension_numbers<[1], [1], [0], [0], [0, 0, 1, 0], [], []>} : vector<1x32xf32>, vector<16x32xf32>, vector<1x16xf32> -> vector<1x16xf32>
    %1811 = vector.broadcast %1799 : f32 to vector<1x16xf32>
    %1812 = arith.mulf %1810, %1811 : vector<1x16xf32>
    %cst_268 = arith.constant 0.000000e+00 : f32
    %1813 = vector.broadcast %cst_268 : f32 to vector<1x16xf32>
    %1814 = arith.subf %1813, %1812 : vector<1x16xf32>
    %1815 = math.exp %1814 : vector<1x16xf32>
    %cst_269 = arith.constant 1.000000e+00 : f32
    %1816 = vector.broadcast %cst_269 : f32 to vector<1x16xf32>
    %1817 = arith.addf %1816, %1815 : vector<1x16xf32>
    %cst_270 = arith.constant 1.000000e+00 : f32
    %1818 = vector.broadcast %cst_270 : f32 to vector<1x16xf32>
    %1819 = arith.divf %1818, %1817 : vector<1x16xf32>
    %cst_271 = arith.constant dense<0.000000e+00> : vector<2x1xf32>
    %1820 = tpu.matmul %34, %1243, %cst_271 {dimension_numbers = #tpu.dot_dimension_numbers<[1], [0], [0], [1], [0, 0, 1, 1], [], []>} : vector<2x16xf32>, vector<16x1xf32>, vector<2x1xf32> -> vector<2x1xf32>
    %cst_272 = arith.constant 5.000000e-01 : f32
    %1821 = vector.broadcast %cst_272 : f32 to vector<2x1xf32>
    %1822 = arith.mulf %1821, %1820 : vector<2x1xf32>
    %1823 = math.ceil %1822 : vector<2x1xf32>
    %cst_273 = arith.constant dense<0.000000e+00> : vector<16x1xf32>
    %1824 = tpu.matmul %36, %1823, %cst_273 {dimension_numbers = #tpu.dot_dimension_numbers<[1], [0], [0], [1], [0, 0, 1, 1], [], []>} : vector<16x2xf32>, vector<2x1xf32>, vector<16x1xf32> -> vector<16x1xf32>
    %1825 = arith.cmpi ne, %38, %37 : vector<16x16xi32>
    %1826 = vector.broadcast %1819 : vector<1x16xf32> to vector<16x16xf32>
    %1827 = vector.broadcast %1809 : vector<16x1xf32> to vector<16x16xf32>
    %1828 = arith.cmpf ogt, %1826, %1827 : vector<16x16xf32>
    %1829 = vector.broadcast %1819 : vector<1x16xf32> to vector<16x16xf32>
    %1830 = vector.broadcast %1809 : vector<16x1xf32> to vector<16x16xf32>
    %1831 = arith.cmpf oeq, %1829, %1830 : vector<16x16xf32>
    %1832 = arith.cmpi slt, %38, %37 : vector<16x16xi32>
    %1833 = arith.andi %1831, %1832 : vector<16x16xi1>
    %1834 = arith.ori %1828, %1833 : vector<16x16xi1>
    %1835 = arith.andi %1825, %1834 : vector<16x16xi1>
    %cst_274 = arith.constant 1.000000e+00 : f32
    %cst_275 = arith.constant 0.000000e+00 : f32
    %1836 = vector.broadcast %cst_274 : f32 to vector<16x16xf32>
    %1837 = vector.broadcast %cst_275 : f32 to vector<16x16xf32>
    %1838 = arith.select %1835, %1836, %1837 : vector<16x16xi1>, vector<16x16xf32>
    %1839 = vector.broadcast %1243 : vector<16x1xf32> to vector<16x2xf32>
    %1840 = arith.mulf %36, %1839 : vector<16x2xf32>
    %cst_276 = arith.constant dense<0.000000e+00> : vector<16x2xf32>
    %1841 = tpu.matmul %1838, %1840, %cst_276 {dimension_numbers = #tpu.dot_dimension_numbers<[1], [0], [0], [1], [0, 0, 1, 1], [], []>} : vector<16x16xf32>, vector<16x2xf32>, vector<16x2xf32> -> vector<16x2xf32>
    %1842 = arith.mulf %36, %1841 : vector<16x2xf32>
    %cst_277 = arith.constant dense<0.000000e+00> : vector<16xf32>
    %1843 = vector.multi_reduction <add>, %1842, %cst_277 [1] : vector<16x2xf32> to vector<16xf32>
    %1844 = vector.shape_cast %1843 : vector<16xf32> to vector<16x1xf32>
    %cst_278 = arith.constant 0.000000e+00 : f32
    %1845 = vector.broadcast %cst_278 : f32 to vector<16x1xf32>
    %1846 = arith.cmpf ogt, %1243, %1845 : vector<16x1xf32>
    %1847 = arith.cmpf olt, %1844, %1824 : vector<16x1xf32>
    %1848 = arith.andi %1846, %1847 : vector<16x1xi1>
    %cst_279 = arith.constant 1.000000e+00 : f32
    %cst_280 = arith.constant 0.000000e+00 : f32
    %1849 = vector.broadcast %cst_279 : f32 to vector<16x1xf32>
    %1850 = vector.broadcast %cst_280 : f32 to vector<16x1xf32>
    %1851 = arith.select %1848, %1849, %1850 : vector<16x1xi1>, vector<16x1xf32>
    %1852 = vector.broadcast %1851 : vector<16x1xf32> to vector<16x16xf32>
    %1853 = arith.mulf %42, %1852 : vector<16x16xf32>
    %cst_281 = arith.constant dense<0.000000e+00> : vector<16xf32>
    %1854 = vector.multi_reduction <add>, %1853, %cst_281 [0] : vector<16x16xf32> to vector<16xf32>
    %1855 = vector.shape_cast %1854 : vector<16xf32> to vector<1x16xf32>
    %1856 = arith.mulf %1809, %1851 : vector<16x1xf32>
    %1857 = vector.broadcast %1856 : vector<16x1xf32> to vector<16x32xf32>
    %1858 = arith.mulf %1792, %1857 : vector<16x32xf32>
    %cst_282 = arith.constant 0.000000e+00 : f32
    %1859 = vector.broadcast %cst_282 : f32 to vector<16x32xf32>
    %1860 = arith.maximumf %1858, %1859 : vector<16x32xf32>
    %1861 = vector.broadcast %1855 : vector<1x16xf32> to vector<2x16xf32>
    %1862 = arith.mulf %34, %1861 : vector<2x16xf32>
    %cst_283 = arith.constant dense<0.000000e+00> : vector<2x32xf32>
    %1863 = tpu.matmul %1862, %1860, %cst_283 {dimension_numbers = #tpu.dot_dimension_numbers<[1], [0], [0], [1], [0, 0, 1, 1], [], []>} : vector<2x16xf32>, vector<16x32xf32>, vector<2x32xf32> -> vector<2x32xf32>
    %cst_284 = arith.constant dense<0.000000e+00> : vector<2xf32>
    %1864 = vector.multi_reduction <add>, %1862, %cst_284 [1] : vector<2x16xf32> to vector<2xf32>
    %1865 = vector.shape_cast %1864 : vector<2xf32> to vector<2x1xf32>
    %1866 = tpu.reciprocal %1865 {approx = true} : vector<2x1xf32> -> vector<2x1xf32>
    %1867 = vector.broadcast %1866 : vector<2x1xf32> to vector<2x32xf32>
    %1868 = arith.mulf %1863, %1867 : vector<2x32xf32>
    %1869 = tpu.iota {dimensions = array<i32: 0>} : vector<2x1xi32>
    %cst_285 = arith.constant 0.000000e+00 : f32
    %1870 = vector.broadcast %cst_285 : f32 to vector<2x32xf32>
    %1871 = vector.extract_strided_slice %36 {offsets = [0, 0], sizes = [16, 1], strides = [1, 1]} : vector<16x2xf32> to vector<16x1xf32>
    %1872 = arith.mulf %1871, %1851 : vector<16x1xf32>
    %cst_286 = arith.constant 0.000000e+00 : f32
    %1873 = vector.broadcast %cst_286 : f32 to vector<16x1xf32>
    %1874 = arith.cmpf ogt, %1872, %1873 : vector<16x1xf32>
    %cst_287 = arith.constant 0.000000e+00 : f32
    %1875 = vector.shape_cast %1874 : vector<16x1xi1> to vector<16x1xi1>
    %1876 = vector.broadcast %1875 : vector<16x1xi1> to vector<16x32xi1>
    %1877 = vector.broadcast %cst_287 : f32 to vector<16x32xf32>
    %1878 = arith.select %1876, %1860, %1877 : vector<16x32xi1>, vector<16x32xf32>
    %cst_288 = arith.constant dense<0xFF800000> : vector<32xf32>
    %1879 = vector.multi_reduction <maximumf>, %1878, %cst_288 [0] : vector<16x32xf32> to vector<32xf32>
    %1880 = vector.shape_cast %1879 : vector<32xf32> to vector<1x32xf32>
    %c0_i32 = arith.constant 0 : i32
    %1881 = vector.broadcast %c0_i32 : i32 to vector<2x1xi32>
    %1882 = arith.cmpi eq, %1869, %1881 : vector<2x1xi32>
    %cst_289 = arith.constant 1.000000e+00 : f32
    %cst_290 = arith.constant 0.000000e+00 : f32
    %1883 = vector.broadcast %cst_289 : f32 to vector<2x1xf32>
    %1884 = vector.broadcast %cst_290 : f32 to vector<2x1xf32>
    %1885 = arith.select %1882, %1883, %1884 : vector<2x1xi1>, vector<2x1xf32>
    %1886 = vector.broadcast %1885 : vector<2x1xf32> to vector<2x32xf32>
    %1887 = vector.broadcast %1880 : vector<1x32xf32> to vector<2x32xf32>
    %1888 = arith.mulf %1886, %1887 : vector<2x32xf32>
    %1889 = arith.addf %1870, %1888 : vector<2x32xf32>
    %1890 = vector.extract_strided_slice %36 {offsets = [0, 1], sizes = [16, 1], strides = [1, 1]} : vector<16x2xf32> to vector<16x1xf32>
    %1891 = arith.mulf %1890, %1851 : vector<16x1xf32>
    %cst_291 = arith.constant 0.000000e+00 : f32
    %1892 = vector.broadcast %cst_291 : f32 to vector<16x1xf32>
    %1893 = arith.cmpf ogt, %1891, %1892 : vector<16x1xf32>
    %cst_292 = arith.constant 0.000000e+00 : f32
    %1894 = vector.shape_cast %1893 : vector<16x1xi1> to vector<16x1xi1>
    %1895 = vector.broadcast %1894 : vector<16x1xi1> to vector<16x32xi1>
    %1896 = vector.broadcast %cst_292 : f32 to vector<16x32xf32>
    %1897 = arith.select %1895, %1860, %1896 : vector<16x32xi1>, vector<16x32xf32>
    %cst_293 = arith.constant dense<0xFF800000> : vector<32xf32>
    %1898 = vector.multi_reduction <maximumf>, %1897, %cst_293 [0] : vector<16x32xf32> to vector<32xf32>
    %1899 = vector.shape_cast %1898 : vector<32xf32> to vector<1x32xf32>
    %c1_i32 = arith.constant 1 : i32
    %1900 = vector.broadcast %c1_i32 : i32 to vector<2x1xi32>
    %1901 = arith.cmpi eq, %1869, %1900 : vector<2x1xi32>
    %cst_294 = arith.constant 1.000000e+00 : f32
    %cst_295 = arith.constant 0.000000e+00 : f32
    %1902 = vector.broadcast %cst_294 : f32 to vector<2x1xf32>
    %1903 = vector.broadcast %cst_295 : f32 to vector<2x1xf32>
    %1904 = arith.select %1901, %1902, %1903 : vector<2x1xi1>, vector<2x1xf32>
    %1905 = vector.broadcast %1904 : vector<2x1xf32> to vector<2x32xf32>
    %1906 = vector.broadcast %1899 : vector<1x32xf32> to vector<2x32xf32>
    %1907 = arith.mulf %1905, %1906 : vector<2x32xf32>
    %1908 = arith.addf %1889, %1907 : vector<2x32xf32>
    %cst_296 = arith.constant dense<0.000000e+00> : vector<2x1xf32>
    %1909 = tpu.matmul %1908, %24, %cst_296 {dimension_numbers = #tpu.dot_dimension_numbers<[1], [0], [0], [1], [0, 0, 1, 1], [], []>} : vector<2x32xf32>, vector<32x1xf32>, vector<2x1xf32> -> vector<2x1xf32>
    %cst_297 = arith.constant dense<0.000000e+00> : vector<2x1xf32>
    %1910 = tpu.matmul %1868, %25, %cst_297 {dimension_numbers = #tpu.dot_dimension_numbers<[1], [0], [0], [1], [0, 0, 1, 1], [], []>} : vector<2x32xf32>, vector<32x1xf32>, vector<2x1xf32> -> vector<2x1xf32>
    %1911 = arith.addf %1909, %1910 : vector<2x1xf32>
    %1912 = vector.broadcast %26 : vector<1x1xf32> to vector<2x1xf32>
    %1913 = arith.addf %1911, %1912 : vector<2x1xf32>
    %cst_298 = arith.constant 0.000000e+00 : f32
    %1914 = vector.broadcast %cst_298 : f32 to vector<2x1xf32>
    %1915 = arith.subf %1914, %1913 : vector<2x1xf32>
    %1916 = math.exp %1915 : vector<2x1xf32>
    %cst_299 = arith.constant 1.000000e+00 : f32
    %1917 = vector.broadcast %cst_299 : f32 to vector<2x1xf32>
    %1918 = arith.addf %1917, %1916 : vector<2x1xf32>
    %cst_300 = arith.constant 1.000000e+00 : f32
    %1919 = vector.broadcast %cst_300 : f32 to vector<2x1xf32>
    %1920 = arith.divf %1919, %1918 : vector<2x1xf32>
    %c0_301 = arith.constant 0 : index
    %c0_302 = arith.constant 0 : index
    %c0_303 = arith.constant 0 : index
    %1921 = vector.load %arg32[%c0_301, %c0_302, %c0_303] : memref<1x2x1xf32, #tpu.memory_space<vmem>>, vector<1x2x1xf32>
    %1922 = vector.shape_cast %1921 : vector<1x2x1xf32> to vector<2x1xf32>
    %1923 = vector.shape_cast %1920 : vector<2x1xf32> to vector<1x2x1xf32>
    tpu.vector_store %arg32[%c0_301, %c0_302, %c0_303], %1923 {strides = array<i32>} : memref<1x2x1xf32, #tpu.memory_space<vmem>>, vector<1x2x1xf32>,
    %c0_304 = arith.constant 0 : index
    %c0_305 = arith.constant 0 : index
    %c0_306 = arith.constant 0 : index
    %1924 = vector.load %arg33[%c0_304, %c0_305, %c0_306] : memref<1x2x64xf32, #tpu.memory_space<vmem>>, vector<1x2x32xf32>
    %1925 = vector.shape_cast %1924 : vector<1x2x32xf32> to vector<2x32xf32>
    %1926 = vector.shape_cast %1908 : vector<2x32xf32> to vector<1x2x32xf32>
    tpu.vector_store %arg33[%c0_304, %c0_305, %c0_306], %1926 {strides = array<i32>} : memref<1x2x64xf32, #tpu.memory_space<vmem>>, vector<1x2x32xf32>,
    %c0_307 = arith.constant 0 : index
    %c0_308 = arith.constant 0 : index
    %c32 = arith.constant 32 : index
    %1927 = vector.load %arg33[%c0_307, %c0_308, %c32] : memref<1x2x64xf32, #tpu.memory_space<vmem>>, vector<1x2x32xf32>
    %1928 = vector.shape_cast %1927 : vector<1x2x32xf32> to vector<2x32xf32>
    %1929 = vector.shape_cast %1868 : vector<2x32xf32> to vector<1x2x32xf32>
    tpu.vector_store %arg33[%c0_307, %c0_308, %c32], %1929 {strides = array<i32>} : memref<1x2x64xf32, #tpu.memory_space<vmem>>, vector<1x2x32xf32>,
    return
  }
  func.func @transform_0(%arg0: i32) -> (i32, i32, i32) {
    %c0_i32 = arith.constant 0 : i32
    %c0_i32_0 = arith.constant 0 : i32
    %c0_i32_1 = arith.constant 0 : i32
    return %arg0, %c0_i32, %c0_i32_0 : i32, i32, i32
  }
  func.func @transform_1(%arg0: i32) -> (i32, i32, i32) {
    %c0_i32 = arith.constant 0 : i32
    %c0_i32_0 = arith.constant 0 : i32
    %c0_i32_1 = arith.constant 0 : i32
    return %arg0, %c0_i32, %c0_i32_0 : i32, i32, i32
  }
  func.func @transform_2(%arg0: i32) -> (i32, i32, i32) {
    %c0_i32 = arith.constant 0 : i32
    %c0_i32_0 = arith.constant 0 : i32
    %c0_i32_1 = arith.constant 0 : i32
    return %arg0, %c0_i32, %c0_i32_0 : i32, i32, i32
  }
  func.func @transform_3(%arg0: i32) -> (i32, i32, i32) {
    %c0_i32 = arith.constant 0 : i32
    %c0_i32_0 = arith.constant 0 : i32
    %c0_i32_1 = arith.constant 0 : i32
    return %arg0, %c0_i32, %c0_i32_0 : i32, i32, i32
  }
  func.func @transform_4(%arg0: i32) -> (i32, i32) {
    %c0_i32 = arith.constant 0 : i32
    %c0_i32_0 = arith.constant 0 : i32
    %c0_i32_1 = arith.constant 0 : i32
    return %c0_i32, %c0_i32_0 : i32, i32
  }
  func.func @transform_5(%arg0: i32) -> (i32, i32) {
    %c0_i32 = arith.constant 0 : i32
    %c0_i32_0 = arith.constant 0 : i32
    %c0_i32_1 = arith.constant 0 : i32
    return %c0_i32, %c0_i32_0 : i32, i32
  }
  func.func @transform_6(%arg0: i32) -> (i32, i32) {
    %c0_i32 = arith.constant 0 : i32
    %c0_i32_0 = arith.constant 0 : i32
    %c0_i32_1 = arith.constant 0 : i32
    return %c0_i32, %c0_i32_0 : i32, i32
  }
  func.func @transform_7(%arg0: i32) -> (i32, i32) {
    %c0_i32 = arith.constant 0 : i32
    %c0_i32_0 = arith.constant 0 : i32
    %c0_i32_1 = arith.constant 0 : i32
    return %c0_i32, %c0_i32_0 : i32, i32
  }
  func.func @transform_8(%arg0: i32) -> (i32, i32) {
    %c0_i32 = arith.constant 0 : i32
    %c0_i32_0 = arith.constant 0 : i32
    %c0_i32_1 = arith.constant 0 : i32
    return %c0_i32, %c0_i32_0 : i32, i32
  }
  func.func @transform_9(%arg0: i32) -> (i32, i32) {
    %c0_i32 = arith.constant 0 : i32
    %c0_i32_0 = arith.constant 0 : i32
    %c0_i32_1 = arith.constant 0 : i32
    return %c0_i32, %c0_i32_0 : i32, i32
  }
  func.func @transform_10(%arg0: i32) -> (i32, i32) {
    %c0_i32 = arith.constant 0 : i32
    %c0_i32_0 = arith.constant 0 : i32
    %c0_i32_1 = arith.constant 0 : i32
    return %c0_i32, %c0_i32_0 : i32, i32
  }
  func.func @transform_11(%arg0: i32) -> (i32, i32) {
    %c0_i32 = arith.constant 0 : i32
    %c0_i32_0 = arith.constant 0 : i32
    %c0_i32_1 = arith.constant 0 : i32
    return %c0_i32, %c0_i32_0 : i32, i32
  }
  func.func @transform_12(%arg0: i32) -> (i32, i32) {
    %c0_i32 = arith.constant 0 : i32
    %c0_i32_0 = arith.constant 0 : i32
    %c0_i32_1 = arith.constant 0 : i32
    return %c0_i32, %c0_i32_0 : i32, i32
  }
  func.func @transform_13(%arg0: i32) -> (i32, i32) {
    %c0_i32 = arith.constant 0 : i32
    %c0_i32_0 = arith.constant 0 : i32
    %c0_i32_1 = arith.constant 0 : i32
    return %c0_i32, %c0_i32_0 : i32, i32
  }
  func.func @transform_14(%arg0: i32) -> (i32, i32) {
    %c0_i32 = arith.constant 0 : i32
    %c0_i32_0 = arith.constant 0 : i32
    %c0_i32_1 = arith.constant 0 : i32
    return %c0_i32, %c0_i32_0 : i32, i32
  }
  func.func @transform_15(%arg0: i32) -> (i32, i32) {
    %c0_i32 = arith.constant 0 : i32
    %c0_i32_0 = arith.constant 0 : i32
    %c0_i32_1 = arith.constant 0 : i32
    return %c0_i32, %c0_i32_0 : i32, i32
  }
  func.func @transform_16(%arg0: i32) -> (i32, i32) {
    %c0_i32 = arith.constant 0 : i32
    %c0_i32_0 = arith.constant 0 : i32
    %c0_i32_1 = arith.constant 0 : i32
    return %c0_i32, %c0_i32_0 : i32, i32
  }
  func.func @transform_17(%arg0: i32) -> (i32, i32) {
    %c0_i32 = arith.constant 0 : i32
    %c0_i32_0 = arith.constant 0 : i32
    %c0_i32_1 = arith.constant 0 : i32
    return %c0_i32, %c0_i32_0 : i32, i32
  }
  func.func @transform_18(%arg0: i32) -> (i32, i32) {
    %c0_i32 = arith.constant 0 : i32
    %c0_i32_0 = arith.constant 0 : i32
    %c0_i32_1 = arith.constant 0 : i32
    return %c0_i32, %c0_i32_0 : i32, i32
  }
  func.func @transform_19(%arg0: i32) -> (i32, i32) {
    %c0_i32 = arith.constant 0 : i32
    %c0_i32_0 = arith.constant 0 : i32
    %c0_i32_1 = arith.constant 0 : i32
    return %c0_i32, %c0_i32_0 : i32, i32
  }
  func.func @transform_20(%arg0: i32) -> (i32, i32) {
    %c0_i32 = arith.constant 0 : i32
    %c0_i32_0 = arith.constant 0 : i32
    %c0_i32_1 = arith.constant 0 : i32
    return %c0_i32, %c0_i32_0 : i32, i32
  }
  func.func @transform_21(%arg0: i32) -> (i32, i32) {
    %c0_i32 = arith.constant 0 : i32
    %c0_i32_0 = arith.constant 0 : i32
    %c0_i32_1 = arith.constant 0 : i32
    return %c0_i32, %c0_i32_0 : i32, i32
  }
  func.func @transform_22(%arg0: i32) -> (i32, i32) {
    %c0_i32 = arith.constant 0 : i32
    %c0_i32_0 = arith.constant 0 : i32
    %c0_i32_1 = arith.constant 0 : i32
    return %c0_i32, %c0_i32_0 : i32, i32
  }
  func.func @transform_23(%arg0: i32) -> (i32, i32) {
    %c0_i32 = arith.constant 0 : i32
    %c0_i32_0 = arith.constant 0 : i32
    %c0_i32_1 = arith.constant 0 : i32
    return %c0_i32, %c0_i32_0 : i32, i32
  }
  func.func @transform_24(%arg0: i32) -> (i32, i32) {
    %c0_i32 = arith.constant 0 : i32
    %c0_i32_0 = arith.constant 0 : i32
    %c0_i32_1 = arith.constant 0 : i32
    return %c0_i32, %c0_i32_0 : i32, i32
  }
  func.func @transform_25(%arg0: i32) -> (i32, i32) {
    %c0_i32 = arith.constant 0 : i32
    %c0_i32_0 = arith.constant 0 : i32
    %c0_i32_1 = arith.constant 0 : i32
    return %c0_i32, %c0_i32_0 : i32, i32
  }
  func.func @transform_26(%arg0: i32) -> (i32, i32) {
    %c0_i32 = arith.constant 0 : i32
    %c0_i32_0 = arith.constant 0 : i32
    %c0_i32_1 = arith.constant 0 : i32
    return %c0_i32, %c0_i32_0 : i32, i32
  }
  func.func @transform_27(%arg0: i32) -> (i32, i32) {
    %c0_i32 = arith.constant 0 : i32
    %c0_i32_0 = arith.constant 0 : i32
    %c0_i32_1 = arith.constant 0 : i32
    return %c0_i32, %c0_i32_0 : i32, i32
  }
  func.func @transform_28(%arg0: i32) -> (i32, i32) {
    %c0_i32 = arith.constant 0 : i32
    %c0_i32_0 = arith.constant 0 : i32
    %c0_i32_1 = arith.constant 0 : i32
    return %c0_i32, %c0_i32_0 : i32, i32
  }
  func.func @transform_29(%arg0: i32) -> (i32, i32) {
    %c0_i32 = arith.constant 0 : i32
    %c0_i32_0 = arith.constant 0 : i32
    %c0_i32_1 = arith.constant 0 : i32
    return %c0_i32, %c0_i32_0 : i32, i32
  }
  func.func @transform_30(%arg0: i32) -> (i32, i32) {
    %c0_i32 = arith.constant 0 : i32
    %c0_i32_0 = arith.constant 0 : i32
    %c0_i32_1 = arith.constant 0 : i32
    return %c0_i32, %c0_i32_0 : i32, i32
  }
  func.func @transform_31(%arg0: i32) -> (i32, i32, i32) {
    %c0_i32 = arith.constant 0 : i32
    %c0_i32_0 = arith.constant 0 : i32
    %c0_i32_1 = arith.constant 0 : i32
    return %arg0, %c0_i32, %c0_i32_0 : i32, i32, i32
  }
  func.func @transform_32(%arg0: i32) -> (i32, i32, i32) {
    %c0_i32 = arith.constant 0 : i32
    %c0_i32_0 = arith.constant 0 : i32
    %c0_i32_1 = arith.constant 0 : i32
    return %arg0, %c0_i32, %c0_i32_0 : i32, i32, i32
  }
}

</mosaic_0001>

<bundles_post_ra>
// kernel: forward.1
= control target key start
LH: loop header
LB: loop body
LE: loop exit
PB: predicated region body
PF: predicated region fallthrough
CT: control target
= control target key end

     0   :  { %s8215_s6 = smov 1   ;;  %s8216_s10 = smov 2   ;;  %s11522_s0 = inlined_call_operand.smem [shape: u32[33], index: -1, kind: input, shape index: {}] }
   0x1   :  { %s8294_s5 = sld [smem:[%s11522_s0]]   ;;  %s8217_s14 = smov 3  }
   0x2   :  { %s8299_s9 = sld [smem:[%s11522_s0 + %s8215_s6]]   ;;  %s8218_s18 = smov 4  }
   0x3   :  { %s8304_s13 = sld [smem:[%s11522_s0 + %s8216_s10]]   ;;  %s8219_s22 = smov 5  }
   0x4   :  { %s8309_s17 = sld [smem:[%s11522_s0 + %s8217_s14]]   ;;  %s8220_s26 = smov 6  }
   0x5   :  { %s8314_s21 = sld [smem:[%s11522_s0 + %s8218_s18]]   ;;  %s8221_s30 = smov 7  }
   0x6   :  { %s8319_s25 = sld [smem:[%s11522_s0 + %s8219_s22]]   ;;  %s8222_s4 = smov 8  }
   0x7   :  { %11865 = sst [smem:[#allocation6_spill]] %s8294_s5  ;;  %s8223_s10 = smov 9  }
   0x8   :  { %11866 = sst [smem:[#allocation7_spill]] %s8299_s9  ;;  %s8224_s15 = smov 10  }
   0x9   :  { %11867 = sst [smem:[#allocation8_spill]] %s8304_s13  ;;  %s8225_s20 = smov 11  }
   0xa   :  { %s8324_s29 = sld [smem:[%s11522_s0 + %s8220_s26]]   ;;  %s8226_s26 = smov 12  }
   0xb   :  { %s8329_s3 = sld [smem:[%s11522_s0 + %s8221_s30]]   ;;  %s8227_s1 = smov 13  }
   0xc   :  { %s8334_s8 = sld [smem:[%s11522_s0 + %s8222_s4]]   ;;  %s8228_s7 = smov 14  }
   0xd   :  { %s8339_s14 = sld [smem:[%s11522_s0 + %s8223_s10]]   ;;  %s8230_s22 = smov 16  }
   0xe   :  { %s8344_s19 = sld [smem:[%s11522_s0 + %s8224_s15]]   ;;  %s8229_s15 = smov 15  }
   0xf   :  { %s8349_s24 = sld [smem:[%s11522_s0 + %s8225_s20]]   ;;  %s8231_s28 = smov 17  }
  0x10   :  { %s8354_s30 = sld [smem:[%s11522_s0 + %s8226_s26]]   ;;  %s8245_s16 = smov 31  }
  0x11   :  { %11868 = sst [smem:[#allocation9_spill]] %s8329_s3  ;;  %s8246_s23 = smov 32  }
  0x12   :  { %11869 = sst [smem:[#allocation10_spill]] %s8334_s8 }
  0x13   :  { %11870 = sst [smem:[#allocation11_spill]] %s8339_s14 }
  0x14   :  { %s8359_s6 = sld [smem:[%s11522_s0 + %s8227_s1]]  }
  0x15   :  { %s8364_s12 = sld [smem:[%s11522_s0 + %s8228_s7]]   ;;  %s8232_s7 = smov 18  }
  0x16   :  { %s8369_s20 = sld [smem:[%s11522_s0 + %s8229_s15]]   ;;  %s8233_s15 = smov 19  }
  0x17   :  { %s8374_s27 = sld [smem:[%s11522_s0 + %s8230_s22]]   ;;  %s8234_s22 = smov 20  }
  0x18   :  { %s8379_s4 = sld [smem:[%s11522_s0 + %s8231_s28]]   ;;  %s8235_s28 = smov 21  }
  0x1a   :  { %11871 = sst [smem:[#allocation12_spill]] %s8359_s6 }
  0x1b   :  { %11872 = sst [smem:[#allocation13_spill]] %s8364_s12 }
  0x1c   :  { %11873 = sst [smem:[#allocation14_spill]] %s8369_s20 }
  0x1d   :  { %s8384_s12 = sld [smem:[%s11522_s0 + %s8232_s7]]   ;;  %s8236_s7 = smov 22  }
  0x1e   :  { %11874 = sst [smem:[#allocation15_spill]] %s8379_s4 }
  0x1f   :  { %s8389_s20 = sld [smem:[%s11522_s0 + %s8233_s15]]   ;;  %s8237_s15 = smov 23  }
  0x20   :  { %s8394_s6 = sld [smem:[%s11522_s0 + %s8234_s22]]   ;;  %s8238_s22 = smov 24  }
  0x21   :  { %s8399_s4 = sld [smem:[%s11522_s0 + %s8235_s28]]   ;;  %s8239_s28 = smov 25  }
  0x23   :  { %11875 = sst [smem:[#allocation16_spill]] %s8384_s12 }
  0x24   :  { %s8404_s12 = sld [smem:[%s11522_s0 + %s8236_s7]]   ;;  %s8240_s7 = smov 26  }
  0x25   :  { %11876 = sst [smem:[#allocation17_spill]] %s8389_s20 }
  0x26   :  { %11877 = sst [smem:[#allocation18_spill]] %s8394_s6 }
  0x27   :  { %11878 = sst [smem:[#allocation19_spill]] %s8399_s4 }
  0x28   :  { %s8409_s20 = sld [smem:[%s11522_s0 + %s8237_s15]]   ;;  %s8241_s15 = smov 27  }
  0x29   :  { %s8414_s6 = sld [smem:[%s11522_s0 + %s8238_s22]]   ;;  %s8242_s22 = smov 28  }
  0x2a   :  { %11879 = sst [smem:[#allocation20_spill]] %s8404_s12 }
  0x2b   :  { %s8419_s4 = sld [smem:[%s11522_s0 + %s8239_s28]]   ;;  %s8243_s28 = smov 29  }
  0x2c   :  { %s8424_s12 = sld [smem:[%s11522_s0 + %s8240_s7]]   ;;  %s8244_s7 = smov 30  }
  0x2e   :  { %11880 = sst [smem:[#allocation21_spill]] %s8409_s20 }
  0x2f   :  { %11881 = sst [smem:[#allocation22_spill]] %s8414_s6 }
  0x30   :  { %s8429_s20 = sld [smem:[%s11522_s0 + %s8241_s15]]  }
  0x31   :  { %11882 = sst [smem:[#allocation23_spill]] %s8419_s4 }
  0x32   :  { %11883 = sst [smem:[#allocation24_spill]] %s8424_s12 }
  0x33   :  { %s8434_s6 = sld [smem:[%s11522_s0 + %s8242_s22]]  }
  0x34   :  { %s8439_s4 = sld [smem:[%s11522_s0 + %s8243_s28]]  }
  0x35   :  { %s7154_s12 = sld [smem:[%s11522_s0 + %s8244_s7]]  }
  0x36   :  { %11884 = sst [smem:[#allocation25_spill]] %s8429_s20 }
  0x37   :  { %s8447_s20 = sld [smem:[%s11522_s0 + %s8245_s16]]  }
  0x39   :  { %11885 = sst [smem:[#allocation26_spill]] %s8434_s6 }
  0x3a   :  { %11886 = sst [smem:[#allocation27_spill]] %s8439_s4 }
  0x3b   :  { %s8452_s6 = sld [smem:[%s11522_s0 + %s8246_s23]]   ;;  %v71_v0 = vstv %s7154_s12 }
  0x3c   :  { %72 = vst [vmem:[#allocation2] sm:$0x1] %v71_v0 }
  0x3d   :  { %73 = vsyncpa [#allocation4], 0 }
  0x3e   :  { %75 = vsyncpa [#allocation4 + $0x1], 0  ;;  %s8454_s28 = smov 0   ;;  %s8456_s1 = smov 0  }
  0x3f   :  { %s8458_s2 = smov 0   ;;  %s8460_s7 = smov 0  }
  0x40 LB: > { %s11887_s4 = sld [smem:[#allocation27_spill]]  ;;  %s8475_s0 = sadd.s32 4294967295, %s8213_s7   ;;  %s8201_s28 = sphi %s8454_s28, %s12570_s28   ;;  %s8213_s7 = sphi %s8460_s7, %s12573_s7   ;;  %s8209_s2 = sphi %s8458_s2, %s12572_s2   ;;  %s8205_s1 = sphi %s8456_s1, %s12571_s1  }
  0x41   : > { %s7158_s12 = sadd.s32 4294967294, %s8213_s7   ;;  %s8479_s10 = sadd.s32 1, %s8213_s7  }
  0x42   : > { %s785_s11 = sadd.s32 1, %s8209_s2  ;;  %s782_s16 = ssub.s32 %s8213_s7, %s8479_s10 }
  0x43   : > { %p795_p0 = scmp.ne.s32.totalorder %s8209_s2, %s8205_s1  ;;  %p783_p1 = scmp.eq.s32.totalorder %s782_s16, 0 }
  0x44   : > { %p796_p2 = scmp.eq.s32.totalorder %s8475_s0, 1  ;;  %p801_p3 = scmp.ne.s32.totalorder %s8205_s1, %s8201_s28 }
  0x45   : > { %p802_p4 = scmp.eq.s32.totalorder %s7158_s12, 1  ;;  %p7161_p7 = scmp.ge.s32.totalorder %s8213_s7, 1 }
  0x46   : > { %s8490_s15 = scalar_select %p783_p1, %s8209_s2, %s785_s11  }
  0x47   : > { %p8492_p5 = por %p796_p2, %p795_p0  ;;  %p8496_p6 = por %p802_p4, %p801_p3 }
  0x48   : > { %p932_p8 = scmp.lt.s32.totalorder %s8213_s7, 3 }
  0x4a   : > { %p933_p9 = pnand %p7161_p7, %p932_p8 }
  0x4c   : > { %936 = sbr.rel (%p933_p9) target bundleno = 5663 (0x161f), region = 144 }
  0x51   : > { %vm1151_vm0 = vcmask 64512   ;;  %s11890_s8 = sld [smem:[#allocation10_spill]]  ;;  %v11579_v1 = vlaneseq  ;;  %v11577_v2 = vmov 0.0   ;;  %v8051_v3 = vld [vmem:[%s8319_s25 + $0x8] sm:$0xff]   ;;  %vm11765_vm1 = vmmov 0   ;;  %p1032_p10 = scmp.lt.s32.totalorder %s8475_s0, 1 }
  0x52   : > { %7366 = vmatprep.subr.bf16.mxu1 %v11577_v2  ;;  %7358 = vmatprep.subr.bf16.mxu0 %v11577_v2  ;;  %s11892_s5 = sld [smem:[#allocation6_spill]]  ;;  %v1222_v6 = vsel %vm1151_vm0, %v8051_v3, 0  ;;  %v11580_v7 = vmov 0   ;;  %v8053_v9 = vld [vmem:[%s8314_s21 + $0x8] sm:$0xff]   ;;  %v11547_v11 = vmov 1   ;;  %v8052_v12 = vld [vmem:[%s8319_s25] sm:$0xff]  }
  0x53   : > { %7370 = vmatprep.mubr.msk.bf16.mxu1 %vm11765_vm1, %v11577_v2  ;;  %v8510_v5 = vshrl.u32 %v11579_v1, 7  ;;  %7362 = vmatprep.mubr.msk.bf16.mxu0 %vm11765_vm1, %v11577_v2  ;;  %s8518_s22 = scalar_select %p1032_p10, %s8475_s0, 1  ;;  %v1159_v14 = vsel %vm1151_vm0, %v8053_v9, 0  ;;  %v8054_v16 = vld [vmem:[%s8314_s21] sm:$0xff]   ;;  %v1219_v17 = vsel %vm1151_vm0, %v8052_v12, 0  ;;  %v11543_v21 = vmov 3  }
  0x54   : > { %7706 = vset.pattern.permute.xlu1 %v11580_v7  ;;  %7367 = vmatpush3.bf16.xpose.msra.mxu1 %v1222_v6  ;;  %v1156_v20 = vsel %vm1151_vm0, %v8054_v16, 0  ;;  %v11551_v23 = vmov 2   ;;  %v11537_v24 = vmov 5   ;;  %v11533_v26 = vmov 7   ;;  %s11894_s3 = sld [smem:[#allocation9_spill]] }
  0x55   : > { %11891 = vst [vmem:[#allocation28_spill] sm:$0xff] %v8510_v5  ;;  %v8521_v10 = vsub.s32 0, %v8510_v5  ;;  %7707 = vset.pattern.permute.xlu0 %v11547_v11  ;;  %7368 = vmatprep.subr.bf16.mxu1 %v11577_v2  ;;  %s8527_s26 = sshll.u32 %s8518_s22, 4  ;;  %v11529_v27 = vmov 9   ;;  %v11573_v28 = vmov 4   ;;  %v11531_v29 = vmov 11  }
  0x56   : > { %7359 = vmatpush3.bf16.xpose.msra.mxu0 %v1159_v14  ;;  %v11535_v30 = vmov 13   ;;  %v11539_v31 = vmov 15   ;;  %v11571_v32 = vmov 6   ;;  %v11541_v33 = vmov 17   ;;  %v7171_v56 = vld [vmem:[%s8324_s29] ss:$0 sm:$0xff] }
  0x57   : > { %v1066_v4 = vld [vmem:[%s11890_s8] sm:$0x1]  ;;  %11893 = vst [vmem:[#allocation29_spill] sm:$0xff] %v8521_v10  ;;  %7360 = vmatprep.subr.bf16.mxu0 %v11577_v2  ;;  %v11545_v34 = vmov 19   ;;  %v11569_v35 = vmov 8   ;;  %v11549_v36 = vmov 21  }
  0x58   : > { %v1316_v8 = vmul.f32 0.2, %v1066_v4  ;;  %s1036_s12 = scalar_lea.vmem %s11892_s5, %s8527_s26  ;;  %v8536_v15 = vrot.slane %v1066_v4, %v8521_v10  ;;  %v11567_v37 = vmov 10   ;;  %v11563_v38 = vmov 12   ;;  %s12001_s9 = sld [smem:[#allocation7_spill]] }
  0x59   : > { %v1116_v18 = vld [vmem:[%s1036_s12] sm:$0xff]  ;;  %v1117_v19 = vld [vmem:[%s1036_s12 + $0x8] sm:$0xff]  ;;  %v11561_v39 = vmov 14   ;;  %v11559_v40 = vmov 16   ;;  %v11555_v41 = vmov 18   ;;  %v11553_v42 = vmov 20  }
  0x5a   : > { %v8530_v13 = vrot.slane %v1316_v8, %v8521_v10  ;;  %1378 = vperm.xlu0 %7707, %v8536_v15   ;;  %v1134_v22 = vpack.c.bf16 %v1117_v19, %v1116_v18  ;;  %v8645_v51 = vld [vmem:[%s11894_s3] ss:$0 sm:$0xff]  ;;  %s12009_s14 = sld [smem:[#allocation11_spill]]  ;;  %s11641_s12 = smov 1e-12  }
  0x5b   : > { %s12010_s13 = sld [smem:[#allocation8_spill]]  ;;  %s9400_s3 = scalar_lea.vmem %s8309_s17, %s8527_s26 }
  0x5c   : > { %1352 = vperm.xlu1 %7706, %v8530_v13   ;;  %7369 = vmatpush3.bf16.xpose.msra.mxu1 %v1219_v17  ;;  %v1153_v25 = vsel %vm1151_vm0, %v1134_v22, 0  ;;  %s12242_s5 = smov 1e-12  }
  0x5d   : > { %7380 = vmatprep.subr.bf16.mxu1 %v11577_v2 }
  0x5e   : > { %7711 = vset.pattern.permute.xlu0 %v11543_v21  ;;  %7361 = vmatpush3.bf16.xpose.msra.mxu0 %v1156_v20  ;;  %s1041_s11 = scalar_lea.vmem %s12001_s9, %s8527_s26  ;;  %s12243_s9 = sld [smem:[#allocation15_spill]] }
  0x5f   : > { %1448 = vperm.xlu0 %7711, %v8530_v13   ;;  %7582 = vmatprep.subr.msk.bf16.mxu0 %vm1151_vm0, %v1134_v22 }
  0x60   : > { %7708 = vset.pattern.permute.xlu1 %v11547_v11 }
  0x61   : > { %1384 = vperm.xlu1 %7708, %v8530_v13  }
  0x63   : > { %7714 = vset.pattern.permute.xlu0 %v11537_v24  ;;  %7371 = vmatmul.mubr.msk.bf16.vlgmr.msra.gmra.mxu1 %vm1151_vm0, %v1134_v22 }
  0x64   : > { %1512 = vperm.xlu0 %7714, %v8530_v13   ;;  %7382 = vmatprep.mubr.msk.bf16.mxu1 %vm11765_vm1, %v11577_v2 }
  0x65   : > { %7709 = vset.pattern.permute.xlu1 %v11551_v23  ;;  %7363 = vmatmul.mubr.msk.bf16.vlgmr.msra.gmra.mxu0 %vm1151_vm0, %v1134_v22 }
  0x66   : > { %1410 = vperm.xlu1 %7709, %v8536_v15   ;;  %7375 = vmatpush3.bf16.xpose.msra.mxu0 %v1153_v25 }
  0x67   : > { %7376 = vmatprep.mubr.msk.bf16.mxu0 %vm1151_vm0, %v8054_v16 }
  0x68   : > { %7717 = vset.pattern.permute.xlu0 %v11533_v26 }
  0x69   : > { %1576 = vperm.xlu0 %7717, %v8530_v13  }
  0x6a   : > { %1416 = vperm.xlu1 %7709, %v8530_v13  }
  0x6d   : > { %7720 = vset.pattern.permute.xlu0 %v11529_v27  ;;  %7377 = vmatmul.mubr.msk.bf16.vlgmr.msra.gmra.mxu0 %vm1151_vm0, %v8053_v9 }
  0x6e   : > { %7710 = vset.pattern.permute.xlu1 %v11543_v21  ;;  %1640 = vperm.xlu0 %7720, %v8530_v13  }
  0x6f   : > { %1442 = vperm.xlu1 %7710, %v8536_v15  }
  0x72   : > { %7723 = vset.pattern.permute.xlu0 %v11531_v29 }
  0x73   : > { %7712 = vset.pattern.permute.xlu1 %v11573_v28  ;;  %1704 = vperm.xlu0 %7723, %v8530_v13  }
  0x74   : > { %1474 = vperm.xlu1 %7712, %v8536_v15  }
  0x77   : > { %7726 = vset.pattern.permute.xlu0 %v11535_v30 }
  0x78   : > { %1480 = vperm.xlu1 %7712, %v8530_v13   ;;  %1768 = vperm.xlu0 %7726, %v8530_v13  }
  0x7c   : > { %7713 = vset.pattern.permute.xlu1 %v11537_v24  ;;  %7729 = vset.pattern.permute.xlu0 %v11539_v31 }
  0x7d   : > { %1506 = vperm.xlu1 %7713, %v8536_v15   ;;  %1832 = vperm.xlu0 %7729, %v8530_v13  }
  0x81   : > { %7715 = vset.pattern.permute.xlu1 %v11571_v32  ;;  %7732 = vset.pattern.permute.xlu0 %v11541_v33 }
  0x82   : > { %1538 = vperm.xlu1 %7715, %v8536_v15   ;;  %1896 = vperm.xlu0 %7732, %v8530_v13  }
  0x86   : > { %1544 = vperm.xlu1 %7715, %v8530_v13   ;;  %7735 = vset.pattern.permute.xlu0 %v11545_v34 }
  0x87   : > { %1960 = vperm.xlu0 %7735, %v8530_v13  }
  0x8a   : > { %7716 = vset.pattern.permute.xlu1 %v11533_v26 }
  0x8b   : > { %1570 = vperm.xlu1 %7716, %v8536_v15   ;;  %7738 = vset.pattern.permute.xlu0 %v11549_v36 }
  0x8c   : > { %2024 = vperm.xlu0 %7738, %v8530_v13  }
  0x8f   : > { %7718 = vset.pattern.permute.xlu1 %v11569_v35 }
  0x90   : > { %1602 = vperm.xlu1 %7718, %v8536_v15   ;;  %7739 = vset.pattern.permute.xlu0 %v11580_v7 }
  0x91   : > { %1341 = vperm.xlu0 %7739, %v8536_v15  }
  0x94   : > { %1608 = vperm.xlu1 %7718, %v8530_v13  }
  0x98   : > { %7719 = vset.pattern.permute.xlu1 %v11529_v27 }
  0x99   : > { %1634 = vperm.xlu1 %7719, %v8536_v15  }
  0x9d   : > { %7721 = vset.pattern.permute.xlu1 %v11567_v37 }
  0x9e   : > { %1666 = vperm.xlu1 %7721, %v8536_v15  }
  0xa2   : > { %1672 = vperm.xlu1 %7721, %v8530_v13  }
  0xa6   : > { %7722 = vset.pattern.permute.xlu1 %v11531_v29 }
  0xa7   : > { %1698 = vperm.xlu1 %7722, %v8536_v15  }
  0xab   : > { %7724 = vset.pattern.permute.xlu1 %v11563_v38 }
  0xac   : > { %1730 = vperm.xlu1 %7724, %v8536_v15  }
  0xb0   : > { %1736 = vperm.xlu1 %7724, %v8530_v13  }
  0xb4   : > { %7725 = vset.pattern.permute.xlu1 %v11535_v30 }
  0xb5   : > { %1762 = vperm.xlu1 %7725, %v8536_v15  }
  0xb9   : > { %7727 = vset.pattern.permute.xlu1 %v11561_v39 }
  0xba   : > { %1794 = vperm.xlu1 %7727, %v8536_v15  }
  0xbe   : > { %1800 = vperm.xlu1 %7727, %v8530_v13  }
  0xc2   : > { %7728 = vset.pattern.permute.xlu1 %v11539_v31 }
  0xc3   : > { %1826 = vperm.xlu1 %7728, %v8536_v15  }
  0xc7   : > { %7730 = vset.pattern.permute.xlu1 %v11559_v40 }
  0xc8   : > { %1858 = vperm.xlu1 %7730, %v8536_v15  }
  0xcc   : > { %1864 = vperm.xlu1 %7730, %v8530_v13  }
  0xd0   : > { %7731 = vset.pattern.permute.xlu1 %v11541_v33 }
  0xd1   : > { %1890 = vperm.xlu1 %7731, %v8536_v15  }
  0xd5   : > { %7733 = vset.pattern.permute.xlu1 %v11555_v41  ;;  %v8716_v20 = vpop.permute.xlu0 %1378 }
  0xd6   : > { %1922 = vperm.xlu1 %7733, %v8536_v15  }
  0xd7   : > { %v8628_v43 = vpop.permute.xlu1 %1352 }
  0xda   : > { %1928 = vperm.xlu1 %7733, %v8530_v13  }
  0xdc   : > { %v8630_v44 = vpop.permute.xlu1 %1384 }
  0xde   : > { %7734 = vset.pattern.permute.xlu1 %v11545_v34 }
  0xdf   : > { %1954 = vperm.xlu1 %7734, %v8536_v15  }
  0xe1   : > { %v8632_v45 = vpop.permute.xlu1 %1410 }
  0xe3   : > { %7736 = vset.pattern.permute.xlu1 %v11553_v42 }
  0xe4   : > { %1986 = vperm.xlu1 %7736, %v8536_v15  }
  0xe5   : > { %v8634_v46 = vpop.permute.xlu1 %1416 }
  0xe8   : > { %1992 = vperm.xlu1 %7736, %v8530_v13  }
  0xea   : > { %v8636_v47 = vpop.permute.xlu1 %1442 }
  0xec   : > { %7737 = vset.pattern.permute.xlu1 %v11549_v36 }
  0xed   : > { %2018 = vperm.xlu1 %7737, %v8536_v15  }
  0xef   : > { %v8638_v48 = vpop.permute.xlu1 %1474 }
  0xf1   : > { %7740 = vset.pattern.permute.xlu1 %v11547_v11 }
  0xf3   : > { %v8640_v49 = vpop.permute.xlu1 %1480 }
  0xf8   : > { %v8642_v50 = vpop.permute.xlu1 %1506 }
  0xfd   : > { %v8647_v52 = vpop.permute.xlu1 %1538 }
 0x101   : > { %v8655_v59 = vpop.permute.xlu1 %1544 }
 0x106   : > { %v8661_v0 = vpop.permute.xlu1 %1570 }
 0x10b   : > { %v8667_v8 = vpop.permute.xlu1 %1602 }
 0x10f   : > { %v8674_v9 = vpop.permute.xlu1 %1608 }
 0x114   : > { %v8680_v12 = vpop.permute.xlu1 %1634 }
 0x119   : > { %v8686_v14 = vpop.permute.xlu1 %1666 }
 0x11a   : > { %11895 = vst [vmem:[#allocation30_spill] sm:$0xff] %v8686_v14 }
 0x11d   : > { %v8692_v16 = vpop.permute.xlu1 %1672 }
 0x11e   : > { %11896 = vst [vmem:[#allocation31_spill] sm:$0xff] %v8692_v16 }
 0x122   : > { %v8698_v17 = vpop.permute.xlu1 %1698 }
 0x123   : > { %v1258_v53 = vpop.f32.mrf.mxu1  ;;  %11897 = vst [vmem:[#allocation32_spill] sm:$0xff] %v8698_v17 }
 0x124   : > { %v8650_v54 = vadd.f32 %v8645_v51, %v1258_v53  ;;  %v11557_v53 = vmov 22  }
 0x125   : > { %v7372_v55 = vpop.f32.mrf.mxu1  ;;  %v1195_v57 = vpop.f32.mrf.mxu0 }
 0x126   : > { %1362 = vperm.xlu1 %7740, %v8650_v54   ;;  %1319 = vperm.xlu0 %7739, %v8650_v54   ;;  %v1196_v62 = vadd.f32 %v7171_v56, %v1195_v57  ;;  %v8727_v55 = vpop.permute.xlu0 %1448 }
 0x127   : > { %v1261_v58 = vpop.f32.mrf.mxu1  ;;  %v7364_v60 = vpop.f32.mrf.mxu0 }
 0x128   : > { %v8704_v18 = vpop.permute.xlu1 %1730  ;;  %v8719_v22 = vadd.f32 %v8645_v51, %v1261_v58 }
 0x129   : > { %v7373_v61 = vpop.f32.mrf.mxu1  ;;  %v1198_v63 = vpop.f32.mrf.mxu0  ;;  %11898 = vst [vmem:[#allocation33_spill] sm:$0xff] %v8704_v18 }
 0x12a   : > { %7741 = vset.pattern.permute.xlu1 %v11551_v23  ;;  %7742 = vset.pattern.permute.xlu0 %v11543_v21  ;;  %v1199_v3 = vadd.f32 %v7171_v56, %v1198_v63  ;;  %v8735_v51 = vpop.permute.xlu0 %1512 }
 0x12b   : > { %1394 = vperm.xlu1 %7741, %v8650_v54   ;;  %1426 = vperm.xlu0 %7742, %v8650_v54   ;;  %v7365_v4 = vpop.f32.mrf.mxu0 }
 0x12c   : > { %v1314_v6 = vpack.c.bf16 %v1199_v3, %v1196_v62  ;;  %v8712_v19 = vpop.permute.xlu1 %1736 }
 0x12d   : > { %11899 = vst [vmem:[#allocation34_spill] sm:$0xff] %v8712_v19 }
 0x12e   : > { %7381 = vmatpush3.bf16.msra.mxu1 %v1314_v6  ;;  %v8747_v60 = vpop.permute.xlu0 %1576 }
 0x12f   : > { %7743 = vset.pattern.permute.xlu1 %v11573_v28  ;;  %7744 = vset.pattern.permute.xlu0 %v11537_v24 }
 0x130   : > { %1458 = vperm.xlu1 %7743, %v8650_v54   ;;  %1490 = vperm.xlu0 %7744, %v8650_v54   ;;  %v8721_v25 = vpop.permute.xlu1 %1762 }
 0x131   : > { %7397 = vmatprep.subr.mxu1 %v11577_v2  ;;  %11900 = vst [vmem:[#allocation35_spill] sm:$0xff] %v8721_v25  ;;  %v8946_v25 = vsub.s32 2, %v8510_v5 }
 0x132   : > { %v8757_v62 = vpop.permute.xlu0 %1640 }
 0x134   : > { %7745 = vset.pattern.permute.xlu1 %v11571_v32  ;;  %7746 = vset.pattern.permute.xlu0 %v11533_v26 }
 0x135   : > { %1522 = vperm.xlu1 %7745, %v8650_v54   ;;  %1554 = vperm.xlu0 %7746, %v8650_v54   ;;  %v8731_v56 = vpop.permute.xlu1 %1794 }
 0x136   : > { %11901 = vst [vmem:[#allocation36_spill] sm:$0xff] %v8731_v56  ;;  %v8765_v3 = vpop.permute.xlu0 %1704 }
 0x137   : > { %11906 = vst [vmem:[#allocation41_spill] sm:$0xff] %v8765_v3 }
 0x139   : > { %7747 = vset.pattern.permute.xlu1 %v11569_v35  ;;  %7748 = vset.pattern.permute.xlu0 %v11529_v27  ;;  %v8741_v57 = vpop.permute.xlu1 %1800 }
 0x13a   : > { %1586 = vperm.xlu1 %7747, %v8650_v54   ;;  %1618 = vperm.xlu0 %7748, %v8650_v54   ;;  %11902 = vst [vmem:[#allocation37_spill] sm:$0xff] %v8741_v57  ;;  %v8773_v6 = vpop.permute.xlu0 %1768 }
 0x13b   : > { %11908 = vst [vmem:[#allocation43_spill] sm:$0xff] %v8773_v6 }
 0x13e   : > { %7749 = vset.pattern.permute.xlu1 %v11567_v37  ;;  %7750 = vset.pattern.permute.xlu0 %v11531_v29  ;;  %v8745_v58 = vpop.permute.xlu1 %1826 }
 0x13f   : > { %1650 = vperm.xlu1 %7749, %v8650_v54   ;;  %1682 = vperm.xlu0 %7750, %v8650_v54   ;;  %11903 = vst [vmem:[#allocation38_spill] sm:$0xff] %v8745_v58 }
 0x143   : > { %7751 = vset.pattern.permute.xlu1 %v11563_v38  ;;  %7752 = vset.pattern.permute.xlu0 %v11535_v30  ;;  %v8755_v61 = vpop.permute.xlu1 %1858 }
 0x144   : > { %1714 = vperm.xlu1 %7751, %v8650_v54   ;;  %1746 = vperm.xlu0 %7752, %v8650_v54   ;;  %11904 = vst [vmem:[#allocation39_spill] sm:$0xff] %v8755_v61 }
 0x147   : > { %v8763_v63 = vpop.permute.xlu1 %1864 }
 0x148   : > { %7753 = vset.pattern.permute.xlu1 %v11561_v39  ;;  %7754 = vset.pattern.permute.xlu0 %v11539_v31  ;;  %11905 = vst [vmem:[#allocation40_spill] sm:$0xff] %v8763_v63 }
 0x149   : > { %1778 = vperm.xlu1 %7753, %v8650_v54   ;;  %1810 = vperm.xlu0 %7754, %v8650_v54  }
 0x14c   : > { %v8771_v4 = vpop.permute.xlu1 %1890 }
 0x14d   : > { %7755 = vset.pattern.permute.xlu1 %v11559_v40  ;;  %7756 = vset.pattern.permute.xlu0 %v11541_v33  ;;  %11907 = vst [vmem:[#allocation42_spill] sm:$0xff] %v8771_v4 }
 0x14e   : > { %1842 = vperm.xlu1 %7755, %v8650_v54   ;;  %1874 = vperm.xlu0 %7756, %v8650_v54  }
 0x152   : > { %7757 = vset.pattern.permute.xlu1 %v11555_v41  ;;  %7758 = vset.pattern.permute.xlu0 %v11545_v34 }
 0x153   : > { %1906 = vperm.xlu1 %7757, %v8650_v54   ;;  %1938 = vperm.xlu0 %7758, %v8650_v54  }
 0x157   : > { %7759 = vset.pattern.permute.xlu1 %v11553_v42  ;;  %7760 = vset.pattern.permute.xlu0 %v11549_v36 }
 0x158   : > { %1970 = vperm.xlu1 %7759, %v8650_v54   ;;  %2002 = vperm.xlu0 %7760, %v8650_v54  }
 0x15c   : > { %7761 = vset.pattern.permute.xlu1 %v11557_v53  ;;  %7762 = vset.pattern.permute.xlu0 %v11580_v7 }
 0x15d   : > { %2034 = vperm.xlu1 %7761, %v8650_v54   ;;  %1324 = vperm.xlu0 %7762, %v8719_v22  }
 0x161   : > { %7763 = vset.pattern.permute.xlu1 %v11547_v11  ;;  %7764 = vset.pattern.permute.xlu0 %v11551_v23  ;;  %v11565_v11 = vmov 23  }
 0x162   : > { %1366 = vperm.xlu1 %7763, %v8719_v22   ;;  %1398 = vperm.xlu0 %7764, %v8719_v22  }
 0x166   : > { %7765 = vset.pattern.permute.xlu1 %v11543_v21  ;;  %7766 = vset.pattern.permute.xlu0 %v11573_v28 }
 0x167   : > { %1430 = vperm.xlu1 %7765, %v8719_v22   ;;  %1462 = vperm.xlu0 %7766, %v8719_v22  }
 0x16b   : > { %7767 = vset.pattern.permute.xlu1 %v11537_v24  ;;  %7768 = vset.pattern.permute.xlu0 %v11571_v32 }
 0x16c   : > { %1494 = vperm.xlu1 %7767, %v8719_v22   ;;  %1526 = vperm.xlu0 %7768, %v8719_v22  }
 0x170   : > { %7769 = vset.pattern.permute.xlu1 %v11533_v26  ;;  %7770 = vset.pattern.permute.xlu0 %v11569_v35  ;;  %v11582_v35 = vmov 26  }
 0x171   : > { %1558 = vperm.xlu1 %7769, %v8719_v22   ;;  %1590 = vperm.xlu0 %7770, %v8719_v22  }
 0x175   : > { %7771 = vset.pattern.permute.xlu1 %v11529_v27  ;;  %7772 = vset.pattern.permute.xlu0 %v11567_v37  ;;  %v8779_v27 = vpop.permute.xlu1 %1922 }
 0x176   : > { %1622 = vperm.xlu1 %7771, %v8719_v22   ;;  %1654 = vperm.xlu0 %7772, %v8719_v22   ;;  %11909 = vst [vmem:[#allocation44_spill] sm:$0xff] %v8779_v27  ;;  %v11604_v27 = vmov 31  }
 0x179   : > { %v8787_v26 = vpop.permute.xlu1 %1928 }
 0x17a   : > { %7773 = vset.pattern.permute.xlu1 %v11531_v29  ;;  %7774 = vset.pattern.permute.xlu0 %v11563_v38  ;;  %v8781_v29 = vpop.permute.xlu0 %1832  ;;  %11911 = vst [vmem:[#allocation46_spill] sm:$0xff] %v8787_v26  ;;  %v11588_v38 = vmov 25  }
 0x17b   : > { %1686 = vperm.xlu1 %7773, %v8719_v22   ;;  %1718 = vperm.xlu0 %7774, %v8719_v22   ;;  %11910 = vst [vmem:[#allocation45_spill] sm:$0xff] %v8781_v29 }
 0x17d   : > { %v8795_v24 = vpop.permute.xlu1 %1954 }
 0x17e   : > { %11913 = vst [vmem:[#allocation48_spill] sm:$0xff] %v8795_v24 }
 0x17f   : > { %7775 = vset.pattern.permute.xlu1 %v11535_v30  ;;  %7776 = vset.pattern.permute.xlu0 %v11561_v39  ;;  %v8791_v30 = vpop.permute.xlu0 %1896 }
 0x180   : > { %1750 = vperm.xlu1 %7775, %v8719_v22   ;;  %1782 = vperm.xlu0 %7776, %v8719_v22   ;;  %11912 = vst [vmem:[#allocation47_spill] sm:$0xff] %v8791_v30 }
 0x184   : > { %7777 = vset.pattern.permute.xlu1 %v11539_v31  ;;  %7778 = vset.pattern.permute.xlu0 %v11559_v40  ;;  %v8801_v31 = vpop.permute.xlu0 %1960 }
 0x185   : > { %1814 = vperm.xlu1 %7777, %v8719_v22   ;;  %1846 = vperm.xlu0 %7778, %v8719_v22   ;;  %11914 = vst [vmem:[#allocation49_spill] sm:$0xff] %v8801_v31 }
 0x188   : > { %v8809_v21 = vpop.permute.xlu0 %2024 }
 0x189   : > { %7779 = vset.pattern.permute.xlu1 %v11541_v33  ;;  %7780 = vset.pattern.permute.xlu0 %v11555_v41  ;;  %v8803_v33 = vpop.permute.xlu1 %1986  ;;  %11916 = vst [vmem:[#allocation51_spill] sm:$0xff] %v8809_v21  ;;  %v11592_v21 = vmov 28  }
 0x18a   : > { %1878 = vperm.xlu1 %7779, %v8719_v22   ;;  %1910 = vperm.xlu0 %7780, %v8719_v22   ;;  %11915 = vst [vmem:[#allocation50_spill] sm:$0xff] %v8803_v33 }
 0x18c   : > { %v8819_v23 = vpop.permute.xlu0 %1341 }
 0x18e   : > { %7781 = vset.pattern.permute.xlu1 %v11545_v34  ;;  %7782 = vset.pattern.permute.xlu0 %v11553_v42  ;;  %v8811_v34 = vpop.permute.xlu1 %1992 }
 0x18f   : > { %1942 = vperm.xlu1 %7781, %v8719_v22   ;;  %1974 = vperm.xlu0 %7782, %v8719_v22   ;;  %11917 = vst [vmem:[#allocation52_spill] sm:$0xff] %v8811_v34 }
 0x193   : > { %7783 = vset.pattern.permute.xlu1 %v11549_v36  ;;  %7784 = vset.pattern.permute.xlu0 %v11557_v53  ;;  %v8817_v36 = vpop.permute.xlu1 %2018 }
 0x194   : > { %2006 = vperm.xlu1 %7783, %v8719_v22   ;;  %2038 = vperm.xlu0 %7784, %v8719_v22   ;;  %11918 = vst [vmem:[#allocation53_spill] sm:$0xff] %v8817_v36  ;;  %v11921_v36 = vmov 26  }
 0x198   : > { %7785 = vset.pattern.permute.xlu1 %v11557_v53  ;;  %7786 = vset.pattern.permute.xlu0 %v11565_v11  ;;  %v11575_v53 = vmov 24  }
 0x199   : > { %2050 = vperm.xlu1 %7785, %v8536_v15   ;;  %2066 = vperm.xlu0 %7786, %v8650_v54  }
 0x19d   : > { %2056 = vperm.xlu1 %7785, %v8530_v13   ;;  %2088 = vperm.xlu0 %7786, %v8530_v13  }
 0x1a1   : > { %v8823_v42 = vpop.permute.xlu1 %1362  ;;  %v8825_v41 = vpop.permute.xlu0 %1319  ;;  %7787 = vset.pattern.permute.xlu1 %v11565_v11  ;;  %7789 = vset.pattern.permute.xlu0 %v11575_v53 }
 0x1a2   : > { %2070 = vperm.xlu1 %7787, %v8719_v22   ;;  %2102 = vperm.xlu0 %7789, %v8719_v22  }
 0x1a6   : > { %v8831_v40 = vpop.permute.xlu1 %1394  ;;  %v8833_v39 = vpop.permute.xlu0 %1426  ;;  %2082 = vperm.xlu1 %7787, %v8536_v15   ;;  %7790 = vset.pattern.permute.xlu0 %v11588_v38 }
 0x1a7   : > { %2130 = vperm.xlu0 %7790, %v8650_v54  }
 0x1aa   : > { %7788 = vset.pattern.permute.xlu1 %v11575_v53  ;;  %v11585_v53 = vmov 27  }
 0x1ab   : > { %v8839_v11 = vpop.permute.xlu1 %1458  ;;  %v8841_v37 = vpop.permute.xlu0 %1490  ;;  %2098 = vperm.xlu1 %7788, %v8650_v54   ;;  %2152 = vperm.xlu0 %7790, %v8530_v13  }
 0x1af   : > { %2114 = vperm.xlu1 %7788, %v8536_v15   ;;  %7793 = vset.pattern.permute.xlu0 %v11582_v35 }
 0x1b0   : > { %v8847_v32 = vpop.permute.xlu1 %1522  ;;  %2166 = vperm.xlu0 %7793, %v8719_v22   ;;  %v8850_v28 = vpop.permute.xlu0 %1554 }
 0x1b3   : > { %2120 = vperm.xlu1 %7788, %v8530_v13  }
 0x1b4   : > { %7794 = vset.pattern.permute.xlu0 %v11585_v53 }
 0x1b5   : > { %v8854_v2 = vpop.permute.xlu1 %1586  ;;  %2194 = vperm.xlu0 %7794, %v8650_v54   ;;  %v8857_v1 = vpop.permute.xlu0 %1618 }
 0x1b7   : > { %7791 = vset.pattern.permute.xlu1 %v11588_v38  ;;  %v11595_v38 = vmov 29  }
 0x1b8   : > { %2134 = vperm.xlu1 %7791, %v8719_v22  }
 0x1b9   : > { %2216 = vperm.xlu0 %7794, %v8530_v13  }
 0x1ba   : > { %v8862_v7 = vpop.permute.xlu1 %1650  ;;  %v8865_v35 = vpop.permute.xlu0 %1682 }
 0x1bb   : > { %11919 = vst [vmem:[#allocation54_spill] sm:$0xff] %v8865_v35 }
 0x1bc   : > { %2146 = vperm.xlu1 %7791, %v8536_v15  }
 0x1bd   : > { %7797 = vset.pattern.permute.xlu0 %v11592_v21 }
 0x1be   : > { %2230 = vperm.xlu0 %7797, %v8719_v22  }
 0x1bf   : > { %v8869_v53 = vpop.permute.xlu1 %1714  ;;  %v8874_v34 = vpop.permute.xlu0 %1746 }
 0x1c0   : > { %11920 = vst [vmem:[#allocation55_spill] sm:$0xff] %v8869_v53  ;;  %7792 = vset.pattern.permute.xlu1 %v11921_v36  ;;  %11922 = vst [vmem:[#allocation56_spill] sm:$0xff] %v8874_v34  ;;  %v11601_v36 = vmov 30   ;;  %v8965_v34 = vsub.s32 4, %v8510_v5 }
 0x1c1   : > { %2162 = vperm.xlu1 %7792, %v8650_v54  }
 0x1c2   : > { %7798 = vset.pattern.permute.xlu0 %v11595_v38  ;;  %v11926_v38 = vmov 27   ;;  %11944 = vst [vmem:[#allocation72_spill] sm:$0xff] %v8965_v34 }
 0x1c3   : > { %2258 = vperm.xlu0 %7798, %v8650_v54  }
 0x1c4   : > { %v8877_v33 = vpop.permute.xlu1 %1778  ;;  %v8881_v21 = vpop.permute.xlu0 %1810 }
 0x1c5   : > { %11923 = vst [vmem:[#allocation57_spill] sm:$0xff] %v8877_v33  ;;  %2178 = vperm.xlu1 %7792, %v8536_v15   ;;  %11924 = vst [vmem:[#allocation58_spill] sm:$0xff] %v8881_v21  ;;  %v8932_v21 = vpop.f32.mrf.mxu0 }
 0x1c6   : > { %11938 = vst [vmem:[#allocation67_spill] sm:$0xff] %v8932_v21 }
 0x1c7   : > { %2280 = vperm.xlu0 %7798, %v8530_v13   ;;  %v8943_v6 = vpop.f32.mrf.mxu0 }
 0x1c8   : > { %v1404_v33 = vrot.slane %v8943_v6, %v8946_v25  ;;  %v1468_v35 = vrot.slane %v8943_v6, %v8965_v34 }
 0x1c9   : > { %v8883_v31 = vpop.permute.xlu1 %1842  ;;  %2184 = vperm.xlu1 %7792, %v8530_v13   ;;  %v8892_v26 = vpop.permute.xlu0 %1874 }
 0x1ca   : > { %11925 = vst [vmem:[#allocation59_spill] sm:$0xff] %v8883_v31  ;;  %11928 = vst [vmem:[#allocation61_spill] sm:$0xff] %v8892_v26  ;;  %v1405_v17 = vadd.f32 %v1404_v33, %v8831_v40 }
 0x1cb   : > { %7801 = vset.pattern.permute.xlu0 %v11601_v36 }
 0x1cc   : > { %2294 = vperm.xlu0 %7801, %v8719_v22   ;;  %vm1407_vm5 = vcmp.gt.f32.partialorder %v1405_v17, 0.0 }
 0x1cd   : > { %7795 = vset.pattern.permute.xlu1 %v11926_v38  ;;  %v11931_v38 = vmov 28  }
 0x1ce   : > { %v8889_v24 = vpop.permute.xlu1 %1906  ;;  %2198 = vperm.xlu1 %7795, %v8719_v22   ;;  %v8899_v36 = vpop.permute.xlu0 %1938 }
 0x1cf   : > { %11927 = vst [vmem:[#allocation60_spill] sm:$0xff] %v8889_v24  ;;  %11930 = vst [vmem:[#allocation63_spill] sm:$0xff] %v8899_v36  ;;  %v11933_v24 = vmov 0   ;;  %v11935_v36 = vmov 29  }
 0x1d0   : > { %7802 = vset.pattern.permute.xlu0 %v11604_v27 }
 0x1d1   : > { %2322 = vperm.xlu0 %7802, %v8650_v54  }
 0x1d2   : > { %2210 = vperm.xlu1 %7795, %v8536_v15  }
 0x1d3   : > { %v8897_v30 = vpop.permute.xlu1 %1970  ;;  %v8907_v26 = vpop.permute.xlu0 %2002 }
 0x1d4   : > { %11929 = vst [vmem:[#allocation62_spill] sm:$0xff] %v8897_v30  ;;  %11934 = vst [vmem:[#allocation65_spill] sm:$0xff] %v8907_v26 }
 0x1d5   : > { %2344 = vperm.xlu0 %7802, %v8530_v13  }
 0x1d6   : > { %7796 = vset.pattern.permute.xlu1 %v11931_v38 }
 0x1d7   : > { %2226 = vperm.xlu1 %7796, %v8650_v54  }
 0x1d8   : > { %v8904_v4 = vpop.permute.xlu1 %2034  ;;  %v1325_v30 = vpop.permute.xlu0 %1324 }
 0x1d9   : > { %11932 = vst [vmem:[#allocation64_spill] sm:$0xff] %v8904_v4  ;;  %7805 = vset.pattern.permute.xlu0 %v11933_v24  ;;  %v11936_v4 = vmov 30  }
 0x1db   : > { %2242 = vperm.xlu1 %7796, %v8536_v15  }
 0x1dd   : > { %v1367_v27 = vpop.permute.xlu1 %1366  ;;  %v1399_v38 = vpop.permute.xlu0 %1398 }
 0x1de   : > { %v1406_v16 = vadd.f32 %v1404_v33, %v1399_v38  ;;  %v1469_v33 = vadd.f32 %v1468_v35, %v8839_v11 }
 0x1df   : > { %2248 = vperm.xlu1 %7796, %v8530_v13  }
 0x1e0   : > { %vm1408_vm7 = vcmp.gt.f32.partialorder %v1406_v16, 0.0  ;;  %vm1471_vm10 = vcmp.gt.f32.partialorder %v1469_v33, 0.0 }
 0x1e2   : > { %v8911_v63 = vpop.permute.xlu1 %1430  ;;  %v8921_v29 = vpop.permute.xlu0 %1462 }
 0x1e3   : > { %7799 = vset.pattern.permute.xlu1 %v11935_v36 }
 0x1e4   : > { %2262 = vperm.xlu1 %7799, %v8719_v22  }
 0x1e7   : > { %v8915_v61 = vpop.permute.xlu1 %1494  ;;  %v8927_v36 = vpop.permute.xlu0 %1526 }
 0x1e8   : > { %2274 = vperm.xlu1 %7799, %v8536_v15  }
 0x1ec   : > { %7800 = vset.pattern.permute.xlu1 %v11936_v4  ;;  %v8919_v26 = vpop.permute.xlu1 %1558  ;;  %v8934_v57 = vpop.permute.xlu0 %1590  ;;  %v11939_v4 = vmov 31  }
 0x1ed   : > { %2290 = vperm.xlu1 %7800, %v8650_v54   ;;  %v8941_v54 = vsub.s32 1, %v8510_v5 }
 0x1ef   : > { %11941 = vst [vmem:[#allocation69_spill] sm:$0xff] %v8941_v54  ;;  %v1372_v21 = vrot.slane %v8943_v6, %v8941_v54 }
 0x1f1   : > { %2306 = vperm.xlu1 %7800, %v8536_v15   ;;  %v8925_v58 = vpop.permute.xlu1 %1622  ;;  %v1374_v18 = vadd.f32 %v1372_v21, %v1367_v27 }
 0x1f3   : > { %v1388_v40 = vmul.f32 %v8630_v44, %v1374_v18  ;;  %vm1376_vm4 = vcmp.gt.f32.partialorder %v1374_v18, 0.0 }
 0x1f5   : > { %2312 = vperm.xlu1 %7800, %v8530_v13   ;;  %v8949_v13 = vpop.permute.xlu0 %1654 }
 0x1f6   : > { %v8930_v31 = vpop.permute.xlu1 %1686  ;;  %11942 = vst [vmem:[#allocation70_spill] sm:$0xff] %v8949_v13 }
 0x1f7   : > { %11937 = vst [vmem:[#allocation66_spill] sm:$0xff] %v8930_v31 }
 0x1f9   : > { %7803 = vset.pattern.permute.xlu1 %v11939_v4 }
 0x1fa   : > { %2326 = vperm.xlu1 %7803, %v8719_v22   ;;  %v1330_v22 = vrot.slane %v8943_v6, %v8521_v10 }
 0x1fb   : > { %v8938_v56 = vpop.permute.xlu1 %1750 }
 0x1fc   : > { %11940 = vst [vmem:[#allocation68_spill] sm:$0xff] %v8938_v56  ;;  %v8961_v56 = vsub.s32 3, %v8510_v5  ;;  %v1331_v19 = vadd.f32 %v1330_v22, %v8825_v41  ;;  %v1332_v53 = vadd.f32 %v1330_v22, %v1325_v30  ;;  %v1382_v41 = vmul.f32 %v8716_v20, %v1374_v18 }
 0x1fd   : > { %v1419_v30 = vmul.f32 %v8634_v46, %v1405_v17 }
 0x1fe   : > { %2338 = vperm.xlu1 %7803, %v8536_v15   ;;  %v1373_v15 = vadd.f32 %v1372_v21, %v8823_v42  ;;  %v1344_v21 = vmul.f32 %v8819_v23, %v1331_v19  ;;  %v1355_v27 = vmul.f32 %v8628_v43, %v1331_v19  ;;  %vm1333_vm3 = vcmp.gt.f32.partialorder %v1331_v19, 0.0 }
 0x1ff   : > { %v1356_v13 = vmul.f32 %v8628_v43, %v1332_v53  ;;  %vm1334_vm6 = vcmp.gt.f32.partialorder %v1332_v53, 0.0  ;;  %v1390_v18 = vsel %vm1376_vm4, %v1382_v41, %v1388_v40  ;;  %v1414_v43 = vmul.f32 %v8632_v45, %v1406_v16 }
 0x200   : > { %v8953_v4 = vpop.permute.xlu1 %1814  ;;  %vm1375_vm2 = vcmp.gt.f32.partialorder %v1373_v15, 0.0  ;;  %v1381_v31 = vmul.f32 %v8716_v20, %v1373_v15  ;;  %v1387_v42 = vmul.f32 %v8630_v44, %v1373_v15  ;;  %v8993_v44 = vsub.s32 5, %v8510_v5 }
 0x201   : > { %11943 = vst [vmem:[#allocation71_spill] sm:$0xff] %v8953_v4  ;;  %v8968_v4 = vpop.permute.xlu0 %1718  ;;  %v1357_v19 = vsel %vm1333_vm3, %v1344_v21, %v1355_v27  ;;  %v9017_v21 = vpop.f32.mrf.mxu0  ;;  %v1470_v41 = vadd.f32 %v1468_v35, %v8921_v29 }
 0x202   : > { %7804 = vset.pattern.permute.xlu1 %v11933_v24  ;;  %11945 = vst [vmem:[#allocation73_spill] sm:$0xff] %v8968_v4  ;;  %v1436_v24 = vrot.slane %v8943_v6, %v8961_v56  ;;  %v1345_v4 = vmul.f32 %v8819_v23, %v1332_v53  ;;  %v1389_v20 = vsel %vm1375_vm2, %v1381_v31, %v1387_v42  ;;  %11948 = vst [vmem:[#allocation76_spill] sm:$0xff] %v8993_v44 }
 0x203   : > { %v8998_v23 = vsub.s32 6, %v8510_v5  ;;  %v1420_v31 = vmul.f32 %v8634_v46, %v1406_v16  ;;  %v1391_v53 = vadd.f32 %v1389_v20, %v1357_v19  ;;  %v1483_v16 = vmul.f32 %v8640_v49, %v1469_v33 }
 0x204   : > { %v1437_v34 = vadd.f32 %v1436_v24, %v8833_v39  ;;  %v1358_v38 = vsel %vm1334_vm6, %v1345_v4, %v1356_v13  ;;  %v1500_v39 = vrot.slane %v8943_v6, %v8993_v44  ;;  %v1477_v13 = vmul.f32 %v8638_v48, %v1469_v33 }
 0x205   : > { %v8970_v3 = vpop.permute.xlu1 %1878  ;;  %v8989_v14 = vpop.permute.xlu0 %1782  ;;  %11949 = vst [vmem:[#allocation77_spill] sm:$0xff] %v8998_v23  ;;  %v1392_v42 = vadd.f32 %v1390_v18, %v1358_v38  ;;  %v1532_v46 = vrot.slane %v8943_v6, %v8998_v23  ;;  %v1422_v27 = vsel %vm1408_vm7, %v1414_v43, %v1420_v31  ;;  %v1478_v29 = vmul.f32 %v8638_v48, %v1470_v41 }
 0x206   : > { %11946 = vst [vmem:[#allocation74_spill] sm:$0xff] %v8970_v3  ;;  %v1413_v3 = vmul.f32 %v8632_v45, %v1405_v17  ;;  %vm1439_vm8 = vcmp.gt.f32.partialorder %v1437_v34, 0.0  ;;  %v1502_v20 = vadd.f32 %v1500_v39, %v8915_v61  ;;  %v1485_v18 = vsel %vm1471_vm10, %v1477_v13, %v1483_v16  ;;  %v9028_v38 = vpop.f32.mrf.mxu0 }
 0x207   : > { %v1484_v35 = vmul.f32 %v8640_v49, %v1470_v41  ;;  %vm1472_vm11 = vcmp.gt.f32.partialorder %v1470_v41, 0.0  ;;  %v1596_v49 = vrot.slane %v9028_v38, %v8521_v10 }
 0x208   : > { %v1421_v17 = vsel %vm1407_vm5, %v1413_v3, %v1419_v30  ;;  %v1501_v30 = vadd.f32 %v1500_v39, %v8841_v37  ;;  %v1516_v39 = vmul.f32 %v8735_v51, %v1502_v20  ;;  %vm1504_vm13 = vcmp.gt.f32.partialorder %v1502_v20, 0.0 }
 0x209   : > { %v9011_v4 = vpop.permute.xlu0 %1846  ;;  %v1423_v45 = vadd.f32 %v1421_v17, %v1391_v53  ;;  %v1533_v17 = vadd.f32 %v1532_v46, %v8847_v32  ;;  %v1510_v32 = vmul.f32 %v8642_v50, %v1502_v20 }
 0x20a   : > { %v8985_v22 = vpop.permute.xlu1 %1942  ;;  %v1509_v61 = vmul.f32 %v8642_v50, %v1501_v30  ;;  %v1515_v53 = vmul.f32 %v8735_v51, %v1501_v30  ;;  %vm1503_vm12 = vcmp.gt.f32.partialorder %v1501_v30, 0.0 }
 0x20b   : > { %11947 = vst [vmem:[#allocation75_spill] sm:$0xff] %v8985_v22  ;;  %v1438_v22 = vadd.f32 %v1436_v24, %v8911_v63  ;;  %v1445_v24 = vmul.f32 %v8636_v47, %v1437_v34  ;;  %v1451_v63 = vmul.f32 %v8727_v55, %v1437_v34  ;;  %vm1535_vm14 = vcmp.gt.f32.partialorder %v1533_v17, 0.0 }
 0x20d   : > { %v1446_v3 = vmul.f32 %v8636_v47, %v1438_v22  ;;  %v1452_v11 = vmul.f32 %v8727_v55, %v1438_v22  ;;  %vm1440_vm9 = vcmp.gt.f32.partialorder %v1438_v22, 0.0  ;;  %v9021_v47 = vsub.s32 7, %v8510_v5  ;;  %v9032_v33 = vpop.permute.xlu0 %1910 }
 0x20e   : > { %v1424_v55 = vadd.f32 %v1422_v27, %v1392_v42  ;;  %v1453_v34 = vsel %vm1439_vm8, %v1445_v24, %v1451_v63  ;;  %v1547_v42 = vmul.f32 %v8655_v59, %v1533_v17  ;;  %v1486_v24 = vsel %vm1472_vm11, %v1478_v29, %v1484_v35 }
 0x20f   : > { %v9003_v15 = vpop.permute.xlu1 %2006  ;;  %11950 = vst [vmem:[#allocation78_spill] sm:$0xff] %v9021_v47  ;;  %v1454_v22 = vsel %vm1440_vm9, %v1446_v3, %v1452_v11  ;;  %v1455_v19 = vadd.f32 %v1453_v34, %v1423_v45  ;;  %v1564_v43 = vrot.slane %v8943_v6, %v9021_v47  ;;  %v1541_v6 = vmul.f32 %v8647_v52, %v1533_v17 }
 0x210   : > { %v1456_v31 = vadd.f32 %v1454_v22, %v1424_v55  ;;  %v1534_v63 = vadd.f32 %v1532_v46, %v8927_v36  ;;  %v1517_v11 = vsel %vm1503_vm12, %v1509_v61, %v1515_v53  ;;  %v1518_v45 = vsel %vm1504_vm13, %v1510_v32, %v1516_v39 }
 0x211   : > { %v1487_v48 = vadd.f32 %v1485_v18, %v1455_v19  ;;  %v1565_v50 = vadd.f32 %v1564_v43, %v8850_v28  ;;  %v1566_v51 = vadd.f32 %v1564_v43, %v8919_v26  ;;  %v9049_v13 = vpop.permute.xlu0 %1974  ;;  %v1549_v41 = vsel %vm1535_vm14, %v1541_v6, %v1547_v42 }
 0x212   : > { %v1488_v3 = vadd.f32 %v1486_v24, %v1456_v31  ;;  %v1597_v55 = vadd.f32 %v1596_v49, %v8854_v2  ;;  %v1542_v34 = vmul.f32 %v8647_v52, %v1534_v63  ;;  %v1548_v36 = vmul.f32 %v8655_v59, %v1534_v63 }
 0x213   : > { %v1519_v27 = vadd.f32 %v1517_v11, %v1487_v48  ;;  %v1628_v46 = vrot.slane %v9028_v38, %v8941_v54  ;;  %vm1536_vm15 = vcmp.gt.f32.partialorder %v1534_v63, 0.0  ;;  %v1573_v28 = vmul.f32 %v8661_v0, %v1565_v50 }
 0x214   : > { %v9023_v40 = vpop.permute.xlu1 %2050  ;;  %v1520_v30 = vadd.f32 %v1518_v45, %v1488_v3  ;;  %v1579_v26 = vmul.f32 %v8747_v60, %v1565_v50  ;;  %v1574_v22 = vmul.f32 %v8661_v0, %v1566_v51  ;;  %v1580_v20 = vmul.f32 %v8747_v60, %v1566_v51 }
 0x215   : > { %v1551_v2 = vadd.f32 %v1549_v41, %v1519_v27  ;;  %vm1567_vm0 = vcmp.gt.f32.partialorder %v1565_v50, 0.0  ;;  %v1660_v52 = vrot.slane %v9028_v38, %v8946_v25  ;;  %vm1568_vm2 = vcmp.gt.f32.partialorder %v1566_v51, 0.0  ;;  %v9069_v35 = vpop.permute.xlu0 %2038  ;;  %v11952_v50 = vld [vmem:[#allocation30_spill] sm:$0xff]  ;;  %v11953_v51 = vld [vmem:[#allocation31_spill] sm:$0xff] }
 0x216   : > { %v1605_v59 = vmul.f32 %v8667_v8, %v1597_v55  ;;  %v1611_v18 = vmul.f32 %v8674_v9, %v1597_v55  ;;  %v1550_v17 = vsel %vm1536_vm15, %v1542_v34, %v1548_v36  ;;  %v1598_v29 = vadd.f32 %v1596_v49, %v8934_v57  ;;  %v11955_v36 = vld [vmem:[#allocation54_spill] sm:$0xff] }
 0x217   : > { %vm1599_vm3 = vcmp.gt.f32.partialorder %v1597_v55, 0.0  ;;  %v1552_v0 = vadd.f32 %v1550_v17, %v1520_v30  ;;  %v1581_v60 = vsel %vm1567_vm0, %v1573_v28, %v1579_v26  ;;  %v1629_v43 = vadd.f32 %v1628_v46, %v8857_v1  ;;  %v11954_v55 = vld [vmem:[#allocation70_spill] sm:$0xff] }
 0x218   : > { %v9036_v37 = vpop.permute.xlu1 %2056  ;;  %v1582_v31 = vsel %vm1568_vm2, %v1574_v22, %v1580_v20  ;;  %v1630_v61 = vadd.f32 %v1628_v46, %v8925_v58  ;;  %v1583_v53 = vadd.f32 %v1581_v60, %v1551_v2  ;;  %v1613_v39 = vsel %vm1599_vm3, %v1605_v59, %v1611_v18  ;;  %v11956_v28 = vld [vmem:[#allocation66_spill] sm:$0xff]  ;;  %v11957_v59 = vld [vmem:[#allocation55_spill] sm:$0xff] }
 0x219   : > { %v1661_v48 = vadd.f32 %v1660_v52, %v8862_v7  ;;  %v1606_v6 = vmul.f32 %v8667_v8, %v1598_v29  ;;  %v1612_v57 = vmul.f32 %v8674_v9, %v1598_v29  ;;  %v1692_v49 = vrot.slane %v9028_v38, %v8961_v56  ;;  %v9084_v3 = vpop.permute.xlu0 %2066  ;;  %v11951_v8 = vld [vmem:[#allocation72_spill] sm:$0xff] }
 0x21a   : > { %v1584_v42 = vadd.f32 %v1582_v31, %v1552_v0  ;;  %vm1600_vm4 = vcmp.gt.f32.partialorder %v1598_v29, 0.0  ;;  %v1637_v1 = vmul.f32 %v8680_v12, %v1629_v43  ;;  %v1643_v24 = vmul.f32 %v8757_v62, %v1629_v43 }
 0x21b   : > { %v1638_v58 = vmul.f32 %v8680_v12, %v1630_v61  ;;  %v1644_v63 = vmul.f32 %v8757_v62, %v1630_v61  ;;  %v1615_v7 = vadd.f32 %v1613_v39, %v1583_v53  ;;  %vm1631_vm5 = vcmp.gt.f32.partialorder %v1629_v43, 0.0  ;;  %v11958_v43 = vld [vmem:[#allocation32_spill] sm:$0xff] }
 0x21c   : > { %v1724_v9 = vrot.slane %v9028_v38, %v11951_v8  ;;  %vm1632_vm6 = vcmp.gt.f32.partialorder %v1630_v61, 0.0  ;;  %v1669_v45 = vmul.f32 %v11952_v50, %v1661_v48  ;;  %v1675_v27 = vmul.f32 %v11953_v51, %v1661_v48  ;;  %v11959_v61 = vld [vmem:[#allocation41_spill] sm:$0xff] }
 0x21d   : > { %v9051_v16 = vpop.permute.xlu1 %2070  ;;  %v1614_v41 = vsel %vm1600_vm4, %v1606_v6, %v1612_v57  ;;  %v1662_v34 = vadd.f32 %v1660_v52, %v11954_v55  ;;  %vm1663_vm7 = vcmp.gt.f32.partialorder %v1661_v48, 0.0  ;;  %v1645_v62 = vsel %vm1631_vm5, %v1637_v1, %v1643_v24  ;;  %v9100_v0 = vpop.permute.xlu0 %2088  ;;  %v11961_v1 = vld [vmem:[#allocation34_spill] sm:$0xff] }
 0x21e   : > { %v1616_v12 = vadd.f32 %v1614_v41, %v1584_v42  ;;  %v1693_v46 = vadd.f32 %v1692_v49, %v11955_v36  ;;  %v1646_v30 = vsel %vm1632_vm6, %v1638_v58, %v1644_v63  ;;  %v1694_v26 = vadd.f32 %v1692_v49, %v11956_v28  ;;  %v11960_v49 = vld [vmem:[#allocation33_spill] sm:$0xff] }
 0x21f   : > { %v1647_v22 = vadd.f32 %v1645_v62, %v1615_v7  ;;  %v1677_v2 = vsel %vm1663_vm7, %v1669_v45, %v1675_v27  ;;  %v1725_v18 = vadd.f32 %v1724_v9, %v11957_v59  ;;  %v1670_v17 = vmul.f32 %v11952_v50, %v1662_v34  ;;  %v11962_v63 = vld [vmem:[#allocation73_spill] sm:$0xff]  ;;  %v11963_v27 = vld [vmem:[#allocation56_spill] sm:$0xff] }
 0x220   : > { %v1676_v29 = vmul.f32 %v11953_v51, %v1662_v34  ;;  %v1756_v52 = vrot.slane %v9028_v38, %v8993_v44  ;;  %v1648_v60 = vadd.f32 %v1646_v30, %v1616_v12  ;;  %vm1664_vm8 = vcmp.gt.f32.partialorder %v1662_v34, 0.0  ;;  %v11964_v34 = vld [vmem:[#allocation68_spill] sm:$0xff]  ;;  %v11965_v30 = vld [vmem:[#allocation57_spill] sm:$0xff] }
 0x221   : > { %v9062_v19 = vpop.permute.xlu1 %2082  ;;  %v1701_v31 = vmul.f32 %v11958_v43, %v1693_v46  ;;  %v1707_v53 = vmul.f32 %v11959_v61, %v1693_v46  ;;  %v1702_v39 = vmul.f32 %v11958_v43, %v1694_v26  ;;  %v1708_v48 = vmul.f32 %v11959_v61, %v1694_v26  ;;  %v9117_v62 = vpop.permute.xlu0 %2102  ;;  %v11968_v61 = vld [vmem:[#allocation67_spill] sm:$0xff] }
 0x222   : > { %v1679_v6 = vadd.f32 %v1677_v2, %v1647_v22  ;;  %vm1695_vm9 = vcmp.gt.f32.partialorder %v1693_v46, 0.0  ;;  %v1788_v57 = vrot.slane %v9028_v38, %v8998_v23  ;;  %vm1696_vm10 = vcmp.gt.f32.partialorder %v1694_v26, 0.0 }
 0x223   : > { %v1733_v42 = vmul.f32 %v11960_v49, %v1725_v18  ;;  %v1739_v24 = vmul.f32 %v11961_v1, %v1725_v18  ;;  %v1678_v58 = vsel %vm1664_vm8, %v1670_v17, %v1676_v29  ;;  %v1726_v7 = vadd.f32 %v1724_v9, %v11962_v63  ;;  %v11967_v29 = vld [vmem:[#allocation43_spill] sm:$0xff] }
 0x224   : > { %vm1727_vm11 = vcmp.gt.f32.partialorder %v1725_v18, 0.0  ;;  %v1680_v45 = vadd.f32 %v1678_v58, %v1648_v60  ;;  %v1709_v51 = vsel %vm1695_vm9, %v1701_v31, %v1707_v53  ;;  %v1757_v41 = vadd.f32 %v1756_v52, %v11963_v27  ;;  %v11966_v18 = vld [vmem:[#allocation35_spill] sm:$0xff] }
 0x225   : > { %v1710_v55 = vsel %vm1696_vm10, %v1702_v39, %v1708_v48  ;;  %v1758_v12 = vadd.f32 %v1756_v52, %v11964_v34  ;;  %v1711_v36 = vadd.f32 %v1709_v51, %v1679_v6  ;;  %v1741_v46 = vsel %vm1727_vm11, %v1733_v42, %v1739_v24  ;;  %v11969_v39 = vld [vmem:[#allocation36_spill] sm:$0xff]  ;;  %v11970_v6 = vld [vmem:[#allocation37_spill] sm:$0xff]  ;;  %v11972_v27 = vld [vmem:[#allocation71_spill] sm:$0xff] }
 0x226   : > { %v9073_v32 = vpop.permute.xlu1 %2098  ;;  %v1789_v28 = vadd.f32 %v1788_v57, %v11965_v30  ;;  %v1734_v26 = vmul.f32 %v11960_v49, %v1726_v7  ;;  %v1740_v9 = vmul.f32 %v11961_v1, %v1726_v7  ;;  %v1820_v2 = vrot.slane %v9028_v38, %v9021_v47  ;;  %v9135_v1 = vpop.permute.xlu0 %2130 }
 0x227   : > { %v1712_v59 = vadd.f32 %v1710_v55, %v1680_v45  ;;  %vm1728_vm12 = vcmp.gt.f32.partialorder %v1726_v7, 0.0  ;;  %v1765_v17 = vmul.f32 %v11966_v18, %v1757_v41  ;;  %v1771_v52 = vmul.f32 %v11967_v29, %v1757_v41  ;;  %v11971_v7 = vld [vmem:[#allocation58_spill] sm:$0xff] }
 0x228   : > { %v1766_v60 = vmul.f32 %v11966_v18, %v1758_v12  ;;  %v1772_v43 = vmul.f32 %v11967_v29, %v1758_v12  ;;  %v1743_v31 = vadd.f32 %v1741_v46, %v1711_v36  ;;  %vm1759_vm13 = vcmp.gt.f32.partialorder %v1757_v41, 0.0 }
 0x229   : > { %v1852_v53 = vrot.slane %v11968_v61, %v8521_v10  ;;  %vm1760_vm14 = vcmp.gt.f32.partialorder %v1758_v12, 0.0  ;;  %v1797_v48 = vmul.f32 %v11969_v39, %v1789_v28  ;;  %v1803_v38 = vmul.f32 %v11970_v6, %v1789_v28  ;;  %v11973_v12 = vld [vmem:[#allocation59_spill] sm:$0xff] }
 0x22a   : > { %v9088_v11 = vpop.permute.xlu1 %2114  ;;  %v1742_v49 = vsel %vm1728_vm12, %v1734_v26, %v1740_v9  ;;  %v1790_v42 = vadd.f32 %v1788_v57, %v8989_v14  ;;  %vm1791_vm15 = vcmp.gt.f32.partialorder %v1789_v28, 0.0  ;;  %v1773_v63 = vsel %vm1759_vm13, %v1765_v17, %v1771_v52  ;;  %v11975_v26 = vld [vmem:[#allocation38_spill] sm:$0xff]  ;;  %v9152_v29 = vpop.permute.xlu0 %2152 }
 0x22b   : > { %v1744_v24 = vadd.f32 %v1742_v49, %v1712_v59  ;;  %v1821_v45 = vadd.f32 %v1820_v2, %v11971_v7  ;;  %v1774_v51 = vsel %vm1760_vm14, %v1766_v60, %v1772_v43  ;;  %v1822_v41 = vadd.f32 %v1820_v2, %v11972_v27  ;;  %v11976_v59 = vld [vmem:[#allocation45_spill] sm:$0xff]  ;;  %v11977_v43 = vld [vmem:[#allocation39_spill] sm:$0xff] }
 0x22c   : > { %v1775_v55 = vadd.f32 %v1773_v63, %v1743_v31  ;;  %v1805_v34 = vsel %vm1791_vm15, %v1797_v48, %v1803_v38  ;;  %v1853_v36 = vadd.f32 %v1852_v53, %v11973_v12  ;;  %v1798_v46 = vmul.f32 %v11969_v39, %v1790_v42  ;;  %v11978_v39 = vld [vmem:[#allocation40_spill] sm:$0xff]  ;;  %v11979_v63 = vld [vmem:[#allocation61_spill] sm:$0xff] }
 0x22d   : > { %v1804_v14 = vmul.f32 %v11970_v6, %v1790_v42  ;;  %v1884_v57 = vrot.slane %v11968_v61, %v8941_v54  ;;  %v1776_v30 = vadd.f32 %v1774_v51, %v1744_v24  ;;  %vm1792_vm0 = vcmp.gt.f32.partialorder %v1790_v42, 0.0 }
 0x22e   : > { %v9095_v20 = vpop.permute.xlu1 %2120  ;;  %v1829_v9 = vmul.f32 %v11975_v26, %v1821_v45  ;;  %v1835_v18 = vmul.f32 %v11976_v59, %v1821_v45  ;;  %v1830_v2 = vmul.f32 %v11975_v26, %v1822_v41  ;;  %v1836_v17 = vmul.f32 %v11976_v59, %v1822_v41 }
 0x22f   : > { %v1807_v52 = vadd.f32 %v1805_v34, %v1775_v55  ;;  %vm1823_vm2 = vcmp.gt.f32.partialorder %v1821_v45, 0.0  ;;  %v1916_v60 = vrot.slane %v11968_v61, %v8946_v25  ;;  %vm1824_vm3 = vcmp.gt.f32.partialorder %v1822_v41, 0.0  ;;  %v11980_v45 = vld [vmem:[#allocation74_spill] sm:$0xff]  ;;  %v11981_v41 = vld [vmem:[#allocation60_spill] sm:$0xff] }
 0x230   : > { %v1861_v31 = vmul.f32 %v11977_v43, %v1853_v36  ;;  %v1867_v48 = vmul.f32 %v11978_v39, %v1853_v36  ;;  %v1806_v6 = vsel %vm1792_vm0, %v1798_v46, %v1804_v14  ;;  %v1854_v38 = vadd.f32 %v1852_v53, %v9011_v4  ;;  %v9166_v14 = vpop.permute.xlu0 %2166 }
 0x231   : > { %vm1855_vm4 = vcmp.gt.f32.partialorder %v1853_v36, 0.0  ;;  %v1808_v49 = vadd.f32 %v1806_v6, %v1776_v30  ;;  %v1837_v24 = vsel %vm1823_vm2, %v1829_v9, %v1835_v18  ;;  %v1885_v7 = vadd.f32 %v1884_v57, %v11979_v63  ;;  %v11982_v36 = vld [vmem:[#allocation42_spill] sm:$0xff]  ;;  %v11983_v9 = vld [vmem:[#allocation47_spill] sm:$0xff] }
 0x232   : > { %v1838_v51 = vsel %vm1824_vm3, %v1830_v2, %v1836_v17  ;;  %v1886_v27 = vadd.f32 %v1884_v57, %v11980_v45  ;;  %v1839_v55 = vadd.f32 %v1837_v24, %v1807_v52  ;;  %v1869_v34 = vsel %vm1855_vm4, %v1861_v31, %v1867_v48  ;;  %v11986_v63 = vld [vmem:[#allocation63_spill] sm:$0xff] }
 0x233   : > { %v9113_v50 = vpop.permute.xlu1 %2134  ;;  %v1917_v12 = vadd.f32 %v1916_v60, %v11981_v41  ;;  %v1862_v26 = vmul.f32 %v11977_v43, %v1854_v38  ;;  %v1868_v46 = vmul.f32 %v11978_v39, %v1854_v38  ;;  %v1948_v4 = vrot.slane %v11968_v61, %v8961_v56  ;;  %v11984_v43 = vld [vmem:[#allocation44_spill] sm:$0xff]  ;;  %v11985_v39 = vld [vmem:[#allocation46_spill] sm:$0xff]  ;;  %v11987_v41 = vld [vmem:[#allocation75_spill] sm:$0xff] }
 0x234   : > { %v1840_v53 = vadd.f32 %v1838_v51, %v1808_v49  ;;  %vm1856_vm5 = vcmp.gt.f32.partialorder %v1854_v38, 0.0  ;;  %v1893_v30 = vmul.f32 %v11982_v36, %v1885_v7  ;;  %v1899_v59 = vmul.f32 %v11983_v9, %v1885_v7 }
 0x235   : > { %v1894_v57 = vmul.f32 %v11982_v36, %v1886_v27  ;;  %v1900_v18 = vmul.f32 %v11983_v9, %v1886_v27  ;;  %v1871_v17 = vadd.f32 %v1869_v34, %v1839_v55  ;;  %vm1887_vm6 = vcmp.gt.f32.partialorder %v1885_v7, 0.0  ;;  %v9183_v7 = vpop.permute.xlu0 %2194  ;;  %v11988_v9 = vld [vmem:[#allocation62_spill] sm:$0xff] }
 0x236   : > { %v1980_v52 = vrot.slane %v11968_v61, %v11951_v8  ;;  %vm1888_vm7 = vcmp.gt.f32.partialorder %v1886_v27, 0.0  ;;  %v1925_v31 = vmul.f32 %v11984_v43, %v1917_v12  ;;  %v1931_v48 = vmul.f32 %v11985_v39, %v1917_v12 }
 0x237   : > { %v9122_v22 = vpop.permute.xlu1 %2146  ;;  %v1870_v6 = vsel %vm1856_vm5, %v1862_v26, %v1868_v46  ;;  %v1918_v38 = vadd.f32 %v1916_v60, %v9032_v33  ;;  %vm1919_vm8 = vcmp.gt.f32.partialorder %v1917_v12, 0.0  ;;  %v1901_v24 = vsel %vm1887_vm6, %v1893_v30, %v1899_v59  ;;  %v11989_v46 = vld [vmem:[#allocation48_spill] sm:$0xff] }
 0x238   : > { %v1872_v49 = vadd.f32 %v1870_v6, %v1840_v53  ;;  %v1949_v51 = vadd.f32 %v1948_v4, %v11986_v63  ;;  %v1902_v45 = vsel %vm1888_vm7, %v1894_v57, %v1900_v18  ;;  %v1950_v55 = vadd.f32 %v1948_v4, %v11987_v41  ;;  %v11990_v4 = vld [vmem:[#allocation49_spill] sm:$0xff] }
 0x239   : > { %v1903_v27 = vadd.f32 %v1901_v24, %v1871_v17  ;;  %v1933_v36 = vsel %vm1919_vm8, %v1925_v31, %v1931_v48  ;;  %v1926_v26 = vmul.f32 %v11984_v43, %v1918_v38  ;;  %v1932_v33 = vmul.f32 %v11985_v39, %v1918_v38  ;;  %v11991_v43 = vld [vmem:[#allocation50_spill] sm:$0xff]  ;;  %v11992_v39 = vld [vmem:[#allocation52_spill] sm:$0xff]  ;;  %v11993_v24 = vld [vmem:[#allocation65_spill] sm:$0xff] }
 0x23a   : > { %v2012_v60 = vrot.slane %v11968_v61, %v8993_v44  ;;  %v1904_v12 = vadd.f32 %v1902_v45, %v1872_v49  ;;  %vm1920_vm9 = vcmp.gt.f32.partialorder %v1918_v38, 0.0  ;;  %v1957_v53 = vmul.f32 %v11989_v46, %v1949_v51  ;;  %v9201_v49 = vpop.permute.xlu0 %2216 }
 0x23b   : > { %v1963_v30 = vmul.f32 %v11990_v4, %v1949_v51  ;;  %v1958_v59 = vmul.f32 %v11989_v46, %v1950_v55  ;;  %v1964_v57 = vmul.f32 %v11990_v4, %v1950_v55  ;;  %v1935_v18 = vadd.f32 %v1933_v36, %v1903_v27 }
 0x23c   : > { %v9137_v58 = vpop.permute.xlu1 %2162  ;;  %vm1951_vm10 = vcmp.gt.f32.partialorder %v1949_v51, 0.0  ;;  %vm1952_vm11 = vcmp.gt.f32.partialorder %v1950_v55, 0.0  ;;  %v1934_v6 = vsel %vm1920_vm9, %v1926_v26, %v1932_v33  ;;  %v1982_v38 = vadd.f32 %v1980_v52, %v9049_v13 }
 0x23d   : > { %v2013_v63 = vadd.f32 %v2012_v60, %v11993_v24  ;;  %v1936_v45 = vadd.f32 %v1934_v6, %v1904_v12  ;;  %v1965_v41 = vsel %vm1951_vm10, %v1957_v53, %v1963_v30  ;;  %v2014_v51 = vadd.f32 %v2012_v60, %v9003_v15  ;;  %v11994_v12 = vld [vmem:[#allocation53_spill] sm:$0xff]  ;;  %v11995_v15 = vld [vmem:[#allocation51_spill] sm:$0xff] }
 0x23e   : > { %v1967_v55 = vadd.f32 %v1965_v41, %v1935_v18  ;;  %v2044_v27 = vrot.slane %v11968_v61, %v8998_v23  ;;  %v2076_v36 = vrot.slane %v11968_v61, %v9021_v47  ;;  %v2108_v33 = vrot.slane %v9017_v21, %v8521_v10  ;;  %v11996_v18 = vld [vmem:[#allocation64_spill] sm:$0xff] }
 0x23f   : > { %v2021_v46 = vmul.f32 %v11994_v12, %v2013_v63  ;;  %v2027_v60 = vmul.f32 %v11995_v15, %v2013_v63  ;;  %vm1984_vm13 = vcmp.gt.f32.partialorder %v1982_v38, 0.0  ;;  %vm2015_vm14 = vcmp.gt.f32.partialorder %v2013_v63, 0.0 }
 0x240   : > { %v9146_v28 = vpop.permute.xlu1 %2178  ;;  %v2022_v4 = vmul.f32 %v11994_v12, %v2014_v51  ;;  %v2028_v61 = vmul.f32 %v11995_v15, %v2014_v51  ;;  %v2140_v30 = vrot.slane %v9017_v21, %v8941_v54  ;;  %vm2016_vm15 = vcmp.gt.f32.partialorder %v2014_v51, 0.0 }
 0x241   : > { %11974 = vst [vmem:[#allocation72_spill] sm:$0xff] %v9146_v28  ;;  %v1981_v28 = vadd.f32 %v1980_v52, %v11988_v9  ;;  %v1966_v9 = vsel %vm1952_vm11, %v1958_v59, %v1964_v57  ;;  %v1990_v52 = vmul.f32 %v11991_v43, %v1982_v38  ;;  %v9221_v59 = vpop.permute.xlu0 %2230  ;;  %v2046_v6 = vadd.f32 %v2044_v27, %v9069_v35 }
 0x242   : > { %v1968_v53 = vadd.f32 %v1966_v9, %v1936_v45  ;;  %v9237_v24 = vrot.slane %v9017_v21, %v11951_v8  ;;  %v2029_v63 = vsel %vm2015_vm14, %v2021_v46, %v2027_v60  ;;  %v9241_v41 = vrot.slane %v9017_v21, %v8993_v44 }
 0x243   : > { %v1989_v31 = vmul.f32 %v11991_v43, %v1981_v28  ;;  %v1995_v48 = vmul.f32 %v11992_v39, %v1981_v28  ;;  %vm1983_vm12 = vcmp.gt.f32.partialorder %v1981_v28, 0.0  ;;  %v1996_v28 = vmul.f32 %v11992_v39, %v1982_v38 }
 0x244   : > { %v9159_v42 = vpop.permute.xlu1 %2184  ;;  %v2045_v43 = vadd.f32 %v2044_v27, %v11996_v18  ;;  %v9233_v38 = vrot.slane %v9017_v21, %v8961_v56  ;;  %v9245_v9 = vrot.slane %v9017_v21, %v8998_v23  ;;  %v2030_v51 = vsel %vm2016_vm15, %v2022_v4, %v2028_v61 }
 0x245   : > { %v1997_v13 = vsel %vm1983_vm12, %v1989_v31, %v1995_v48  ;;  %v9226_v31 = vrot.slane %v9017_v21, %v8946_v25  ;;  %v1998_v48 = vsel %vm1984_vm13, %v1990_v52, %v1996_v28  ;;  %v2077_v35 = vadd.f32 %v2076_v36, %v9084_v3  ;;  %v2259_v60 = vpop.permute.xlu0 %2258 }
 0x246   : > { %v1999_v57 = vadd.f32 %v1997_v13, %v1967_v55  ;;  %v2000_v45 = vadd.f32 %v1998_v48, %v1968_v53  ;;  %v2059_v55 = vmul.f32 %v9036_v37, %v2045_v43  ;;  %v2060_v27 = vmul.f32 %v9036_v37, %v2046_v6 }
 0x247   : > { %vm2047_vm0 = vcmp.gt.f32.partialorder %v2045_v43, 0.0  ;;  %v2078_v52 = vadd.f32 %v2076_v36, %v9051_v16  ;;  %v9253_v28 = vrot.slane %v9017_v21, %v9021_v47  ;;  %v2053_v12 = vmul.f32 %v9023_v40, %v2045_v43 }
 0x248   : > { %v2031_v13 = vadd.f32 %v2029_v63, %v1999_v57  ;;  %v2054_v46 = vmul.f32 %v9023_v40, %v2046_v6  ;;  %v2085_v15 = vmul.f32 %v9062_v19, %v2077_v35  ;;  %v9261_v53 = vadd.s32 8, %v8510_v5 }
 0x249   : > { %v9174_v2 = vpop.permute.xlu1 %2198  ;;  %v2032_v37 = vadd.f32 %v2030_v51, %v2000_v45  ;;  %vm2048_vm2 = vcmp.gt.f32.partialorder %v2046_v6, 0.0  ;;  %v2110_v16 = vadd.f32 %v2108_v33, %v9117_v62  ;;  %v2086_v36 = vmul.f32 %v9062_v19, %v2078_v52 }
 0x24a   : > { %11997 = vst [vmem:[#allocation30_spill] sm:$0xff] %v9261_v53  ;;  %v2061_v21 = vsel %vm2047_vm0, %v2053_v12, %v2059_v55  ;;  %v2062_v4 = vsel %vm2048_vm2, %v2054_v46, %v2060_v27  ;;  %v2091_v61 = vmul.f32 %v9100_v0, %v2077_v35  ;;  %v2109_v40 = vadd.f32 %v2108_v33, %v9073_v32 }
 0x24b   : > { %vm2079_vm3 = vcmp.gt.f32.partialorder %v2077_v35, 0.0  ;;  %vm2080_vm4 = vcmp.gt.f32.partialorder %v2078_v52, 0.0  ;;  %v2092_v57 = vmul.f32 %v9100_v0, %v2078_v52  ;;  %v2141_v18 = vadd.f32 %v2140_v30, %v9135_v1  ;;  %v9278_v35 = vpop.permute.xlu0 %2280 }
 0x24c   : > { %v2093_v43 = vsel %vm2079_vm3, %v2085_v15, %v2091_v61  ;;  %v2123_v48 = vmul.f32 %v9095_v20, %v2109_v40  ;;  %v2124_v6 = vmul.f32 %v9095_v20, %v2110_v16  ;;  %v2142_v62 = vadd.f32 %v2140_v30, %v9113_v50 }
 0x24d   : > { %v9185_v34 = vpop.permute.xlu1 %2210  ;;  %v2063_v63 = vadd.f32 %v2061_v21, %v2031_v13  ;;  %v2064_v45 = vadd.f32 %v2062_v4, %v2032_v37  ;;  %vm2112_vm5 = vcmp.gt.f32.partialorder %v2110_v16, 0.0  ;;  %v2094_v51 = vsel %vm2080_vm4, %v2086_v36, %v2092_v57 }
 0x24e   : > { %v2117_v32 = vmul.f32 %v9088_v11, %v2109_v40  ;;  %v2118_v33 = vmul.f32 %v9088_v11, %v2110_v16  ;;  %v2149_v0 = vmul.f32 %v9122_v22, %v2141_v18  ;;  %v2150_v1 = vmul.f32 %v9122_v22, %v2142_v62 }
 0x24f   : > { %v2095_v55 = vadd.f32 %v2093_v43, %v2063_v63  ;;  %vm2111_vm6 = vcmp.gt.f32.partialorder %v2109_v40, 0.0  ;;  %v2155_v20 = vmul.f32 %v9152_v29, %v2141_v18  ;;  %v2174_v50 = vadd.f32 %v9226_v31, %v9166_v14 }
 0x250   : > { %v2125_v30 = vsel %vm2111_vm6, %v2117_v32, %v2123_v48  ;;  %v2126_v27 = vsel %vm2112_vm5, %v2118_v33, %v2124_v6  ;;  %v2205_v13 = vadd.f32 %v9233_v38, %v9183_v7  ;;  %v2156_v11 = vmul.f32 %v9152_v29, %v2142_v62 }
 0x251   : > { %v2096_v52 = vadd.f32 %v2094_v51, %v2064_v45  ;;  %vm2143_vm7 = vcmp.gt.f32.partialorder %v2141_v18, 0.0  ;;  %vm2144_vm8 = vcmp.gt.f32.partialorder %v2142_v62, 0.0  ;;  %v2238_v22 = vadd.f32 %v9237_v24, %v9221_v59  ;;  %v2295_v59 = vpop.permute.xlu0 %2294  ;;  %v12000_v18 = vld [vmem:[#allocation72_spill] sm:$0xff] }
 0x252   : > { %v9196_v17 = vpop.permute.xlu1 %2226  ;;  %v2157_v46 = vsel %vm2143_vm7, %v2149_v0, %v2155_v20  ;;  %v2158_v15 = vsel %vm2144_vm8, %v2150_v1, %v2156_v11  ;;  %v2173_v37 = vadd.f32 %v9226_v31, %v9137_v58  ;;  %v11998_v14 = vlaneseq }
 0x253   : > { %vm2176_vm9 = vcmp.gt.f32.partialorder %v2174_v50, 0.0  ;;  %v2127_v36 = vadd.f32 %v2125_v30, %v2095_v55  ;;  %v2128_v7 = vadd.f32 %v2126_v27, %v2096_v52  ;;  %v2269_v29 = vadd.f32 %v9241_v41, %v2259_v60 }
 0x254   : > { %v9291_v16 = vand.u32 127, %v11998_v14  ;;  %vm2207_vm10 = vcmp.gt.f32.partialorder %v2205_v13, 0.0  ;;  %v2219_v21 = vmul.f32 %v9201_v49, %v2205_v13  ;;  %v2187_v4 = vmul.f32 %v9159_v42, %v2173_v37 }
 0x255   : > { %v2206_v61 = vadd.f32 %v9233_v38, %v9174_v2  ;;  %v2159_v40 = vadd.f32 %v2157_v46, %v2127_v36  ;;  %v2160_v57 = vadd.f32 %v2158_v15, %v2128_v7  ;;  %vm2240_vm11 = vcmp.gt.f32.partialorder %v2238_v22, 0.0  ;;  %v2323_v32 = vpop.permute.xlu0 %2322  ;;  %v9327_v36 = vld [vmem:[%s1041_s11] sm:$0xff] }
 0x256   : > { %v9209_v26 = vpop.permute.xlu1 %2242  ;;  %11999 = vst [vmem:[#allocation31_spill] sm:$0xff] %v9291_v16  ;;  %v2188_v58 = vmul.f32 %v9159_v42, %v2174_v50  ;;  %v2181_v43 = vmul.f32 %v12000_v18, %v2173_v37  ;;  %v2213_v48 = vmul.f32 %v9185_v34, %v2205_v13  ;;  %v2237_v6 = vadd.f32 %v9237_v24, %v9196_v17 }
 0x257   : > { %v2214_v60 = vmul.f32 %v9185_v34, %v2206_v61  ;;  %vm2175_vm12 = vcmp.gt.f32.partialorder %v2173_v37, 0.0  ;;  %vm2271_vm13 = vcmp.gt.f32.partialorder %v2269_v29, 0.0  ;;  %v2182_v62 = vmul.f32 %v12000_v18, %v2174_v50  ;;  %12003 = vst [vmem:[#allocation54_spill] sm:$0xff] %v9327_v36 }
 0x258   : > { %v2283_v2 = vmul.f32 %v9278_v35, %v2269_v29  ;;  %v2189_v38 = vsel %vm2175_vm12, %v2181_v43, %v2187_v4  ;;  %v2302_v63 = vadd.f32 %v9245_v9, %v2295_v59  ;;  %v2220_v42 = vmul.f32 %v9201_v49, %v2206_v61 }
 0x259   : > { %v2190_v34 = vsel %vm2176_vm9, %v2182_v62, %v2188_v58  ;;  %vm2208_vm14 = vcmp.gt.f32.partialorder %v2206_v61, 0.0  ;;  %v2221_v33 = vsel %vm2207_vm10, %v2213_v48, %v2219_v21  ;;  %v2245_v1 = vmul.f32 %v9209_v26, %v2237_v6 }
 0x25a   : > { %v9228_v39 = vpop.permute.xlu1 %2248  ;;  %v2222_v0 = vsel %vm2208_vm14, %v2214_v60, %v2220_v42  ;;  %vm2239_vm15 = vcmp.gt.f32.partialorder %v2237_v6, 0.0  ;;  %v2246_v55 = vmul.f32 %v9209_v26, %v2238_v22  ;;  %v2192_v30 = vadd.f32 %v2190_v34, %v2160_v57 }
 0x25b   : > { %v2251_v45 = vmul.f32 %v9228_v39, %v2237_v6  ;;  %v2252_v17 = vmul.f32 %v9228_v39, %v2238_v22  ;;  %v2191_v39 = vadd.f32 %v2189_v38, %v2159_v40  ;;  %vm2304_vm0 = vcmp.gt.f32.partialorder %v2302_v63, 0.0 }
 0x25c   : > { %v2224_v46 = vadd.f32 %v2222_v0, %v2192_v30  ;;  %v2333_v22 = vadd.f32 %v9253_v28, %v2323_v32  ;;  %vm11630_vm5 = vcmp.eq.s32.totalorder %v9261_v53, %v9291_v16  ;;  %vm11628_vm6 = vcmp.gt.f32.partialorder %v9327_v36, 0.0  ;;  %v1071_v32 = vld [vmem:[%s8344_s19 + $0x18] sm:$0xff] }
 0x25d   : > { %v2223_v52 = vadd.f32 %v2221_v33, %v2191_v39  ;;  %vm11629_vm7 = vcmp.eq.s32.totalorder %v8510_v5, %v9291_v16  ;;  %vm11767_vm12 = vcmask 130048   ;;  %7386 = vmatprep.subr.mxu0 %v1071_v32  ;;  %vm11764_vm14 = vcmask 261120  }
 0x25e   : > { %vm2335_vm8 = vcmp.gt.f32.partialorder %v2333_v22, 0.0  ;;  %7387 = vmatpush3.msra.mxu0 %v1071_v32 }
 0x25f   : > { %v9258_v3 = vpop.permute.xlu1 %2262 }
 0x260   : > { %v2270_v24 = vadd.f32 %v9241_v41, %v9258_v3  ;;  %v2253_v41 = vsel %vm2239_vm15, %v2245_v1, %v2251_v45  ;;  %v2254_v3 = vsel %vm2240_vm11, %v2246_v55, %v2252_v17  ;;  %vm9351_vm11 = vmor %vm11628_vm6, %vm11629_vm7  ;;  %v1068_v17 = vld [vmem:[%s8344_s19] sm:$0xff]  ;;  %vm11761_vm15 = vcmask 15360  }
 0x261   : > { %v2255_v7 = vadd.f32 %v2253_v41, %v2223_v52  ;;  %v2256_v21 = vadd.f32 %v2254_v3, %v2224_v46  ;;  %v2455_v33 = vmul.f32 %v1068_v17, %v1068_v17  ;;  %vm11758_vm7 = vcmp.ne.s32.totalorder %v9291_v16, %v8510_v5 }
 0x262   : > { %v2284_v27 = vmul.f32 %v9278_v35, %v2270_v24  ;;  %vm2272_vm2 = vcmp.gt.f32.partialorder %v2270_v24, 0.0  ;;  %v2345_v35 = vpop.permute.xlu0 %2344 }
 0x263   : > { %v9272_v19 = vpop.permute.xlu1 %2274  ;;  %v2347_v40 = vmul.f32 %v2345_v35, %v2333_v22 }
 0x264   : > { %v2277_v49 = vmul.f32 %v9272_v19, %v2269_v29  ;;  %v2278_v20 = vmul.f32 %v9272_v19, %v2270_v24  ;;  %v9324_v19 = vld [vmem:[%s1041_s11 + $0x8] sm:$0xff] }
 0x265   : > { %12002 = vst [vmem:[#allocation70_spill] sm:$0xff] %v9324_v19  ;;  %vm11627_vm4 = vcmp.gt.f32.partialorder %v9324_v19, 0.0  ;;  %v1069_v24 = vld [vmem:[%s8344_s19 + $0x8] sm:$0xff] }
 0x266   : > { %v2285_v26 = vsel %vm2271_vm13, %v2277_v49, %v2283_v2  ;;  %vm9342_vm10 = vmor %vm11627_vm4, %vm11630_vm5  ;;  %vm11626_vm13 = vcmask 7168   ;;  %v2456_v0 = vmul.f32 %v1069_v24, %v1069_v24  ;;  %v2458_v49 = vmul.f32 %v1071_v32, %v1071_v32 }
 0x267   : > { %v2460_v55 = vsel %vm11626_vm13, %v2455_v33, 0.0  ;;  %v7182_v33 = vld [vmem:[%s12009_s14] ss:$0 sm:$0xff] }
 0x268   : > { %v2291_v12 = vpop.permute.xlu1 %2290  ;;  %v2465_v30 = vsel %vm11626_vm13, %v2458_v49, 0.0 }
 0x269   : > { %v2301_v50 = vadd.f32 %v9245_v9, %v2291_v12  ;;  %v2286_v9 = vsel %vm2272_vm2, %v2278_v20, %v2284_v27  ;;  %v2461_v20 = vsel %vm11626_vm13, %v2456_v0, 0.0  ;;  %v12008_v27 = vmov 0.0  }
 0x26a   : > { %v2288_v61 = vadd.f32 %v2286_v9, %v2256_v21  ;;  %v2462_v39 = vadd.f32 %v2461_v20, %v2460_v55  ;;  %vm11631_vm2 = vcmp.lt.s32.totalorder %v9291_v16, %v9261_v53 }
 0x26b   : > { %vm2303_vm3 = vcmp.gt.f32.partialorder %v2301_v50, 0.0 }
 0x26c   : > { %v2307_v31 = vpop.permute.xlu1 %2306 }
 0x26d   : > { %v2309_v12 = vmul.f32 %v2307_v31, %v2301_v50  ;;  %v2310_v37 = vmul.f32 %v2307_v31, %v2302_v63 }
 0x270   : > { %v2313_v51 = vpop.permute.xlu1 %2312 }
 0x271   : > { %v2315_v13 = vmul.f32 %v2313_v51, %v2301_v50  ;;  %v2316_v11 = vmul.f32 %v2313_v51, %v2302_v63  ;;  %v1070_v51 = vld [vmem:[%s8344_s19 + $0x10] sm:$0xff] }
 0x272   : > { %v2457_v1 = vmul.f32 %v1070_v51, %v1070_v51  ;;  %7388 = vmatprep.subr.mxu0 %v1070_v51 }
 0x273   : > { %v2318_v29 = vsel %vm2304_vm0, %v2310_v37, %v2316_v11  ;;  %v2317_v4 = vsel %vm2303_vm3, %v2309_v12, %v2315_v13  ;;  %7389 = vmatpush3.msra.mxu0 %v1070_v51  ;;  %vm11625_vm0 = vcmask 1041408   ;;  %vm11760_vm3 = vcmp.ne.s32.totalorder %v9291_v16, %v9261_v53 }
 0x274   : > { %v2320_v18 = vadd.f32 %v2318_v29, %v2288_v61  ;;  %v2463_v50 = vsel %vm11626_vm13, %v2457_v1, 0.0  ;;  %7390 = vmatprep.subr.mxu0 %v1069_v24 }
 0x275   : > { %v2327_v15 = vpop.permute.xlu1 %2326  ;;  %v2464_v41 = vadd.f32 %v2463_v50, %v2462_v39  ;;  %7391 = vmatpush3.msra.mxu0 %v1069_v24 }
 0x276   : > { %v2334_v14 = vadd.f32 %v9253_v28, %v2327_v15  ;;  %v2287_v28 = vadd.f32 %v2285_v26, %v2255_v7  ;;  %7392 = vmatprep.subr.mxu0 %v1068_v17 }
 0x277   : > { %v2466_v3 = vadd.f32 %v2465_v30, %v2464_v41  ;;  %7393 = vmatpush3.msra.mxu0 %v1068_v17 }
 0x278   : > { %v2348_v57 = vmul.f32 %v2345_v35, %v2334_v14  ;;  %vm2336_vm9 = vcmp.gt.f32.partialorder %v2334_v14, 0.0  ;;  %v2319_v48 = vadd.f32 %v2317_v4, %v2287_v28  ;;  %7404 = vmatprep.subr.mxu0 %v12008_v27 }
 0x279   : > { %v2339_v59 = vpop.permute.xlu1 %2338 }
 0x27a   : > { %v2341_v58 = vmul.f32 %v2339_v59, %v2333_v22  ;;  %v2342_v31 = vmul.f32 %v2339_v59, %v2334_v14 }
 0x27c   : > { %v2350_v60 = vsel %vm2336_vm9, %v2342_v31, %v2348_v57  ;;  %v2349_v6 = vsel %vm2335_vm8, %v2341_v58, %v2347_v40 }
 0x27d   : > { %v2352_v2 = vadd.f32 %v2350_v60, %v2320_v18  ;;  %v2351_v38 = vadd.f32 %v2349_v6, %v2319_v48 }
 0x27f   : > { %v2360_v63 = vsel %vm9342_vm10, %v2352_v2, -1e+30  ;;  %v2359_v42 = vsel %vm9351_vm11, %v2351_v38, -1e+30 }
 0x280   : > { %v2365_v45 = vsel %vm11767_vm12, %v2360_v63, -inf  ;;  %v2362_v34 = vsel %vm11767_vm12, %v2359_v42, -inf }
 0x281   : > { %2366 = vmax.xlane.f32.xlu0 %v2365_v45  ;;  %2363 = vmax.xlane.f32.xlu1 %v2362_v34 }
 0x30a   : > { %v2367_v13 = vpop.xlane.xlu0 %2366  ;;  %v2364_v11 = vpop.xlane.xlu1 %2363 }
 0x30b   : > { %v2369_v52 = vmax.f32 %v2367_v13, -1e+30  ;;  %v2368_v46 = vmax.f32 %v2364_v11, -1e+30  ;;  %v1072_v13 = vld [vmem:[%s8349_s24] sm:$0x1] }
 0x30d   : > { %v2377_v26 = vsub.f32 %v2360_v63, %v2369_v52  ;;  %v2376_v15 = vsub.f32 %v2359_v42, %v2368_v46  ;;  %v2370_v57 = vsub.f32 -1e+30, %v2368_v46  ;;  %v2371_v18 = vsub.f32 -1e+30, %v2369_v52  ;;  %v9404_v52 = vld [vmem:[%s9400_s3 + $0x8] sm:$0xff] }
 0x30e   : > { %v11632_v46 = vmov 1.0  }
 0x30f   : > { %v2380_v9 = vmul.f32 1.442695, %v2377_v26  ;;  %v2378_v12 = vmul.f32 1.442695, %v2376_v15  ;;  %v2372_v43 = vmul.f32 1.442695, %v2370_v57 }
 0x310   : > { %v2374_v60 = vmul.f32 1.442695, %v2371_v18  ;;  %v9415_v15 = vld [vmem:[%s9400_s3] sm:$0xff] }
 0x311   : > { %8063 = vpow2.f32 %v2380_v9 }
 0x312   : > { %8065 = vpow2.f32 %v2378_v12 }
 0x313   : > { %8067 = vpow2.f32 %v2372_v43  ;;  %v12011_v43 = vmov 4  }
 0x314   : > { %8069 = vpow2.f32 %v2374_v60 }
 0x31e   : > { %v8064_v37 = vpop.eup %8063 }
 0x31f   : > { %v2383_v14 = vsel %vm9342_vm10, %v8064_v37, 0.0  ;;  %v8066_v22 = vpop.eup %8065 }
 0x320   : > { %v2389_v35 = vsel %vm11767_vm12, %v2383_v14, 0.0  ;;  %v2382_v7 = vsel %vm9351_vm11, %v8066_v22, 0.0  ;;  %v8068_v6 = vpop.eup %8067  ;;  %vm11759_vm11 = vcmp.lt.s32.totalorder %v9291_v16, %v8510_v5 }
 0x321   : > { %2390 = vadd.xlane.f32.xlu1 %v2389_v35  ;;  %v2386_v21 = vsel %vm11767_vm12, %v2382_v7, 0.0  ;;  %v2394_v29 = vpack.c.bf16 %v2383_v14, %v2382_v7  ;;  %v2384_v62 = vmul.f32 0.0, %v8068_v6  ;;  %v8070_v2 = vpop.eup %8069 }
 0x322   : > { %2387 = vadd.xlane.f32.xlu0 %v2386_v21  ;;  %v2385_v42 = vmul.f32 0.0, %v8070_v2 }
 0x323   : > { %7383 = vmatmul.mubr.msk.bf16.vlgmr.msra.gmra.mxu1 %vm11767_vm12, %v2394_v29 }
 0x324   : > { %7401 = vmatprep.mubr.msk.f32.mxu1 %vm11765_vm1, %v12008_v27 }
 0x326   : > { %2467 = vadd.xlane.f32.xlu0 %v2466_v3 }
 0x3aa   : > { %v2391_v63 = vpop.xlane.xlu1 %2390 }
 0x3ab   : > { %v2388_v4 = vpop.xlane.xlu0 %2387  ;;  %v2393_v34 = vadd.f32 %v2391_v63, %v2385_v42 }
 0x3ac   : > { %v2392_v38 = vadd.f32 %v2388_v4, %v2384_v62 }
 0x3ad   : > { %v2442_v17 = vmax.f32 %v2393_v34, 1e-09 }
 0x3ae   : > { %v2441_v45 = vmax.f32 %v2392_v38, 1e-09 }
 0x3af   : > { %v2468_v59 = vpop.xlane.xlu0 %2467 }
 0x3b0   : > { %v2469_v61 = vrot.slane %v2468_v59, 4  ;;  %8071 = vrcp.f32 %v2441_v45 }
 0x3b1   : > { %8073 = vrcp.f32 %v2442_v17 }
 0x3b2   : > { %v2470_v28 = vadd.f32 %v2469_v61, %v2468_v59 }
 0x3b4   : > { %v2471_v40 = vrot.slane %v2470_v28, 2 }
 0x3b6   : > { %v2472_v58 = vadd.f32 %v2471_v40, %v2470_v28 }
 0x3b8   : > { %v2473_v31 = vrot.slane %v2472_v58, 1 }
 0x3ba   : > { %v2474_v48 = vadd.f32 %v2473_v31, %v2472_v58 }
 0x3bc   : > { %7585 = vpush %v2474_v48 }
 0x3bd   : > { %v8072_v32 = vpop.eup %8071 }
 0x3be   : > { %v8074_v50 = vpop.eup %8073 }
 0x3e3   : > { %v2432_v24 = vpop.f32.mrf.mxu1 }
 0x3e4   : > { %v2439_v51 = vadd.f32 %v2432_v24, %v2384_v62 }
 0x3e5   : > { %v7384_v0 = vpop.f32.mrf.mxu1 }
 0x3e6   : > { %v2445_v1 = vmul.f32 %v8072_v32, %v2439_v51 }
 0x3e7   : > { %v2435_v49 = vpop.f32.mrf.mxu1 }
 0x3e8   : > { %v9380_v55 = vadd.f32 %v7182_v33, %v2445_v1  ;;  %v2440_v20 = vadd.f32 %v2435_v49, %v2385_v42 }
 0x3e9   : > { %v7385_v39 = vpop.f32.mrf.mxu1 }
 0x3ea   : > { %v2446_v30 = vmul.f32 %v8074_v50, %v2440_v20  ;;  %7394 = vmatprep.mubr.msk.f32.mxu0 %vm11764_vm14, %v9380_v55  ;;  %v1083_v39 = vld [vmem:[%s8374_s27] sm:$0x1] }
 0x3ec   : > { %v9384_v41 = vadd.f32 %v7182_v33, %v2446_v30  ;;  %v9473_v30 = vrot.slane %v1083_v39, %v8521_v10 }
 0x3ed   : > { %s7586_s16 = spop %7585 }
 0x3ee   : > { %7395 = vmatmul.mubr.msk.f32.vlgmr.msra.gmra.mxu0 %vm11764_vm14, %v9384_v41  ;;  %7398 = vmatpush3.xpose.msk.msra.mxu1 %vm11764_vm14, %v9384_v41  ;;  %s2476_s11 = smax.f32 %s11641_s12, %s7586_s16  ;;  %s11637_s16 = sshll.u32 %s8518_s22, 1 }
 0x3ef   : > { %7399 = vmatprep.subr.mxu1 %v12008_v27  ;;  %v2477_v3 = vstv %s2476_s11  ;;  %7408 = vmatprep.mubr.msk.f32.mxu0 %vm11765_vm1, %v12008_v27  ;;  %s9410_s11 = scalar_lea.vmem %s12010_s13, %s11637_s16  ;;  %s12055_s16 = sld [smem:[#allocation14_spill]] }
 0x3f0   : > { %8075 = vrsqrt.f32 %v2477_v3  ;;  %7405 = vmatpush3.msra.mxu0 %v11632_v46  ;;  %v1122_v26 = vld [vmem:[%s9410_s11] sm:$0x3]  ;;  %v3179_v3 = vmul.f32 0.2, %v1083_v39  ;;  %s12059_s12 = sld [smem:[#allocation13_spill]]  ;;  %s8285_s13 = smov [#allocation3]  }
 0x3f1   : > { %7406 = vmatprep.subr.mxu0 %v12008_v27  ;;  %s8157_s14 = sshll.u32 %s8285_s13, 4  ;;  %s8158_s14 = int_to_ptr.vmem [resolvable:$false] %s8157_s14 }
 0x3f2   : > { %7400 = vmatpush3.xpose.msk.msra.mxu1 %vm11764_vm14, %v9380_v55  ;;  %7407 = vmatpush3.msra.mxu0 %v11632_v46 }
 0x3f3   : > { %7409 = vmatmul.mubr.msk.f32.vlgmr.msra.gmra.mxu0 %vm11767_vm12, %v1122_v26  ;;  %7416 = vmatprep.subr.mxu0 %v9404_v52  ;;  %v12014_v26 = vmov 10  }
 0x3f4   : > { %7417 = vmatpush3.msra.mxu0 %v9404_v52 }
 0x3f5   : > { %7402 = vmatmul.mubr.msk.f32.vlgmr.msra.gmra.mxu1 %vm11764_vm14, %v1072_v13  ;;  %7418 = vmatprep.subr.mxu0 %v9415_v15  ;;  %v9477_v13 = vrot.slane %v3179_v3, %v8521_v10 }
 0x3f6   : > { %7419 = vmatpush3.msra.mxu0 %v9415_v15  ;;  %7413 = vmatprep.mubr.msk.f32.mxu1 %vm11761_vm15, %v9415_v15 }
 0x3f7   : > { %7431 = vmatprep.subr.bf16.mxu0 %v12008_v27 }
 0x3fd   : > { %v8076_v11 = vpop.eup %8075 }
 0x3fe   : > { %7587 = vpush %v8076_v11  ;;  %v12012_v11 = vmov 6  }
 0x42f   : > { %s7588_s26 = spop %7587 }
 0x430   : > { %v2562_v9 = vstv %s7588_s26  ;;  %s12020_s26 = sld [smem:[#allocation12_spill]] }
 0x4ae   : > { %v7396_v12 = vpop.f32.mrf.mxu0 }
 0x4af   : > { %v2564_v37 = vmul.f32 %v7396_v12, %v2562_v9  ;;  %v12017_v12 = vmov 16  }
 0x4b0   : > { %v2553_v14 = vpop.f32.mrf.mxu0 }
 0x4b1   : > { %v2566_v22 = vsub.f32 0.0, %v2564_v37  ;;  %v2563_v35 = vmul.f32 %v2562_v9, %v2553_v14  ;;  %v12018_v37 = vmov 18   ;;  %v12019_v14 = vmov 20  }
 0x4b3   : > { %v2569_v7 = vmul.f32 1.442695, %v2566_v22  ;;  %v2565_v21 = vsub.f32 0.0, %v2563_v35  ;;  %v2726_v48 = vpop.f32.mrf.mxu0  ;;  %v12021_v22 = vmov 22   ;;  %v12022_v35 = vmov 23  }
 0x4b4   : > { %v2730_v60 = vmul.f32 0.5, %v2726_v48  ;;  %v9524_v48 = vld [vmem:[%s8354_s30] sm:$0xff]  }
 0x4b5   : > { %8077 = vpow2.f32 %v2569_v7  ;;  %v2567_v29 = vmul.f32 1.442695, %v2565_v21  ;;  %v2646_v4 = vpop.f32.mrf.mxu1  ;;  %v7410_v6 = vpop.f32.mrf.mxu0  ;;  %v12023_v7 = vmov 25   ;;  %v12024_v21 = vmov 27  }
 0x4b6   : > { %v2650_v59 = vmul.f32 %v2646_v4, %v2562_v9  ;;  %v2731_v62 = vceil.f32 %v2730_v60  ;;  %v12016_v9 = vmov 14   ;;  %v12026_v4 = vmov 2   ;;  %v8058_v60 = vld [vmem:[%s12020_s26] sm:$0xff]  }
 0x4b7   : > { %8079 = vpow2.f32 %v2567_v29  ;;  %v7403_v61 = vpop.f32.mrf.mxu1  ;;  %v12025_v29 = vmov 29  }
 0x4b8   : > { %7411 = vmatprep.subr.msk.mxu1 %vm11625_vm0, %v2731_v62  ;;  %v2651_v2 = vsub.f32 0.0, %v2650_v59  ;;  %v9509_v59 = vld [vmem:[%s8354_s30 + $0x8] sm:$0xff]  }
 0x4b9   : > { %7412 = vmatpush3.msk.msra.mxu1 %vm11625_vm0, %v2731_v62  ;;  %v8056_v61 = vld [vmem:[%s12020_s26 + $0x8] sm:$0xff]  }
 0x4ba   : > { %7414 = vmatmul.mubr.msk.f32.vlgmr.msra.gmra.mxu1 %vm11761_vm15, %v9404_v52  ;;  %7423 = vmatprep.subr.bf16.mxu1 %v12008_v27  ;;  %v2652_v38 = vmul.f32 1.442695, %v2651_v2 }
 0x4bb   : > { %7427 = vmatprep.mubr.msk.bf16.mxu1 %vm11765_vm1, %v12008_v27 }
 0x4c2   : > { %v8078_v28 = vpop.eup %8077 }
 0x4c3   : > { %v2572_v40 = vadd.f32 1.0, %v8078_v28  ;;  %v3023_v28 = vsel %vm11764_vm14, %v9509_v59, 0 }
 0x4c4   : > { %v8080_v57 = vpop.eup %8079  ;;  %7424 = vmatpush3.bf16.xpose.msra.mxu1 %v3023_v28 }
 0x4c5   : > { %8081 = vrcp.f32 %v2572_v40  ;;  %v2571_v58 = vadd.f32 1.0, %v8080_v57  ;;  %v3086_v40 = vsel %vm11764_vm14, %v8056_v61, 0  ;;  %7425 = vmatprep.subr.bf16.mxu1 %v12008_v27 }
 0x4c7   : > { %8083 = vrcp.f32 %v2571_v58 }
 0x4c8   : > { %8085 = vpow2.f32 %v2652_v38 }
 0x4d2   : > { %v9424_v31 = vpop.eup %8081 }
 0x4d3   : > { %2831 = vperm.xlu0 %7805, %v9424_v31  }
 0x4d4   : > { %v9427_v18 = vpop.eup %8083 }
 0x4d5   : > { %2826 = vperm.xlu1 %7804, %v9427_v18   ;;  %v8086_v63 = vpop.eup %8085 }
 0x4d6   : > { %v2654_v42 = vadd.f32 1.0, %v8086_v63  ;;  %v3020_v63 = vsel %vm11764_vm14, %v9524_v48, 0 }
 0x4d7   : > { %7810 = vset.pattern.permute.xlu0 %v12011_v43  ;;  %7426 = vmatpush3.bf16.xpose.msra.mxu1 %v3020_v63 }
 0x4d8   : > { %8087 = vrcp.f32 %v2654_v42  ;;  %v3083_v42 = vsel %vm11764_vm14, %v8058_v60, 0 }
 0x4e5   : > { %v8088_v45 = vpop.eup %8087 }
 0x4e6   : > { %v2823_v34 = vrot.slane %v8088_v45, %v8521_v10 }
 0x54e   : > { %v2832_v17 = vpop.permute.xlu0 %2831 }
 0x54f   : > { %vm2835_vm8 = vcmp.gt.f32.partialorder %v2823_v34, %v2832_v17  ;;  %vm2837_vm9 = vcmp.eq.f32.partialorder %v2823_v34, %v2832_v17  ;;  %v12033_v17 = vmov 1  }
 0x550   : > { %vm2841_vm10 = vmand %vm2837_vm9, %vm11631_vm2  ;;  %v2827_v24 = vpop.permute.xlu1 %2826 }
 0x551   : > { %vm2843_vm0 = vmor %vm2835_vm8, %vm2841_vm10  ;;  %vm2834_vm13 = vcmp.gt.f32.partialorder %v2823_v34, %v2827_v24  ;;  %vm2836_vm4 = vcmp.eq.f32.partialorder %v2823_v34, %v2827_v24  ;;  %v12034_v24 = vmov 3  }
 0x552   : > { %vm2845_vm6 = vmand %vm11760_vm3, %vm2843_vm0 }
 0x553   : > { %vm2840_vm5 = vmand %vm2836_vm4, %vm11759_vm11  ;;  %v2847_v32 = vsel %vm2845_vm6, 1.0, %v12008_v27 }
 0x554   : > { %vm2842_vm9 = vmor %vm2834_vm13, %vm2840_vm5 }
 0x555   : > { %vm2844_vm2 = vmand %vm11758_vm7, %vm2842_vm9 }
 0x556   : > { %v2846_v51 = vsel %vm2844_vm2, 1.0, %v12008_v27 }
 0x557   : > { %7420 = vmatprep.mubr.msk.f32.mxu0 %vm11767_vm12, %v2846_v51  ;;  %v12036_v51 = vmov 7  }
 0x558   : > { %7421 = vmatmul.mubr.msk.f32.vlgmr.msra.gmra.mxu0 %vm11767_vm12, %v2847_v32  ;;  %v12037_v32 = vmov 9  }
 0x559   : > { %7435 = vmatprep.mubr.msk.bf16.mxu0 %vm11765_vm1, %v12008_v27  ;;  %7432 = vmatpush3.bf16.xpose.msra.mxu0 %v3086_v40 }
 0x55a   : > { %7433 = vmatprep.subr.bf16.mxu0 %v12008_v27 }
 0x561   : > { %7434 = vmatpush3.bf16.xpose.msra.mxu0 %v3083_v42  ;;  %v12045_v42 = vmov 24  }
 0x562   : > { %7445 = vmatprep.subr.bf16.mxu0 %v12008_v27 }
 0x57a   : > { %v9517_v57 = vpop.f32.mrf.mxu1 }
 0x57b   : > { %12027 = vst [vmem:[#allocation66_spill] sm:$0xff] %v9517_v57 }
 0x57c   : > { %v9527_v6 = vpop.f32.mrf.mxu1 }
 0x57d   : > { %12029 = vst [vmem:[#allocation32_spill] sm:$0xff] %v9527_v6 }
 0x618   : > { %v7422_v33 = vpop.f32.mrf.mxu0 }
 0x619   : > { %v2930_v0 = vmul.f32 %v7422_v33, %v9404_v52  ;;  %v12013_v52 = vmov 8   ;;  %v12038_v33 = vmov 11  }
 0x61a   : > { %v2920_v1 = vpop.f32.mrf.mxu0 }
 0x61b   : > { %v2929_v49 = vmul.f32 %v2920_v1, %v9415_v15  ;;  %v2934_v20 = vsel %vm11761_vm15, %v2930_v0, 0.0  ;;  %v12015_v15 = vmov 12   ;;  %v12039_v0 = vmov 13  }
 0x61c   : > { %2935 = vadd.xlane.f32.xlu0 %v2934_v20  ;;  %v12040_v1 = vmov 15  }
 0x61d   : > { %v2931_v50 = vsel %vm11761_vm15, %v2929_v49, 0.0 }
 0x61e   : > { %2932 = vadd.xlane.f32.xlu1 %v2931_v50  ;;  %v12041_v50 = vmov 17  }
 0x62f   : > { %3204 = vperm.xlu1 %7804, %v9473_v30  }
 0x632   : > { %3343 = vperm.xlu0 %7810, %v9477_v13  }
 0x636   : > { %7813 = vset.pattern.permute.xlu0 %v12012_v11 }
 0x637   : > { %3407 = vperm.xlu0 %7813, %v9477_v13  }
 0x63b   : > { %7816 = vset.pattern.permute.xlu0 %v12013_v52 }
 0x63c   : > { %3471 = vperm.xlu0 %7816, %v9477_v13  }
 0x640   : > { %7819 = vset.pattern.permute.xlu0 %v12014_v26 }
 0x641   : > { %3535 = vperm.xlu0 %7819, %v9477_v13  }
 0x645   : > { %7822 = vset.pattern.permute.xlu0 %v12015_v15 }
 0x646   : > { %3599 = vperm.xlu0 %7822, %v9477_v13  }
 0x64a   : > { %7825 = vset.pattern.permute.xlu0 %v12016_v9 }
 0x64b   : > { %3663 = vperm.xlu0 %7825, %v9477_v13  }
 0x64f   : > { %7828 = vset.pattern.permute.xlu0 %v12017_v12 }
 0x650   : > { %3727 = vperm.xlu0 %7828, %v9477_v13  }
 0x654   : > { %7831 = vset.pattern.permute.xlu0 %v12018_v37 }
 0x655   : > { %3791 = vperm.xlu0 %7831, %v9477_v13  }
 0x659   : > { %7834 = vset.pattern.permute.xlu0 %v12019_v14 }
 0x65a   : > { %3855 = vperm.xlu0 %7834, %v9477_v13  }
 0x65e   : > { %7837 = vset.pattern.permute.xlu0 %v12021_v22 }
 0x65f   : > { %3919 = vperm.xlu0 %7837, %v9477_v13  }
 0x663   : > { %7845 = vset.pattern.permute.xlu0 %v12022_v35 }
 0x664   : > { %3951 = vperm.xlu0 %7845, %v9477_v13  }
 0x668   : > { %7848 = vset.pattern.permute.xlu0 %v12023_v7 }
 0x669   : > { %4015 = vperm.xlu0 %7848, %v9477_v13  }
 0x66d   : > { %7851 = vset.pattern.permute.xlu0 %v12024_v21 }
 0x66e   : > { %4079 = vperm.xlu0 %7851, %v9477_v13  }
 0x672   : > { %7854 = vset.pattern.permute.xlu0 %v12025_v29 }
 0x673   : > { %4143 = vperm.xlu0 %7854, %v9477_v13  }
 0x677   : > { %7855 = vset.pattern.permute.xlu0 %v12026_v4 }
 0x678   : > { %3279 = vperm.xlu0 %7855, %v9477_v13  }
 0x6a5   : > { %v9519_v58 = vpop.xlane.xlu0 %2935 }
 0x6a6   : > { %12028 = vst [vmem:[#allocation55_spill] sm:$0xff] %v9519_v58  ;;  %vm11763_vm4 = vcmp.lt.f32.partialorder %v9519_v58, %v9517_v57 }
 0x6a7   : > { %v9533_v62 = vsel %vm11763_vm4, 1.0, %v12008_v27  ;;  %v9535_v2 = vpop.xlane.xlu1 %2932 }
 0x6a8   : > { %12030 = vst [vmem:[#allocation41_spill] sm:$0xff] %v9533_v62  ;;  %12031 = vst [vmem:[#allocation33_spill] sm:$0xff] %v9535_v2  ;;  %v2965_v38 = vmul.f32 %v9424_v31, %v9533_v62  ;;  %vm11762_vm5 = vcmp.lt.f32.partialorder %v9535_v2, %v9527_v6  ;;  %vm11757_vm13 = vcmp.gt.f32.partialorder %v9533_v62, 0.0 }
 0x6a9   : > { %v9548_v45 = vsel %vm11762_vm5, 1.0, %v12008_v27 }
 0x6aa   : > { %12032 = vst [vmem:[#allocation34_spill] sm:$0xff] %v9548_v45  ;;  %v7839_v34 = vpack.i.bf16 %v9533_v62, %v9548_v45  ;;  %2973 = vperm.xlu1 %7804, %v2965_v38   ;;  %v2964_v31 = vmul.f32 %v9427_v18, %v9548_v45  ;;  %v12035_v18 = vmov 5   ;;  %vm11756_vm6 = vcmp.gt.f32.partialorder %v9548_v45, 0.0 }
 0x6ab   : > { %v9594_v49 = vpop.permute.xlu1 %3204 }
 0x6ae   : > { %2968 = vperm.xlu1 %7804, %v2964_v31  }
 0x6b2   : > { %3215 = vperm.xlu1 %7804, %v9477_v13  }
 0x6b6   : > { %7806 = vset.pattern.permute.xlu1 %v12033_v17 }
 0x6b7   : > { %3241 = vperm.xlu1 %7806, %v9473_v30  }
 0x6bb   : > { %3247 = vperm.xlu1 %7806, %v9477_v13  }
 0x6bf   : > { %7807 = vset.pattern.permute.xlu1 %v12026_v4 }
 0x6c0   : > { %3273 = vperm.xlu1 %7807, %v9473_v30  }
 0x6c4   : > { %7808 = vset.pattern.permute.xlu1 %v12034_v24 }
 0x6c5   : > { %3305 = vperm.xlu1 %7808, %v9473_v30  }
 0x6c9   : > { %3311 = vperm.xlu1 %7808, %v9477_v13  }
 0x6cd   : > { %7809 = vset.pattern.permute.xlu1 %v12011_v43 }
 0x6ce   : > { %3337 = vperm.xlu1 %7809, %v9473_v30  }
 0x6d2   : > { %7811 = vset.pattern.permute.xlu1 %v12035_v18 }
 0x6d3   : > { %3369 = vperm.xlu1 %7811, %v9473_v30  }
 0x6d7   : > { %3375 = vperm.xlu1 %7811, %v9477_v13  }
 0x6db   : > { %7812 = vset.pattern.permute.xlu1 %v12012_v11 }
 0x6dc   : > { %3401 = vperm.xlu1 %7812, %v9473_v30  }
 0x6e0   : > { %7814 = vset.pattern.permute.xlu1 %v12036_v51 }
 0x6e1   : > { %3433 = vperm.xlu1 %7814, %v9473_v30  }
 0x6e5   : > { %3439 = vperm.xlu1 %7814, %v9477_v13  }
 0x6e9   : > { %7815 = vset.pattern.permute.xlu1 %v12013_v52 }
 0x6ea   : > { %3465 = vperm.xlu1 %7815, %v9473_v30  }
 0x6ee   : > { %7817 = vset.pattern.permute.xlu1 %v12037_v32 }
 0x6ef   : > { %3497 = vperm.xlu1 %7817, %v9473_v30  }
 0x6f3   : > { %3503 = vperm.xlu1 %7817, %v9477_v13  }
 0x6f7   : > { %7818 = vset.pattern.permute.xlu1 %v12014_v26 }
 0x6f8   : > { %3529 = vperm.xlu1 %7818, %v9473_v30  }
 0x6fc   : > { %7820 = vset.pattern.permute.xlu1 %v12038_v33 }
 0x6fd   : > { %3561 = vperm.xlu1 %7820, %v9473_v30  }
 0x701   : > { %3567 = vperm.xlu1 %7820, %v9477_v13  }
 0x705   : > { %7821 = vset.pattern.permute.xlu1 %v12015_v15 }
 0x706   : > { %3593 = vperm.xlu1 %7821, %v9473_v30  }
 0x70a   : > { %7823 = vset.pattern.permute.xlu1 %v12039_v0 }
 0x70b   : > { %3625 = vperm.xlu1 %7823, %v9473_v30  }
 0x70f   : > { %3631 = vperm.xlu1 %7823, %v9477_v13  }
 0x713   : > { %7824 = vset.pattern.permute.xlu1 %v12016_v9 }
 0x714   : > { %3657 = vperm.xlu1 %7824, %v9473_v30  }
 0x718   : > { %7826 = vset.pattern.permute.xlu1 %v12040_v1 }
 0x719   : > { %3689 = vperm.xlu1 %7826, %v9473_v30  }
 0x71d   : > { %3695 = vperm.xlu1 %7826, %v9477_v13  }
 0x721   : > { %7827 = vset.pattern.permute.xlu1 %v12017_v12 }
 0x722   : > { %3721 = vperm.xlu1 %7827, %v9473_v30  }
 0x725   : > { %v2974_v20 = vpop.permute.xlu1 %2973 }
 0x726   : > { %7829 = vset.pattern.permute.xlu1 %v12041_v50  ;;  %v2977_v39 = vmul.f32 %v2974_v20, %v9384_v41  ;;  %v12043_v41 = vmov 21   ;;  %v12046_v20 = vmov 26  }
 0x727   : > { %3753 = vperm.xlu1 %7829, %v9473_v30  }
 0x728   : > { %v2998_v28 = vmax.f32 %v2977_v39, 0.0 }
 0x729   : > { %v2969_v3 = vpop.permute.xlu1 %2968 }
 0x72a   : > { %v2976_v61 = vmul.f32 %v2969_v3, %v9380_v55  ;;  %v12042_v55 = vmov 19  }
 0x72b   : > { %3759 = vperm.xlu1 %7829, %v9477_v13  }
 0x72c   : > { %v2997_v40 = vmax.f32 %v2976_v61, 0.0  ;;  %v12047_v61 = vmov 28  }
 0x72e   : > { %v2999_v60 = vpack.c.bf16 %v2998_v28, %v2997_v40 }
 0x72f   : > { %7830 = vset.pattern.permute.xlu1 %v12018_v37 }
 0x730   : > { %3785 = vperm.xlu1 %7830, %v9473_v30   ;;  %7428 = vmatmul.mubr.msk.bf16.vlgmr.msra.gmra.mxu1 %vm11764_vm14, %v2999_v60  ;;  %v3017_v38 = vsel %vm11764_vm14, %v2999_v60, 0 }
 0x731   : > { %7436 = vmatmul.mubr.msk.bf16.vlgmr.msra.gmra.mxu0 %vm11764_vm14, %v2999_v60  ;;  %7583 = vmatprep.subr.msk.bf16.mxu1 %vm11764_vm14, %v2999_v60 }
 0x732   : > { %7440 = vmatpush3.bf16.xpose.msra.mxu1 %v3017_v38  ;;  %7441 = vmatprep.mubr.msk.bf16.mxu1 %vm11764_vm14, %v9524_v48  ;;  %v12044_v48 = vmov 0   ;;  %v12051_v38 = vmov 30  }
 0x733   : > { %7447 = vmatprep.mubr.msk.bf16.mxu0 %vm11765_vm1, %v12008_v27  ;;  %v2980_v6 = vsel %vm11756_vm6, 1, %v12044_v48 }
 0x734   : > { %7832 = vset.pattern.permute.xlu1 %v12042_v55 }
 0x735   : > { %3817 = vperm.xlu1 %7832, %v9473_v30  }
 0x739   : > { %3823 = vperm.xlu1 %7832, %v9477_v13   ;;  %7442 = vmatmul.mubr.msk.bf16.vlgmr.msra.gmra.mxu1 %vm11764_vm14, %v9509_v59  ;;  %v9629_v59 = vpop.permute.xlu1 %3215 }
 0x73d   : > { %7833 = vset.pattern.permute.xlu1 %v12019_v14  ;;  %v9633_v63 = vpop.permute.xlu1 %3241 }
 0x73e   : > { %3849 = vperm.xlu1 %7833, %v9473_v30  }
 0x741   : > { %v9637_v31 = vpop.permute.xlu1 %3247 }
 0x742   : > { %7835 = vset.pattern.permute.xlu1 %v12043_v41 }
 0x743   : > { %3881 = vperm.xlu1 %7835, %v9473_v30  }
 0x747   : > { %3887 = vperm.xlu1 %7835, %v9477_v13  }
 0x74b   : > { %7836 = vset.pattern.permute.xlu1 %v12021_v22 }
 0x74c   : > { %3913 = vperm.xlu1 %7836, %v9473_v30  }
 0x750   : > { %7838 = vset.pattern.permute.xlu1 %v12044_v48 }
 0x751   : > { %7840 = vperm.xlu1 %7838, %v7839_v34   ;;  %v9642_v34 = vpop.permute.xlu1 %3273 }
 0x755   : > { %7844 = vset.pattern.permute.xlu1 %v12022_v35  ;;  %v9646_v39 = vpop.permute.xlu1 %3305 }
 0x756   : > { %3945 = vperm.xlu1 %7844, %v9473_v30  }
 0x759   : > { %v9649_v3 = vpop.permute.xlu1 %3311 }
 0x75a   : > { %7846 = vset.pattern.permute.xlu1 %v12045_v42 }
 0x75b   : > { %3977 = vperm.xlu1 %7846, %v9473_v30  }
 0x75d   : > { %v9654_v28 = vpop.permute.xlu1 %3337 }
 0x75e   : > { %12048 = vst [vmem:[#allocation73_spill] sm:$0xff] %v9654_v28 }
 0x75f   : > { %3983 = vperm.xlu1 %7846, %v9477_v13  }
 0x761   : > { %v9658_v40 = vpop.permute.xlu1 %3369 }
 0x762   : > { %12049 = vst [vmem:[#allocation56_spill] sm:$0xff] %v9658_v40 }
 0x763   : > { %7847 = vset.pattern.permute.xlu1 %v12023_v7 }
 0x764   : > { %4009 = vperm.xlu1 %7847, %v9473_v30  }
 0x765   : > { %v9662_v60 = vpop.permute.xlu1 %3375 }
 0x766   : > { %12050 = vst [vmem:[#allocation68_spill] sm:$0xff] %v9662_v60 }
 0x768   : > { %7849 = vset.pattern.permute.xlu1 %v12046_v20 }
 0x769   : > { %4041 = vperm.xlu1 %7849, %v9473_v30   ;;  %v9666_v46 = vpop.permute.xlu1 %3401 }
 0x76a   : > { %12052 = vst [vmem:[#allocation57_spill] sm:$0xff] %v9666_v46 }
 0x76d   : > { %4047 = vperm.xlu1 %7849, %v9477_v13   ;;  %v9674_v2 = vpop.permute.xlu1 %3433 }
 0x76e   : > { %12053 = vst [vmem:[#allocation35_spill] sm:$0xff] %v9674_v2 }
 0x771   : > { %7850 = vset.pattern.permute.xlu1 %v12024_v21  ;;  %v9676_v57 = vpop.permute.xlu1 %3439 }
 0x772   : > { %4073 = vperm.xlu1 %7850, %v9473_v30   ;;  %12054 = vst [vmem:[#allocation43_spill] sm:$0xff] %v9676_v57 }
 0x775   : > { %v9678_v58 = vpop.permute.xlu1 %3465 }
 0x776   : > { %7852 = vset.pattern.permute.xlu1 %v12047_v61  ;;  %12056 = vst [vmem:[#allocation67_spill] sm:$0xff] %v9678_v58 }
 0x777   : > { %4105 = vperm.xlu1 %7852, %v9473_v30  }
 0x779   : > { %v9680_v19 = vpop.permute.xlu1 %3497 }
 0x77a   : > { %12057 = vst [vmem:[#allocation36_spill] sm:$0xff] %v9680_v19 }
 0x77b   : > { %4111 = vperm.xlu1 %7852, %v9477_v13  }
 0x77d   : > { %v9682_v36 = vpop.permute.xlu1 %3503 }
 0x77e   : > { %12058 = vst [vmem:[#allocation37_spill] sm:$0xff] %v9682_v36 }
 0x77f   : > { %7853 = vset.pattern.permute.xlu1 %v12025_v29 }
 0x780   : > { %4137 = vperm.xlu1 %7853, %v9473_v30  }
 0x781   : > { %v9684_v5 = vpop.permute.xlu1 %3529 }
 0x782   : > { %12060 = vst [vmem:[#allocation58_spill] sm:$0xff] %v9684_v5 }
 0x784   : > { %7856 = vset.pattern.permute.xlu1 %v12051_v38 }
 0x785   : > { %4169 = vperm.xlu1 %7856, %v9473_v30   ;;  %v9686_v16 = vpop.permute.xlu1 %3561 }
 0x786   : > { %12061 = vst [vmem:[#allocation71_spill] sm:$0xff] %v9686_v16  ;;  %v7198_v16 = vld [vmem:[%s12055_s16] ss:$0 sm:$0xff] }
 0x789   : > { %4175 = vperm.xlu1 %7856, %v9477_v13   ;;  %v9688_v53 = vpop.permute.xlu1 %3567 }
 0x78a   : > { %12062 = vst [vmem:[#allocation59_spill] sm:$0xff] %v9688_v53 }
 0x78d   : > { %7857 = vset.pattern.permute.xlu1 %v12044_v48  ;;  %v9690_v45 = vpop.permute.xlu1 %3593 }
 0x78e   : > { %2983 = vperm.xlu1 %7857, %v2980_v6   ;;  %12063 = vst [vmem:[#allocation38_spill] sm:$0xff] %v9690_v45  ;;  %v7194_v45 = vld [vmem:[%s12059_s12] ss:$0 sm:$0xff]  ;;  %s12232_s12 = sld [smem:[#allocation16_spill]] }
 0x791   : > { %v9692_v6 = vpop.permute.xlu1 %3625 }
 0x792   : > { %12064 = vst [vmem:[#allocation45_spill] sm:$0xff] %v9692_v6 }
 0x795   : > { %v9694_v2 = vpop.permute.xlu1 %3631 }
 0x796   : > { %12065 = vst [vmem:[#allocation39_spill] sm:$0xff] %v9694_v2 }
 0x799   : > { %v9696_v57 = vpop.permute.xlu1 %3657 }
 0x79a   : > { %12066 = vst [vmem:[#allocation40_spill] sm:$0xff] %v9696_v57 }
 0x79d   : > { %v9698_v58 = vpop.permute.xlu1 %3689 }
 0x79e   : > { %12067 = vst [vmem:[#allocation61_spill] sm:$0xff] %v9698_v58 }
 0x7a1   : > { %v9700_v19 = vpop.permute.xlu1 %3695 }
 0x7a2   : > { %12068 = vst [vmem:[#allocation74_spill] sm:$0xff] %v9700_v19 }
 0x7a5   : > { %v9702_v36 = vpop.permute.xlu1 %3721 }
 0x7a6   : > { %12069 = vst [vmem:[#allocation60_spill] sm:$0xff] %v9702_v36 }
 0x7a9   : > { %v9704_v46 = vpop.permute.xlu1 %3753 }
 0x7aa   : > { %12070 = vst [vmem:[#allocation42_spill] sm:$0xff] %v9704_v46 }
 0x7ad   : > { %v9706_v5 = vpop.permute.xlu1 %3759 }
 0x7ae   : > { %12071 = vst [vmem:[#allocation47_spill] sm:$0xff] %v9706_v5 }
 0x7b1   : > { %v9714_v19 = vpop.permute.xlu1 %3785 }
 0x7b2   : > { %12072 = vst [vmem:[#allocation44_spill] sm:$0xff] %v9714_v19 }
 0x7f0   : > { %v3059_v53 = vpop.f32.mrf.mxu1 }
 0x7f1   : > { %v3122_v47 = vpop.f32.mrf.mxu0  ;;  %v3060_v36 = vadd.f32 %v7194_v45, %v3059_v53 }
 0x7f2   : > { %v9710_v60 = vadd.f32 %v7198_v16, %v3122_v47  ;;  %v7429_v6 = vpop.f32.mrf.mxu1  ;;  %v9722_v47 = vpop.permute.xlu1 %3817 }
 0x7f3   : > { %v7437_v2 = vpop.f32.mrf.mxu0  ;;  %12073 = vst [vmem:[#allocation46_spill] sm:$0xff] %v9722_v47 }
 0x7f4   : > { %3257 = vperm.xlu0 %7855, %v9710_v60   ;;  %3182 = vperm.xlu1 %7857, %v9710_v60   ;;  %v3062_v58 = vpop.f32.mrf.mxu1 }
 0x7f5   : > { %v3063_v57 = vadd.f32 %v7194_v45, %v3062_v58  ;;  %v3125_v46 = vpop.f32.mrf.mxu0 }
 0x7f6   : > { %v9716_v40 = vadd.f32 %v7198_v16, %v3125_v46  ;;  %v7430_v5 = vpop.f32.mrf.mxu1 }
 0x7f7   : > { %v3178_v23 = vpack.c.bf16 %v3063_v57, %v3060_v36  ;;  %v7438_v28 = vpop.f32.mrf.mxu0  ;;  %v9729_v5 = vpop.permute.xlu1 %3823 }
 0x7f8   : > { %7860 = vset.pattern.permute.xlu0 %v12011_v43  ;;  %7858 = vset.pattern.permute.xlu1 %v12033_v17  ;;  %12074 = vst [vmem:[#allocation63_spill] sm:$0xff] %v9729_v5  ;;  %v9753_v36 = vpop.permute.xlu0 %3343 }
 0x7f9   : > { %3321 = vperm.xlu0 %7860, %v9710_v60   ;;  %3225 = vperm.xlu1 %7858, %v9710_v60   ;;  %12078 = vst [vmem:[#allocation49_spill] sm:$0xff] %v9753_v36 }
 0x7fa   : > { %7446 = vmatpush3.bf16.msra.mxu0 %v3178_v23 }
 0x7fb   : > { %7462 = vmatprep.subr.mxu0 %v12008_v27  ;;  %v9735_v23 = vpop.permute.xlu1 %3849 }
 0x7fc   : > { %12075 = vst [vmem:[#allocation75_spill] sm:$0xff] %v9735_v23  ;;  %v9763_v57 = vpop.permute.xlu0 %3407 }
 0x7fd   : > { %7862 = vset.pattern.permute.xlu0 %v12012_v11  ;;  %7859 = vset.pattern.permute.xlu1 %v12034_v24  ;;  %12080 = vst [vmem:[#allocation52_spill] sm:$0xff] %v9763_v57 }
 0x7fe   : > { %3385 = vperm.xlu0 %7862, %v9710_v60   ;;  %3289 = vperm.xlu1 %7859, %v9710_v60  }
 0x7ff   : > { %v9743_v53 = vpop.permute.xlu1 %3881 }
 0x800   : > { %12076 = vst [vmem:[#allocation62_spill] sm:$0xff] %v9743_v53  ;;  %v9773_v2 = vpop.permute.xlu0 %3471 }
 0x801   : > { %12082 = vst [vmem:[#allocation53_spill] sm:$0xff] %v9773_v2 }
 0x802   : > { %7864 = vset.pattern.permute.xlu0 %v12013_v52  ;;  %7861 = vset.pattern.permute.xlu1 %v12035_v18 }
 0x803   : > { %3449 = vperm.xlu0 %7864, %v9710_v60   ;;  %3353 = vperm.xlu1 %7861, %v9710_v60   ;;  %v9751_v16 = vpop.permute.xlu1 %3887 }
 0x804   : > { %12077 = vst [vmem:[#allocation48_spill] sm:$0xff] %v9751_v16  ;;  %v9781_v28 = vpop.permute.xlu0 %3535 }
 0x805   : > { %12084 = vst [vmem:[#allocation64_spill] sm:$0xff] %v9781_v28 }
 0x807   : > { %7866 = vset.pattern.permute.xlu0 %v12014_v26  ;;  %7863 = vset.pattern.permute.xlu1 %v12036_v51  ;;  %v9759_v46 = vpop.permute.xlu1 %3913 }
 0x808   : > { %3513 = vperm.xlu0 %7866, %v9710_v60   ;;  %3417 = vperm.xlu1 %7863, %v9710_v60   ;;  %12079 = vst [vmem:[#allocation50_spill] sm:$0xff] %v9759_v46 }
 0x80b   : > { %v9767_v58 = vpop.permute.xlu1 %7840 }
 0x80c   : > { %7868 = vset.pattern.permute.xlu0 %v12015_v15  ;;  %7865 = vset.pattern.permute.xlu1 %v12037_v32  ;;  %12081 = vst [vmem:[#allocation65_spill] sm:$0xff] %v9767_v58 }
 0x80d   : > { %3577 = vperm.xlu0 %7868, %v9710_v60   ;;  %3481 = vperm.xlu1 %7865, %v9710_v60  }
 0x80f   : > { %v9775_v45 = vpop.permute.xlu1 %3945 }
 0x810   : > { %12083 = vst [vmem:[#allocation51_spill] sm:$0xff] %v9775_v45  ;;  %v9789_v45 = vpop.permute.xlu0 %3599 }
 0x811   : > { %7870 = vset.pattern.permute.xlu0 %v12016_v9  ;;  %7867 = vset.pattern.permute.xlu1 %v12038_v33  ;;  %12086 = vst [vmem:[#allocation79_spill] sm:$0xff] %v9789_v45 }
 0x812   : > { %3641 = vperm.xlu0 %7870, %v9710_v60   ;;  %3545 = vperm.xlu1 %7867, %v9710_v60  }
 0x813   : > { %v9783_v6 = vpop.permute.xlu1 %3977 }
 0x814   : > { %12085 = vst [vmem:[#allocation72_spill] sm:$0xff] %v9783_v6  ;;  %v9797_v6 = vpop.permute.xlu0 %3663 }
 0x815   : > { %12088 = vst [vmem:[#allocation81_spill] sm:$0xff] %v9797_v6 }
 0x816   : > { %7872 = vset.pattern.permute.xlu0 %v12017_v12  ;;  %7869 = vset.pattern.permute.xlu1 %v12039_v0 }
 0x817   : > { %3705 = vperm.xlu0 %7872, %v9710_v60   ;;  %3609 = vperm.xlu1 %7869, %v9710_v60   ;;  %v9791_v46 = vpop.permute.xlu1 %3983 }
 0x818   : > { %12087 = vst [vmem:[#allocation80_spill] sm:$0xff] %v9791_v46  ;;  %v12090_v46 = vmov 31   ;;  %v9807_v53 = vpop.permute.xlu0 %3727 }
 0x819   : > { %12091 = vst [vmem:[#allocation83_spill] sm:$0xff] %v9807_v53 }
 0x81b   : > { %7874 = vset.pattern.permute.xlu0 %v12018_v37  ;;  %7871 = vset.pattern.permute.xlu1 %v12040_v1  ;;  %v9801_v16 = vpop.permute.xlu1 %4009 }
 0x81c   : > { %3769 = vperm.xlu0 %7874, %v9710_v60   ;;  %3673 = vperm.xlu1 %7871, %v9710_v60   ;;  %12089 = vst [vmem:[#allocation82_spill] sm:$0xff] %v9801_v16  ;;  %v9817_v16 = vpop.permute.xlu0 %3791 }
 0x81d   : > { %12093 = vst [vmem:[#allocation85_spill] sm:$0xff] %v9817_v16 }
 0x81f   : > { %v9811_v23 = vpop.permute.xlu1 %4041 }
 0x820   : > { %7876 = vset.pattern.permute.xlu0 %v12019_v14  ;;  %7873 = vset.pattern.permute.xlu1 %v12041_v50  ;;  %12092 = vst [vmem:[#allocation84_spill] sm:$0xff] %v9811_v23  ;;  %v9825_v23 = vpop.permute.xlu0 %3855 }
 0x821   : > { %3833 = vperm.xlu0 %7876, %v9710_v60   ;;  %3737 = vperm.xlu1 %7873, %v9710_v60   ;;  %12095 = vst [vmem:[#allocation87_spill] sm:$0xff] %v9825_v23 }
 0x823   : > { %v9819_v5 = vpop.permute.xlu1 %4047 }
 0x824   : > { %12094 = vst [vmem:[#allocation86_spill] sm:$0xff] %v9819_v5  ;;  %v9833_v5 = vpop.permute.xlu0 %3919 }
 0x825   : > { %7878 = vset.pattern.permute.xlu0 %v12021_v22  ;;  %7875 = vset.pattern.permute.xlu1 %v12042_v55  ;;  %12097 = vst [vmem:[#allocation89_spill] sm:$0xff] %v9833_v5 }
 0x826   : > { %3897 = vperm.xlu0 %7878, %v9710_v60   ;;  %3801 = vperm.xlu1 %7875, %v9710_v60  }
 0x827   : > { %v9827_v47 = vpop.permute.xlu1 %4073 }
 0x828   : > { %12096 = vst [vmem:[#allocation88_spill] sm:$0xff] %v9827_v47 }
 0x82a   : > { %7881 = vset.pattern.permute.xlu0 %v12023_v7  ;;  %7877 = vset.pattern.permute.xlu1 %v12043_v41 }
 0x82b   : > { %3993 = vperm.xlu0 %7881, %v9710_v60   ;;  %3865 = vperm.xlu1 %7877, %v9710_v60  }
 0x82f   : > { %7883 = vset.pattern.permute.xlu0 %v12024_v21  ;;  %7879 = vset.pattern.permute.xlu1 %v12022_v35 }
 0x830   : > { %4057 = vperm.xlu0 %7883, %v9710_v60   ;;  %3929 = vperm.xlu1 %7879, %v9710_v60  }
 0x834   : > { %7885 = vset.pattern.permute.xlu0 %v12025_v29  ;;  %7880 = vset.pattern.permute.xlu1 %v12045_v42 }
 0x835   : > { %4121 = vperm.xlu0 %7885, %v9710_v60   ;;  %3961 = vperm.xlu1 %7880, %v9710_v60  }
 0x839   : > { %7887 = vset.pattern.permute.xlu0 %v12090_v46  ;;  %7882 = vset.pattern.permute.xlu1 %v12046_v20 }
 0x83a   : > { %4185 = vperm.xlu0 %7887, %v9710_v60   ;;  %4025 = vperm.xlu1 %7882, %v9710_v60  }
 0x83e   : > { %7888 = vset.pattern.permute.xlu0 %v12044_v48  ;;  %7884 = vset.pattern.permute.xlu1 %v12047_v61 }
 0x83f   : > { %3187 = vperm.xlu0 %7888, %v9716_v40   ;;  %4089 = vperm.xlu1 %7884, %v9710_v60  }
 0x843   : > { %7891 = vset.pattern.permute.xlu0 %v12034_v24  ;;  %7886 = vset.pattern.permute.xlu1 %v12051_v38  ;;  %v9835_v24 = vpop.permute.xlu1 %4105 }
 0x844   : > { %3293 = vperm.xlu0 %7891, %v9716_v40   ;;  %4153 = vperm.xlu1 %7886, %v9710_v60   ;;  %12098 = vst [vmem:[#allocation90_spill] sm:$0xff] %v9835_v24  ;;  %v9841_v60 = vpop.permute.xlu0 %3951 }
 0x845   : > { %12099 = vst [vmem:[#allocation91_spill] sm:$0xff] %v9841_v60 }
 0x848   : > { %7893 = vset.pattern.permute.xlu0 %v12035_v18  ;;  %7889 = vset.pattern.permute.xlu1 %v12033_v17  ;;  %v9845_v18 = vpop.permute.xlu1 %4111 }
 0x849   : > { %3357 = vperm.xlu0 %7893, %v9716_v40   ;;  %3229 = vperm.xlu1 %7889, %v9716_v40   ;;  %12100 = vst [vmem:[#allocation92_spill] sm:$0xff] %v9845_v18 }
 0x84d   : > { %7895 = vset.pattern.permute.xlu0 %v12036_v51  ;;  %7890 = vset.pattern.permute.xlu1 %v12026_v4  ;;  %v9851_v51 = vpop.permute.xlu0 %4015  ;;  %v9855_v4 = vpop.permute.xlu1 %4137 }
 0x84e   : > { %3421 = vperm.xlu0 %7895, %v9716_v40   ;;  %3261 = vperm.xlu1 %7890, %v9716_v40   ;;  %12101 = vst [vmem:[#allocation93_spill] sm:$0xff] %v9851_v51  ;;  %12102 = vst [vmem:[#allocation94_spill] sm:$0xff] %v9855_v4 }
 0x852   : > { %7897 = vset.pattern.permute.xlu0 %v12037_v32  ;;  %7892 = vset.pattern.permute.xlu1 %v12011_v43  ;;  %v9861_v32 = vpop.permute.xlu0 %4079 }
 0x853   : > { %3485 = vperm.xlu0 %7897, %v9716_v40   ;;  %3325 = vperm.xlu1 %7892, %v9716_v40   ;;  %12103 = vst [vmem:[#allocation95_spill] sm:$0xff] %v9861_v32 }
 0x857   : > { %7899 = vset.pattern.permute.xlu0 %v12038_v33  ;;  %7894 = vset.pattern.permute.xlu1 %v12012_v11  ;;  %v9863_v33 = vpop.permute.xlu1 %4169  ;;  %v9869_v11 = vpop.permute.xlu0 %4143 }
 0x858   : > { %3549 = vperm.xlu0 %7899, %v9716_v40   ;;  %3389 = vperm.xlu1 %7894, %v9716_v40   ;;  %12104 = vst [vmem:[#allocation96_spill] sm:$0xff] %v9863_v33  ;;  %12105 = vst [vmem:[#allocation97_spill] sm:$0xff] %v9869_v11 }
 0x85c   : > { %7901 = vset.pattern.permute.xlu0 %v12039_v0  ;;  %7896 = vset.pattern.permute.xlu1 %v12013_v52  ;;  %v9871_v0 = vpop.permute.xlu1 %4175  ;;  %v9877_v52 = vpop.permute.xlu0 %3279 }
 0x85d   : > { %3613 = vperm.xlu0 %7901, %v9716_v40   ;;  %3453 = vperm.xlu1 %7896, %v9716_v40   ;;  %12106 = vst [vmem:[#allocation98_spill] sm:$0xff] %v9871_v0 }
 0x861   : > { %7903 = vset.pattern.permute.xlu0 %v12040_v1  ;;  %7898 = vset.pattern.permute.xlu1 %v12014_v26  ;;  %v9879_v1 = vpop.permute.xlu1 %2983 }
 0x862   : > { %3677 = vperm.xlu0 %7903, %v9716_v40   ;;  %3517 = vperm.xlu1 %7898, %v9716_v40   ;;  %12107 = vst [vmem:[#allocation99_spill] sm:$0xff] %v9879_v1 }
 0x866   : > { %7905 = vset.pattern.permute.xlu0 %v12041_v50  ;;  %7900 = vset.pattern.permute.xlu1 %v12015_v15 }
 0x867   : > { %3741 = vperm.xlu0 %7905, %v9716_v40   ;;  %3581 = vperm.xlu1 %7900, %v9716_v40  }
 0x86b   : > { %7907 = vset.pattern.permute.xlu0 %v12042_v55  ;;  %7902 = vset.pattern.permute.xlu1 %v12016_v9 }
 0x86c   : > { %3805 = vperm.xlu0 %7907, %v9716_v40   ;;  %3645 = vperm.xlu1 %7902, %v9716_v40  }
 0x86f   : > { %v3258_v26 = vpop.permute.xlu0 %3257  ;;  %v3183_v50 = vpop.permute.xlu1 %3182 }
 0x870   : > { %7909 = vset.pattern.permute.xlu0 %v12043_v41  ;;  %7904 = vset.pattern.permute.xlu1 %v12017_v12 }
 0x871   : > { %3869 = vperm.xlu0 %7909, %v9716_v40   ;;  %3709 = vperm.xlu1 %7904, %v9716_v40  }
 0x874   : > { %v9889_v15 = vpop.permute.xlu0 %3321  ;;  %v3226_v43 = vpop.permute.xlu1 %3225 }
 0x875   : > { %7911 = vset.pattern.permute.xlu0 %v12022_v35  ;;  %7906 = vset.pattern.permute.xlu1 %v12018_v37 }
 0x876   : > { %3933 = vperm.xlu0 %7911, %v9716_v40   ;;  %3773 = vperm.xlu1 %7906, %v9716_v40  }
 0x879   : > { %v9895_v55 = vpop.permute.xlu0 %3385  ;;  %v3290_v41 = vpop.permute.xlu1 %3289 }
 0x87a   : > { %7912 = vset.pattern.permute.xlu0 %v12045_v42  ;;  %7908 = vset.pattern.permute.xlu1 %v12019_v14  ;;  %v9917_v14 = vpop.f32.mrf.mxu1 }
 0x87b   : > { %3965 = vperm.xlu0 %7912, %v9716_v40   ;;  %3837 = vperm.xlu1 %7908, %v9716_v40  }
 0x87c   : > { %v3163_v9 = vpop.f32.mrf.mxu1 }
 0x87d   : > { %v9946_v33 = vrot.slane %v3163_v9, %v8946_v25  ;;  %v9956_v62 = vrot.slane %v3163_v9, %v8961_v56 }
 0x87e   : > { %v9901_v12 = vpop.permute.xlu0 %3449  ;;  %v9903_v35 = vpop.permute.xlu1 %3353 }
 0x87f   : > { %7914 = vset.pattern.permute.xlu0 %v12046_v20  ;;  %7910 = vset.pattern.permute.xlu1 %v12021_v22  ;;  %v3300_v32 = vadd.f32 %v9956_v62, %v3290_v41  ;;  %v9988_v5 = vpop.f32.mrf.mxu1 }
 0x880   : > { %4029 = vperm.xlu0 %7914, %v9716_v40   ;;  %3901 = vperm.xlu1 %7910, %v9716_v40   ;;  %12110 = vst [vmem:[#allocation102_spill] sm:$0xff] %v9988_v5 }
 0x881   : > { %vm3302_vm10 = vcmp.gt.f32.partialorder %v3300_v32, 0.0 }
 0x883   : > { %v9909_v37 = vpop.permute.xlu0 %3513  ;;  %v9911_v42 = vpop.permute.xlu1 %3417 }
 0x884   : > { %7916 = vset.pattern.permute.xlu0 %v12047_v61  ;;  %7913 = vset.pattern.permute.xlu1 %v12023_v7  ;;  %v9928_v61 = vrot.slane %v3163_v9, %v8941_v54  ;;  %v9932_v7 = vrot.slane %v3163_v9, %v8521_v10 }
 0x885   : > { %4093 = vperm.xlu0 %7916, %v9716_v40   ;;  %3997 = vperm.xlu1 %7913, %v9716_v40  }
 0x886   : > { %v3194_v11 = vadd.f32 %v9932_v7, %v3183_v50 }
 0x888   : > { %v9919_v20 = vpop.permute.xlu0 %3577  ;;  %v9921_v22 = vpop.permute.xlu1 %3481  ;;  %v3207_v50 = vmul.f32 %v9594_v49, %v3194_v11  ;;  %vm3196_vm2 = vcmp.gt.f32.partialorder %v3194_v11, 0.0 }
 0x889   : > { %7918 = vset.pattern.permute.xlu0 %v12051_v38  ;;  %7915 = vset.pattern.permute.xlu1 %v12024_v21  ;;  %v2981_v38 = vsel %vm11757_vm13, 1, %v12044_v48  ;;  %v3236_v21 = vadd.f32 %v9928_v61, %v3226_v43  ;;  %v3268_v43 = vadd.f32 %v9946_v33, %v3258_v26  ;;  %v9972_v26 = vrot.slane %v3163_v9, %v11951_v8 }
 0x88a   : > { %4157 = vperm.xlu0 %7918, %v9716_v40   ;;  %4061 = vperm.xlu1 %7915, %v9716_v40  }
 0x88b   : > { %v3250_v18 = vmul.f32 %v9637_v31, %v3236_v21  ;;  %vm3238_vm0 = vcmp.gt.f32.partialorder %v3236_v21, 0.0  ;;  %vm3270_vm8 = vcmp.gt.f32.partialorder %v3268_v43, 0.0 }
 0x88d   : > { %v9934_v17 = vpop.permute.xlu0 %3641  ;;  %v9936_v0 = vpop.permute.xlu1 %3545 }
 0x88e   : > { %7919 = vset.pattern.permute.xlu0 %v12044_v48  ;;  %7917 = vset.pattern.permute.xlu1 %v12025_v29  ;;  %v3244_v29 = vmul.f32 %v9633_v63, %v3236_v21  ;;  %v3276_v21 = vmul.f32 %v9642_v34, %v3268_v43 }
 0x88f   : > { %2986 = vperm.xlu0 %7919, %v2981_v38   ;;  %4125 = vperm.xlu1 %7917, %v9716_v40   ;;  %v3218_v38 = vmul.f32 %v9629_v59, %v3194_v11  ;;  %v3308_v11 = vmul.f32 %v9646_v39, %v3300_v32 }
 0x890   : > { %v3252_v24 = vsel %vm3238_vm0, %v3244_v29, %v3250_v18  ;;  %v3314_v29 = vmul.f32 %v9649_v3, %v3300_v32  ;;  %v9977_v18 = vrot.slane %v3163_v9, %v8993_v44  ;;  %v12111_v32 = vld [vmem:[#allocation73_spill] sm:$0xff] }
 0x892   : > { %v9949_v4 = vpop.permute.xlu0 %3705  ;;  %v9951_v1 = vpop.permute.xlu1 %3609 }
 0x893   : > { %7920 = vset.pattern.permute.xlu1 %v12090_v46  ;;  %v3220_v46 = vsel %vm3196_vm2, %v3207_v50, %v3218_v38  ;;  %v3332_v38 = vadd.f32 %v9972_v26, %v9889_v15 }
 0x894   : > { %4201 = vperm.xlu1 %7920, %v9473_v30   ;;  %v3282_v30 = vmul.f32 %v9877_v52, %v3268_v43  ;;  %v3254_v60 = vadd.f32 %v3252_v24, %v3220_v46  ;;  %v3316_v24 = vsel %vm3302_vm10, %v3308_v11, %v3314_v29  ;;  %v3364_v46 = vadd.f32 %v9977_v18, %v9903_v35  ;;  %v12116_v35 = vld [vmem:[#allocation68_spill] sm:$0xff] }
 0x895   : > { %v3340_v23 = vmul.f32 %v12111_v32, %v3332_v38  ;;  %vm3334_vm9 = vcmp.gt.f32.partialorder %v3332_v38, 0.0 }
 0x896   : > { %v3284_v50 = vsel %vm3270_vm8, %v3276_v21, %v3282_v30  ;;  %v3378_v29 = vmul.f32 %v12116_v35, %v3364_v46  ;;  %vm3366_vm0 = vcmp.gt.f32.partialorder %v3364_v46, 0.0 }
 0x897   : > { %v9964_v47 = vpop.permute.xlu0 %3769  ;;  %v9966_v51 = vpop.permute.xlu1 %3673  ;;  %v3286_v43 = vadd.f32 %v3284_v50, %v3254_v60  ;;  %v12115_v60 = vld [vmem:[#allocation56_spill] sm:$0xff]  ;;  %v12117_v50 = vld [vmem:[#allocation78_spill] sm:$0xff] }
 0x898   : > { %12108 = vst [vmem:[#allocation100_spill] sm:$0xff] %v9964_v47  ;;  %4189 = vperm.xlu1 %7920, %v9716_v40   ;;  %v3372_v11 = vmul.f32 %v12115_v60, %v3364_v46  ;;  %v10003_v5 = vrot.slane %v3163_v9, %v12117_v50  ;;  %v10007_v47 = vpop.f32.mrf.mxu1  ;;  %v12122_v46 = vld [vmem:[#allocation43_spill] sm:$0xff] }
 0x899   : > { %v3318_v15 = vadd.f32 %v3316_v24, %v3286_v43  ;;  %v12120_v24 = vld [vmem:[#allocation57_spill] sm:$0xff] }
 0x89a   : > { %v3428_v43 = vadd.f32 %v10003_v5, %v9911_v42 }
 0x89c   : > { %v9979_v41 = vpop.permute.xlu0 %3833  ;;  %4207 = vperm.xlu1 %7920, %v9477_v13   ;;  %v9982_v40 = vpop.permute.xlu1 %3737  ;;  %v12112_v13 = vld [vmem:[#allocation77_spill] sm:$0xff]  ;;  %vm3430_vm8 = vcmp.gt.f32.partialorder %v3428_v43, 0.0 }
 0x89d   : > { %12109 = vst [vmem:[#allocation101_spill] sm:$0xff] %v9979_v41  ;;  %v3346_v41 = vmul.f32 %v9753_v36, %v3332_v38  ;;  %v9994_v16 = vrot.slane %v3163_v9, %v12112_v13  ;;  %v3380_v38 = vsel %vm3366_vm0, %v3372_v11, %v3378_v29  ;;  %v10025_v11 = vrot.slane %v10007_v47, %v8941_v54 }
 0x89f   : > { %v3396_v19 = vadd.f32 %v9994_v16, %v9895_v55 }
 0x8a0   : > { %7921 = vset.pattern.permute.xlu1 %v12044_v48  ;;  %v3348_v48 = vsel %vm3334_vm9, %v3340_v23, %v3346_v41  ;;  %v10019_v23 = vrot.slane %v10007_v47, %v8521_v10  ;;  %v12121_v41 = vld [vmem:[#allocation35_spill] sm:$0xff] }
 0x8a1   : > { %v9996_v21 = vpop.permute.xlu0 %3897  ;;  %v9998_v30 = vpop.permute.xlu1 %3801  ;;  %v3350_v53 = vadd.f32 %v3348_v48, %v3318_v15  ;;  %v3404_v36 = vmul.f32 %v12120_v24, %v3396_v19  ;;  %v3410_v9 = vmul.f32 %v9763_v57, %v3396_v19  ;;  %vm3398_vm2 = vcmp.gt.f32.partialorder %v3396_v19, 0.0 }
 0x8a2   : > { %12113 = vst [vmem:[#allocation73_spill] sm:$0xff] %v9996_v21  ;;  %12114 = vst [vmem:[#allocation77_spill] sm:$0xff] %v9998_v30  ;;  %v3436_v48 = vmul.f32 %v12121_v41, %v3428_v43  ;;  %v3442_v15 = vmul.f32 %v12122_v46, %v3428_v43  ;;  %v12127_v46 = vld [vmem:[#allocation67_spill] sm:$0xff]  ;;  %v10043_v43 = vrot.slane %v10007_v47, %v8946_v25 }
 0x8a3   : > { %v3382_v55 = vadd.f32 %v3380_v38, %v3350_v53  ;;  %v3492_v53 = vadd.f32 %v10025_v11, %v9921_v22  ;;  %v10049_v22 = vrot.slane %v10007_v47, %v8961_v56 }
 0x8a4   : > { %v3444_v19 = vsel %vm3430_vm8, %v3436_v48, %v3442_v15  ;;  %12128 = vst [vmem:[#allocation107_spill] sm:$0xff] %v10043_v43  ;;  %v3524_v15 = vadd.f32 %v10043_v43, %v9909_v37  ;;  %v12134_v37 = vld [vmem:[#allocation30_spill] sm:$0xff] }
 0x8a5   : > { %vm3494_vm9 = vcmp.gt.f32.partialorder %v3492_v53, 0.0 }
 0x8a6   : > { %v10009_v21 = vpop.permute.xlu0 %3993  ;;  %v10011_v30 = vpop.permute.xlu1 %3865 }
 0x8a7   : > { %12118 = vst [vmem:[#allocation56_spill] sm:$0xff] %v10009_v21  ;;  %12119 = vst [vmem:[#allocation68_spill] sm:$0xff] %v10011_v30  ;;  %v3412_v21 = vsel %vm3398_vm2, %v3404_v36, %v3410_v9  ;;  %v3460_v30 = vadd.f32 %v10019_v23, %v9901_v12  ;;  %v12129_v12 = vld [vmem:[#allocation36_spill] sm:$0xff]  ;;  %v12130_v9 = vld [vmem:[#allocation37_spill] sm:$0xff]  ;;  %vm3526_vm2 = vcmp.gt.f32.partialorder %v3524_v15, 0.0 }
 0x8a8   : > { %v3414_v57 = vadd.f32 %v3412_v21, %v3382_v55  ;;  %v3500_v21 = vmul.f32 %v12129_v12, %v3492_v53  ;;  %v3506_v55 = vmul.f32 %v12130_v9, %v3492_v53  ;;  %v3538_v9 = vmul.f32 %v9781_v28, %v3524_v15  ;;  %v12143_v28 = vld [vmem:[#allocation59_spill] sm:$0xff] }
 0x8a9   : > { %v3468_v41 = vmul.f32 %v12127_v46, %v3460_v30  ;;  %vm3462_vm10 = vcmp.gt.f32.partialorder %v3460_v30, 0.0 }
 0x8aa   : > { %v3446_v36 = vadd.f32 %v3444_v19, %v3414_v57  ;;  %v3556_v57 = vadd.f32 %v10049_v22, %v9936_v0 }
 0x8ab   : > { %v10027_v29 = vpop.permute.xlu0 %4057  ;;  %v10029_v42 = vpop.permute.xlu1 %3929 }
 0x8ac   : > { %12123 = vst [vmem:[#allocation103_spill] sm:$0xff] %v10027_v29  ;;  %12124 = vst [vmem:[#allocation104_spill] sm:$0xff] %v10029_v42  ;;  %v3474_v29 = vmul.f32 %v9773_v2, %v3460_v30  ;;  %v3508_v30 = vsel %vm3494_vm9, %v3500_v21, %v3506_v55  ;;  %v12133_v2 = vld [vmem:[#allocation58_spill] sm:$0xff] }
 0x8ad   : > { %v3532_v46 = vmul.f32 %v12133_v2, %v3524_v15  ;;  %v3570_v2 = vmul.f32 %v12143_v28, %v3556_v57 }
 0x8ae   : > { %v3476_v48 = vsel %vm3462_vm10, %v3468_v41, %v3474_v29  ;;  %v10064_v41 = vrot.slane %v10007_v47, %v11951_v8  ;;  %v12135_v29 = vld [vmem:[#allocation31_spill] sm:$0xff]  ;;  %vm3558_vm10 = vcmp.gt.f32.partialorder %v3556_v57, 0.0 }
 0x8af   : > { %v3478_v42 = vadd.f32 %v3476_v48, %v3446_v36  ;;  %vm12136_vm0 = vcmp.eq.s32.totalorder %v12134_v37, %v12135_v29  ;;  %v12139_v48 = vld [vmem:[#allocation28_spill] sm:$0xff]  ;;  %v10085_v37 = vrot.slane %v10007_v47, %v8993_v44  ;;  %v12147_v44 = vld [vmem:[#allocation38_spill] sm:$0xff] }
 0x8b0   : > { %v10035_v38 = vpop.permute.xlu0 %4121  ;;  %v10037_v24 = vpop.permute.xlu1 %3961  ;;  %v10070_v53 = vsel %vm12136_vm0, 1.0, %v12008_v27  ;;  %vm12140_vm8 = vcmp.eq.s32.totalorder %v12139_v48, %v12135_v29  ;;  %v3588_v36 = vadd.f32 %v10064_v41, %v9919_v20 }
 0x8b1   : > { %12125 = vst [vmem:[#allocation105_spill] sm:$0xff] %v10035_v38  ;;  %12126 = vst [vmem:[#allocation106_spill] sm:$0xff] %v10037_v24  ;;  %v3510_v0 = vadd.f32 %v3508_v30, %v3478_v42  ;;  %v10079_v19 = vsel %vm12140_vm8, 1.0, %v12008_v27  ;;  %v12144_v42 = vunpack.i.h.bf16 %v9767_v58  ;;  %v3540_v30 = vsel %vm3526_vm2, %v3532_v46, %v3538_v9 }
 0x8b2   : > { %12137 = vst [vmem:[#allocation109_spill] sm:$0xff] %v10070_v53  ;;  %12141 = vst [vmem:[#allocation111_spill] sm:$0xff] %v10079_v19  ;;  %v12145_v27 = vunpack.i.l.bf16 %v9767_v58  ;;  %v3620_v28 = vadd.f32 %v10085_v37, %v9951_v1  ;;  %v3602_v46 = vmul.f32 %v9789_v45, %v3588_v36  ;;  %vm3590_vm9 = vcmp.gt.f32.partialorder %v3588_v36, 0.0  ;;  %v12149_v1 = vld [vmem:[#allocation39_spill] sm:$0xff] }
 0x8b3   : > { %v2954_v15 = vmul.f32 %v12144_v42, %v10070_v53  ;;  %v3542_v48 = vadd.f32 %v3540_v30, %v3510_v0  ;;  %v3596_v42 = vmul.f32 %v12147_v44, %v3588_v36  ;;  %v10111_v30 = vrot.slane %v10007_v47, %v12117_v50 }
 0x8b4   : > { %v2953_v29 = vmul.f32 %v12145_v27, %v10079_v19  ;;  %v10105_v27 = vrot.slane %v10007_v47, %v12112_v13  ;;  %v3634_v0 = vmul.f32 %v12149_v1, %v3620_v28  ;;  %vm3622_vm0 = vcmp.gt.f32.partialorder %v3620_v28, 0.0 }
 0x8b5   : > { %v10053_v38 = vpop.permute.xlu0 %4185  ;;  %v10055_v24 = vpop.permute.xlu1 %4025  ;;  %v3604_v36 = vsel %vm3590_vm9, %v3596_v42, %v3602_v46  ;;  %v3684_v45 = vadd.f32 %v10111_v30, %v9966_v51 }
 0x8b6   : > { %12131 = vst [vmem:[#allocation36_spill] sm:$0xff] %v10053_v38  ;;  %12132 = vst [vmem:[#allocation108_spill] sm:$0xff] %v10055_v24  ;;  %v12142_v38 = vld [vmem:[#allocation71_spill] sm:$0xff]  ;;  %v2955_v20 = vsel %vm11767_vm12, %v2953_v29, 0.0 }
 0x8b7   : > { %v3564_v24 = vmul.f32 %v12142_v38, %v3556_v57  ;;  %v2956_v57 = vsel %vm11767_vm12, %v2954_v15, 0.0  ;;  %vm3686_vm9 = vcmp.gt.f32.partialorder %v3684_v45, 0.0 }
 0x8b8   : > { %v2957_v29 = vadd.f32 %v2956_v57, %v2955_v20  ;;  %v12151_v57 = vld [vmem:[#allocation61_spill] sm:$0xff]  ;;  %v12152_v20 = vld [vmem:[#allocation74_spill] sm:$0xff] }
 0x8b9   : > { %v3692_v42 = vmul.f32 %v12151_v57, %v3684_v45 }
 0x8ba   : > { %v3188_v21 = vpop.permute.xlu0 %3187  ;;  %v10073_v55 = vpop.permute.xlu1 %4089 }
 0x8bb   : > { %12138 = vst [vmem:[#allocation110_spill] sm:$0xff] %v10073_v55  ;;  %v3572_v55 = vsel %vm3558_vm10, %v3564_v24, %v3570_v2  ;;  %v12148_v24 = vld [vmem:[#allocation45_spill] sm:$0xff]  ;;  %v3195_v15 = vadd.f32 %v9932_v7, %v3188_v21 }
 0x8bc   : > { %v3574_v2 = vadd.f32 %v3572_v55, %v3542_v48  ;;  %v3628_v9 = vmul.f32 %v12148_v24, %v3620_v28  ;;  %v3652_v55 = vadd.f32 %v10105_v27, %v9934_v17  ;;  %v10126_v17 = vrot.slane %v9917_v14, %v8521_v10 }
 0x8bd   : > { %v3208_v47 = vmul.f32 %v9594_v49, %v3195_v15  ;;  %v3219_v44 = vmul.f32 %v9629_v59, %v3195_v15  ;;  %vm3197_vm8 = vcmp.gt.f32.partialorder %v3195_v15, 0.0  ;;  %v12150_v59 = vld [vmem:[#allocation40_spill] sm:$0xff] }
 0x8be   : > { %v3606_v48 = vadd.f32 %v3604_v36, %v3574_v2  ;;  %vm3654_vm10 = vcmp.gt.f32.partialorder %v3652_v55, 0.0  ;;  %v3698_v2 = vmul.f32 %v12152_v20, %v3684_v45  ;;  %v12154_v45 = vld [vmem:[#allocation60_spill] sm:$0xff] }
 0x8bf   : > { %v3294_v38 = vpop.permute.xlu0 %3293  ;;  %v10097_v43 = vpop.permute.xlu1 %4153 }
 0x8c0   : > { %12146 = vst [vmem:[#allocation112_spill] sm:$0xff] %v10097_v43  ;;  %v3636_v43 = vsel %vm3622_vm0, %v3628_v9, %v3634_v0  ;;  %v3301_v7 = vadd.f32 %v9956_v62, %v3294_v38  ;;  %v3660_v62 = vmul.f32 %v12150_v59, %v3652_v55  ;;  %v3666_v38 = vmul.f32 %v9797_v6, %v3652_v55 }
 0x8c1   : > { %v3221_v9 = vsel %vm3197_vm8, %v3208_v47, %v3219_v44 }
 0x8c2   : > { %v3309_v0 = vmul.f32 %v9646_v39, %v3301_v7  ;;  %v3315_v15 = vmul.f32 %v9649_v3, %v3301_v7  ;;  %v3668_v39 = vsel %vm3654_vm10, %v3660_v62, %v3666_v38  ;;  %v3716_v3 = vadd.f32 %v10126_v17, %v9949_v4 }
 0x8c4   : > { %v3358_v19 = vpop.permute.xlu0 %3357  ;;  %v3230_v53 = vpop.permute.xlu1 %3229  ;;  %vm3718_vm10 = vcmp.gt.f32.partialorder %v3716_v3, 0.0  ;;  %v3724_v62 = vmul.f32 %v12154_v45, %v3716_v3 }
 0x8c5   : > { %v3237_v58 = vadd.f32 %v9928_v61, %v3230_v53  ;;  %v2958_v61 = vrot.slane %v2957_v29, 4  ;;  %v10130_v53 = vrot.slane %v9917_v14, %v8941_v54  ;;  %v3365_v36 = vadd.f32 %v9977_v18, %v3358_v19 }
 0x8c7   : > { %vm3239_vm2 = vcmp.gt.f32.partialorder %v3237_v58, 0.0  ;;  %v3245_v28 = vmul.f32 %v9633_v63, %v3237_v58  ;;  %v3251_v21 = vmul.f32 %v9637_v31, %v3237_v58  ;;  %v3638_v31 = vadd.f32 %v3636_v43, %v3606_v48 }
 0x8c8   : > { %v10143_v43 = vadd.f32 %v2958_v61, %v2957_v29  ;;  %v10147_v58 = vrot.slane %v9917_v14, %v8946_v25  ;;  %v3748_v29 = vadd.f32 %v10130_v53, %v9982_v40  ;;  %v3379_v61 = vmul.f32 %v12116_v35, %v3365_v36 }
 0x8c9   : > { %v3422_v51 = vpop.permute.xlu0 %3421  ;;  %v3262_v49 = vpop.permute.xlu1 %3261  ;;  %v3253_v46 = vsel %vm3239_vm2, %v3245_v28, %v3251_v21  ;;  %vm3303_vm2 = vcmp.gt.f32.partialorder %v3301_v7, 0.0  ;;  %v3670_v19 = vadd.f32 %v3668_v39, %v3638_v31  ;;  %v3373_v7 = vmul.f32 %v12115_v60, %v3365_v36 }
 0x8ca   : > { %v3269_v63 = vadd.f32 %v9946_v33, %v3262_v49  ;;  %v3255_v48 = vadd.f32 %v3253_v46, %v3221_v9  ;;  %v3317_v21 = vsel %vm3303_vm2, %v3309_v0, %v3315_v15  ;;  %v3429_v55 = vadd.f32 %v10003_v5, %v3422_v51  ;;  %v12157_v46 = vld [vmem:[#allocation47_spill] sm:$0xff] }
 0x8cb   : > { %v10164_v40 = vrot.slane %v9917_v14, %v8961_v56  ;;  %v12158_v15 = vld [vmem:[#allocation35_spill] sm:$0xff] }
 0x8cc   : > { %vm3271_vm0 = vcmp.gt.f32.partialorder %v3269_v63, 0.0  ;;  %v3277_v6 = vmul.f32 %v9642_v34, %v3269_v63  ;;  %v3283_v33 = vmul.f32 %v9877_v52, %v3269_v63  ;;  %v3700_v52 = vsel %vm3686_vm9, %v3692_v42, %v3698_v2  ;;  %v12155_v63 = vld [vmem:[#allocation83_spill] sm:$0xff] }
 0x8cd   : > { %vm3367_vm9 = vcmp.gt.f32.partialorder %v3365_v36, 0.0  ;;  %v3730_v35 = vmul.f32 %v12155_v63, %v3716_v3  ;;  %v3702_v31 = vadd.f32 %v3700_v52, %v3670_v19  ;;  %v3762_v2 = vmul.f32 %v12157_v46, %v3748_v29  ;;  %v12161_v19 = vld [vmem:[#allocation52_spill] sm:$0xff] }
 0x8ce   : > { %v3486_v44 = vpop.permute.xlu0 %3485  ;;  %v3326_v47 = vpop.permute.xlu1 %3325  ;;  %v3285_v18 = vsel %vm3271_vm0, %v3277_v6, %v3283_v33  ;;  %v12153_v6 = vld [vmem:[#allocation49_spill] sm:$0xff]  ;;  %vm3750_vm0 = vcmp.gt.f32.partialorder %v3748_v29, 0.0  ;;  %v3381_v0 = vsel %vm3367_vm9, %v3373_v7, %v3379_v61  ;;  %v3437_v33 = vmul.f32 %v12158_v15, %v3429_v55 }
 0x8cf   : > { %v3333_v34 = vadd.f32 %v9972_v26, %v3326_v47  ;;  %v3287_v28 = vadd.f32 %v3285_v18, %v3255_v48  ;;  %v12159_v48 = vld [vmem:[#allocation43_spill] sm:$0xff]  ;;  %v3493_v36 = vadd.f32 %v10025_v11, %v3486_v44  ;;  %v12160_v18 = vld [vmem:[#allocation57_spill] sm:$0xff]  ;;  %v3732_v11 = vsel %vm3718_vm10, %v3724_v62, %v3730_v35  ;;  %v12162_v44 = vld [vmem:[#allocation100_spill] sm:$0xff] }
 0x8d0   : > { %v3443_v47 = vmul.f32 %v12159_v48, %v3429_v55  ;;  %v12164_v15 = vld [vmem:[#allocation37_spill] sm:$0xff]  ;;  %v12165_v35 = vld [vmem:[#allocation67_spill] sm:$0xff] }
 0x8d1   : > { %vm3335_vm8 = vcmp.gt.f32.partialorder %v3333_v34, 0.0  ;;  %v3319_v49 = vadd.f32 %v3317_v21, %v3287_v28  ;;  %v3341_v4 = vmul.f32 %v12111_v32, %v3333_v34  ;;  %v3347_v26 = vmul.f32 %v12153_v6, %v3333_v34  ;;  %v12156_v32 = vld [vmem:[#allocation42_spill] sm:$0xff] }
 0x8d2   : > { %v3756_v51 = vmul.f32 %v12156_v32, %v3748_v29  ;;  %v10178_v28 = vrot.slane %v9917_v14, %v11951_v8  ;;  %v10182_v21 = vrot.slane %v9917_v14, %v12112_v13  ;;  %v3507_v48 = vmul.f32 %v12164_v15, %v3493_v36  ;;  %v12167_v29 = vld [vmem:[#allocation44_spill] sm:$0xff]  ;;  %v12174_v15 = vld [vmem:[#allocation59_spill] sm:$0xff] }
 0x8d3   : > { %v3550_v38 = vpop.permute.xlu0 %3549  ;;  %v3390_v60 = vpop.permute.xlu1 %3389  ;;  %v3349_v42 = vsel %vm3335_vm8, %v3341_v4, %v3347_v26  ;;  %vm3431_vm8 = vcmp.gt.f32.partialorder %v3429_v55, 0.0  ;;  %v3734_v26 = vadd.f32 %v3732_v11, %v3702_v31  ;;  %v3501_v55 = vmul.f32 %v12129_v12, %v3493_v36 }
 0x8d4   : > { %v3397_v5 = vadd.f32 %v9994_v16, %v3390_v60  ;;  %v3351_v9 = vadd.f32 %v3349_v42, %v3319_v49  ;;  %v3780_v49 = vadd.f32 %v10147_v58, %v12162_v44  ;;  %v3764_v60 = vsel %vm3750_vm0, %v3756_v51, %v3762_v2  ;;  %v12163_v42 = vld [vmem:[#allocation77_spill] sm:$0xff]  ;;  %v12168_v51 = vld [vmem:[#allocation76_spill] sm:$0xff]  ;;  %v12172_v44 = vld [vmem:[#allocation63_spill] sm:$0xff] }
 0x8d5   : > { %v3557_v3 = vadd.f32 %v10049_v22, %v3550_v38  ;;  %v10199_v2 = vrot.slane %v9917_v14, %v12168_v51  ;;  %vm3495_vm0 = vcmp.gt.f32.partialorder %v3493_v36, 0.0  ;;  %v12170_v22 = vld [vmem:[#allocation107_spill] sm:$0xff]  ;;  %v12175_v16 = vld [vmem:[#allocation58_spill] sm:$0xff] }
 0x8d6   : > { %vm3399_vm2 = vcmp.gt.f32.partialorder %v3397_v5, 0.0  ;;  %v3383_v39 = vadd.f32 %v3381_v0, %v3351_v9  ;;  %v3405_v34 = vmul.f32 %v12160_v18, %v3397_v5  ;;  %v3411_v52 = vmul.f32 %v12161_v19, %v3397_v5 }
 0x8d7   : > { %v3812_v5 = vadd.f32 %v10164_v40, %v12163_v42  ;;  %v3445_v0 = vsel %vm3431_vm8, %v3437_v33, %v3443_v47  ;;  %vm3782_vm10 = vcmp.gt.f32.partialorder %v3780_v49, 0.0  ;;  %v3788_v31 = vmul.f32 %v12167_v29, %v3780_v49  ;;  %v12169_v47 = vld [vmem:[#allocation85_spill] sm:$0xff] }
 0x8d8   : > { %v3614_v7 = vpop.permute.xlu0 %3613  ;;  %v3454_v61 = vpop.permute.xlu1 %3453  ;;  %v3413_v4 = vsel %vm3399_vm2, %v3405_v34, %v3411_v52  ;;  %v12166_v34 = vld [vmem:[#allocation53_spill] sm:$0xff]  ;;  %v3766_v19 = vadd.f32 %v3764_v60, %v3734_v26  ;;  %v3509_v42 = vsel %vm3495_vm0, %v3501_v55, %v3507_v48  ;;  %v12176_v60 = vld [vmem:[#allocation64_spill] sm:$0xff] }
 0x8d9   : > { %v3461_v6 = vadd.f32 %v10019_v23, %v3454_v61  ;;  %v3415_v9 = vadd.f32 %v3413_v4, %v3383_v39  ;;  %v3794_v39 = vmul.f32 %v12169_v47, %v3780_v49  ;;  %vm3814_vm2 = vcmp.gt.f32.partialorder %v3812_v5, 0.0  ;;  %v12171_v61 = vld [vmem:[#allocation46_spill] sm:$0xff] }
 0x8da   : > { %v3820_v11 = vmul.f32 %v12171_v61, %v3812_v5  ;;  %v3826_v4 = vmul.f32 %v12172_v44, %v3812_v5  ;;  %v3621_v36 = vadd.f32 %v10085_v37, %v3614_v7  ;;  %v12182_v5 = vld [vmem:[#allocation75_spill] sm:$0xff] }
 0x8db   : > { %vm3463_vm9 = vcmp.gt.f32.partialorder %v3461_v6, 0.0  ;;  %v3447_v62 = vadd.f32 %v3445_v0, %v3415_v9  ;;  %v3469_v18 = vmul.f32 %v12165_v35, %v3461_v6  ;;  %v3475_v23 = vmul.f32 %v12166_v34, %v3461_v6  ;;  %v12173_v9 = vld [vmem:[#allocation71_spill] sm:$0xff] }
 0x8dc   : > { %v3565_v0 = vmul.f32 %v12173_v9, %v3557_v3  ;;  %v3571_v35 = vmul.f32 %v12174_v15, %v3557_v3  ;;  %v3796_v7 = vsel %vm3782_vm10, %v3788_v31, %v3794_v39  ;;  %v12180_v39 = vld [vmem:[#allocation38_spill] sm:$0xff] }
 0x8dd   : > { %v3678_v33 = vpop.permute.xlu0 %3677  ;;  %v3518_v12 = vpop.permute.xlu1 %3517  ;;  %v3477_v52 = vsel %vm3463_vm9, %v3469_v18, %v3475_v23  ;;  %v12177_v23 = vld [vmem:[#allocation102_spill] sm:$0xff]  ;;  %vm3559_vm9 = vcmp.gt.f32.partialorder %v3557_v3, 0.0  ;;  %v3629_v3 = vmul.f32 %v12148_v24, %v3621_v36 }
 0x8de   : > { %v3525_v38 = vadd.f32 %v12170_v22, %v3518_v12  ;;  %v3479_v6 = vadd.f32 %v3477_v52, %v3447_v62  ;;  %v10212_v12 = vrot.slane %v12177_v23, %v8941_v54  ;;  %v10216_v62 = vrot.slane %v9917_v14, %v12117_v50  ;;  %v12179_v14 = vld [vmem:[#allocation68_spill] sm:$0xff] }
 0x8df   : > { %v10220_v55 = vrot.slane %v12177_v23, %v8521_v10  ;;  %v3876_v9 = vadd.f32 %v10199_v2, %v12179_v14  ;;  %v3635_v54 = vmul.f32 %v12149_v1, %v3621_v36  ;;  %v3685_v49 = vadd.f32 %v10111_v30, %v3678_v33  ;;  %v12185_v33 = vld [vmem:[#allocation62_spill] sm:$0xff] }
 0x8e0   : > { %vm3527_vm8 = vcmp.gt.f32.partialorder %v3525_v38, 0.0  ;;  %v3511_v34 = vadd.f32 %v3509_v42, %v3479_v6  ;;  %v3533_v26 = vmul.f32 %v12175_v16, %v3525_v38  ;;  %v3539_v18 = vmul.f32 %v12176_v60, %v3525_v38  ;;  %v12178_v16 = vld [vmem:[#allocation101_spill] sm:$0xff] }
 0x8e1   : > { %v3844_v52 = vadd.f32 %v10178_v28, %v12178_v16  ;;  %v3798_v6 = vadd.f32 %v3796_v7, %v3766_v19  ;;  %v3828_v42 = vsel %vm3814_vm2, %v3820_v11, %v3826_v4  ;;  %v3573_v60 = vsel %vm3559_vm9, %v3565_v0, %v3571_v35  ;;  %v12183_v11 = vld [vmem:[#allocation87_spill] sm:$0xff]  ;;  %v12184_v35 = vld [vmem:[#allocation73_spill] sm:$0xff]  ;;  %v12186_v16 = vld [vmem:[#allocation48_spill] sm:$0xff] }
 0x8e2   : > { %v3742_v48 = vpop.permute.xlu0 %3741  ;;  %v3582_v37 = vpop.permute.xlu1 %3581  ;;  %v3541_v22 = vsel %vm3527_vm8, %v3533_v26, %v3539_v18  ;;  %v12181_v18 = vld [vmem:[#allocation79_spill] sm:$0xff]  ;;  %vm3623_vm2 = vcmp.gt.f32.partialorder %v3621_v36, 0.0  ;;  %v10238_v24 = vadd.f32 %v10182_v21, %v12184_v35  ;;  %vm3878_vm8 = vcmp.gt.f32.partialorder %v3876_v9, 0.0 }
 0x8e3   : > { %v3589_v38 = vadd.f32 %v10064_v41, %v3582_v37  ;;  %v3543_v15 = vadd.f32 %v3541_v22, %v3511_v34  ;;  %vm3846_vm10 = vcmp.gt.f32.partialorder %v3844_v52, 0.0  ;;  %v3852_v19 = vmul.f32 %v12182_v5, %v3844_v52 }
 0x8e4   : > { %v3858_v4 = vmul.f32 %v12183_v11, %v3844_v52  ;;  %v3830_v1 = vadd.f32 %v3828_v42, %v3798_v6  ;;  %v3884_v7 = vmul.f32 %v12185_v33, %v3876_v9  ;;  %v3890_v22 = vmul.f32 %v12186_v16, %v3876_v9  ;;  %v12187_v42 = vld [vmem:[#allocation81_spill] sm:$0xff] }
 0x8e5   : > { %vm3591_vm0 = vcmp.gt.f32.partialorder %v3589_v38, 0.0  ;;  %v3575_v31 = vadd.f32 %v3573_v60, %v3543_v15  ;;  %v3597_v26 = vmul.f32 %v12180_v39, %v3589_v38  ;;  %v3603_v41 = vmul.f32 %v12181_v18, %v3589_v38  ;;  %v12189_v18 = vld [vmem:[#allocation50_spill] sm:$0xff]  ;;  %v12191_v9 = vld [vmem:[#allocation89_spill] sm:$0xff] }
 0x8e6   : > { %v3637_v14 = vsel %vm3623_vm2, %v3629_v3, %v3635_v54  ;;  %v3693_v15 = vmul.f32 %v12151_v57, %v3685_v49  ;;  %v3699_v36 = vmul.f32 %v12152_v20, %v3685_v49  ;;  %v3749_v60 = vadd.f32 %v10130_v53, %v3742_v48  ;;  %v12188_v3 = vld [vmem:[#allocation104_spill] sm:$0xff] }
 0x8e7   : > { %v3806_v34 = vpop.permute.xlu0 %3805  ;;  %v3646_v0 = vpop.permute.xlu1 %3645  ;;  %v3605_v37 = vsel %vm3591_vm0, %v3597_v26, %v3603_v41  ;;  %vm3910_vm0 = vcmp.gt.f32.partialorder %v10238_v24, 0.0  ;;  %vm3687_vm2 = vcmp.gt.f32.partialorder %v3685_v49, 0.0  ;;  %v3940_v53 = vadd.f32 %v10216_v62, %v12188_v3 }
 0x8e8   : > { %v3653_v30 = vadd.f32 %v10105_v27, %v3646_v0  ;;  %v3607_v38 = vadd.f32 %v3605_v37, %v3575_v31  ;;  %v3860_v27 = vsel %vm3846_vm10, %v3852_v19, %v3858_v4  ;;  %v10252_v31 = vrot.slane %v12177_v23, %v8946_v25  ;;  %v12190_v19 = vld [vmem:[#allocation106_spill] sm:$0xff] }
 0x8e9   : > { %v3862_v20 = vadd.f32 %v3860_v27, %v3830_v1  ;;  %v3916_v52 = vmul.f32 %v12189_v18, %v10238_v24  ;;  %v3892_v41 = vsel %vm3878_vm8, %v3884_v7, %v3890_v22  ;;  %v3972_v4 = vadd.f32 %v10220_v55, %v12190_v19 }
 0x8ea   : > { %vm3655_vm9 = vcmp.gt.f32.partialorder %v3653_v30, 0.0  ;;  %v3639_v39 = vadd.f32 %v3637_v14, %v3607_v38  ;;  %v3661_v6 = vmul.f32 %v12150_v59, %v3653_v30  ;;  %v3667_v26 = vmul.f32 %v12187_v42, %v3653_v30  ;;  %v12195_v42 = vld [vmem:[#allocation80_spill] sm:$0xff] }
 0x8eb   : > { %v3701_v35 = vsel %vm3687_vm2, %v3693_v15, %v3699_v36  ;;  %v3757_v49 = vmul.f32 %v12156_v32, %v3749_v60  ;;  %v3763_v1 = vmul.f32 %v12157_v46, %v3749_v60  ;;  %v3813_v37 = vadd.f32 %v10164_v40, %v3806_v34  ;;  %v12192_v36 = vld [vmem:[#allocation51_spill] sm:$0xff]  ;;  %v12194_v34 = vld [vmem:[#allocation72_spill] sm:$0xff] }
 0x8ec   : > { %v3870_v54 = vpop.permute.xlu0 %3869  ;;  %v3710_v57 = vpop.permute.xlu1 %3709  ;;  %v3669_v48 = vsel %vm3655_vm9, %v3661_v6, %v3667_v26  ;;  %v3922_v7 = vmul.f32 %v12191_v9, %v10238_v24  ;;  %v3894_v22 = vadd.f32 %v3892_v41, %v3862_v20  ;;  %vm3942_vm8 = vcmp.gt.f32.partialorder %v3940_v53, 0.0 }
 0x8ed   : > { %v3717_v59 = vadd.f32 %v10126_v17, %v3710_v57  ;;  %v3671_v0 = vadd.f32 %v3669_v48, %v3639_v39  ;;  %vm3751_vm9 = vcmp.gt.f32.partialorder %v3749_v60, 0.0  ;;  %v3948_v32 = vmul.f32 %v12192_v36, %v3940_v53  ;;  %v12193_v39 = vld [vmem:[#allocation91_spill] sm:$0xff] }
 0x8ee   : > { %v3954_v46 = vmul.f32 %v12193_v39, %v3940_v53  ;;  %vm3974_vm2 = vcmp.gt.f32.partialorder %v3972_v4, 0.0  ;;  %v3765_v27 = vsel %vm3751_vm9, %v3757_v49, %v3763_v1  ;;  %v3821_v57 = vmul.f32 %v12171_v61, %v3813_v37  ;;  %v12198_v1 = vld [vmem:[#allocation108_spill] sm:$0xff] }
 0x8ef   : > { %vm3719_vm10 = vcmp.gt.f32.partialorder %v3717_v59, 0.0  ;;  %v3703_v30 = vadd.f32 %v3701_v35, %v3671_v0  ;;  %v3725_v17 = vmul.f32 %v12154_v45, %v3717_v59  ;;  %v3731_v38 = vmul.f32 %v12155_v63, %v3717_v59 }
 0x8f0   : > { %v3980_v45 = vmul.f32 %v12194_v34, %v3972_v4  ;;  %v3986_v63 = vmul.f32 %v12195_v42, %v3972_v4  ;;  %v3827_v60 = vmul.f32 %v12172_v44, %v3813_v37  ;;  %v3877_v20 = vadd.f32 %v10199_v2, %v3870_v54  ;;  %v12197_v44 = vld [vmem:[#allocation56_spill] sm:$0xff] }
 0x8f1   : > { %v3934_v14 = vpop.permute.xlu0 %3933  ;;  %v3774_v15 = vpop.permute.xlu1 %3773  ;;  %v3733_v6 = vsel %vm3719_vm10, %v3725_v17, %v3731_v38  ;;  %v3924_v19 = vsel %vm3910_vm0, %v3916_v52, %v3922_v7  ;;  %vm3815_vm10 = vcmp.gt.f32.partialorder %v3813_v37, 0.0  ;;  %v4004_v35 = vadd.f32 %v10212_v12, %v12197_v44  ;;  %v12203_v44 = vld [vmem:[#allocation103_spill] sm:$0xff] }
 0x8f2   : > { %v3781_v40 = vadd.f32 %v10147_v58, %v3774_v15  ;;  %v3735_v26 = vadd.f32 %v3733_v6, %v3703_v30  ;;  %v12196_v58 = vrot.slane %v10143_v43, 2  ;;  %v3926_v2 = vadd.f32 %v3924_v19, %v3894_v22 }
 0x8f3   : > { %v3988_v49 = vsel %vm3974_vm2, %v3980_v45, %v3986_v63  ;;  %v3829_v24 = vsel %vm3815_vm10, %v3821_v57, %v3827_v60  ;;  %v3885_v52 = vmul.f32 %v12185_v33, %v3877_v20  ;;  %v3891_v37 = vmul.f32 %v12186_v16, %v3877_v20  ;;  %v12201_v60 = vld [vmem:[#allocation84_spill] sm:$0xff] }
 0x8f4   : > { %vm3783_vm6 = vcmp.gt.f32.partialorder %v3781_v40, 0.0  ;;  %v3767_v3 = vadd.f32 %v3765_v27, %v3735_v26  ;;  %v3789_v48 = vmul.f32 %v12167_v29, %v3781_v40  ;;  %v3795_v59 = vmul.f32 %v12169_v47, %v3781_v40 }
 0x8f5   : > { %v10282_v41 = vadd.f32 %v12196_v58, %v10143_v43  ;;  %v3956_v47 = vsel %vm3942_vm8, %v3948_v32, %v3954_v46  ;;  %v4036_v43 = vadd.f32 %v10252_v31, %v12198_v1  ;;  %v3941_v17 = vadd.f32 %v10216_v62, %v3934_v14  ;;  %v12199_v14 = vld [vmem:[#allocation82_spill] sm:$0xff]  ;;  %v12200_v46 = vld [vmem:[#allocation93_spill] sm:$0xff] }
 0x8f6   : > { %v3966_v61 = vpop.permute.xlu0 %3965  ;;  %v3838_v0 = vpop.permute.xlu1 %3837  ;;  %v3797_v54 = vsel %vm3783_vm6, %v3789_v48, %v3795_v59  ;;  %v4067_v53 = vrot.slane %v12177_v23, %v8961_v56  ;;  %v3958_v4 = vadd.f32 %v3956_v47, %v3926_v2  ;;  %v4099_v22 = vrot.slane %v12177_v23, %v11951_v8 }
 0x8f7   : > { %v3845_v29 = vadd.f32 %v10178_v28, %v3838_v0  ;;  %v3799_v30 = vadd.f32 %v3797_v54, %v3767_v3  ;;  %vm3879_vm6 = vcmp.gt.f32.partialorder %v3877_v20, 0.0  ;;  %vm4006_vm8 = vcmp.gt.f32.partialorder %v4004_v35, 0.0  ;;  %v12202_v20 = vld [vmem:[#allocation86_spill] sm:$0xff] }
 0x8f8   : > { %v3973_v16 = vadd.f32 %v10220_v55, %v3966_v61  ;;  %v3990_v6 = vadd.f32 %v3988_v49, %v3958_v4  ;;  %vm4038_vm9 = vcmp.gt.f32.partialorder %v4036_v43, 0.0  ;;  %v3893_v45 = vsel %vm3879_vm6, %v3885_v52, %v3891_v37  ;;  %v12204_v49 = vld [vmem:[#allocation110_spill] sm:$0xff] }
 0x8f9   : > { %vm3847_vm0 = vcmp.gt.f32.partialorder %v3845_v29, 0.0  ;;  %v3831_v38 = vadd.f32 %v3829_v24, %v3799_v30  ;;  %v3853_v7 = vmul.f32 %v12182_v5, %v3845_v29  ;;  %v3859_v28 = vmul.f32 %v12183_v11, %v3845_v29 }
 0x8fa   : > { %v4012_v5 = vmul.f32 %v12199_v14, %v4004_v35  ;;  %v4018_v11 = vmul.f32 %v12200_v46, %v4004_v35  ;;  %v3949_v63 = vmul.f32 %v12192_v36, %v3941_v17  ;;  %v3955_v26 = vmul.f32 %v12193_v39, %v3941_v17 }
 0x8fb   : > { %v4030_v15 = vpop.permute.xlu0 %4029  ;;  %v3902_v33 = vpop.permute.xlu1 %3901  ;;  %v3861_v32 = vsel %vm3847_vm0, %v3853_v7, %v3859_v28  ;;  %v4050_v3 = vmul.f32 %v12202_v20, %v4036_v43  ;;  %vm3943_vm10 = vcmp.gt.f32.partialorder %v3941_v17, 0.0  ;;  %v3981_v48 = vmul.f32 %v12194_v34, %v3973_v16  ;;  %v12205_v7 = vld [vmem:[#allocation88_spill] sm:$0xff] }
 0x8fc   : > { %v3909_v62 = vadd.f32 %v10182_v21, %v3902_v33  ;;  %v3863_v40 = vadd.f32 %v3861_v32, %v3831_v38  ;;  %v4044_v21 = vmul.f32 %v12201_v60, %v4036_v43  ;;  %v3987_v19 = vmul.f32 %v12195_v42, %v3973_v16 }
 0x8fd   : > { %v4037_v36 = vadd.f32 %v10252_v31, %v4030_v15  ;;  %vm3975_vm0 = vcmp.gt.f32.partialorder %v3973_v16, 0.0  ;;  %v4068_v2 = vadd.f32 %v4067_v53, %v12203_v44  ;;  %v3957_v29 = vsel %vm3943_vm10, %v3949_v63, %v3955_v26  ;;  %v12206_v15 = vld [vmem:[#allocation95_spill] sm:$0xff] }
 0x8fe   : > { %vm3911_vm2 = vcmp.gt.f32.partialorder %v3909_v62, 0.0  ;;  %v3895_v27 = vadd.f32 %v3893_v45, %v3863_v40  ;;  %v3917_v57 = vmul.f32 %v12189_v18, %v3909_v62  ;;  %v3923_v55 = vmul.f32 %v12191_v9, %v3909_v62 }
 0x8ff   : > { %v2962_v18 = vrot.slane %v10282_v41, 1  ;;  %v4020_v9 = vsel %vm4006_vm8, %v4012_v5, %v4018_v11  ;;  %v4052_v34 = vsel %vm4038_vm9, %v4044_v21, %v4050_v3  ;;  %v3989_v1 = vsel %vm3975_vm0, %v3981_v48, %v3987_v19  ;;  %v12208_v11 = vld [vmem:[#allocation92_spill] sm:$0xff] }
 0x900   : > { %v4094_v59 = vpop.permute.xlu0 %4093  ;;  %v3998_v58 = vpop.permute.xlu1 %3997  ;;  %v3925_v61 = vsel %vm3911_vm2, %v3917_v57, %v3923_v55  ;;  %v4022_v54 = vadd.f32 %v4020_v9, %v3990_v6  ;;  %v4045_v35 = vmul.f32 %v12201_v60, %v4037_v36  ;;  %v4051_v30 = vmul.f32 %v12202_v20, %v4037_v36  ;;  %v12210_v60 = vld [vmem:[#allocation105_spill] sm:$0xff]  ;;  %v12211_v19 = vld [vmem:[#allocation112_spill] sm:$0xff] }
 0x901   : > { %v4005_v39 = vadd.f32 %v10212_v12, %v3998_v58  ;;  %v3927_v0 = vadd.f32 %v3925_v61, %v3895_v27  ;;  %v4100_v12 = vadd.f32 %v4099_v22, %v12204_v49  ;;  %vm4039_vm8 = vcmp.gt.f32.partialorder %v4037_v36, 0.0  ;;  %v12209_v27 = vld [vmem:[#allocation99_spill] sm:$0xff]  ;;  %v12212_v61 = vld [vmem:[#allocation94_spill] sm:$0xff] }
 0x902   : > { %v10326_v43 = vadd.f32 %v2962_v18, %v10282_v41  ;;  %vm4070_vm9 = vcmp.gt.f32.partialorder %v4068_v2, 0.0  ;;  %v4076_v28 = vmul.f32 %v12205_v7, %v4068_v2  ;;  %v4131_v4 = vrot.slane %v12177_v23, %v12168_v51  ;;  %v12213_v18 = vld [vmem:[#allocation97_spill] sm:$0xff] }
 0x903   : > { %vm4007_vm6 = vcmp.gt.f32.partialorder %v4005_v39, 0.0  ;;  %v3959_v47 = vadd.f32 %v3957_v29, %v3927_v0  ;;  %v4013_v42 = vmul.f32 %v12199_v14, %v4005_v39  ;;  %v4019_v31 = vmul.f32 %v12200_v46, %v4005_v39  ;;  %v12207_v46 = vld [vmem:[#allocation90_spill] sm:$0xff] }
 0x904   : > { %v4082_v33 = vmul.f32 %v12206_v15, %v4068_v2  ;;  %v4054_v16 = vadd.f32 %v4052_v34, %v4022_v54  ;;  %v4101_v32 = vadd.f32 %v4099_v22, %v4094_v59  ;;  %v4053_v14 = vsel %vm4039_vm8, %v4045_v35, %v4051_v30  ;;  %v12214_v0 = vld [vmem:[#allocation54_spill] sm:$0xff] }
 0x905   : > { %v4158_v24 = vpop.permute.xlu0 %4157  ;;  %v4062_v52 = vpop.permute.xlu1 %4061  ;;  %v3991_v37 = vadd.f32 %v3989_v1, %v3959_v47  ;;  %v4021_v17 = vsel %vm4007_vm6, %v4013_v42, %v4019_v31  ;;  %v4108_v41 = vmul.f32 %v12207_v46, %v4100_v12  ;;  %v4114_v6 = vmul.f32 %v12208_v11, %v4100_v12  ;;  %v12216_v47 = vld [vmem:[#allocation70_spill] sm:$0xff]  ;;  %v12221_v1 = vld [vmem:[#allocation96_spill] sm:$0xff] }
 0x906   : > { %v4069_v38 = vadd.f32 %v4067_v53, %v4062_v52  ;;  %v4163_v40 = vrot.slane %v12177_v23, %v12112_v13  ;;  %vm2988_vm10 = vcmp.eq.s32.totalorder %v12209_v27, 1  ;;  %vm4102_vm0 = vcmp.gt.f32.partialorder %v4100_v12, 0.0  ;;  %v12222_v30 = vld [vmem:[#allocation98_spill] sm:$0xff] }
 0x907   : > { %v4023_v62 = vadd.f32 %v4021_v17, %v3991_v37  ;;  %v4084_v55 = vsel %vm4070_vm9, %v4076_v28, %v4082_v33  ;;  %v4132_v21 = vadd.f32 %v4131_v4, %v12210_v60  ;;  %v4109_v20 = vmul.f32 %v12207_v46, %v4101_v32  ;;  %v12229_v33 = vld [vmem:[#allocation36_spill] sm:$0xff] }
 0x908   : > { %vm4071_vm2 = vcmp.gt.f32.partialorder %v4069_v38, 0.0  ;;  %v4077_v5 = vmul.f32 %v12205_v7, %v4069_v38  ;;  %v4083_v53 = vmul.f32 %v12206_v15, %v4069_v38  ;;  %v4115_v3 = vmul.f32 %v12208_v11, %v4101_v32  ;;  %v12227_v15 = vld [vmem:[#allocation31_spill] sm:$0xff] }
 0x909   : > { %v4055_v45 = vadd.f32 %v4053_v14, %v4023_v62  ;;  %v4086_v48 = vadd.f32 %v4084_v55, %v4054_v16  ;;  %vm4103_vm6 = vcmp.gt.f32.partialorder %v4101_v32, 0.0  ;;  %v4116_v58 = vsel %vm4102_vm0, %v4108_v41, %v4114_v6  ;;  %v12230_v14 = vld [vmem:[#allocation30_spill] sm:$0xff] }
 0x90a   : > { %v2987_v63 = vpop.permute.xlu0 %2986  ;;  %v4126_v26 = vpop.permute.xlu1 %4125  ;;  %v4085_v22 = vsel %vm4071_vm2, %v4077_v5, %v4083_v53  ;;  %v4164_v36 = vadd.f32 %v4163_v40, %v12211_v19  ;;  %vm12215_vm9 = vcmp.gt.f32.partialorder %v12214_v0, 0.0  ;;  %v4165_v44 = vadd.f32 %v4163_v40, %v4158_v24  ;;  %v1087_v19 = vld [vmem:[%s12232_s12 + $0x10] sm:$0xff] }
 0x90b   : > { %v4133_v57 = vadd.f32 %v4131_v4, %v4126_v26  ;;  %v4087_v59 = vadd.f32 %v4085_v22, %v4055_v45  ;;  %vm2989_vm8 = vcmp.eq.s32.totalorder %v2987_v63, 1  ;;  %vm2990_vm2 = vmand %vm12215_vm9, %vm2988_vm10  ;;  %vm2992_vm7 = vcmp.gt.f32.partialorder %v10326_v43, 0.0  ;;  %v12226_v4 = vld [vmem:[#allocation28_spill] sm:$0xff]  ;;  %v1088_v43 = vld [vmem:[%s12232_s12 + $0x18] sm:$0xff] }
 0x90c   : > { %v4140_v54 = vmul.f32 %v12212_v61, %v4132_v21  ;;  %v4146_v29 = vmul.f32 %v12213_v18, %v4132_v21  ;;  %v4117_v34 = vsel %vm4103_vm6, %v4109_v20, %v4115_v3  ;;  %vm12217_vm0 = vcmp.gt.f32.partialorder %v12216_v47, 0.0  ;;  %vm10360_vm9 = vmand %vm2990_vm2, %vm2992_vm7  ;;  %7451 = vmatprep.subr.mxu1 %v1088_v43 }
 0x90d   : > { %v4141_v39 = vmul.f32 %v12212_v61, %v4133_v57  ;;  %v4147_v9 = vmul.f32 %v12213_v18, %v4133_v57  ;;  %vm4135_vm13 = vcmp.gt.f32.partialorder %v4133_v57, 0.0  ;;  %vm2991_vm11 = vmand %vm12217_vm0, %vm2989_vm8  ;;  %vm4134_vm3 = vcmp.gt.f32.partialorder %v4132_v21, 0.0  ;;  %7452 = vmatpush3.msra.mxu1 %v1088_v43 }
 0x90e   : > { %v4195_v42 = vrot.slane %v12177_v23, %v12117_v50  ;;  %v4118_v31 = vadd.f32 %v4116_v58, %v4086_v48  ;;  %v4119_v49 = vadd.f32 %v4117_v34, %v4087_v59  ;;  %v12218_v12 = vmov 0  ;;  %vm10370_vm0 = vmand %vm2991_vm11, %vm2992_vm7  ;;  %v1085_v59 = vld [vmem:[%s12232_s12] sm:$0xff]  ;;  %v1086_v58 = vld [vmem:[%s12232_s12 + $0x8] sm:$0xff]  ;;  %7453 = vmatprep.subr.mxu1 %v1087_v19 }
 0x90f   : > { %v4202_v2 = vpop.permute.xlu1 %4201  ;;  %v12219_v12 = vsel %vm10360_vm9, 4294967295, %v12218_v12  ;;  %v4172_v35 = vmul.f32 %v12221_v1, %v4164_v36  ;;  %v4178_v24 = vmul.f32 %v12222_v30, %v4164_v36  ;;  %v4149_v52 = vsel %vm4135_vm13, %v4141_v39, %v4147_v9  ;;  %7454 = vmatpush3.msra.mxu1 %v1087_v19 }
 0x910   : > { %12220 = vst [vmem:[#allocation45_spill] sm:$0xff] %v12219_v12  ;;  %vm4166_vm6 = vcmp.gt.f32.partialorder %v4164_v36, 0.0  ;;  %v4173_v37 = vmul.f32 %v12221_v1, %v4165_v44  ;;  %v4179_v17 = vmul.f32 %v12222_v30, %v4165_v44  ;;  %v12223_v23 = vmov 0  ;;  %7455 = vmatprep.subr.mxu1 %v1086_v58 }
 0x911   : > { %v12224_v23 = vsel %vm10370_vm0, 4294967295, %v12223_v23  ;;  %v4148_v7 = vsel %vm4134_vm3, %v4140_v54, %v4146_v29  ;;  %vm4167_vm2 = vcmp.gt.f32.partialorder %v4165_v44, 0.0  ;;  %vm12228_vm15 = vcmp.eq.s32.totalorder %v12226_v4, %v12227_v15  ;;  %7456 = vmatpush3.msra.mxu1 %v1086_v58 }
 0x912   : > { %12225 = vst [vmem:[#allocation39_spill] sm:$0xff] %v12224_v23  ;;  %vm4216_vm13 = vmor %vm10360_vm9, %vm12228_vm15  ;;  %v4196_v16 = vadd.f32 %v4195_v42, %v12229_v33  ;;  %v4151_v32 = vadd.f32 %v4149_v52, %v4119_v49  ;;  %v4150_v62 = vadd.f32 %v4148_v7, %v4118_v31  ;;  %vm12231_vm11 = vcmp.eq.s32.totalorder %v12230_v14, %v12227_v15 }
 0x913   : > { %v4190_v38 = vpop.permute.xlu1 %4189  ;;  %vm4217_vm5 = vmor %vm10370_vm0, %vm12231_vm11  ;;  %v4180_v5 = vsel %vm4166_vm6, %v4172_v35, %v4178_v24  ;;  %v4181_v46 = vsel %vm4167_vm2, %v4173_v37, %v4179_v17  ;;  %v4317_v36 = vmul.f32 %v1085_v59, %v1085_v59  ;;  %v4318_v61 = vmul.f32 %v1086_v58, %v1086_v58  ;;  %7457 = vmatprep.subr.mxu1 %v1085_v59 }
 0x914   : > { %v4197_v28 = vadd.f32 %v4195_v42, %v4190_v38  ;;  %vm4218_vm3 = vmand %vm4216_vm13, %vm2988_vm10  ;;  %v4204_v41 = vmul.f32 %v4202_v2, %v4196_v16  ;;  %vm4198_vm15 = vcmp.gt.f32.partialorder %v4196_v16, 0.0  ;;  %v4183_v45 = vadd.f32 %v4181_v46, %v4151_v32  ;;  %7458 = vmatpush3.msra.mxu1 %v1085_v59 }
 0x915   : > { %vm4219_vm4 = vmand %vm4217_vm5, %vm2989_vm8  ;;  %v4182_v26 = vadd.f32 %v4180_v5, %v4150_v62  ;;  %v4319_v39 = vmul.f32 %v1087_v19, %v1087_v19  ;;  %v4320_v18 = vmul.f32 %v1088_v43, %v1088_v43  ;;  %v12241_v47 = vmov 0.0  }
 0x916   : > { %v4205_v11 = vmul.f32 %v4202_v2, %v4197_v28  ;;  %vm4199_vm14 = vcmp.gt.f32.partialorder %v4197_v28, 0.0  ;;  %vm10390_vm10 = vmand %vm4218_vm3, %vm2992_vm7  ;;  %7469 = vmatprep.subr.mxu1 %v12241_v47  ;;  %vm12245_vm6 = vcmask 261120  }
 0x917   : > { %v4208_v53 = vpop.permute.xlu1 %4207  ;;  %vm10396_vm5 = vmand %vm4219_vm4, %vm2992_vm7  ;;  %vm12237_vm7 = vcmask 7168  }
 0x918   : > { %v4210_v6 = vmul.f32 %v4208_v53, %v4196_v16  ;;  %v4211_v40 = vmul.f32 %v4208_v53, %v4197_v28  ;;  %v4321_v9 = vsel %vm12237_vm7, %v4317_v36, 0.0  ;;  %vm12239_vm4 = vmmov %vm12237_vm7 }
 0x919   : > { %v4324_v44 = vsel %vm12239_vm4, %v4319_v39, 0.0  ;;  %vm12240_vm8 = vmmov %vm12239_vm4 }
 0x91a   : > { %v4213_v22 = vsel %vm4199_vm14, %v4205_v11, %v4211_v40  ;;  %v4212_v57 = vsel %vm4198_vm15, %v4204_v41, %v4210_v6  ;;  %vm12238_vm14 = vmmov %vm12237_vm7  ;;  %v4326_v54 = vsel %vm12240_vm8, %v4320_v18, 0.0  ;;  %vm12262_vm7 = vcmask 1041408  }
 0x91b   : > { %v4215_v55 = vadd.f32 %v4213_v22, %v4183_v45  ;;  %v4214_v60 = vadd.f32 %v4212_v57, %v4182_v26  ;;  %v4322_v0 = vsel %vm12238_vm14, %v4318_v61, 0.0  ;;  %v7205_v61 = vld [vmem:[%s12243_s9] ss:$0 sm:$0xff]  ;;  %vm12246_vm2 = vmmov %vm12245_vm6 }
 0x91c   : > { %v4323_v2 = vadd.f32 %v4322_v0, %v4321_v9  ;;  %vm12247_vm13 = vmmov %vm12246_vm2 }
 0x91d   : > { %v4223_v21 = vsel %vm10396_vm5, %v4215_v55, -1e+30  ;;  %v4222_v20 = vsel %vm10390_vm10, %v4214_v60, -1e+30  ;;  %vm12257_vm15 = vmmov %vm12246_vm2 }
 0x91e   : > { %v4227_v3 = vsel %vm11767_vm12, %v4223_v21, -inf  ;;  %v4224_v48 = vsel %vm11767_vm12, %v4222_v20, -inf  ;;  %v4325_v29 = vadd.f32 %v4324_v44, %v4323_v2  ;;  %vm12263_vm14 = vmmov %vm12262_vm7 }
 0x91f   : > { %4228 = vmax.xlane.f32.xlu1 %v4227_v3  ;;  %4225 = vmax.xlane.f32.xlu0 %v4224_v48 }
 0x920   : > { %v4327_v34 = vadd.f32 %v4326_v54, %v4325_v29 }
 0x923   : > { %4328 = vadd.xlane.f32.xlu1 %v4327_v34 }
 0x9a8   : > { %v4229_v42 = vpop.xlane.xlu1 %4228  ;;  %v4226_v31 = vpop.xlane.xlu0 %4225 }
 0x9a9   : > { %v4231_v49 = vmax.f32 %v4229_v42, -1e+30  ;;  %v4230_v1 = vmax.f32 %v4226_v31, -1e+30  ;;  %v12248_v42 = vmov 1.0   ;;  %v12249_v31 = vld [vmem:[#allocation55_spill] sm:$0xff] }
 0x9ab   : > { %v4239_v35 = vsub.f32 %v4223_v21, %v4231_v49  ;;  %v4238_v30 = vsub.f32 %v4222_v20, %v4230_v1  ;;  %v4232_v6 = vsub.f32 -1e+30, %v4230_v1  ;;  %v4233_v45 = vsub.f32 -1e+30, %v4231_v49  ;;  %v12250_v49 = vld [vmem:[#allocation66_spill] sm:$0xff]  ;;  %v10445_v1 = vld [vmem:[%s9400_s3 + $0x8] sm:$0xff] }
 0x9ac   : > { %v4329_v32 = vpop.xlane.xlu1 %4328  ;;  %vm12251_vm11 = vcmp.lt.f32.partialorder %v12249_v31, %v12250_v49 }
 0x9ad   : > { %v4242_v24 = vmul.f32 1.442695, %v4239_v35  ;;  %v4240_v52 = vmul.f32 1.442695, %v4238_v30  ;;  %v4330_v62 = vrot.slane %v4329_v32, 4  ;;  %v12252_v35 = vld [vmem:[#allocation65_spill] sm:$0xff] }
 0x9ae   : > { %v4234_v26 = vmul.f32 1.442695, %v4232_v6  ;;  %v4236_v22 = vmul.f32 1.442695, %v4233_v45  ;;  %v12253_v30 = vunpack.i.h.bf16 %v12252_v35 }
 0x9af   : > { %8089 = vpow2.f32 %v4242_v24  ;;  %v4331_v5 = vadd.f32 %v4330_v62, %v4329_v32 }
 0x9b0   : > { %8091 = vpow2.f32 %v4240_v52  ;;  %v4694_v24 = vmul.f32 %v10445_v1, %v12253_v30  ;;  %v12254_v52 = vld [vmem:[#allocation33_spill] sm:$0xff] }
 0x9b1   : > { %v4332_v53 = vrot.slane %v4331_v5, 2 }
 0x9b3   : > { %v4333_v46 = vadd.f32 %v4332_v53, %v4331_v5 }
 0x9b5   : > { %v4334_v41 = vrot.slane %v4333_v46, 1 }
 0x9b7   : > { %v4335_v11 = vadd.f32 %v4334_v41, %v4333_v46 }
 0x9b9   : > { %7589 = vpush %v4335_v11 }
 0x9bc   : > { %v8090_v37 = vpop.eup %8089 }
 0x9bd   : > { %v4245_v17 = vsel %vm10396_vm5, %v8090_v37, 0.0  ;;  %v8092_v38 = vpop.eup %8091  ;;  %v12255_v37 = vld [vmem:[#allocation32_spill] sm:$0xff]  ;;  %vm12260_vm5 = vcmask 15360  }
 0x9be   : > { %v4244_v7 = vsel %vm10390_vm10, %v8092_v38, 0.0  ;;  %v4251_v16 = vsel %vm11767_vm12, %v4245_v17, 0.0  ;;  %vm12256_vm3 = vcmp.lt.f32.partialorder %v12254_v52, %v12255_v37  ;;  %v8148_v38 = vld [vmem:[%s9410_s11] sm:$0x3]  ;;  %vm12259_vm10 = vmmov %vm12246_vm2 }
 0x9bf   : > { %v4248_v28 = vsel %vm11767_vm12, %v4244_v7, 0.0  ;;  %v4256_v33 = vpack.c.bf16 %v4245_v17, %v4244_v7  ;;  %v10460_v7 = vld [vmem:[%s9400_s3] sm:$0xff]  ;;  %vm12264_vm4 = vmmov %vm12260_vm5 }
 0x9c0   : > { %4249 = vadd.xlane.f32.xlu0 %v4248_v28  ;;  %v12258_v28 = vunpack.i.l.bf16 %v12252_v35 }
 0x9c1   : > { %7448 = vmatmul.mubr.msk.bf16.vlgmr.msra.gmra.mxu0 %vm11767_vm12, %v4256_v33 }
 0x9c2   : > { %7466 = vmatprep.mubr.msk.f32.mxu0 %vm11765_vm1, %v12241_v47  ;;  %v4693_v33 = vmul.f32 %v10460_v7, %v12258_v28  ;;  %v12282_v28 = vmov 10  }
 0x9c4   : > { %4252 = vadd.xlane.f32.xlu0 %v4251_v16 }
 0x9ea   : > { %s7590_s16 = spop %7589 }
 0x9eb   : > { %s4337_s8 = smax.f32 %s12242_s5, %s7590_s16  ;;  %s12268_s16 = sld [smem:[#allocation22_spill]] }
 0x9ec   : > { %v4338_v40 = vstv %s4337_s8  ;;  %s12244_s8 = sld [smem:[#allocation17_spill]] }
 0x9ed   : > { %8093 = vrsqrt.f32 %v4338_v40 }
 0x9ee   : > { %8095 = vpow2.f32 %v4234_v26 }
 0x9ef   : > { %8097 = vpow2.f32 %v4236_v22 }
 0x9f2   : > { %v1089_v17 = vld [vmem:[%s12244_s8] sm:$0x1]  ;;  %s12276_s8 = sld [smem:[#allocation18_spill]] }
 0x9fa   : > { %v8094_v57 = vpop.eup %8093 }
 0x9fb   : > { %7591 = vpush %v8094_v57  ;;  %v8096_v55 = vpop.eup %8095 }
 0x9fc   : > { %v4246_v27 = vmul.f32 0.0, %v8096_v55  ;;  %v8098_v63 = vpop.eup %8097 }
 0x9fd   : > { %v4247_v3 = vmul.f32 0.0, %v8098_v63 }
 0xa2c   : > { %s7592_s9 = spop %7591 }
 0xa2d   : > { %v4422_v16 = vstv %s7592_s9  ;;  %s12277_s9 = sld [smem:[#allocation19_spill]] }
 0xa49   : > { %v4250_v60 = vpop.xlane.xlu0 %4249 }
 0xa4a   : > { %v4254_v21 = vadd.f32 %v4250_v60, %v4246_v27 }
 0xa4c   : > { %v4303_v48 = vmax.f32 %v4254_v21, 1e-09 }
 0xa4d   : > { %v4253_v20 = vpop.xlane.xlu0 %4252 }
 0xa4e   : > { %v4255_v59 = vadd.f32 %v4253_v20, %v4247_v3  ;;  %8099 = vrcp.f32 %v4303_v48 }
 0xa50   : > { %v4304_v58 = vmax.f32 %v4255_v59, 1e-09 }
 0xa52   : > { %8101 = vrcp.f32 %v4304_v58 }
 0xa5b   : > { %v8100_v36 = vpop.eup %8099 }
 0xa5f   : > { %v8102_v2 = vpop.eup %8101 }
 0xa81   : > { %v4294_v19 = vpop.f32.mrf.mxu0 }
 0xa82   : > { %v4301_v43 = vadd.f32 %v4294_v19, %v4246_v27 }
 0xa83   : > { %v7449_v39 = vpop.f32.mrf.mxu0 }
 0xa84   : > { %v4307_v18 = vmul.f32 %v8100_v36, %v4301_v43 }
 0xa85   : > { %v4297_v9 = vpop.f32.mrf.mxu0 }
 0xa86   : > { %v10426_v0 = vadd.f32 %v7205_v61, %v4307_v18  ;;  %v4302_v44 = vadd.f32 %v4297_v9, %v4247_v3  ;;  %v12261_v3 = vmov 1  }
 0xa87   : > { %v7450_v54 = vpop.f32.mrf.mxu0 }
 0xa88   : > { %v4308_v29 = vmul.f32 %v8102_v2, %v4302_v44  ;;  %7459 = vmatprep.mubr.msk.f32.mxu1 %vm12245_vm6, %v10426_v0 }
 0xa8a   : > { %v10430_v34 = vadd.f32 %v7205_v61, %v4308_v29 }
 0xa8c   : > { %7460 = vmatmul.mubr.msk.f32.vlgmr.msra.gmra.mxu1 %vm12246_vm2, %v10430_v34  ;;  %7463 = vmatpush3.xpose.msk.msra.mxu0 %vm12247_vm13, %v10430_v34  ;;  %vm12265_vm2 = vcmp.lt.s32.totalorder %v12227_v15, %v12230_v14 }
 0xa8d   : > { %7470 = vmatpush3.msk.msra.mxu1 %vm12251_vm11, %v12248_v42  ;;  %7464 = vmatprep.subr.mxu0 %v12241_v47 }
 0xa8e   : > { %7471 = vmatprep.subr.mxu1 %v12241_v47  ;;  %7473 = vmatprep.mubr.msk.f32.mxu1 %vm11765_vm1, %v12241_v47 }
 0xa8f   : > { %7472 = vmatpush3.msk.msra.mxu1 %vm12256_vm3, %v12248_v42  ;;  %v12343_v42 = vmov 30  }
 0xa90   : > { %7481 = vmatprep.subr.mxu1 %v4694_v24  ;;  %7465 = vmatpush3.xpose.msk.msra.mxu0 %vm12257_vm15, %v10426_v0 }
 0xa91   : > { %7474 = vmatmul.mubr.msk.f32.vlgmr.msra.gmra.mxu1 %vm11767_vm12, %v8148_v38  ;;  %v12280_v38 = vmov 6  }
 0xa92   : > { %7482 = vmatpush3.msra.mxu1 %v4694_v24  ;;  %v1100_v24 = vld [vmem:[%s12268_s16] sm:$0x1]  ;;  %s12347_s16 = sld [smem:[#allocation21_spill]] }
 0xa93   : > { %7483 = vmatprep.subr.mxu1 %v4693_v33  ;;  %7467 = vmatmul.mubr.msk.f32.vlgmr.msra.gmra.mxu0 %vm12259_vm10, %v1089_v17  ;;  %vm12266_vm10 = vcmp.ne.s32.totalorder %v12227_v15, %v12230_v14  ;;  %v10508_v52 = vrot.slane %v1100_v24, %v8521_v10  ;;  %v5026_v37 = vmul.f32 0.2, %v1100_v24  ;;  %v12279_v17 = vmov 4  }
 0xa94   : > { %7484 = vmatpush3.msra.mxu1 %v4693_v33  ;;  %7478 = vmatprep.mubr.msk.f32.mxu0 %vm12260_vm5, %v10460_v7  ;;  %v12283_v33 = vmov 12  }
 0xa95   : > { %7496 = vmatprep.subr.bf16.mxu1 %v12241_v47  ;;  %12275 = vst [vmem:[#allocation40_spill] sm:$0xff] %v10508_v52 }
 0xb4c   : > { %v7461_v32 = vpop.f32.mrf.mxu1 }
 0xb4d   : > { %v4424_v62 = vmul.f32 %v7461_v32, %v4422_v16  ;;  %v12285_v32 = vmov 0  }
 0xb4e   : > { %v4413_v5 = vpop.f32.mrf.mxu1 }
 0xb4f   : > { %v4426_v53 = vsub.f32 0.0, %v4424_v62  ;;  %v4423_v46 = vmul.f32 %v4422_v16, %v4413_v5  ;;  %v10528_v62 = vld [vmem:[%s12276_s8 + $0x8] sm:$0xff]  }
 0xb50   : > { %v8060_v5 = vld [vmem:[%s12277_s9 + $0x8] sm:$0xff]  }
 0xb51   : > { %v4429_v41 = vmul.f32 1.442695, %v4426_v53  ;;  %v4425_v11 = vsub.f32 0.0, %v4423_v46  ;;  %v4583_v21 = vpop.f32.mrf.mxu1 }
 0xb52   : > { %v4587_v20 = vmul.f32 0.5, %v4583_v21 }
 0xb53   : > { %8103 = vpow2.f32 %v4429_v41  ;;  %v4427_v6 = vmul.f32 1.442695, %v4425_v11  ;;  %v4506_v40 = vpop.f32.mrf.mxu0  ;;  %v7475_v48 = vpop.f32.mrf.mxu1 }
 0xb54   : > { %v4510_v45 = vmul.f32 %v4506_v40, %v4422_v16  ;;  %v4588_v59 = vceil.f32 %v4587_v20  ;;  %v12284_v16 = vmov 14   ;;  %v8062_v40 = vld [vmem:[%s12277_s9] sm:$0xff]   ;;  %v12296_v48 = vld [vmem:[#allocation34_spill] sm:$0xff]  ;;  %s12529_s9 = sld [smem:[#allocation23_spill]] }
 0xb55   : > { %8105 = vpow2.f32 %v4427_v6  ;;  %v7468_v26 = vpop.f32.mrf.mxu0  ;;  %v10537_v6 = vld [vmem:[%s12276_s8] sm:$0xff]   ;;  %s12352_s8 = sld [smem:[#allocation20_spill]] }
 0xb56   : > { %7476 = vmatprep.subr.msk.mxu0 %vm12262_vm7, %v4588_v59  ;;  %v4511_v58 = vsub.f32 0.0, %v4510_v45  ;;  %vm12267_vm7 = vcmp.lt.s32.totalorder %v12227_v15, %v12226_v4  ;;  %v12288_v26 = vld [vmem:[#allocation41_spill] sm:$0xff] }
 0xb57   : > { %7477 = vmatpush3.msk.msra.mxu0 %vm12263_vm14, %v4588_v59  ;;  %v12298_v59 = vmov 0 }
 0xb58   : > { %7479 = vmatmul.mubr.msk.f32.vlgmr.msra.gmra.mxu0 %vm12264_vm4, %v10445_v1  ;;  %7488 = vmatprep.subr.bf16.mxu0 %v12241_v47  ;;  %v4512_v19 = vmul.f32 1.442695, %v4511_v58 }
 0xb59   : > { %7492 = vmatprep.mubr.msk.bf16.mxu0 %vm11765_vm1, %v12241_v47  ;;  %vm12269_vm1 = vcmp.ne.s32.totalorder %v12227_v15, %v12226_v4 }
 0xb60   : > { %v8104_v22 = vpop.eup %8103 }
 0xb61   : > { %v4432_v57 = vadd.f32 1.0, %v8104_v22  ;;  %v12290_v22 = vmov 0 }
 0xb62   : > { %v8106_v55 = vpop.eup %8105 }
 0xb63   : > { %8107 = vrcp.f32 %v4432_v57  ;;  %v4431_v60 = vadd.f32 1.0, %v8106_v55 }
 0xb65   : > { %8109 = vrcp.f32 %v4431_v60 }
 0xb66   : > { %8111 = vpow2.f32 %v4512_v19 }
 0xb70   : > { %v10469_v27 = vpop.eup %8107 }
 0xb71   : > { %4678 = vperm.xlu1 %7921, %v10469_v27  }
 0xb72   : > { %v10472_v63 = vpop.eup %8109 }
 0xb73   : > { %4673 = vperm.xlu0 %7919, %v10472_v63   ;;  %v8112_v43 = vpop.eup %8111 }
 0xb74   : > { %v4514_v36 = vadd.f32 1.0, %v8112_v43  ;;  %v12302_v43 = vmov 16  }
 0xb76   : > { %8113 = vrcp.f32 %v4514_v36  ;;  %v12303_v36 = vmov 18  }
 0xb77   : > { %7922 = vset.pattern.permute.xlu0 %v12261_v3 }
 0xb83   : > { %v8114_v61 = vpop.eup %8113 }
 0xb84   : > { %v4670_v39 = vrot.slane %v8114_v61, %v8521_v10  ;;  %v12304_v61 = vmov 20  }
 0xbec   : > { %v4679_v18 = vpop.permute.xlu1 %4678 }
 0xbed   : > { %vm4682_vm8 = vcmp.gt.f32.partialorder %v4670_v39, %v4679_v18  ;;  %vm4684_vm6 = vcmp.eq.f32.partialorder %v4670_v39, %v4679_v18  ;;  %v12307_v18 = vmov 3  }
 0xbee   : > { %vm4686_vm13 = vmand %vm4684_vm6, %vm12265_vm2  ;;  %v4674_v9 = vpop.permute.xlu0 %4673  ;;  %vm12270_vm6 = vcmask 130048   ;;  %vm12272_vm2 = vmmov 0  }
 0xbef   : > { %vm4688_vm11 = vmor %vm4682_vm8, %vm4686_vm13  ;;  %vm4681_vm3 = vcmp.gt.f32.partialorder %v4670_v39, %v4674_v9  ;;  %vm4683_vm15 = vcmp.eq.f32.partialorder %v4670_v39, %v4674_v9  ;;  %vm12273_vm13 = vcmask 15360   ;;  %v12306_v39 = vmov 22  }
 0xbf0   : > { %vm4690_vm5 = vmand %vm12266_vm10, %vm4688_vm11  ;;  %v12308_v9 = vmov 23  }
 0xbf1   : > { %vm4685_vm14 = vmand %vm4683_vm15, %vm12267_vm7  ;;  %v4692_v2 = vsel %vm4690_vm5, 1.0, %v12241_v47  ;;  %vm12289_vm15 = vcmp.gt.f32.partialorder %v12288_v26, 0.0 }
 0xbf2   : > { %vm4687_vm4 = vmor %vm4681_vm3, %vm4685_vm14 }
 0xbf3   : > { %vm4689_vm12 = vmand %vm12269_vm1, %vm4687_vm4  ;;  %vm12297_vm4 = vcmp.gt.f32.partialorder %v12296_v48, 0.0 }
 0xbf4   : > { %v4691_v44 = vsel %vm4689_vm12, 1.0, %v12241_v47  ;;  %vm12271_vm8 = vmmov %vm12270_vm6  ;;  %vm12286_vm12 = vcmask 261120  }
 0xbf5   : > { %7485 = vmatprep.mubr.msk.f32.mxu1 %vm12270_vm6, %v4691_v44  ;;  %vm12274_vm1 = vmmov %vm12273_vm13  ;;  %v4870_v53 = vsel %vm12286_vm12, %v10528_v62, 0  ;;  %v12309_v44 = vmov 25  }
 0xbf6   : > { %7486 = vmatmul.mubr.msk.f32.vlgmr.msra.gmra.mxu1 %vm12271_vm8, %v4692_v2  ;;  %vm12287_vm11 = vmmov %vm12286_vm12  ;;  %7489 = vmatpush3.bf16.xpose.msra.mxu0 %v4870_v53  ;;  %v12310_v2 = vmov 5  }
 0xbf7   : > { %7500 = vmatprep.mubr.msk.bf16.mxu1 %vm12272_vm2, %v12241_v47  ;;  %v4933_v46 = vsel %vm12287_vm11, %v8060_v5, 0  ;;  %7490 = vmatprep.subr.bf16.mxu0 %v12241_v47  ;;  %vm12294_vm7 = vmmov %vm12287_vm11 }
 0xbf8   : > { %7497 = vmatpush3.bf16.xpose.msra.mxu1 %v4933_v46  ;;  %v4867_v60 = vsel %vm12294_vm7, %v10537_v6, 0  ;;  %vm12295_vm14 = vmmov %vm12294_vm7  ;;  %v12320_v46 = vmov 15  }
 0xbf9   : > { %7498 = vmatprep.subr.bf16.mxu1 %v12241_v47  ;;  %v4930_v21 = vsel %vm12295_vm14, %v8062_v40, 0  ;;  %vm12325_vm8 = vmmov %vm12294_vm7 }
 0xbfe   : > { %7491 = vmatpush3.bf16.xpose.msra.mxu0 %v4867_v60 }
 0xc00   : > { %7499 = vmatpush3.bf16.xpose.msra.mxu1 %v4930_v21 }
 0xc01   : > { %7510 = vmatprep.subr.bf16.mxu1 %v12241_v47 }
 0xc18   : > { %v7480_v41 = vpop.f32.mrf.mxu0 }
 0xc1a   : > { %v4658_v45 = vpop.f32.mrf.mxu0 }
 0xcb6   : > { %v7487_v54 = vpop.f32.mrf.mxu1 }
 0xcb7   : > { %v4777_v29 = vmul.f32 %v10445_v1, %v7487_v54  ;;  %v10512_v1 = vrot.slane %v5026_v37, %v8521_v10  ;;  %v12311_v54 = vmov 27   ;;  %v12317_v37 = vmov 13  }
 0xcb8   : > { %v4767_v31 = vpop.f32.mrf.mxu1 }
 0xcb9   : > { %v4776_v49 = vmul.f32 %v10460_v7, %v4767_v31  ;;  %v4781_v35 = vsel %vm12273_vm13, %v4777_v29, 0.0  ;;  %12278 = vst [vmem:[#allocation61_spill] sm:$0xff] %v10512_v1  ;;  %v12281_v7 = vmov 8   ;;  %v12312_v29 = vmov 29   ;;  %vm12326_vm13 = vmmov %vm12294_vm7 }
 0xcba   : > { %4782 = vadd.xlane.f32.xlu0 %v4781_v35  ;;  %v12313_v31 = vmov 7   ;;  %v12315_v35 = vmov 11  }
 0xcbb   : > { %v4778_v30 = vsel %vm12274_vm1, %v4776_v49, 0.0  ;;  %v12314_v49 = vmov 9   ;;  %vm12327_vm1 = vmmov %vm12294_vm7 }
 0xcbc   : > { %4779 = vadd.xlane.f32.xlu1 %v4778_v30  ;;  %vm12328_vm12 = vmmov %vm12327_vm1 }
 0xcbd   : > { %vm12329_vm11 = vmmov %vm12327_vm1 }
 0xcd0   : > { %5088 = vperm.xlu0 %7922, %v10508_v52  }
 0xcd4   : > { %7927 = vset.pattern.permute.xlu0 %v12279_v17 }
 0xcd5   : > { %5190 = vperm.xlu0 %7927, %v10512_v1  }
 0xcd9   : > { %7930 = vset.pattern.permute.xlu0 %v12280_v38 }
 0xcda   : > { %5254 = vperm.xlu0 %7930, %v10512_v1  }
 0xcde   : > { %7933 = vset.pattern.permute.xlu0 %v12281_v7 }
 0xcdf   : > { %5318 = vperm.xlu0 %7933, %v10512_v1  }
 0xce3   : > { %7936 = vset.pattern.permute.xlu0 %v12282_v28 }
 0xce4   : > { %5382 = vperm.xlu0 %7936, %v10512_v1  }
 0xce8   : > { %7939 = vset.pattern.permute.xlu0 %v12283_v33 }
 0xce9   : > { %5446 = vperm.xlu0 %7939, %v10512_v1  }
 0xced   : > { %7942 = vset.pattern.permute.xlu0 %v12284_v16 }
 0xcee   : > { %5510 = vperm.xlu0 %7942, %v10512_v1  }
 0xcf2   : > { %7945 = vset.pattern.permute.xlu0 %v12285_v32 }
 0xd43   : > { %v4783_v11 = vpop.xlane.xlu0 %4782 }
 0xd44   : > { %vm4785_vm3 = vcmp.lt.f32.partialorder %v4783_v11, %v7480_v41 }
 0xd45   : > { %vm10542_vm10 = vmand %vm12289_vm15, %vm4785_vm3  ;;  %v4780_v57 = vpop.xlane.xlu1 %4779 }
 0xd46   : > { %v12291_v22 = vsel %vm10542_vm10, 4294967295, %v12290_v22  ;;  %v10549_v55 = vsel %vm10542_vm10, 1.0, %v12241_v47  ;;  %vm4784_vm5 = vcmp.lt.f32.partialorder %v4780_v57, %v4658_v45  ;;  %v12324_v45 = vmov 17   ;;  %vm12331_vm3 = vmmov %vm12327_vm1 }
 0xd47   : > { %12292 = vst [vmem:[#allocation74_spill] sm:$0xff] %v12291_v22  ;;  %12293 = vst [vmem:[#allocation49_spill] sm:$0xff] %v10549_v55  ;;  %v4812_v20 = vmul.f32 %v10469_v27, %v10549_v55 }
 0xd48   : > { %vm10558_vm6 = vmand %vm12297_vm4, %vm4784_vm5 }
 0xd49   : > { %v12299_v59 = vsel %vm10558_vm6, 4294967295, %v12298_v59  ;;  %v10565_v58 = vsel %vm10558_vm6, 1.0, %v12241_v47  ;;  %4820 = vperm.xlu1 %7921, %v4812_v20  }
 0xd4a   : > { %12300 = vst [vmem:[#allocation60_spill] sm:$0xff] %v12299_v59  ;;  %12301 = vst [vmem:[#allocation83_spill] sm:$0xff] %v10565_v58  ;;  %v4811_v27 = vmul.f32 %v10472_v63, %v10565_v58  ;;  %v12305_v63 = vmov 2   ;;  %vm11858_vm15 = vcmp.gt.f32.partialorder %v10565_v58, 0.0 }
 0xd4b   : > { %v10619_v30 = vpop.permute.xlu0 %5088  ;;  %v4827_v23 = vsel %vm11858_vm15, 1, %v12285_v32 }
 0xd4c   : > { %4815 = vperm.xlu0 %7945, %v4811_v27  }
 0xd4d   : > { %5051 = vperm.xlu1 %7921, %v10508_v52  }
 0xd50   : > { %7946 = vset.pattern.permute.xlu0 %v12302_v43  ;;  %v10623_v24 = vpop.permute.xlu0 %5190 }
 0xd51   : > { %5574 = vperm.xlu0 %7946, %v10512_v1   ;;  %5062 = vperm.xlu1 %7921, %v10512_v1   ;;  %12316 = vst [vmem:[#allocation42_spill] sm:$0xff] %v10623_v24 }
 0xd55   : > { %7949 = vset.pattern.permute.xlu0 %v12303_v36  ;;  %7923 = vset.pattern.permute.xlu1 %v12261_v3  ;;  %v10627_v5 = vpop.permute.xlu0 %5254 }
 0xd56   : > { %5638 = vperm.xlu0 %7949, %v10512_v1   ;;  %5094 = vperm.xlu1 %7923, %v10512_v1   ;;  %12318 = vst [vmem:[#allocation47_spill] sm:$0xff] %v10627_v5 }
 0xd5a   : > { %7952 = vset.pattern.permute.xlu0 %v12304_v61  ;;  %7924 = vset.pattern.permute.xlu1 %v12305_v63  ;;  %v10631_v53 = vpop.permute.xlu0 %5318 }
 0xd5b   : > { %5702 = vperm.xlu0 %7952, %v10512_v1   ;;  %5120 = vperm.xlu1 %7924, %v10508_v52   ;;  %12319 = vst [vmem:[#allocation35_spill] sm:$0xff] %v10631_v53 }
 0xd5f   : > { %7955 = vset.pattern.permute.xlu0 %v12306_v39  ;;  %7925 = vset.pattern.permute.xlu1 %v12307_v18  ;;  %v10636_v41 = vpop.permute.xlu0 %5382 }
 0xd60   : > { %5766 = vperm.xlu0 %7955, %v10512_v1   ;;  %5152 = vperm.xlu1 %7925, %v10508_v52   ;;  %12321 = vst [vmem:[#allocation43_spill] sm:$0xff] %v10636_v41 }
 0xd64   : > { %7963 = vset.pattern.permute.xlu0 %v12308_v9  ;;  %5158 = vperm.xlu1 %7925, %v10512_v1   ;;  %v10639_v11 = vpop.permute.xlu0 %5446 }
 0xd65   : > { %5798 = vperm.xlu0 %7963, %v10512_v1   ;;  %12322 = vst [vmem:[#allocation57_spill] sm:$0xff] %v10639_v11 }
 0xd68   : > { %7926 = vset.pattern.permute.xlu1 %v12279_v17 }
 0xd69   : > { %7966 = vset.pattern.permute.xlu0 %v12309_v44  ;;  %5184 = vperm.xlu1 %7926, %v10508_v52   ;;  %v10643_v40 = vpop.permute.xlu0 %5510 }
 0xd6a   : > { %5862 = vperm.xlu0 %7966, %v10512_v1   ;;  %12323 = vst [vmem:[#allocation52_spill] sm:$0xff] %v10643_v40 }
 0xd6d   : > { %7928 = vset.pattern.permute.xlu1 %v12310_v2 }
 0xd6e   : > { %7969 = vset.pattern.permute.xlu0 %v12311_v54  ;;  %5216 = vperm.xlu1 %7928, %v10508_v52  }
 0xd6f   : > { %5926 = vperm.xlu0 %7969, %v10512_v1  }
 0xd72   : > { %5222 = vperm.xlu1 %7928, %v10512_v1  }
 0xd73   : > { %7972 = vset.pattern.permute.xlu0 %v12312_v29 }
 0xd74   : > { %5990 = vperm.xlu0 %7972, %v10512_v1  }
 0xd76   : > { %7929 = vset.pattern.permute.xlu1 %v12280_v38 }
 0xd77   : > { %5248 = vperm.xlu1 %7929, %v10508_v52  }
 0xd78   : > { %7973 = vset.pattern.permute.xlu0 %v12305_v63 }
 0xd79   : > { %5126 = vperm.xlu0 %7973, %v10512_v1  }
 0xd7b   : > { %7931 = vset.pattern.permute.xlu1 %v12313_v31 }
 0xd7c   : > { %5280 = vperm.xlu1 %7931, %v10508_v52  }
 0xd80   : > { %5286 = vperm.xlu1 %7931, %v10512_v1  }
 0xd84   : > { %7932 = vset.pattern.permute.xlu1 %v12281_v7 }
 0xd85   : > { %5312 = vperm.xlu1 %7932, %v10508_v52  }
 0xd89   : > { %7934 = vset.pattern.permute.xlu1 %v12314_v49 }
 0xd8a   : > { %5344 = vperm.xlu1 %7934, %v10508_v52  }
 0xd8e   : > { %5350 = vperm.xlu1 %7934, %v10512_v1  }
 0xd92   : > { %7935 = vset.pattern.permute.xlu1 %v12282_v28 }
 0xd93   : > { %5376 = vperm.xlu1 %7935, %v10508_v52  }
 0xd97   : > { %7937 = vset.pattern.permute.xlu1 %v12315_v35 }
 0xd98   : > { %5408 = vperm.xlu1 %7937, %v10508_v52  }
 0xd9c   : > { %5414 = vperm.xlu1 %7937, %v10512_v1  }
 0xda0   : > { %7938 = vset.pattern.permute.xlu1 %v12283_v33 }
 0xda1   : > { %5440 = vperm.xlu1 %7938, %v10508_v52  }
 0xda5   : > { %7940 = vset.pattern.permute.xlu1 %v12317_v37 }
 0xda6   : > { %5472 = vperm.xlu1 %7940, %v10508_v52  }
 0xdaa   : > { %5478 = vperm.xlu1 %7940, %v10512_v1  }
 0xdae   : > { %7941 = vset.pattern.permute.xlu1 %v12284_v16 }
 0xdaf   : > { %5504 = vperm.xlu1 %7941, %v10508_v52  }
 0xdb3   : > { %7943 = vset.pattern.permute.xlu1 %v12320_v46 }
 0xdb4   : > { %5536 = vperm.xlu1 %7943, %v10508_v52  }
 0xdb8   : > { %5542 = vperm.xlu1 %7943, %v10512_v1  }
 0xdbc   : > { %7944 = vset.pattern.permute.xlu1 %v12302_v43 }
 0xdbd   : > { %5568 = vperm.xlu1 %7944, %v10508_v52  }
 0xdc1   : > { %7947 = vset.pattern.permute.xlu1 %v12324_v45 }
 0xdc2   : > { %5600 = vperm.xlu1 %7947, %v10508_v52  }
 0xdc4   : > { %v4821_v26 = vpop.permute.xlu1 %4820 }
 0xdc5   : > { %v4824_v57 = vmul.f32 %v4821_v26, %v10430_v34  ;;  %v12332_v34 = vmov 21  }
 0xdc6   : > { %5606 = vperm.xlu1 %7947, %v10512_v1  }
 0xdc7   : > { %v4816_v60 = vpop.permute.xlu0 %4815  ;;  %v4845_v20 = vmax.f32 %v4824_v57, 0.0 }
 0xdc8   : > { %v4823_v21 = vmul.f32 %v4816_v60, %v10426_v0  ;;  %v12330_v0 = vmov 19  }
 0xdca   : > { %v4844_v48 = vmax.f32 %v4823_v21, 0.0  ;;  %7948 = vset.pattern.permute.xlu1 %v12303_v36  ;;  %v12338_v21 = vmov 26  }
 0xdcb   : > { %5632 = vperm.xlu1 %7948, %v10508_v52  }
 0xdcc   : > { %v4846_v27 = vpack.c.bf16 %v4845_v20, %v4844_v48 }
 0xdce   : > { %7493 = vmatmul.mubr.msk.bf16.vlgmr.msra.gmra.mxu0 %vm12325_vm8, %v4846_v27  ;;  %7501 = vmatmul.mubr.msk.bf16.vlgmr.msra.gmra.mxu1 %vm12326_vm13, %v4846_v27  ;;  %v4864_v19 = vsel %vm12327_vm1, %v4846_v27, 0 }
 0xdcf   : > { %7584 = vmatprep.subr.msk.bf16.mxu0 %vm12328_vm12, %v4846_v27  ;;  %7506 = vmatprep.mubr.msk.bf16.mxu0 %vm12329_vm11, %v10537_v6  ;;  %v12333_v6 = vpack.i.bf16 %v10549_v55, %v10565_v58  ;;  %v12339_v27 = vmov 28  }
 0xdd0   : > { %7505 = vmatpush3.bf16.xpose.msra.mxu0 %v4864_v19  ;;  %7950 = vset.pattern.permute.xlu1 %v12330_v0  ;;  %v12335_v19 = vmov 24  }
 0xdd1   : > { %5664 = vperm.xlu1 %7950, %v10508_v52   ;;  %7512 = vmatprep.mubr.msk.bf16.mxu1 %vm12272_vm2, %v12241_v47 }
 0xdd5   : > { %5670 = vperm.xlu1 %7950, %v10512_v1  }
 0xdd7   : > { %7507 = vmatmul.mubr.msk.bf16.vlgmr.msra.gmra.mxu0 %vm12331_vm3, %v10528_v62  ;;  %v10676_v62 = vpop.permute.xlu1 %5051 }
 0xdd8   : > { %12334 = vst [vmem:[#allocation100_spill] sm:$0xff] %v10676_v62 }
 0xdd9   : > { %7951 = vset.pattern.permute.xlu1 %v12304_v61 }
 0xdda   : > { %5696 = vperm.xlu1 %7951, %v10508_v52  }
 0xddb   : > { %v10681_v26 = vpop.permute.xlu1 %5062 }
 0xddc   : > { %12336 = vst [vmem:[#allocation77_spill] sm:$0xff] %v10681_v26 }
 0xdde   : > { %7953 = vset.pattern.permute.xlu1 %v12332_v34 }
 0xddf   : > { %5728 = vperm.xlu1 %7953, %v10508_v52   ;;  %v10684_v57 = vpop.permute.xlu1 %5094 }
 0xde3   : > { %5734 = vperm.xlu1 %7953, %v10512_v1   ;;  %v10689_v60 = vpop.permute.xlu1 %5120 }
 0xde4   : > { %12337 = vst [vmem:[#allocation37_spill] sm:$0xff] %v10689_v60 }
 0xde7   : > { %7954 = vset.pattern.permute.xlu1 %v12306_v39  ;;  %v10693_v20 = vpop.permute.xlu1 %5152 }
 0xde8   : > { %5760 = vperm.xlu1 %7954, %v10508_v52  }
 0xdeb   : > { %v10696_v48 = vpop.permute.xlu1 %5158 }
 0xdec   : > { %7956 = vset.pattern.permute.xlu1 %v12285_v32 }
 0xded   : > { %7958 = vperm.xlu1 %7956, %v12333_v6  }
 0xdef   : > { %v10701_v6 = vpop.permute.xlu1 %5184 }
 0xdf0   : > { %12340 = vst [vmem:[#allocation67_spill] sm:$0xff] %v10701_v6 }
 0xdf1   : > { %7962 = vset.pattern.permute.xlu1 %v12308_v9 }
 0xdf2   : > { %5792 = vperm.xlu1 %7962, %v10508_v52  }
 0xdf3   : > { %v10705_v59 = vpop.permute.xlu1 %5216 }
 0xdf4   : > { %12341 = vst [vmem:[#allocation53_spill] sm:$0xff] %v10705_v59 }
 0xdf6   : > { %7964 = vset.pattern.permute.xlu1 %v12335_v19 }
 0xdf7   : > { %5824 = vperm.xlu1 %7964, %v10508_v52   ;;  %v10709_v22 = vpop.permute.xlu1 %5222 }
 0xdf8   : > { %12342 = vst [vmem:[#allocation44_spill] sm:$0xff] %v10709_v22 }
 0xdfb   : > { %5830 = vperm.xlu1 %7964, %v10512_v1   ;;  %v10713_v14 = vpop.permute.xlu1 %5248 }
 0xdfc   : > { %12344 = vst [vmem:[#allocation76_spill] sm:$0xff] %v10713_v14 }
 0xdff   : > { %7965 = vset.pattern.permute.xlu1 %v12309_v44  ;;  %v10721_v15 = vpop.permute.xlu1 %5280 }
 0xe00   : > { %5856 = vperm.xlu1 %7965, %v10508_v52   ;;  %12345 = vst [vmem:[#allocation85_spill] sm:$0xff] %v10721_v15 }
 0xe03   : > { %v10723_v4 = vpop.permute.xlu1 %5286 }
 0xe04   : > { %7967 = vset.pattern.permute.xlu1 %v12338_v21  ;;  %12346 = vst [vmem:[#allocation107_spill] sm:$0xff] %v10723_v4 }
 0xe05   : > { %5888 = vperm.xlu1 %7967, %v10508_v52  }
 0xe07   : > { %v10725_v12 = vpop.permute.xlu1 %5312 }
 0xe08   : > { %12348 = vst [vmem:[#allocation46_spill] sm:$0xff] %v10725_v12 }
 0xe09   : > { %5894 = vperm.xlu1 %7967, %v10512_v1  }
 0xe0b   : > { %v10727_v40 = vpop.permute.xlu1 %5344 }
 0xe0c   : > { %12349 = vst [vmem:[#allocation63_spill] sm:$0xff] %v10727_v40 }
 0xe0d   : > { %7968 = vset.pattern.permute.xlu1 %v12311_v54 }
 0xe0e   : > { %5920 = vperm.xlu1 %7968, %v10508_v52  }
 0xe0f   : > { %v10729_v11 = vpop.permute.xlu1 %5350 }
 0xe10   : > { %12350 = vst [vmem:[#allocation71_spill] sm:$0xff] %v10729_v11 }
 0xe12   : > { %7970 = vset.pattern.permute.xlu1 %v12339_v27 }
 0xe13   : > { %5952 = vperm.xlu1 %7970, %v10508_v52  }
 0xe17   : > { %5958 = vperm.xlu1 %7970, %v10512_v1  }
 0xe1b   : > { %7971 = vset.pattern.permute.xlu1 %v12312_v29 }
 0xe1c   : > { %5984 = vperm.xlu1 %7971, %v10508_v52  }
 0xe20   : > { %7974 = vset.pattern.permute.xlu1 %v12343_v42 }
 0xe21   : > { %6016 = vperm.xlu1 %7974, %v10508_v52  }
 0xe25   : > { %6022 = vperm.xlu1 %7974, %v10512_v1   ;;  %v10731_v1 = vpop.permute.xlu1 %5376 }
 0xe26   : > { %12351 = vst [vmem:[#allocation59_spill] sm:$0xff] %v10731_v1 }
 0xe29   : > { %7975 = vset.pattern.permute.xlu1 %v12285_v32  ;;  %v10733_v55 = vpop.permute.xlu1 %5408 }
 0xe2a   : > { %4830 = vperm.xlu1 %7975, %v4827_v23   ;;  %12353 = vst [vmem:[#allocation58_spill] sm:$0xff] %v10733_v55  ;;  %v7223_v55 = vld [vmem:[%s12347_s16] ss:$0 sm:$0xff] }
 0xe2d   : > { %v10735_v52 = vpop.permute.xlu1 %5414 }
 0xe2e   : > { %12354 = vst [vmem:[#allocation64_spill] sm:$0xff] %v10735_v52 }
 0xe31   : > { %v10737_v58 = vpop.permute.xlu1 %5440 }
 0xe32   : > { %12355 = vst [vmem:[#allocation102_spill] sm:$0xff] %v10737_v58 }
 0xe35   : > { %v10739_v23 = vpop.permute.xlu1 %5472 }
 0xe36   : > { %12356 = vst [vmem:[#allocation101_spill] sm:$0xff] %v10739_v23  ;;  %v7219_v23 = vld [vmem:[%s12352_s8] ss:$0 sm:$0xff]  ;;  %s12514_s8 = sld [smem:[#allocation24_spill]] }
 0xe39   : > { %v10741_v41 = vpop.permute.xlu1 %5478 }
 0xe3a   : > { %12357 = vst [vmem:[#allocation68_spill] sm:$0xff] %v10741_v41 }
 0xe3d   : > { %v10743_v4 = vpop.permute.xlu1 %5504 }
 0xe3e   : > { %12358 = vst [vmem:[#allocation38_spill] sm:$0xff] %v10743_v4 }
 0xe41   : > { %v10745_v15 = vpop.permute.xlu1 %5536 }
 0xe42   : > { %12359 = vst [vmem:[#allocation79_spill] sm:$0xff] %v10745_v15 }
 0xe45   : > { %v10747_v40 = vpop.permute.xlu1 %5542 }
 0xe46   : > { %12360 = vst [vmem:[#allocation75_spill] sm:$0xff] %v10747_v40 }
 0xe49   : > { %v10749_v11 = vpop.permute.xlu1 %5568 }
 0xe4a   : > { %12361 = vst [vmem:[#allocation87_spill] sm:$0xff] %v10749_v11 }
 0xe4d   : > { %v10751_v1 = vpop.permute.xlu1 %5600 }
 0xe4e   : > { %12362 = vst [vmem:[#allocation73_spill] sm:$0xff] %v10751_v1 }
 0xe51   : > { %v10753_v53 = vpop.permute.xlu1 %5606 }
 0xe52   : > { %12363 = vst [vmem:[#allocation62_spill] sm:$0xff] %v10753_v53 }
 0xe55   : > { %v10759_v59 = vpop.permute.xlu1 %5632 }
 0xe56   : > { %12364 = vst [vmem:[#allocation48_spill] sm:$0xff] %v10759_v59 }
 0xe8e   : > { %v4906_v52 = vpop.f32.mrf.mxu0  ;;  %v4969_v12 = vpop.f32.mrf.mxu1 }
 0xe8f   : > { %v10756_v58 = vadd.f32 %v7223_v55, %v4969_v12  ;;  %v4907_v11 = vadd.f32 %v7219_v23, %v4906_v52  ;;  %v10769_v12 = vpop.permute.xlu1 %5664 }
 0xe90   : > { %v7494_v22 = vpop.f32.mrf.mxu0  ;;  %v7502_v41 = vpop.f32.mrf.mxu1 }
 0xe91   : > { %5104 = vperm.xlu0 %7973, %v10756_v58   ;;  %5029 = vperm.xlu1 %7975, %v10756_v58  }
 0xe92   : > { %v4909_v40 = vpop.f32.mrf.mxu0  ;;  %v4972_v15 = vpop.f32.mrf.mxu1 }
 0xe93   : > { %v4910_v1 = vadd.f32 %v7219_v23, %v4909_v40  ;;  %v10763_v4 = vadd.f32 %v7223_v55, %v4972_v15  ;;  %v10776_v15 = vpop.permute.xlu1 %5670  ;;  %v12369_v40 = vmov 31   ;;  %v10842_v23 = vpop.permute.xlu0 %5574 }
 0xe94   : > { %v7495_v53 = vpop.f32.mrf.mxu0  ;;  %v7503_v5 = vpop.f32.mrf.mxu1  ;;  %12370 = vst [vmem:[#allocation89_spill] sm:$0xff] %v10842_v23 }
 0xe95   : > { %v5025_v14 = vpack.c.bf16 %v4910_v1, %v4907_v11  ;;  %7978 = vset.pattern.permute.xlu0 %v12279_v17  ;;  %7976 = vset.pattern.permute.xlu1 %v12261_v3 }
 0xe96   : > { %5168 = vperm.xlu0 %7978, %v10756_v58   ;;  %5072 = vperm.xlu1 %7976, %v10756_v58  }
 0xe97   : > { %7511 = vmatpush3.bf16.msra.mxu1 %v5025_v14  ;;  %v10782_v14 = vpop.permute.xlu1 %5696 }
 0xe98   : > { %7527 = vmatprep.subr.mxu1 %v12241_v47 }
 0xe9a   : > { %7980 = vset.pattern.permute.xlu0 %v12280_v38  ;;  %7977 = vset.pattern.permute.xlu1 %v12307_v18 }
 0xe9b   : > { %5232 = vperm.xlu0 %7980, %v10756_v58   ;;  %5136 = vperm.xlu1 %7977, %v10756_v58   ;;  %v10790_v52 = vpop.permute.xlu1 %5728 }
 0xe9f   : > { %7982 = vset.pattern.permute.xlu0 %v12281_v7  ;;  %7979 = vset.pattern.permute.xlu1 %v12310_v2  ;;  %v10798_v1 = vpop.permute.xlu1 %5734 }
 0xea0   : > { %5296 = vperm.xlu0 %7982, %v10756_v58   ;;  %5200 = vperm.xlu1 %7979, %v10756_v58  }
 0xea3   : > { %v10804_v22 = vpop.permute.xlu1 %5760 }
 0xea4   : > { %7984 = vset.pattern.permute.xlu0 %v12282_v28  ;;  %7981 = vset.pattern.permute.xlu1 %v12313_v31 }
 0xea5   : > { %5360 = vperm.xlu0 %7984, %v10756_v58   ;;  %5264 = vperm.xlu1 %7981, %v10756_v58  }
 0xea7   : > { %v10810_v55 = vpop.permute.xlu1 %7958 }
 0xea8   : > { %12365 = vst [vmem:[#allocation81_spill] sm:$0xff] %v10810_v55  ;;  %v10852_v55 = vpop.permute.xlu0 %5638 }
 0xea9   : > { %7986 = vset.pattern.permute.xlu0 %v12283_v33  ;;  %7983 = vset.pattern.permute.xlu1 %v12314_v49  ;;  %12372 = vst [vmem:[#allocation91_spill] sm:$0xff] %v10852_v55 }
 0xeaa   : > { %5424 = vperm.xlu0 %7986, %v10756_v58   ;;  %5328 = vperm.xlu1 %7983, %v10756_v58  }
 0xeab   : > { %v10816_v5 = vpop.permute.xlu1 %5792 }
 0xeae   : > { %7988 = vset.pattern.permute.xlu0 %v12284_v16  ;;  %7985 = vset.pattern.permute.xlu1 %v12315_v35 }
 0xeaf   : > { %5488 = vperm.xlu0 %7988, %v10756_v58   ;;  %5392 = vperm.xlu1 %7985, %v10756_v58   ;;  %v10822_v53 = vpop.permute.xlu1 %5824 }
 0xeb0   : > { %12366 = vst [vmem:[#allocation104_spill] sm:$0xff] %v10822_v53 }
 0xeb3   : > { %7990 = vset.pattern.permute.xlu0 %v12302_v43  ;;  %7987 = vset.pattern.permute.xlu1 %v12317_v37  ;;  %v10828_v41 = vpop.permute.xlu1 %5830 }
 0xeb4   : > { %5552 = vperm.xlu0 %7990, %v10756_v58   ;;  %5456 = vperm.xlu1 %7987, %v10756_v58   ;;  %12367 = vst [vmem:[#allocation50_spill] sm:$0xff] %v10828_v41 }
 0xeb7   : > { %v10836_v11 = vpop.permute.xlu1 %5856 }
 0xeb8   : > { %7992 = vset.pattern.permute.xlu0 %v12303_v36  ;;  %7989 = vset.pattern.permute.xlu1 %v12320_v46  ;;  %12368 = vst [vmem:[#allocation106_spill] sm:$0xff] %v10836_v11 }
 0xeb9   : > { %5616 = vperm.xlu0 %7992, %v10756_v58   ;;  %5520 = vperm.xlu1 %7989, %v10756_v58  }
 0xebb   : > { %v10846_v47 = vpop.permute.xlu1 %5888 }
 0xebc   : > { %12371 = vst [vmem:[#allocation51_spill] sm:$0xff] %v10846_v47  ;;  %v10860_v47 = vpop.permute.xlu0 %5702 }
 0xebd   : > { %7994 = vset.pattern.permute.xlu0 %v12304_v61  ;;  %7991 = vset.pattern.permute.xlu1 %v12324_v45  ;;  %12374 = vst [vmem:[#allocation80_spill] sm:$0xff] %v10860_v47 }
 0xebe   : > { %5680 = vperm.xlu0 %7994, %v10756_v58   ;;  %5584 = vperm.xlu1 %7991, %v10756_v58  }
 0xebf   : > { %v10854_v41 = vpop.permute.xlu1 %5894 }
 0xec0   : > { %12373 = vst [vmem:[#allocation72_spill] sm:$0xff] %v10854_v41  ;;  %v10868_v41 = vpop.permute.xlu0 %5766 }
 0xec2   : > { %7996 = vset.pattern.permute.xlu0 %v12306_v39  ;;  %7993 = vset.pattern.permute.xlu1 %v12330_v0 }
 0xec3   : > { %5744 = vperm.xlu0 %7996, %v10756_v58   ;;  %5648 = vperm.xlu1 %7993, %v10756_v58   ;;  %v10862_v53 = vpop.permute.xlu1 %5920 }
 0xec4   : > { %12375 = vst [vmem:[#allocation56_spill] sm:$0xff] %v10862_v53 }
 0xec7   : > { %7999 = vset.pattern.permute.xlu0 %v12309_v44  ;;  %7995 = vset.pattern.permute.xlu1 %v12332_v34 }
 0xec8   : > { %5840 = vperm.xlu0 %7999, %v10756_v58   ;;  %5712 = vperm.xlu1 %7995, %v10756_v58  }
 0xecc   : > { %8001 = vset.pattern.permute.xlu0 %v12311_v54  ;;  %7997 = vset.pattern.permute.xlu1 %v12308_v9 }
 0xecd   : > { %5904 = vperm.xlu0 %8001, %v10756_v58   ;;  %5776 = vperm.xlu1 %7997, %v10756_v58  }
 0xed1   : > { %8003 = vset.pattern.permute.xlu0 %v12312_v29  ;;  %7998 = vset.pattern.permute.xlu1 %v12335_v19 }
 0xed2   : > { %5968 = vperm.xlu0 %8003, %v10756_v58   ;;  %5808 = vperm.xlu1 %7998, %v10756_v58  }
 0xed6   : > { %8005 = vset.pattern.permute.xlu0 %v12369_v40  ;;  %8000 = vset.pattern.permute.xlu1 %v12338_v21 }
 0xed7   : > { %6032 = vperm.xlu0 %8005, %v10756_v58   ;;  %5872 = vperm.xlu1 %8000, %v10756_v58  }
 0xedb   : > { %8006 = vset.pattern.permute.xlu0 %v12285_v32  ;;  %8002 = vset.pattern.permute.xlu1 %v12339_v27 }
 0xedc   : > { %5034 = vperm.xlu0 %8006, %v10763_v4   ;;  %5936 = vperm.xlu1 %8002, %v10756_v58  }
 0xee0   : > { %8007 = vset.pattern.permute.xlu0 %v12261_v3  ;;  %8004 = vset.pattern.permute.xlu1 %v12343_v42  ;;  %v10870_v3 = vpop.permute.xlu1 %5952 }
 0xee1   : > { %5076 = vperm.xlu0 %8007, %v10763_v4   ;;  %6000 = vperm.xlu1 %8004, %v10756_v58   ;;  %12376 = vst [vmem:[#allocation108_spill] sm:$0xff] %v10870_v3  ;;  %v10876_v58 = vpop.permute.xlu0 %5798 }
 0xee5   : > { %8009 = vset.pattern.permute.xlu0 %v12307_v18  ;;  %8008 = vset.pattern.permute.xlu1 %v12305_v63  ;;  %v10880_v63 = vpop.permute.xlu1 %5958 }
 0xee6   : > { %5140 = vperm.xlu0 %8009, %v10763_v4   ;;  %5108 = vperm.xlu1 %8008, %v10763_v4   ;;  %12377 = vst [vmem:[#allocation82_spill] sm:$0xff] %v10880_v63 }
 0xee9   : > { %v10890_v18 = vpop.permute.xlu1 %5984 }
 0xeea   : > { %8011 = vset.pattern.permute.xlu0 %v12310_v2  ;;  %8010 = vset.pattern.permute.xlu1 %v12279_v17  ;;  %v10886_v17 = vpop.permute.xlu0 %5862  ;;  %12379 = vst [vmem:[#allocation84_spill] sm:$0xff] %v10890_v18 }
 0xeeb   : > { %5204 = vperm.xlu0 %8011, %v10763_v4   ;;  %5172 = vperm.xlu1 %8010, %v10763_v4   ;;  %12378 = vst [vmem:[#allocation93_spill] sm:$0xff] %v10886_v17 }
 0xeed   : > { %v10898_v2 = vpop.permute.xlu1 %6016 }
 0xeee   : > { %12381 = vst [vmem:[#allocation103_spill] sm:$0xff] %v10898_v2 }
 0xeef   : > { %8013 = vset.pattern.permute.xlu0 %v12313_v31  ;;  %8012 = vset.pattern.permute.xlu1 %v12280_v38  ;;  %v10896_v38 = vpop.permute.xlu0 %5926 }
 0xef0   : > { %5268 = vperm.xlu0 %8013, %v10763_v4   ;;  %5236 = vperm.xlu1 %8012, %v10763_v4   ;;  %12380 = vst [vmem:[#allocation86_spill] sm:$0xff] %v10896_v38 }
 0xef1   : > { %v10906_v31 = vpop.permute.xlu1 %6022 }
 0xef2   : > { %12383 = vst [vmem:[#allocation88_spill] sm:$0xff] %v10906_v31 }
 0xef4   : > { %8015 = vset.pattern.permute.xlu0 %v12314_v49  ;;  %8014 = vset.pattern.permute.xlu1 %v12281_v7  ;;  %v10904_v7 = vpop.permute.xlu0 %5990 }
 0xef5   : > { %5332 = vperm.xlu0 %8015, %v10763_v4   ;;  %5300 = vperm.xlu1 %8014, %v10763_v4   ;;  %12382 = vst [vmem:[#allocation110_spill] sm:$0xff] %v10904_v7 }
 0xef8   : > { %v10914_v49 = vpop.permute.xlu0 %5126 }
 0xef9   : > { %8017 = vset.pattern.permute.xlu0 %v12315_v35  ;;  %8016 = vset.pattern.permute.xlu1 %v12282_v28  ;;  %v10912_v28 = vpop.f32.mrf.mxu0 }
 0xefa   : > { %5396 = vperm.xlu0 %8017, %v10763_v4   ;;  %5364 = vperm.xlu1 %8016, %v10763_v4  }
 0xefb   : > { %v10920_v35 = vpop.f32.mrf.mxu0 }
 0xefc   : > { %v10944_v3 = vrot.slane %v10920_v35, %v11951_v8 }
 0xefe   : > { %8019 = vset.pattern.permute.xlu0 %v12317_v37  ;;  %8018 = vset.pattern.permute.xlu1 %v12283_v33  ;;  %v10916_v33 = vpop.permute.xlu1 %4830  ;;  %12389 = vst [vmem:[#allocation105_spill] sm:$0xff] %v10944_v3 }
 0xeff   : > { %5460 = vperm.xlu0 %8019, %v10763_v4   ;;  %5428 = vperm.xlu1 %8018, %v10763_v4   ;;  %12384 = vst [vmem:[#allocation95_spill] sm:$0xff] %v10916_v33 }
 0xf03   : > { %8021 = vset.pattern.permute.xlu0 %v12320_v46  ;;  %8020 = vset.pattern.permute.xlu1 %v12284_v16  ;;  %v10926_v16 = vrot.slane %v10920_v35, %v8521_v10  ;;  %v10930_v46 = vrot.slane %v10920_v35, %v8946_v25 }
 0xf04   : > { %5524 = vperm.xlu0 %8021, %v10763_v4   ;;  %5492 = vperm.xlu1 %8020, %v10763_v4  }
 0xf05   : > { %12385 = vst [vmem:[#allocation90_spill] sm:$0xff] %v10926_v16  ;;  %12386 = vst [vmem:[#allocation92_spill] sm:$0xff] %v10930_v46 }
 0xf08   : > { %8023 = vset.pattern.permute.xlu0 %v12324_v45  ;;  %8022 = vset.pattern.permute.xlu1 %v12302_v43  ;;  %v12387_v43 = vld [vmem:[#allocation69_spill] sm:$0xff] }
 0xf09   : > { %5588 = vperm.xlu0 %8023, %v10763_v4   ;;  %5556 = vperm.xlu1 %8022, %v10763_v4   ;;  %v10938_v45 = vrot.slane %v10920_v35, %v12387_v43 }
 0xf0b   : > { %12388 = vst [vmem:[#allocation99_spill] sm:$0xff] %v10938_v45 }
 0xf0c   : > { %v5105_v37 = vpop.permute.xlu0 %5104  ;;  %v5030_v33 = vpop.permute.xlu1 %5029 }
 0xf0d   : > { %8025 = vset.pattern.permute.xlu0 %v12330_v0  ;;  %8024 = vset.pattern.permute.xlu1 %v12303_v36  ;;  %v5041_v31 = vadd.f32 %v10926_v16, %v5030_v33  ;;  %v5115_v2 = vadd.f32 %v10930_v46, %v5105_v37  ;;  %v10955_v33 = vrot.slane %v10920_v35, %v8961_v56 }
 0xf0e   : > { %5652 = vperm.xlu0 %8025, %v10763_v4   ;;  %5620 = vperm.xlu1 %8024, %v10763_v4  }
 0xf0f   : > { %v5054_v7 = vmul.f32 %v10676_v62, %v5041_v31  ;;  %v5065_v18 = vmul.f32 %v10681_v26, %v5041_v31  ;;  %v5123_v37 = vmul.f32 %v10689_v60, %v5115_v2  ;;  %vm5043_vm5 = vcmp.gt.f32.partialorder %v5041_v31, 0.0 }
 0xf10   : > { %vm5117_vm14 = vcmp.gt.f32.partialorder %v5115_v2, 0.0 }
 0xf11   : > { %v5169_v63 = vpop.permute.xlu0 %5168  ;;  %v5073_v0 = vpop.permute.xlu1 %5072  ;;  %v5067_v60 = vsel %vm5043_vm5, %v5054_v7, %v5065_v18 }
 0xf12   : > { %v5083_v36 = vadd.f32 %v10938_v45, %v5073_v0  ;;  %8027 = vset.pattern.permute.xlu0 %v12332_v34  ;;  %8026 = vset.pattern.permute.xlu1 %v12304_v61  ;;  %v10958_v0 = vpop.f32.mrf.mxu0  ;;  %v5129_v61 = vmul.f32 %v10914_v49, %v5115_v2  ;;  %v5179_v34 = vadd.f32 %v10944_v3, %v5169_v63 }
 0xf13   : > { %5716 = vperm.xlu0 %8027, %v10763_v4   ;;  %5684 = vperm.xlu1 %8026, %v10763_v4   ;;  %12390 = vst [vmem:[#allocation112_spill] sm:$0xff] %v10958_v0  ;;  %v10966_v45 = vrot.slane %v10920_v35, %v12112_v13 }
 0xf14   : > { %vm5085_vm7 = vcmp.gt.f32.partialorder %v5083_v36, 0.0  ;;  %v5091_v46 = vmul.f32 %v10619_v30, %v5083_v36  ;;  %v5097_v26 = vmul.f32 %v10684_v57, %v5083_v36  ;;  %v10973_v2 = vpop.f32.mrf.mxu0  ;;  %v10977_v36 = vrot.slane %v10920_v35, %v12168_v51 }
 0xf15   : > { %12391 = vst [vmem:[#allocation94_spill] sm:$0xff] %v10966_v45  ;;  %v5131_v3 = vsel %vm5117_vm14, %v5123_v37, %v5129_v61  ;;  %v5193_v18 = vmul.f32 %v10623_v24, %v5179_v34  ;;  %vm5181_vm8 = vcmp.gt.f32.partialorder %v5179_v34, 0.0 }
 0xf16   : > { %v5233_v62 = vpop.permute.xlu0 %5232  ;;  %v5137_v16 = vpop.permute.xlu1 %5136  ;;  %v5099_v31 = vsel %vm5085_vm7, %v5091_v46, %v5097_v26  ;;  %v5187_v26 = vmul.f32 %v10701_v6, %v5179_v34  ;;  %v10986_v46 = vrot.slane %v10973_v2, %v8521_v10  ;;  %v12394_v34 = vld [vmem:[#allocation76_spill] sm:$0xff]  ;;  %v11004_v6 = vrot.slane %v10973_v2, %v8946_v25 }
 0xf17   : > { %v5147_v38 = vadd.f32 %v10955_v33, %v5137_v16  ;;  %8029 = vset.pattern.permute.xlu0 %v12308_v9  ;;  %8028 = vset.pattern.permute.xlu1 %v12306_v39  ;;  %v5101_v63 = vadd.f32 %v5099_v31, %v5067_v60  ;;  %v5243_v9 = vadd.f32 %v10966_v45, %v5233_v62  ;;  %v12395_v45 = vld [vmem:[#allocation47_spill] sm:$0xff] }
 0xf18   : > { %5780 = vperm.xlu0 %8029, %v10763_v4   ;;  %5748 = vperm.xlu1 %8028, %v10763_v4   ;;  %12392 = vst [vmem:[#allocation97_spill] sm:$0xff] %v10986_v46  ;;  %12398 = vst [vmem:[#allocation70_spill] sm:$0xff] %v11004_v6 }
 0xf19   : > { %vm5149_vm4 = vcmp.gt.f32.partialorder %v5147_v38, 0.0  ;;  %v5133_v39 = vadd.f32 %v5131_v3, %v5101_v63  ;;  %v5155_v60 = vmul.f32 %v10693_v20, %v5147_v38  ;;  %v5161_v7 = vmul.f32 %v10696_v48, %v5147_v38 }
 0xf1a   : > { %v10995_v3 = vrot.slane %v10920_v35, %v12117_v50  ;;  %v5195_v38 = vsel %vm5181_vm8, %v5187_v26, %v5193_v18  ;;  %v5251_v63 = vmul.f32 %v12394_v34, %v5243_v9  ;;  %vm5245_vm1 = vcmp.gt.f32.partialorder %v5243_v9, 0.0 }
 0xf1b   : > { %v5297_v16 = vpop.permute.xlu0 %5296  ;;  %v5201_v31 = vpop.permute.xlu1 %5200  ;;  %v5163_v37 = vsel %vm5149_vm4, %v5155_v60, %v5161_v7  ;;  %v5257_v60 = vmul.f32 %v12395_v45, %v5243_v9  ;;  %v11013_v9 = vrot.slane %v10973_v2, %v12387_v43  ;;  %v11022_v34 = vrot.slane %v10973_v2, %v11951_v8 }
 0xf1c   : > { %v5211_v61 = vadd.f32 %v10977_v36, %v5201_v31  ;;  %8030 = vset.pattern.permute.xlu0 %v12335_v19  ;;  %8031 = vset.pattern.permute.xlu1 %v12309_v44  ;;  %v5165_v62 = vadd.f32 %v5163_v37, %v5133_v39  ;;  %12393 = vst [vmem:[#allocation54_spill] sm:$0xff] %v10995_v3  ;;  %v12396_v31 = vld [vmem:[#allocation53_spill] sm:$0xff]  ;;  %v12397_v39 = vld [vmem:[#allocation44_spill] sm:$0xff] }
 0xf1d   : > { %5812 = vperm.xlu0 %8030, %v10763_v4   ;;  %5844 = vperm.xlu1 %8031, %v10763_v4   ;;  %v5307_v7 = vadd.f32 %v10986_v46, %v5297_v16  ;;  %12399 = vst [vmem:[#allocation96_spill] sm:$0xff] %v11013_v9  ;;  %v12401_v46 = vld [vmem:[#allocation35_spill] sm:$0xff]  ;;  %12404 = vst [vmem:[#allocation98_spill] sm:$0xff] %v11022_v34 }
 0xf1e   : > { %vm5213_vm13 = vcmp.gt.f32.partialorder %v5211_v61, 0.0  ;;  %v5197_v19 = vadd.f32 %v5195_v38, %v5165_v62  ;;  %v5219_v44 = vmul.f32 %v12396_v31, %v5211_v61  ;;  %v5225_v37 = vmul.f32 %v12397_v39, %v5211_v61  ;;  %v12400_v62 = vld [vmem:[#allocation46_spill] sm:$0xff] }
 0xf1f   : > { %v5259_v61 = vsel %vm5245_vm1, %v5251_v63, %v5257_v60  ;;  %v5315_v38 = vmul.f32 %v12400_v62, %v5307_v7  ;;  %vm5309_vm11 = vcmp.gt.f32.partialorder %v5307_v7, 0.0  ;;  %v11040_v62 = vrot.slane %v10973_v2, %v12112_v13 }
 0xf20   : > { %v5361_v24 = vpop.permute.xlu0 %5360  ;;  %v5265_v35 = vpop.permute.xlu1 %5264  ;;  %v5227_v26 = vsel %vm5213_vm13, %v5219_v44, %v5225_v37  ;;  %v5321_v44 = vmul.f32 %v12401_v46, %v5307_v7  ;;  %v11031_v7 = vrot.slane %v10973_v2, %v8961_v56 }
 0xf21   : > { %v5275_v18 = vadd.f32 %v10995_v3, %v5265_v35  ;;  %8032 = vset.pattern.permute.xlu0 %v12338_v21  ;;  %8033 = vset.pattern.permute.xlu1 %v12311_v54  ;;  %v5229_v16 = vadd.f32 %v5227_v26, %v5197_v19  ;;  %v5371_v37 = vadd.f32 %v11004_v6, %v5361_v24  ;;  %v12402_v35 = vld [vmem:[#allocation85_spill] sm:$0xff]  ;;  %v12403_v19 = vld [vmem:[#allocation107_spill] sm:$0xff] }
 0xf22   : > { %5876 = vperm.xlu0 %8032, %v10763_v4   ;;  %5908 = vperm.xlu1 %8033, %v10763_v4   ;;  %12405 = vst [vmem:[#allocation36_spill] sm:$0xff] %v11031_v7  ;;  %v12407_v6 = vld [vmem:[#allocation43_spill] sm:$0xff]  ;;  %12410 = vst [vmem:[#allocation55_spill] sm:$0xff] %v11040_v62 }
 0xf23   : > { %vm5277_vm12 = vcmp.gt.f32.partialorder %v5275_v18, 0.0  ;;  %v5261_v21 = vadd.f32 %v5259_v61, %v5229_v16  ;;  %v5283_v54 = vmul.f32 %v12402_v35, %v5275_v18  ;;  %v5289_v26 = vmul.f32 %v12403_v19, %v5275_v18  ;;  %v12406_v16 = vld [vmem:[#allocation59_spill] sm:$0xff] }
 0xf24   : > { %v5323_v18 = vsel %vm5309_vm11, %v5315_v38, %v5321_v44  ;;  %v5379_v61 = vmul.f32 %v12406_v16, %v5371_v37  ;;  %vm5373_vm5 = vcmp.gt.f32.partialorder %v5371_v37, 0.0 }
 0xf25   : > { %v5425_v45 = vpop.permute.xlu0 %5424  ;;  %v5329_v3 = vpop.permute.xlu1 %5328  ;;  %v5291_v63 = vsel %vm5277_vm12, %v5283_v54, %v5289_v26  ;;  %v5385_v54 = vmul.f32 %v12407_v6, %v5371_v37  ;;  %v12408_v26 = vld [vmem:[#allocation63_spill] sm:$0xff]  ;;  %v11049_v37 = vrot.slane %v10973_v2, %v12168_v51  ;;  %v12417_v6 = vld [vmem:[#allocation64_spill] sm:$0xff] }
 0xf26   : > { %v5339_v60 = vadd.f32 %v11013_v9, %v5329_v3  ;;  %8034 = vset.pattern.permute.xlu0 %v12339_v27  ;;  %8035 = vset.pattern.permute.xlu1 %v12312_v29  ;;  %v5293_v24 = vadd.f32 %v5291_v63, %v5261_v21  ;;  %v5435_v3 = vadd.f32 %v11022_v34, %v5425_v45  ;;  %v12409_v21 = vld [vmem:[#allocation71_spill] sm:$0xff]  ;;  %v12414_v34 = vld [vmem:[#allocation102_spill] sm:$0xff] }
 0xf27   : > { %5940 = vperm.xlu0 %8034, %v10763_v4   ;;  %5972 = vperm.xlu1 %8035, %v10763_v4   ;;  %12412 = vst [vmem:[#allocation66_spill] sm:$0xff] %v11049_v37 }
 0xf28   : > { %vm5341_vm3 = vcmp.gt.f32.partialorder %v5339_v60, 0.0  ;;  %v5325_v27 = vadd.f32 %v5323_v18, %v5293_v24  ;;  %v5347_v29 = vmul.f32 %v12408_v26, %v5339_v60  ;;  %v5353_v63 = vmul.f32 %v12409_v21, %v5339_v60  ;;  %v12411_v24 = vld [vmem:[#allocation40_spill] sm:$0xff]  ;;  %v12413_v60 = vld [vmem:[#allocation49_spill] sm:$0xff] }
 0xf29   : > { %vm4826_vm7 = vcmp.gt.f32.partialorder %v12413_v60, 0.0  ;;  %v5387_v18 = vsel %vm5373_vm5, %v5379_v61, %v5385_v54  ;;  %vm5437_vm4 = vcmp.gt.f32.partialorder %v5435_v3, 0.0 }
 0xf2a   : > { %v5489_v46 = vpop.permute.xlu0 %5488  ;;  %v5393_v9 = vpop.permute.xlu1 %5392  ;;  %v5355_v38 = vsel %vm5341_vm3, %v5347_v29, %v5353_v63  ;;  %v5443_v29 = vmul.f32 %v12414_v34, %v5435_v3  ;;  %v12415_v63 = vld [vmem:[#allocation57_spill] sm:$0xff] }
 0xf2b   : > { %v5403_v44 = vadd.f32 %v11031_v7, %v5393_v9  ;;  %8036 = vset.pattern.permute.xlu0 %v12343_v42  ;;  %8038 = vset.pattern.permute.xlu1 %v12369_v40  ;;  %v5357_v45 = vadd.f32 %v5355_v38, %v5325_v27  ;;  %v5449_v9 = vmul.f32 %v12415_v63, %v5435_v3  ;;  %v12416_v27 = vld [vmem:[#allocation58_spill] sm:$0xff] }
 0xf2c   : > { %6004 = vperm.xlu0 %8036, %v10763_v4   ;;  %6048 = vperm.xlu1 %8038, %v12411_v24   ;;  %v5499_v42 = vadd.f32 %v11040_v62, %v5489_v46  ;;  %v11059_v7 = vrot.slane %v10912_v28, %v8521_v10  ;;  %v4828_v46 = vsel %vm4826_vm7, 1, %v12285_v32  ;;  %v11069_v3 = vrot.slane %v10973_v2, %v12117_v50  ;;  %v12424_v2 = vld [vmem:[#allocation61_spill] sm:$0xff] }
 0xf2d   : > { %vm5405_vm14 = vcmp.gt.f32.partialorder %v5403_v44, 0.0  ;;  %v5389_v40 = vadd.f32 %v5387_v18, %v5357_v45  ;;  %v5411_v38 = vmul.f32 %v12416_v27, %v5403_v44  ;;  %v5417_v16 = vmul.f32 %v12417_v6, %v5403_v44  ;;  %v12419_v18 = vld [vmem:[#allocation38_spill] sm:$0xff] }
 0xf2e   : > { %12418 = vst [vmem:[#allocation65_spill] sm:$0xff] %v11059_v7  ;;  %v5451_v44 = vsel %vm5437_vm4, %v5443_v29, %v5449_v9  ;;  %v5507_v62 = vmul.f32 %v12419_v18, %v5499_v42  ;;  %vm5501_vm13 = vcmp.gt.f32.partialorder %v5499_v42, 0.0 }
 0xf2f   : > { %v5553_v24 = vpop.permute.xlu0 %5552  ;;  %v5457_v21 = vpop.permute.xlu1 %5456  ;;  %v5419_v61 = vsel %vm5405_vm14, %v5411_v38, %v5417_v16  ;;  %v12420_v16 = vld [vmem:[#allocation52_spill] sm:$0xff] }
 0xf30   : > { %v5467_v54 = vadd.f32 %v11049_v37, %v5457_v21  ;;  %8037 = vset.pattern.permute.xlu0 %v12285_v32  ;;  %6036 = vperm.xlu1 %8038, %v10763_v4   ;;  %v5421_v45 = vadd.f32 %v5419_v61, %v5389_v40  ;;  %v5513_v38 = vmul.f32 %v12420_v16, %v5499_v42  ;;  %v12421_v4 = vld [vmem:[#allocation101_spill] sm:$0xff]  ;;  %v12422_v37 = vld [vmem:[#allocation68_spill] sm:$0xff] }
 0xf31   : > { %4833 = vperm.xlu0 %8037, %v4828_v46   ;;  %v5563_v21 = vadd.f32 %v11059_v7, %v5553_v24  ;;  %v11078_v61 = vrot.slane %v10912_v28, %v8946_v25  ;;  %v11084_v24 = vrot.slane %v10912_v28, %v12387_v43 }
 0xf32   : > { %vm5469_vm8 = vcmp.gt.f32.partialorder %v5467_v54, 0.0  ;;  %v5453_v63 = vadd.f32 %v5451_v44, %v5421_v45  ;;  %v5475_v34 = vmul.f32 %v12421_v4, %v5467_v54  ;;  %v5481_v60 = vmul.f32 %v12422_v37, %v5467_v54  ;;  %v12425_v44 = vld [vmem:[#allocation87_spill] sm:$0xff] }
 0xf33   : > { %12423 = vst [vmem:[#allocation33_spill] sm:$0xff] %v11078_v61  ;;  %v5515_v45 = vsel %vm5501_vm13, %v5507_v62, %v5513_v38  ;;  %v5571_v54 = vmul.f32 %v12425_v44, %v5563_v21  ;;  %v5577_v42 = vmul.f32 %v10842_v23, %v5563_v21  ;;  %v12426_v37 = vld [vmem:[#allocation79_spill] sm:$0xff]  ;;  %vm5565_vm12 = vcmp.gt.f32.partialorder %v5563_v21, 0.0  ;;  %v12430_v44 = vld [vmem:[#allocation62_spill] sm:$0xff] }
 0xf34   : > { %v5617_v40 = vpop.permute.xlu0 %5616  ;;  %6054 = vperm.xlu1 %8038, %v12424_v2   ;;  %v5521_v29 = vpop.permute.xlu1 %5520  ;;  %v5483_v9 = vsel %vm5469_vm8, %v5475_v34, %v5481_v60  ;;  %v12427_v4 = vld [vmem:[#allocation75_spill] sm:$0xff] }
 0xf35   : > { %v5531_v46 = vadd.f32 %v11069_v3, %v5521_v29  ;;  %v5485_v16 = vadd.f32 %v5483_v9, %v5453_v63  ;;  %v5627_v7 = vadd.f32 %v11078_v61, %v5617_v40  ;;  %v11094_v63 = vrot.slane %v10912_v28, %v11951_v8  ;;  %v12429_v61 = vld [vmem:[#allocation73_spill] sm:$0xff] }
 0xf36   : > { %v5579_v40 = vsel %vm5565_vm12, %v5571_v54, %v5577_v42 }
 0xf37   : > { %vm5533_vm1 = vcmp.gt.f32.partialorder %v5531_v46, 0.0  ;;  %v5517_v18 = vadd.f32 %v5515_v45, %v5485_v16  ;;  %v5539_v2 = vmul.f32 %v12426_v37, %v5531_v46  ;;  %v5545_v34 = vmul.f32 %v12427_v4, %v5531_v46  ;;  %12428 = vst [vmem:[#allocation32_spill] sm:$0xff] %v11094_v63 }
 0xf38   : > { %8039 = vset.pattern.permute.xlu1 %v12285_v32  ;;  %v11099_v16 = vrot.slane %v10912_v28, %v8961_v56  ;;  %v5635_v46 = vmul.f32 %v10759_v59, %v5627_v7  ;;  %v5641_v45 = vmul.f32 %v10852_v55, %v5627_v7  ;;  %vm5629_vm3 = vcmp.gt.f32.partialorder %v5627_v7, 0.0 }
 0xf39   : > { %v5681_v60 = vpop.permute.xlu0 %5680  ;;  %v5585_v62 = vpop.permute.xlu1 %5584  ;;  %v5547_v38 = vsel %vm5533_vm1, %v5539_v2, %v5545_v34  ;;  %v11113_v55 = vrot.slane %v10912_v28, %v12168_v51 }
 0xf3a   : > { %v5595_v29 = vadd.f32 %v11084_v24, %v5585_v62  ;;  %v5549_v9 = vadd.f32 %v5547_v38, %v5517_v18  ;;  %v5691_v21 = vadd.f32 %v11094_v63, %v5681_v60  ;;  %v11108_v18 = vrot.slane %v10912_v28, %v12112_v13 }
 0xf3b   : > { %v5643_v60 = vsel %vm5629_vm3, %v5635_v46, %v5641_v45  ;;  %v11123_v46 = vrot.slane %v10912_v28, %v12117_v50  ;;  %v12437_v50 = vld [vmem:[#allocation86_spill] sm:$0xff] }
 0xf3c   : > { %vm5597_vm11 = vcmp.gt.f32.partialorder %v5595_v29, 0.0  ;;  %v5581_v32 = vadd.f32 %v5579_v40, %v5549_v9  ;;  %v5603_v23 = vmul.f32 %v12429_v61, %v5595_v29  ;;  %v5609_v2 = vmul.f32 %v12430_v44, %v5595_v29 }
 0xf3d   : > { %v5699_v9 = vmul.f32 %v10782_v14, %v5691_v21  ;;  %v5705_v29 = vmul.f32 %v10860_v47, %v5691_v21  ;;  %vm5693_vm14 = vcmp.gt.f32.partialorder %v5691_v21, 0.0 }
 0xf3e   : > { %v5745_v34 = vpop.permute.xlu0 %5744  ;;  %v5649_v62 = vpop.permute.xlu1 %5648  ;;  %v5611_v54 = vsel %vm5597_vm11, %v5603_v23, %v5609_v2 }
 0xf3f   : > { %v5659_v42 = vadd.f32 %v11099_v16, %v5649_v62  ;;  %v5613_v38 = vadd.f32 %v5611_v54, %v5581_v32  ;;  %v5755_v7 = vadd.f32 %v11108_v18, %v5745_v34  ;;  %v5707_v45 = vsel %vm5693_vm14, %v5699_v9, %v5705_v29 }
 0xf41   : > { %vm5661_vm5 = vcmp.gt.f32.partialorder %v5659_v42, 0.0  ;;  %v5645_v40 = vadd.f32 %v5643_v60, %v5613_v38  ;;  %v5667_v63 = vmul.f32 %v10769_v12, %v5659_v42  ;;  %v5673_v23 = vmul.f32 %v10776_v15, %v5659_v42 }
 0xf42   : > { %v5763_v47 = vmul.f32 %v10804_v22, %v5755_v7  ;;  %v5769_v34 = vmul.f32 %v10868_v41, %v5755_v7  ;;  %vm5757_vm8 = vcmp.gt.f32.partialorder %v5755_v7, 0.0 }
 0xf43   : > { %v5841_v2 = vpop.permute.xlu0 %5840  ;;  %v5713_v32 = vpop.permute.xlu1 %5712  ;;  %v5675_v62 = vsel %vm5661_vm5, %v5667_v63, %v5673_v23  ;;  %v11131_v63 = vrot.slane %v10958_v0, %v12387_v43  ;;  %v11136_v23 = vrot.slane %v10958_v0, %v8521_v10 }
 0xf44   : > { %v5723_v54 = vadd.f32 %v11113_v55, %v5713_v32  ;;  %v5677_v59 = vadd.f32 %v5675_v62, %v5645_v40  ;;  %v11140_v32 = vrot.slane %v10958_v0, %v8961_v56 }
 0xf45   : > { %v5851_v7 = vadd.f32 %v11131_v63, %v5841_v2 }
 0xf46   : > { %vm5725_vm4 = vcmp.gt.f32.partialorder %v5723_v54, 0.0  ;;  %v5709_v38 = vadd.f32 %v5707_v45, %v5677_v59  ;;  %v5731_v42 = vmul.f32 %v10790_v52, %v5723_v54  ;;  %v5737_v21 = vmul.f32 %v10798_v1, %v5723_v54  ;;  %12431 = vst [vmem:[#allocation41_spill] sm:$0xff] %v11140_v32 }
 0xf47   : > { %v5771_v59 = vsel %vm5757_vm8, %v5763_v47, %v5769_v34  ;;  %v11148_v47 = vrot.slane %v10958_v0, %v8946_v25  ;;  %v5859_v56 = vmul.f32 %v10836_v11, %v5851_v7  ;;  %v5865_v34 = vmul.f32 %v10886_v17, %v5851_v7  ;;  %v12439_v17 = vld [vmem:[#allocation72_spill] sm:$0xff] }
 0xf48   : > { %v5905_v60 = vpop.permute.xlu0 %5904  ;;  %v5777_v40 = vpop.permute.xlu1 %5776  ;;  %v5739_v28 = vsel %vm5725_vm4, %v5731_v42, %v5737_v21  ;;  %vm5853_vm12 = vcmp.gt.f32.partialorder %v5851_v7, 0.0  ;;  %v11165_v7 = vrot.slane %v10958_v0, %v11951_v8  ;;  %v11174_v8 = vrot.slane %v10958_v0, %v12112_v13 }
 0xf49   : > { %v5787_v9 = vadd.f32 %v11123_v46, %v5777_v40  ;;  %v5741_v29 = vadd.f32 %v5739_v28, %v5709_v38  ;;  %12432 = vst [vmem:[#allocation34_spill] sm:$0xff] %v11148_v47  ;;  %v5915_v2 = vadd.f32 %v11140_v32, %v5905_v60  ;;  %v12433_v28 = vld [vmem:[#allocation104_spill] sm:$0xff]  ;;  %v12438_v32 = vld [vmem:[#allocation51_spill] sm:$0xff] }
 0xf4b   : > { %vm5789_vm13 = vcmp.gt.f32.partialorder %v5787_v9, 0.0  ;;  %v5773_v43 = vadd.f32 %v5771_v59, %v5741_v29  ;;  %v5795_v62 = vmul.f32 %v10816_v5, %v5787_v9  ;;  %v5801_v54 = vmul.f32 %v10876_v58, %v5787_v9  ;;  %v12434_v29 = vld [vmem:[#allocation50_spill] sm:$0xff] }
 0xf4c   : > { %v5923_v10 = vmul.f32 %v10862_v53, %v5915_v2  ;;  %vm5917_vm3 = vcmp.gt.f32.partialorder %v5915_v2, 0.0 }
 0xf4d   : > { %v5969_v45 = vpop.permute.xlu0 %5968  ;;  %v5809_v42 = vpop.permute.xlu1 %5808  ;;  %v5803_v38 = vsel %vm5789_vm13, %v5795_v62, %v5801_v54  ;;  %v11157_v62 = vrot.slane %v10958_v0, %v12168_v51  ;;  %v12446_v0 = vld [vmem:[#allocation100_spill] sm:$0xff] }
 0xf4e   : > { %v5819_v21 = vadd.f32 %v11136_v23, %v5809_v42  ;;  %v5805_v40 = vadd.f32 %v5803_v38, %v5773_v43  ;;  %v5867_v38 = vsel %vm5853_vm12, %v5859_v56, %v5865_v34 }
 0xf4f   : > { %12435 = vst [vmem:[#allocation69_spill] sm:$0xff] %v11157_v62 }
 0xf50   : > { %vm5821_vm1 = vcmp.gt.f32.partialorder %v5819_v21, 0.0  ;;  %v5827_v9 = vmul.f32 %v12433_v28, %v5819_v21  ;;  %v5833_v59 = vmul.f32 %v12434_v29, %v5819_v21  ;;  %v5929_v21 = vmul.f32 %v12437_v50, %v5915_v2  ;;  %v12440_v50 = vld [vmem:[#allocation84_spill] sm:$0xff] }
 0xf52   : > { %v11159_v43 = vpop.permute.xlu0 %6032  ;;  %v5873_v25 = vpop.permute.xlu1 %5872  ;;  %v5835_v54 = vsel %vm5821_vm1, %v5827_v9, %v5833_v59  ;;  %v5979_v9 = vadd.f32 %v11157_v62, %v5969_v45  ;;  %v12447_v62 = vld [vmem:[#allocation77_spill] sm:$0xff] }
 0xf53   : > { %12436 = vst [vmem:[#allocation53_spill] sm:$0xff] %v11159_v43  ;;  %v5883_v42 = vadd.f32 %v11148_v47, %v5873_v25  ;;  %v5837_v60 = vadd.f32 %v5835_v54, %v5805_v40  ;;  %v5931_v54 = vsel %vm5917_vm3, %v5923_v10, %v5929_v21  ;;  %v12445_v21 = vld [vmem:[#allocation99_spill] sm:$0xff] }
 0xf54   : > { %v5987_v53 = vmul.f32 %v12440_v50, %v5979_v9  ;;  %vm5981_vm5 = vcmp.gt.f32.partialorder %v5979_v9, 0.0 }
 0xf55   : > { %vm5885_vm11 = vcmp.gt.f32.partialorder %v5883_v42, 0.0  ;;  %v5891_v51 = vmul.f32 %v12438_v32, %v5883_v42  ;;  %v5897_v11 = vmul.f32 %v12439_v17, %v5883_v42  ;;  %v5869_v59 = vadd.f32 %v5867_v38, %v5837_v60  ;;  %v12441_v32 = vld [vmem:[#allocation110_spill] sm:$0xff] }
 0xf56   : > { %v5993_v47 = vmul.f32 %v12441_v32, %v5979_v9  ;;  %v12442_v42 = vld [vmem:[#allocation90_spill] sm:$0xff] }
 0xf57   : > { %v5899_v25 = vsel %vm5885_vm11, %v5891_v51, %v5897_v11  ;;  %v5035_v56 = vpop.permute.xlu0 %5034  ;;  %v5937_v34 = vpop.permute.xlu1 %5936  ;;  %v12443_v11 = vld [vmem:[#allocation108_spill] sm:$0xff]  ;;  %v12444_v38 = vld [vmem:[#allocation82_spill] sm:$0xff] }
 0xf58   : > { %v5901_v43 = vadd.f32 %v5899_v25, %v5869_v59  ;;  %v5947_v40 = vadd.f32 %v11165_v7, %v5937_v34  ;;  %v5042_v2 = vadd.f32 %v12442_v42, %v5035_v56  ;;  %v5995_v34 = vsel %vm5981_vm5, %v5987_v53, %v5993_v47  ;;  %v12449_v42 = vld [vmem:[#allocation88_spill] sm:$0xff] }
 0xf5a   : > { %v5933_v17 = vadd.f32 %v5931_v54, %v5901_v43  ;;  %vm5949_vm14 = vcmp.gt.f32.partialorder %v5947_v40, 0.0  ;;  %v5955_v45 = vmul.f32 %v12443_v11, %v5947_v40  ;;  %v5961_v60 = vmul.f32 %v12444_v38, %v5947_v40  ;;  %v12448_v40 = vld [vmem:[#allocation103_spill] sm:$0xff] }
 0xf5b   : > { %v5055_v50 = vmul.f32 %v12446_v0, %v5042_v2  ;;  %v5066_v56 = vmul.f32 %v12447_v62, %v5042_v2  ;;  %vm5044_vm13 = vcmp.gt.f32.partialorder %v5042_v2, 0.0 }
 0xf5c   : > { %v5077_v51 = vpop.permute.xlu0 %5076  ;;  %v6001_v59 = vpop.permute.xlu1 %6000  ;;  %v5963_v10 = vsel %vm5949_vm14, %v5955_v45, %v5961_v60 }
 0xf5d   : > { %v5084_v25 = vadd.f32 %v12445_v21, %v5077_v51  ;;  %v6011_v13 = vadd.f32 %v11174_v8, %v6001_v59  ;;  %v5965_v32 = vadd.f32 %v5963_v10, %v5933_v17  ;;  %v12450_v17 = vld [vmem:[#allocation92_spill] sm:$0xff] }
 0xf5f   : > { %v5092_v43 = vmul.f32 %v10619_v30, %v5084_v25  ;;  %v5098_v9 = vmul.f32 %v10684_v57, %v5084_v25  ;;  %vm6013_vm4 = vcmp.gt.f32.partialorder %v6011_v13, 0.0  ;;  %vm5086_vm8 = vcmp.gt.f32.partialorder %v5084_v25, 0.0  ;;  %v12451_v25 = vld [vmem:[#allocation37_spill] sm:$0xff] }
 0xf60   : > { %v6019_v54 = vmul.f32 %v12448_v40, %v6011_v13  ;;  %v6025_v45 = vmul.f32 %v12449_v42, %v6011_v13  ;;  %v5997_v60 = vadd.f32 %v5995_v34, %v5965_v32  ;;  %v5068_v30 = vsel %vm5044_vm13, %v5055_v50, %v5066_v56 }
 0xf61   : > { %v5141_v51 = vpop.permute.xlu0 %5140  ;;  %v5109_v59 = vpop.permute.xlu1 %5108  ;;  %v5100_v62 = vsel %vm5086_vm8, %v5092_v43, %v5098_v9  ;;  %v12452_v43 = vld [vmem:[#allocation105_spill] sm:$0xff] }
 0xf62   : > { %v6027_v53 = vsel %vm6013_vm4, %v6019_v54, %v6025_v45  ;;  %v5148_v0 = vadd.f32 %v10955_v33, %v5141_v51  ;;  %v5116_v47 = vadd.f32 %v12450_v17, %v5109_v59  ;;  %v5102_v2 = vadd.f32 %v5100_v62, %v5068_v30  ;;  %v12453_v51 = vld [vmem:[#allocation67_spill] sm:$0xff]  ;;  %v12455_v62 = vld [vmem:[#allocation54_spill] sm:$0xff] }
 0xf63   : > { %v11191_v10 = vadd.f32 %v6027_v53, %v5997_v60  ;;  %v12456_v30 = vld [vmem:[#allocation94_spill] sm:$0xff] }
 0xf64   : > { %vm5118_vm1 = vcmp.gt.f32.partialorder %v5116_v47, 0.0  ;;  %v5156_v57 = vmul.f32 %v10693_v20, %v5148_v0  ;;  %v5162_v21 = vmul.f32 %v10696_v48, %v5148_v0  ;;  %v5124_v13 = vmul.f32 %v12451_v25, %v5116_v47 }
 0xf65   : > { %v5130_v32 = vmul.f32 %v10914_v49, %v5116_v47  ;;  %vm5150_vm12 = vcmp.gt.f32.partialorder %v5148_v0, 0.0  ;;  %v12454_v49 = vld [vmem:[#allocation42_spill] sm:$0xff] }
 0xf66   : > { %v5205_v34 = vpop.permute.xlu0 %5204  ;;  %v5173_v54 = vpop.permute.xlu1 %5172  ;;  %v5164_v50 = vsel %vm5150_vm12, %v5156_v57, %v5162_v21 }
 0xf67   : > { %v5132_v33 = vsel %vm5118_vm1, %v5124_v13, %v5130_v32  ;;  %v5212_v45 = vadd.f32 %v10977_v36, %v5205_v34  ;;  %v5180_v9 = vadd.f32 %v12452_v43, %v5173_v54  ;;  %v12457_v32 = vld [vmem:[#allocation76_spill] sm:$0xff]  ;;  %v12458_v34 = vld [vmem:[#allocation47_spill] sm:$0xff] }
 0xf68   : > { %v5134_v60 = vadd.f32 %v5132_v33, %v5102_v2 }
 0xf69   : > { %v5220_v56 = vmul.f32 %v12396_v31, %v5212_v45  ;;  %vm5182_vm11 = vcmp.gt.f32.partialorder %v5180_v9, 0.0  ;;  %v5226_v20 = vmul.f32 %v12397_v39, %v5212_v45  ;;  %v5188_v59 = vmul.f32 %v12453_v51, %v5180_v9 }
 0xf6a   : > { %v5166_v48 = vadd.f32 %v5164_v50, %v5134_v60  ;;  %v5194_v53 = vmul.f32 %v12454_v49, %v5180_v9  ;;  %vm5214_vm3 = vcmp.gt.f32.partialorder %v5212_v45, 0.0  ;;  %v12459_v9 = vld [vmem:[#allocation96_spill] sm:$0xff]  ;;  %v12460_v50 = vld [vmem:[#allocation97_spill] sm:$0xff]  ;;  %v12462_v49 = vld [vmem:[#allocation46_spill] sm:$0xff] }
 0xf6b   : > { %v5269_v0 = vpop.permute.xlu0 %5268  ;;  %v5237_v17 = vpop.permute.xlu1 %5236  ;;  %v5228_v57 = vsel %vm5214_vm3, %v5220_v56, %v5226_v20  ;;  %v12461_v20 = vld [vmem:[#allocation71_spill] sm:$0xff] }
 0xf6c   : > { %v5196_v47 = vsel %vm5182_vm11, %v5188_v59, %v5194_v53  ;;  %v5276_v36 = vadd.f32 %v12455_v62, %v5269_v0  ;;  %v5244_v25 = vadd.f32 %v12456_v30, %v5237_v17  ;;  %v12463_v0 = vld [vmem:[#allocation35_spill] sm:$0xff]  ;;  %v12464_v30 = vld [vmem:[#allocation36_spill] sm:$0xff] }
 0xf6d   : > { %v5198_v13 = vadd.f32 %v5196_v47, %v5166_v48 }
 0xf6e   : > { %v5284_v31 = vmul.f32 %v12402_v35, %v5276_v36  ;;  %vm5246_vm5 = vcmp.gt.f32.partialorder %v5244_v25, 0.0  ;;  %v5290_v39 = vmul.f32 %v12403_v19, %v5276_v36  ;;  %v5252_v2 = vmul.f32 %v12457_v32, %v5244_v25 }
 0xf6f   : > { %v5230_v21 = vadd.f32 %v5228_v57, %v5198_v13  ;;  %v5258_v54 = vmul.f32 %v12458_v34, %v5244_v25  ;;  %vm5278_vm14 = vcmp.gt.f32.partialorder %v5276_v36, 0.0  ;;  %v12465_v13 = vld [vmem:[#allocation70_spill] sm:$0xff] }
 0xf70   : > { %v5333_v33 = vpop.permute.xlu0 %5332  ;;  %v5301_v45 = vpop.permute.xlu1 %5300  ;;  %v5292_v56 = vsel %vm5278_vm14, %v5284_v31, %v5290_v39 }
 0xf71   : > { %v5260_v43 = vsel %vm5246_vm5, %v5252_v2, %v5258_v54  ;;  %v5340_v60 = vadd.f32 %v12459_v9, %v5333_v33  ;;  %v5308_v51 = vadd.f32 %v12460_v50, %v5301_v45  ;;  %v12466_v2 = vld [vmem:[#allocation59_spill] sm:$0xff]  ;;  %v12468_v9 = vld [vmem:[#allocation81_spill] sm:$0xff]  ;;  %vm12480_vm5 = vcmask 130048  }
 0xf72   : > { %v5262_v48 = vadd.f32 %v5260_v43, %v5230_v21  ;;  %v12467_v54 = vld [vmem:[#allocation43_spill] sm:$0xff]  ;;  %vm12481_vm14 = vmmov %vm12480_vm5 }
 0xf73   : > { %v5348_v35 = vmul.f32 %v12408_v26, %v5340_v60  ;;  %vm5310_vm4 = vcmp.gt.f32.partialorder %v5308_v51, 0.0  ;;  %v5354_v19 = vmul.f32 %v12461_v20, %v5340_v60  ;;  %v5316_v53 = vmul.f32 %v12462_v49, %v5308_v51  ;;  %v12472_v49 = vld [vmem:[#allocation68_spill] sm:$0xff] }
 0xf74   : > { %v5294_v59 = vadd.f32 %v5292_v56, %v5262_v48  ;;  %v5322_v17 = vmul.f32 %v12463_v0, %v5308_v51  ;;  %vm5342_vm8 = vcmp.gt.f32.partialorder %v5340_v60, 0.0  ;;  %v7961_v60 = vunpack.i.h.bf16 %v12468_v9  ;;  %v12469_v51 = vld [vmem:[#allocation66_spill] sm:$0xff] }
 0xf75   : > { %v5397_v47 = vpop.permute.xlu0 %5396  ;;  %v5365_v62 = vpop.permute.xlu1 %5364  ;;  %v5356_v31 = vsel %vm5342_vm8, %v5348_v35, %v5354_v19  ;;  %v12470_v56 = vld [vmem:[#allocation98_spill] sm:$0xff] }
 0xf76   : > { %v5324_v36 = vsel %vm5310_vm4, %v5316_v53, %v5322_v17  ;;  %v5404_v25 = vadd.f32 %v12464_v30, %v5397_v47  ;;  %v5372_v57 = vadd.f32 %v12465_v13, %v5365_v62  ;;  %v12473_v17 = vld [vmem:[#allocation102_spill] sm:$0xff]  ;;  %v12474_v62 = vld [vmem:[#allocation57_spill] sm:$0xff] }
 0xf77   : > { %v5326_v21 = vadd.f32 %v5324_v36, %v5294_v59  ;;  %v12475_v30 = vld [vmem:[#allocation109_spill] sm:$0xff] }
 0xf78   : > { %v5412_v26 = vmul.f32 %v12416_v27, %v5404_v25  ;;  %vm5374_vm13 = vcmp.gt.f32.partialorder %v5372_v57, 0.0  ;;  %v5418_v39 = vmul.f32 %v12417_v6, %v5404_v25  ;;  %v5380_v34 = vmul.f32 %v12466_v2, %v5372_v57  ;;  %v12471_v6 = vld [vmem:[#allocation101_spill] sm:$0xff] }
 0xf79   : > { %v5358_v32 = vadd.f32 %v5356_v31, %v5326_v21  ;;  %v5386_v33 = vmul.f32 %v12467_v54, %v5372_v57  ;;  %vm5406_vm1 = vcmp.gt.f32.partialorder %v5404_v25, 0.0  ;;  %v7960_v27 = vunpack.i.l.bf16 %v12468_v9  ;;  %v12476_v21 = vld [vmem:[#allocation111_spill] sm:$0xff] }
 0xf7a   : > { %v5461_v45 = vpop.permute.xlu0 %5460  ;;  %v5429_v43 = vpop.permute.xlu1 %5428  ;;  %v5420_v19 = vsel %vm5406_vm1, %v5412_v26, %v5418_v39  ;;  %v4801_v25 = vmul.f32 %v7961_v60, %v12475_v30 }
 0xf7b   : > { %v5388_v50 = vsel %vm5374_vm13, %v5380_v34, %v5386_v33  ;;  %v5468_v48 = vadd.f32 %v12469_v51, %v5461_v45  ;;  %v5436_v35 = vadd.f32 %v12470_v56, %v5429_v43  ;;  %v4800_v31 = vmul.f32 %v7960_v27, %v12476_v21 }
 0xf7c   : > { %v5390_v20 = vadd.f32 %v5388_v50, %v5358_v32  ;;  %v12477_v32 = vld [vmem:[#allocation55_spill] sm:$0xff]  ;;  %v12478_v50 = vld [vmem:[#allocation38_spill] sm:$0xff] }
 0xf7d   : > { %v5476_v59 = vmul.f32 %v12471_v6, %v5468_v48  ;;  %vm5438_vm12 = vcmp.gt.f32.partialorder %v5436_v35, 0.0  ;;  %v5482_v53 = vmul.f32 %v12472_v49, %v5468_v48  ;;  %v5444_v47 = vmul.f32 %v12473_v17, %v5436_v35  ;;  %v12482_v49 = vld [vmem:[#allocation65_spill] sm:$0xff] }
 0xf7e   : > { %v5422_v0 = vadd.f32 %v5420_v19, %v5390_v20  ;;  %v5450_v36 = vmul.f32 %v12474_v62, %v5436_v35  ;;  %vm5470_vm11 = vcmp.gt.f32.partialorder %v5468_v48, 0.0  ;;  %v12479_v48 = vld [vmem:[#allocation52_spill] sm:$0xff]  ;;  %v4803_v35 = vsel %vm12480_vm5, %v4801_v25, 0.0 }
 0xf7f   : > { %v5525_v13 = vpop.permute.xlu0 %5524  ;;  %v5493_v57 = vpop.permute.xlu1 %5492  ;;  %v5484_v54 = vsel %vm5470_vm11, %v5476_v59, %v5482_v53  ;;  %v4802_v20 = vsel %vm12481_vm14, %v4800_v31, 0.0 }
 0xf80   : > { %v5452_v26 = vsel %vm5438_vm12, %v5444_v47, %v5450_v36  ;;  %v5532_v39 = vadd.f32 %v11069_v3, %v5525_v13  ;;  %v5500_v2 = vadd.f32 %v12477_v32, %v5493_v57  ;;  %v12483_v36 = vld [vmem:[#allocation87_spill] sm:$0xff]  ;;  %v12484_v13 = vld [vmem:[#allocation89_spill] sm:$0xff] }
 0xf81   : > { %v5454_v34 = vadd.f32 %v5452_v26, %v5422_v0  ;;  %v4804_v0 = vadd.f32 %v4803_v35, %v4802_v20  ;;  %v12485_v32 = vld [vmem:[#allocation33_spill] sm:$0xff] }
 0xf82   : > { %v5540_v33 = vmul.f32 %v12426_v37, %v5532_v39  ;;  %vm5502_vm3 = vcmp.gt.f32.partialorder %v5500_v2, 0.0  ;;  %v5546_v45 = vmul.f32 %v12427_v4, %v5532_v39  ;;  %v5508_v51 = vmul.f32 %v12478_v50, %v5500_v2 }
 0xf83   : > { %v5486_v43 = vadd.f32 %v5484_v54, %v5454_v34  ;;  %v5514_v56 = vmul.f32 %v12479_v48, %v5500_v2  ;;  %vm5534_vm4 = vcmp.gt.f32.partialorder %v5532_v39, 0.0  ;;  %v4805_v54 = vrot.slane %v4804_v0, 4 }
 0xf84   : > { %v5589_v3 = vpop.permute.xlu0 %5588  ;;  %v5557_v19 = vpop.permute.xlu1 %5556  ;;  %v5548_v4 = vsel %vm5534_vm4, %v5540_v33, %v5546_v45 }
 0xf85   : > { %v5516_v6 = vsel %vm5502_vm3, %v5508_v51, %v5514_v56  ;;  %v5596_v59 = vadd.f32 %v11084_v24, %v5589_v3  ;;  %v5564_v37 = vadd.f32 %v12482_v49, %v5557_v19  ;;  %v12487_v51 = vld [vmem:[#allocation91_spill] sm:$0xff]  ;;  %v12488_v3 = vld [vmem:[#allocation32_spill] sm:$0xff] }
 0xf86   : > { %v5518_v53 = vadd.f32 %v5516_v6, %v5486_v43  ;;  %v12486_v43 = vld [vmem:[#allocation48_spill] sm:$0xff] }
 0xf87   : > { %v5604_v17 = vmul.f32 %v12429_v61, %v5596_v59  ;;  %vm5566_vm8 = vcmp.gt.f32.partialorder %v5564_v37, 0.0  ;;  %v5610_v47 = vmul.f32 %v12430_v44, %v5596_v59  ;;  %v5572_v25 = vmul.f32 %v12483_v36, %v5564_v37 }
 0xf88   : > { %v5550_v62 = vadd.f32 %v5548_v4, %v5518_v53  ;;  %v5578_v57 = vmul.f32 %v12484_v13, %v5564_v37  ;;  %vm5598_vm13 = vcmp.gt.f32.partialorder %v5596_v59, 0.0  ;;  %v4806_v59 = vadd.f32 %v4805_v54, %v4804_v0  ;;  %v12489_v4 = vld [vmem:[#allocation80_spill] sm:$0xff] }
 0xf89   : > { %v5653_v31 = vpop.permute.xlu0 %5652  ;;  %v5621_v26 = vpop.permute.xlu1 %5620  ;;  %v5612_v33 = vsel %vm5598_vm13, %v5604_v17, %v5610_v47 }
 0xf8a   : > { %v5580_v39 = vsel %vm5566_vm8, %v5572_v25, %v5578_v57  ;;  %v5660_v24 = vadd.f32 %v11099_v16, %v5653_v31  ;;  %v5628_v2 = vadd.f32 %v12485_v32, %v5621_v26  ;;  %v4807_v13 = vrot.slane %v4806_v59, 2 }
 0xf8b   : > { %v5582_v34 = vadd.f32 %v5580_v39, %v5550_v62 }
 0xf8c   : > { %v5668_v61 = vmul.f32 %v10769_v12, %v5660_v24  ;;  %vm5630_vm1 = vcmp.gt.f32.partialorder %v5628_v2, 0.0  ;;  %v5674_v44 = vmul.f32 %v10776_v15, %v5660_v24  ;;  %v5636_v50 = vmul.f32 %v12486_v43, %v5628_v2 }
 0xf8d   : > { %v5614_v45 = vadd.f32 %v5612_v33, %v5582_v34  ;;  %v5642_v48 = vmul.f32 %v12487_v51, %v5628_v2  ;;  %vm5662_vm12 = vcmp.gt.f32.partialorder %v5660_v24, 0.0  ;;  %v4808_v2 = vadd.f32 %v4807_v13, %v4806_v59  ;;  %v12497_v59 = vld [vmem:[#allocation56_spill] sm:$0xff] }
 0xf8e   : > { %v5717_v56 = vpop.permute.xlu0 %5716  ;;  %v5685_v35 = vpop.permute.xlu1 %5684  ;;  %v5676_v49 = vsel %vm5662_vm12, %v5668_v61, %v5674_v44  ;;  %v12491_v61 = vld [vmem:[#allocation93_spill] sm:$0xff] }
 0xf8f   : > { %v5644_v20 = vsel %vm5630_vm1, %v5636_v50, %v5642_v48  ;;  %v5724_v16 = vadd.f32 %v11113_v55, %v5717_v56  ;;  %v5692_v19 = vadd.f32 %v12488_v3, %v5685_v35  ;;  %v12493_v56 = vld [vmem:[#allocation41_spill] sm:$0xff]  ;;  %v12495_v3 = vld [vmem:[#allocation72_spill] sm:$0xff] }
 0xf90   : > { %v5646_v6 = vadd.f32 %v5644_v20, %v5614_v45 }
 0xf91   : > { %v5732_v12 = vmul.f32 %v10790_v52, %v5724_v16  ;;  %vm5694_vm11 = vcmp.gt.f32.partialorder %v5692_v19, 0.0  ;;  %v5738_v15 = vmul.f32 %v10798_v1, %v5724_v16  ;;  %v5700_v53 = vmul.f32 %v10782_v14, %v5692_v19 }
 0xf92   : > { %v5678_v37 = vadd.f32 %v5676_v49, %v5646_v6  ;;  %v5706_v17 = vmul.f32 %v12489_v4, %v5692_v19  ;;  %vm5726_vm3 = vcmp.gt.f32.partialorder %v5724_v16, 0.0  ;;  %v12496_v6 = vld [vmem:[#allocation95_spill] sm:$0xff] }
 0xf93   : > { %v5781_v47 = vpop.permute.xlu0 %5780  ;;  %v5749_v62 = vpop.permute.xlu1 %5748  ;;  %v5740_v57 = vsel %vm5726_vm3, %v5732_v12, %v5738_v15  ;;  %vm4835_vm1 = vcmp.eq.s32.totalorder %v12496_v6, 1  ;;  %v12498_v12 = vld [vmem:[#allocation86_spill] sm:$0xff] }
 0xf94   : > { %v5708_v36 = vsel %vm5694_vm11, %v5700_v53, %v5706_v17  ;;  %v5788_v55 = vadd.f32 %v11123_v46, %v5781_v47  ;;  %v5756_v25 = vadd.f32 %v11108_v18, %v5749_v62  ;;  %vm4837_vm11 = vmand %vm10360_vm9, %vm4835_vm1 }
 0xf95   : > { %v5710_v0 = vadd.f32 %v5708_v36, %v5678_v37 }
 0xf96   : > { %v5796_v52 = vmul.f32 %v10816_v5, %v5788_v55  ;;  %vm5758_vm5 = vcmp.gt.f32.partialorder %v5756_v25, 0.0  ;;  %v5802_v1 = vmul.f32 %v10876_v58, %v5788_v55  ;;  %v5764_v14 = vmul.f32 %v10804_v22, %v5756_v25  ;;  %v12490_v22 = vld [vmem:[#allocation106_spill] sm:$0xff] }
 0xf97   : > { %v5742_v31 = vadd.f32 %v5740_v57, %v5710_v0  ;;  %v5770_v26 = vmul.f32 %v10868_v41, %v5756_v25  ;;  %vm5790_vm14 = vcmp.gt.f32.partialorder %v5788_v55, 0.0  ;;  %v12500_v25 = vld [vmem:[#allocation69_spill] sm:$0xff] }
 0xf98   : > { %v5813_v39 = vpop.permute.xlu0 %5812  ;;  %v5845_v24 = vpop.permute.xlu1 %5844  ;;  %v5804_v54 = vsel %vm5790_vm14, %v5796_v52, %v5802_v1 }
 0xf99   : > { %v5772_v32 = vsel %vm5758_vm5, %v5764_v14, %v5770_v26  ;;  %v5820_v46 = vadd.f32 %v11136_v23, %v5813_v39  ;;  %v5852_v18 = vadd.f32 %v11131_v63, %v5845_v24  ;;  %v4809_v23 = vrot.slane %v4808_v2, 1  ;;  %v12492_v63 = vld [vmem:[#allocation34_spill] sm:$0xff]  ;;  %v12501_v14 = vld [vmem:[#allocation84_spill] sm:$0xff] }
 0xf9a   : > { %v5774_v34 = vadd.f32 %v5772_v32, %v5742_v31  ;;  %v12502_v39 = vld [vmem:[#allocation110_spill] sm:$0xff] }
 0xf9b   : > { %vm5822_vm4 = vcmp.gt.f32.partialorder %v5820_v46, 0.0  ;;  %v5828_v5 = vmul.f32 %v12433_v28, %v5820_v46  ;;  %v5834_v58 = vmul.f32 %v12434_v29, %v5820_v46  ;;  %vm5854_vm8 = vcmp.gt.f32.partialorder %v5852_v18, 0.0  ;;  %v12494_v28 = vld [vmem:[#allocation51_spill] sm:$0xff]  ;;  %v12503_v46 = vld [vmem:[#allocation78_spill] sm:$0xff] }
 0xf9c   : > { %v5806_v33 = vadd.f32 %v5804_v54, %v5774_v34  ;;  %v5860_v41 = vmul.f32 %v12490_v22, %v5852_v18  ;;  %v5866_v44 = vmul.f32 %v12491_v61, %v5852_v18  ;;  %v4810_v37 = vadd.f32 %v4809_v23, %v4808_v2  ;;  %v12504_v18 = vld [vmem:[#allocation112_spill] sm:$0xff]  ;;  %v12506_v54 = vld [vmem:[#allocation31_spill] sm:$0xff]  ;;  %v12510_v61 = vld [vmem:[#allocation53_spill] sm:$0xff] }
 0xf9d   : > { %v5836_v45 = vsel %vm5822_vm4, %v5828_v5, %v5834_v58  ;;  %v5877_v43 = vpop.permute.xlu0 %5876  ;;  %v5909_v50 = vpop.permute.xlu1 %5908  ;;  %v6042_v2 = vrot.slane %v12504_v18, %v12503_v46 }
 0xf9e   : > { %v5838_v51 = vadd.f32 %v5836_v45, %v5806_v33  ;;  %v5884_v48 = vadd.f32 %v12492_v63, %v5877_v43  ;;  %v5916_v35 = vadd.f32 %v12493_v56, %v5909_v50  ;;  %v5868_v20 = vsel %vm5854_vm8, %v5860_v41, %v5866_v44 }
 0xf9f   : > { %vm4839_vm5 = vcmp.gt.f32.partialorder %v4810_v37, 0.0  ;;  %v6043_v44 = vadd.f32 %v6042_v2, %v12510_v61  ;;  %v1105_v37 = vld [vmem:[%s12514_s8 + $0x18] sm:$0xff] }
 0xfa0   : > { %v5870_v16 = vadd.f32 %v5868_v20, %v5838_v51  ;;  %vm5886_vm13 = vcmp.gt.f32.partialorder %v5884_v48, 0.0  ;;  %v5892_v29 = vmul.f32 %v12494_v28, %v5884_v48  ;;  %v5898_v19 = vmul.f32 %v12495_v3, %v5884_v48  ;;  %vm4842_vm14 = vmand %vm4837_vm11, %vm4839_vm5  ;;  %v12512_v51 = vld [vmem:[#allocation30_spill] sm:$0xff]  ;;  %7516 = vmatprep.subr.mxu0 %v1105_v37 }
 0xfa1   : > { %vm5918_vm12 = vcmp.gt.f32.partialorder %v5916_v35, 0.0  ;;  %v5924_v49 = vmul.f32 %v12497_v59, %v5916_v35  ;;  %v5930_v15 = vmul.f32 %v12498_v12, %v5916_v35  ;;  %v1102_v12 = vld [vmem:[%s12514_s8] sm:$0xff]  ;;  %7517 = vmatpush3.msra.mxu0 %v1105_v37 }
 0xfa2   : > { %v5900_v53 = vsel %vm5886_vm13, %v5892_v29, %v5898_v19  ;;  %v5941_v4 = vpop.permute.xlu0 %5940  ;;  %v5973_v17 = vpop.permute.xlu1 %5972 }
 0xfa3   : > { %v5902_v47 = vadd.f32 %v5900_v53, %v5870_v16  ;;  %v5948_v62 = vadd.f32 %v11165_v7, %v5941_v4  ;;  %v5932_v55 = vsel %vm5918_vm12, %v5924_v49, %v5930_v15  ;;  %v5980_v0 = vadd.f32 %v12500_v25, %v5973_v17  ;;  %v1103_v15 = vld [vmem:[%s12514_s8 + $0x8] sm:$0xff] }
 0xfa4   : > { %v6164_v53 = vmul.f32 %v1102_v12, %v1102_v12  ;;  %v6165_v4 = vmul.f32 %v1103_v15, %v1103_v15 }
 0xfa5   : > { %v5934_v13 = vadd.f32 %v5932_v55, %v5902_v47  ;;  %vm5950_vm3 = vcmp.gt.f32.partialorder %v5948_v62, 0.0  ;;  %v5956_v57 = vmul.f32 %v12443_v11, %v5948_v62  ;;  %v5962_v52 = vmul.f32 %v12444_v38, %v5948_v62  ;;  %v12505_v11 = vld [vmem:[#allocation28_spill] sm:$0xff] }
 0xfa6   : > { %v5988_v26 = vmul.f32 %v12501_v14, %v5980_v0  ;;  %v5994_v24 = vmul.f32 %v12502_v39, %v5980_v0  ;;  %vm5982_vm9 = vcmp.gt.f32.partialorder %v5980_v0, 0.0  ;;  %vm12507_vm4 = vcmp.eq.s32.totalorder %v12505_v11, %v12506_v54 }
 0xfa7   : > { %v5964_v1 = vsel %vm5950_vm3, %v5956_v57, %v5962_v52  ;;  %v6005_v31 = vpop.permute.xlu0 %6004  ;;  %v6049_v7 = vpop.permute.xlu1 %6048  ;;  %vm6063_vm8 = vmor %vm4842_vm14, %vm12507_vm4  ;;  %vm6045_vm4 = vcmp.gt.f32.partialorder %v6043_v44, 0.0  ;;  %v6167_v47 = vmul.f32 %v1105_v37, %v1105_v37  ;;  %v12525_v52 = vmov 0.0  }
 0xfa8   : > { %v6012_v32 = vadd.f32 %v11174_v8, %v6005_v31  ;;  %v5966_v34 = vadd.f32 %v5964_v1, %v5934_v13  ;;  %v5996_v33 = vsel %vm5982_vm9, %v5988_v26, %v5994_v24  ;;  %vm11301_vm12 = vmand %vm6063_vm8, %vm4835_vm1  ;;  %vm12513_vm9 = vcmp.eq.s32.totalorder %v12512_v51, %v12506_v54 }
 0xfaa   : > { %v6020_v38 = vmul.f32 %v12448_v40, %v6012_v32  ;;  %v6026_v5 = vmul.f32 %v12449_v42, %v6012_v32  ;;  %vm6014_vm13 = vcmp.gt.f32.partialorder %v6012_v32, 0.0  ;;  %v5998_v45 = vadd.f32 %v5996_v33, %v5966_v34 }
 0xfab   : > { %v6037_v58 = vpop.permute.xlu1 %6036  ;;  %v6051_v42 = vmul.f32 %v6049_v7, %v6043_v44 }
 0xfac   : > { %v6044_v22 = vadd.f32 %v6042_v2, %v6037_v58  ;;  %v4834_v41 = vpop.permute.xlu0 %4833  ;;  %v6028_v43 = vsel %vm6014_vm13, %v6020_v38, %v6026_v5 }
 0xfad   : > { %vm4836_vm11 = vcmp.eq.s32.totalorder %v4834_v41, 1  ;;  %v6030_v56 = vadd.f32 %v6028_v43, %v5998_v45 }
 0xfae   : > { %vm4838_vm3 = vmand %vm10370_vm0, %vm4836_vm11  ;;  %v6052_v23 = vmul.f32 %v6049_v7, %v6044_v22  ;;  %vm6046_vm8 = vcmp.gt.f32.partialorder %v6044_v22, 0.0 }
 0xfaf   : > { %vm4843_vm14 = vmand %vm4838_vm3, %vm4839_vm5  ;;  %v6055_v40 = vpop.permute.xlu1 %6054 }
 0xfb0   : > { %vm6064_vm1 = vmor %vm4843_vm14, %vm12513_vm9  ;;  %v6057_v63 = vmul.f32 %v6055_v40, %v6043_v44  ;;  %v6058_v48 = vmul.f32 %v6055_v40, %v6044_v22 }
 0xfb1   : > { %vm6066_vm15 = vmand %vm6064_vm1, %vm4836_vm11  ;;  %vm12519_vm11 = vcmask 130048  }
 0xfb2   : > { %v6060_v35 = vsel %vm6046_vm8, %v6052_v23, %v6058_v48  ;;  %v6059_v20 = vsel %vm6045_vm4, %v6051_v42, %v6057_v63  ;;  %vm11315_vm0 = vmand %vm11301_vm12, %vm4839_vm5  ;;  %vm12531_vm8 = vcmask 261120  }
 0xfb3   : > { %v6062_v28 = vadd.f32 %v6060_v35, %v6030_v56  ;;  %v6061_v29 = vadd.f32 %v6059_v20, %v11191_v10  ;;  %vm11321_vm13 = vmand %vm6066_vm15, %vm4839_vm5  ;;  %v1104_v10 = vld [vmem:[%s12514_s8 + $0x10] sm:$0xff]  ;;  %vm12521_vm15 = vcmask 7168  }
 0xfb4   : > { %vm12520_vm12 = vmmov %vm12519_vm11  ;;  %v6166_v17 = vmul.f32 %v1104_v10, %v1104_v10  ;;  %v6168_v62 = vsel %vm12521_vm15, %v6164_v53, 0.0  ;;  %7518 = vmatprep.subr.mxu0 %v1104_v10 }
 0xfb5   : > { %v6070_v19 = vsel %vm11321_vm13, %v6062_v28, -1e+30  ;;  %v6069_v6 = vsel %vm11315_vm0, %v6061_v29, -1e+30  ;;  %vm12522_vm5 = vmmov %vm12521_vm15  ;;  %7519 = vmatpush3.msra.mxu0 %v1104_v10  ;;  %vm12541_vm15 = vcmask 1041408  }
 0xfb6   : > { %v6074_v59 = vsel %vm12519_vm11, %v6070_v19, -inf  ;;  %v6071_v49 = vsel %vm12520_vm12, %v6069_v6, -inf  ;;  %v6169_v36 = vsel %vm12522_vm5, %v6165_v4, 0.0  ;;  %vm12523_vm3 = vmmov %vm12522_vm5  ;;  %7520 = vmatprep.subr.mxu0 %v1103_v15 }
 0xfb7   : > { %6075 = vmax.xlane.f32.xlu1 %v6074_v59  ;;  %6072 = vmax.xlane.f32.xlu0 %v6071_v49  ;;  %v6171_v55 = vsel %vm12523_vm3, %v6166_v17, 0.0  ;;  %v6170_v25 = vadd.f32 %v6169_v36, %v6168_v62  ;;  %vm12524_vm14 = vmmov %vm12523_vm3 }
 0xfb8   : > { %v6173_v0 = vsel %vm12524_vm14, %v6167_v47, 0.0  ;;  %7521 = vmatpush3.msra.mxu0 %v1103_v15  ;;  %vm12526_vm9 = vmmov %vm12519_vm11  ;;  %v7230_v15 = vld [vmem:[%s12529_s9] ss:$0 sm:$0xff]  ;;  %s12560_s9 = sld [smem:[#allocation26_spill]] }
 0xfb9   : > { %v6172_v13 = vadd.f32 %v6171_v55, %v6170_v25  ;;  %7522 = vmatprep.subr.mxu0 %v1102_v12  ;;  %vm12527_vm1 = vmmov %vm12526_vm9  ;;  %v12534_v25 = vmov 1.0  }
 0xfba   : > { %7523 = vmatpush3.msra.mxu0 %v1102_v12  ;;  %vm12528_vm4 = vmmov %vm12527_vm1 }
 0xfbb   : > { %v6174_v57 = vadd.f32 %v6173_v0, %v6172_v13  ;;  %7534 = vmatprep.subr.mxu0 %v12525_v52  ;;  %v11369_v13 = vld [vmem:[%s9400_s3 + $0x8] sm:$0xff]  ;;  %vm12538_vm11 = vmmov %vm12527_vm1 }
 0xfbc   : > { %vm12542_vm5 = vmmov %vm12541_vm15 }
 0xfbd   : > { %6175 = vadd.xlane.f32.xlu1 %v6174_v57  ;;  %v6541_v57 = vmul.f32 %v11369_v13, %v7961_v60 }
0x1040   : > { %v6076_v1 = vpop.xlane.xlu1 %6075  ;;  %v6073_v31 = vpop.xlane.xlu0 %6072 }
0x1041   : > { %v6078_v7 = vmax.f32 %v6076_v1, -1e+30  ;;  %v6077_v14 = vmax.f32 %v6073_v31, -1e+30  ;;  %v12556_v1 = vmov 0  }
0x1043   : > { %v6086_v26 = vsub.f32 %v6070_v19, %v6078_v7  ;;  %v6085_v39 = vsub.f32 %v6069_v6, %v6077_v14  ;;  %v6079_v43 = vsub.f32 -1e+30, %v6077_v14  ;;  %v6080_v40 = vsub.f32 -1e+30, %v6078_v7  ;;  %v11381_v7 = vld [vmem:[%s9410_s11] sm:$0x3] }
0x1044   : > { %v11386_v14 = vld [vmem:[%s9400_s3] sm:$0xff]  ;;  %s8283_s3 = smov 1  }
0x1045   : > { %v6089_v24 = vmul.f32 1.442695, %v6086_v26  ;;  %v6087_v32 = vmul.f32 1.442695, %v6085_v39  ;;  %v6081_v42 = vmul.f32 1.442695, %v6079_v43  ;;  %v6540_v60 = vmul.f32 %v11386_v14, %v7960_v27 }
0x1046   : > { %v6176_v33 = vpop.xlane.xlu1 %6175  ;;  %v6083_v23 = vmul.f32 1.442695, %v6080_v40 }
0x1047   : > { %8115 = vpow2.f32 %v6089_v24  ;;  %v6177_v22 = vrot.slane %v6176_v33, 4 }
0x1048   : > { %8117 = vpow2.f32 %v6087_v32 }
0x1049   : > { %v6178_v41 = vadd.f32 %v6177_v22, %v6176_v33 }
0x104b   : > { %v6179_v8 = vrot.slane %v6178_v41, 2 }
0x104d   : > { %v6180_v61 = vadd.f32 %v6179_v8, %v6178_v41 }
0x104f   : > { %v6181_v44 = vrot.slane %v6180_v61, 1 }
0x1051   : > { %v6182_v45 = vadd.f32 %v6181_v44, %v6180_v61 }
0x1053   : > { %7593 = vpush %v6182_v45 }
0x1054   : > { %v8116_v46 = vpop.eup %8115 }
0x1055   : > { %v6092_v18 = vsel %vm11321_vm13, %v8116_v46, 0.0  ;;  %v8118_v2 = vpop.eup %8117 }
0x1056   : > { %v6091_v34 = vsel %vm11315_vm0, %v8118_v2, 0.0  ;;  %v6098_v58 = vsel %vm12528_vm4, %v6092_v18, 0.0  ;;  %vm12532_vm0 = vmmov %vm12531_vm8 }
0x1057   : > { %v6095_v38 = vsel %vm12526_vm9, %v6091_v34, 0.0  ;;  %v6103_v5 = vpack.c.bf16 %v6092_v18, %v6091_v34  ;;  %vm12533_vm13 = vmmov %vm12532_vm0 }
0x1058   : > { %6096 = vadd.xlane.f32.xlu0 %v6095_v38  ;;  %vm12539_vm12 = vmmov %vm12532_vm0 }
0x1059   : > { %7513 = vmatmul.mubr.msk.bf16.vlgmr.msra.gmra.mxu1 %vm12527_vm1, %v6103_v5  ;;  %vm12545_vm1 = vcmp.lt.s32.totalorder %v12506_v54, %v12512_v51 }
0x105a   : > { %7531 = vmatprep.mubr.msk.f32.mxu1 %vm12272_vm2, %v12525_v52 }
0x105c   : > { %6099 = vadd.xlane.f32.xlu0 %v6098_v58 }
0x1084   : > { %s7594_s16 = spop %7593 }
0x1085   : > { %s6184_s8 = smax.f32 %s12242_s5, %s7594_s16  ;;  %s12530_s5 = sld [smem:[#allocation25_spill]] }
0x1086   : > { %v6185_v50 = vstv %s6184_s8  ;;  %s11861_s8 = sand.u32 1, %s8205_s1  }
0x1087   : > { %8119 = vrsqrt.f32 %v6185_v50  ;;  %s7162_s16 = sshll.u32 %s11861_s8, 1 }
0x1088   : > { %8121 = vpow2.f32 %v6081_v42 }
0x1089   : > { %8123 = vpow2.f32 %v6083_v23 }
0x108b   : > { %v1106_v31 = vld [vmem:[%s12530_s5] sm:$0x1]  ;;  %s1031_s5 = scalar_lea.vmem [#allocation3], %s7162_s16  ;;  %s12568_s16 = sand.u32 1, %s8205_s1  }
0x108c   : > { %s7007_s8 = sshll.u32 %s1031_s5, 4  ;;  %s7008_s8 = int_to_ptr.vmem [resolvable:$true] %s7007_s8 }
0x108d   : > { %s8153_s12 = scalar_lea.vmem %s7008_s8, 32  ;;  %p8160_p0 = scmp.lt.s32.totalorder %s7008_s8, %s8158_s14 }
0x108e   : > { %p8154_p11 = scmp.ne.s32.totalorder %s7008_s8, %s8153_s12 }
0x1090   : > { %p8155_p12 = pnand %p8154_p11, %p8492_p5 }
0x1092   : > { %p8156_p13 = pneg %p8155_p12 }
0x1094   : > { %v8120_v63 = vpop.eup %8119 }
0x1095   : > { %7595 = vpush %v8120_v63  ;;  %v8122_v48 = vpop.eup %8121 }
0x1096   : > { %v6093_v35 = vmul.f32 0.0, %v8122_v48  ;;  %v8124_v20 = vpop.eup %8123 }
0x1097   : > { %v6094_v29 = vmul.f32 0.0, %v8124_v20 }
0x10c6   : > { %s7596_s11 = spop %7595 }
0x10c7   : > { %v6269_v26 = vstv %s7596_s11  ;;  %s8284_s11 = smov 32  }
0x10e1   : > { %v6097_v56 = vpop.xlane.xlu0 %6096 }
0x10e2   : > { %v6101_v16 = vadd.f32 %v6097_v56, %v6093_v35  ;;  %v12544_v56 = vld [vmem:[#allocation29_spill] sm:$0xff] }
0x10e4   : > { %v6150_v3 = vmax.f32 %v6101_v16, 1e-09 }
0x10e5   : > { %v6100_v28 = vpop.xlane.xlu0 %6099 }
0x10e6   : > { %v6102_v19 = vadd.f32 %v6100_v28, %v6094_v29  ;;  %8125 = vrcp.f32 %v6150_v3 }
0x10e8   : > { %v6151_v6 = vmax.f32 %v6102_v19, 1e-09 }
0x10ea   : > { %8127 = vrcp.f32 %v6151_v6 }
0x10f3   : > { %v8126_v12 = vpop.eup %8125 }
0x10f7   : > { %v8128_v47 = vpop.eup %8127 }
0x1119   : > { %v6141_v59 = vpop.f32.mrf.mxu1 }
0x111a   : > { %v6148_v49 = vadd.f32 %v6141_v59, %v6093_v35 }
0x111b   : > { %v7514_v10 = vpop.f32.mrf.mxu1 }
0x111c   : > { %v6154_v37 = vmul.f32 %v8126_v12, %v6148_v49 }
0x111d   : > { %v6144_v53 = vpop.f32.mrf.mxu1 }
0x111e   : > { %v11351_v4 = vadd.f32 %v7230_v15, %v6154_v37  ;;  %v6149_v17 = vadd.f32 %v6144_v53, %v6094_v29 }
0x111f   : > { %v7515_v62 = vpop.f32.mrf.mxu1 }
0x1120   : > { %v6155_v36 = vmul.f32 %v8128_v47, %v6149_v17  ;;  %7524 = vmatprep.mubr.msk.f32.mxu0 %vm12531_vm8, %v11351_v4  ;;  %v12554_v47 = vld [vmem:[#allocation83_spill] sm:$0xff] }
0x1122   : > { %v11355_v55 = vadd.f32 %v7230_v15, %v6155_v36 }
0x1124   : > { %7525 = vmatmul.mubr.msk.f32.vlgmr.msra.gmra.mxu0 %vm12532_vm0, %v11355_v55  ;;  %7528 = vmatpush3.xpose.msk.msra.mxu1 %vm12533_vm13, %v11355_v55 }
0x1125   : > { %7535 = vmatpush3.msk.msra.mxu0 %vm10542_vm10, %v12534_v25  ;;  %7529 = vmatprep.subr.mxu1 %v12525_v52  ;;  %vm12537_vm10 = vmmov %vm12532_vm0 }
0x1126   : > { %7536 = vmatprep.subr.mxu0 %v12525_v52  ;;  %7538 = vmatprep.mubr.msk.f32.mxu0 %vm12272_vm2, %v12525_v52 }
0x1127   : > { %7537 = vmatpush3.msk.msra.mxu0 %vm10558_vm6, %v12534_v25  ;;  %vm12540_vm6 = vcmask 15360  }
0x1128   : > { %7546 = vmatprep.subr.mxu0 %v6541_v57  ;;  %7530 = vmatpush3.xpose.msk.msra.mxu1 %vm12537_vm10, %v11351_v4  ;;  %vm12543_vm3 = vmmov %vm12540_vm6  ;;  %vm12546_vm10 = vcmp.ne.s32.totalorder %v12506_v54, %v12512_v51 }
0x1129   : > { %7539 = vmatmul.mubr.msk.f32.vlgmr.msra.gmra.mxu0 %vm12538_vm11, %v11381_v7 }
0x112a   : > { %7547 = vmatpush3.msra.mxu0 %v6541_v57 }
0x112b   : > { %7548 = vmatprep.subr.mxu0 %v6540_v60  ;;  %7532 = vmatmul.mubr.msk.f32.vlgmr.msra.gmra.mxu1 %vm12539_vm12, %v1106_v31  ;;  %vm12547_vm12 = vcmp.lt.s32.totalorder %v12506_v54, %v12505_v11 }
0x112c   : > { %7549 = vmatpush3.msra.mxu0 %v6540_v60  ;;  %7543 = vmatprep.mubr.msk.f32.mxu1 %vm12540_vm6, %v11386_v14 }
0x112d   : > { %7560 = vmatprep.subr.mxu0 %v12525_v52 }
0x11e4   : > { %v7526_v39 = vpop.f32.mrf.mxu0 }
0x11e5   : > { %v6271_v24 = vmul.f32 %v7526_v39, %v6269_v26 }
0x11e6   : > { %v6260_v32 = vpop.f32.mrf.mxu0 }
0x11e7   : > { %v6273_v46 = vsub.f32 0.0, %v6271_v24  ;;  %v6270_v18 = vmul.f32 %v6269_v26, %v6260_v32 }
0x11e9   : > { %v6276_v9 = vmul.f32 1.442695, %v6273_v46  ;;  %v6272_v2 = vsub.f32 0.0, %v6270_v18  ;;  %v6430_v44 = vpop.f32.mrf.mxu0 }
0x11ea   : > { %v6434_v45 = vmul.f32 0.5, %v6430_v44 }
0x11eb   : > { %8129 = vpow2.f32 %v6276_v9  ;;  %v6274_v27 = vmul.f32 1.442695, %v6272_v2  ;;  %v6353_v34 = vpop.f32.mrf.mxu1  ;;  %v7540_v43 = vpop.f32.mrf.mxu0 }
0x11ec   : > { %v6357_v38 = vmul.f32 %v6353_v34, %v6269_v26  ;;  %v6435_v50 = vceil.f32 %v6434_v45  ;;  %v12557_v26 = vmov 1  }
0x11ed   : > { %8131 = vpow2.f32 %v6274_v27  ;;  %v7533_v5 = vpop.f32.mrf.mxu1 }
0x11ee   : > { %7541 = vmatprep.subr.msk.mxu1 %vm12541_vm15, %v6435_v50  ;;  %v6358_v40 = vsub.f32 0.0, %v6357_v38 }
0x11ef   : > { %7542 = vmatpush3.msk.msra.mxu1 %vm12542_vm5, %v6435_v50  ;;  %vm12548_vm5 = vcmp.ne.s32.totalorder %v12506_v54, %v12505_v11 }
0x11f0   : > { %7544 = vmatmul.mubr.msk.f32.vlgmr.msra.gmra.mxu1 %vm12543_vm3, %v11369_v13  ;;  %7553 = vmatprep.subr.mxu1 %v12525_v52  ;;  %v6359_v42 = vmul.f32 1.442695, %v6358_v40 }
0x11f1   : > { %7557 = vmatprep.mubr.msk.f32.mxu1 %vm12272_vm2, %v12525_v52 }
0x11f8   : > { %v8130_v58 = vpop.eup %8129 }
0x11f9   : > { %v6279_v33 = vadd.f32 1.0, %v8130_v58 }
0x11fa   : > { %v8132_v22 = vpop.eup %8131 }
0x11fb   : > { %8133 = vrcp.f32 %v6279_v33  ;;  %v6278_v41 = vadd.f32 1.0, %v8132_v22 }
0x11fd   : > { %8135 = vrcp.f32 %v6278_v41 }
0x11fe   : > { %8137 = vpow2.f32 %v6359_v42 }
0x1208   : > { %v8134_v8 = vpop.eup %8133 }
0x1209   : > { %6525 = vperm.xlu1 %8039, %v8134_v8  }
0x120a   : > { %v8136_v61 = vpop.eup %8135 }
0x120b   : > { %6520 = vperm.xlu0 %8037, %v8136_v61   ;;  %v8138_v23 = vpop.eup %8137 }
0x120c   : > { %v6361_v63 = vadd.f32 1.0, %v8138_v23  ;;  %v1110_v23 = vld [vmem:[%s12560_s9 + $0x18] sm:$0xff] }
0x120e   : > { %8139 = vrcp.f32 %v6361_v63  ;;  %v1109_v63 = vld [vmem:[%s12560_s9 + $0x10] sm:$0xff] }
0x121b   : > { %v8140_v48 = vpop.eup %8139 }
0x121c   : > { %v6517_v35 = vrot.slane %v8140_v48, %v12544_v56  ;;  %v1107_v48 = vld [vmem:[%s12560_s9] sm:$0xff]  ;;  %v1114_v56 = vld [vmem:[%s11887_s4 + $0x18] sm:$0xff] }
0x1284   : > { %v6526_v20 = vpop.permute.xlu1 %6525 }
0x1285   : > { %vm6529_vm14 = vcmp.gt.f32.partialorder %v6517_v35, %v6526_v20  ;;  %vm6531_vm9 = vcmp.eq.f32.partialorder %v6517_v35, %v6526_v20  ;;  %v1112_v20 = vld [vmem:[%s11887_s4 + $0x8] sm:$0xff] }
0x1286   : > { %vm6533_vm4 = vmand %vm6531_vm9, %vm12545_vm1  ;;  %v6521_v16 = vpop.permute.xlu0 %6520  ;;  %vm12551_vm1 = vcmask 15360  }
0x1287   : > { %vm6535_vm8 = vmor %vm6529_vm14, %vm6533_vm4  ;;  %vm6528_vm0 = vcmp.gt.f32.partialorder %v6517_v35, %v6521_v16  ;;  %vm6530_vm13 = vcmp.eq.f32.partialorder %v6517_v35, %v6521_v16  ;;  %vm12549_vm14 = vcmask 130048   ;;  %v1113_v35 = vld [vmem:[%s11887_s4 + $0x10] sm:$0xff]  ;;  %v1111_v16 = vld [vmem:[%s11887_s4] sm:$0xff] }
0x1288   : > { %vm6537_vm11 = vmand %vm12546_vm10, %vm6535_vm8  ;;  %vm12555_vm10 = vcmp.gt.f32.partialorder %v12554_v47, 0.0 }
0x1289   : > { %vm6532_vm6 = vmand %vm6530_vm13, %vm12547_vm12  ;;  %v6539_v29 = vsel %vm6537_vm11, 1.0, %v12525_v52 }
0x128a   : > { %vm6534_vm15 = vmor %vm6528_vm0, %vm6532_vm6 }
0x128b   : > { %vm6536_vm3 = vmand %vm12548_vm5, %vm6534_vm15 }
0x128c   : > { %v6538_v28 = vsel %vm6536_vm3, 1.0, %v12525_v52  ;;  %vm12550_vm9 = vmmov %vm12549_vm14 }
0x128d   : > { %7550 = vmatprep.mubr.msk.f32.mxu0 %vm12549_vm14, %v6538_v28  ;;  %vm12552_vm4 = vmmov %vm12551_vm1  ;;  %vm6748_vm14 = vcmask 123904  }
0x128e   : > { %7551 = vmatmul.mubr.msk.f32.vlgmr.msra.gmra.mxu0 %vm12550_vm9, %v6539_v29  ;;  %vm12558_vm6 = vmmov %vm12550_vm9 }
0x128f   : > { %7568 = vmatprep.mubr.msk.f32.mxu0 %vm12272_vm2, %v12525_v52  ;;  %vm12559_vm15 = vmmov %vm12558_vm6  ;;  %7561 = vmatpush3.msra.mxu0 %v1114_v56 }
0x1290   : > { %vm12561_vm9 = vmmov %vm12558_vm6  ;;  %7562 = vmatprep.subr.mxu0 %v12525_v52 }
0x1291   : > { %7563 = vmatpush3.msra.mxu0 %v1113_v35 }
0x1292   : > { %7564 = vmatprep.subr.mxu0 %v12525_v52 }
0x1293   : > { %7565 = vmatpush3.msra.mxu0 %v1112_v20 }
0x1294   : > { %7566 = vmatprep.subr.mxu0 %v12525_v52 }
0x1295   : > { %7567 = vmatpush3.msra.mxu0 %v1111_v16 }
0x12b0   : > { %v7545_v49 = vpop.f32.mrf.mxu1 }
0x12b2   : > { %v6505_v15 = vpop.f32.mrf.mxu1 }
0x134e   : > { %v7552_v51 = vpop.f32.mrf.mxu0 }
0x134f   : > { %v6624_v3 = vmul.f32 %v11369_v13, %v7552_v51 }
0x1350   : > { %v6614_v19 = vpop.f32.mrf.mxu0 }
0x1351   : > { %v6623_v6 = vmul.f32 %v11386_v14, %v6614_v19  ;;  %v6628_v54 = vsel %vm12551_vm1, %v6624_v3, 0.0 }
0x1352   : > { %6629 = vadd.xlane.f32.xlu0 %v6628_v54 }
0x1353   : > { %v6625_v59 = vsel %vm12552_vm4, %v6623_v6, 0.0  ;;  %vm12562_vm4 = vcmask 261120  }
0x1354   : > { %6626 = vadd.xlane.f32.xlu1 %v6625_v59 }
0x13db   : > { %v6630_v12 = vpop.xlane.xlu0 %6629 }
0x13dc   : > { %vm6632_vm8 = vcmp.lt.f32.partialorder %v6630_v12, %v7545_v49 }
0x13dd   : > { %vm6634_vm0 = vmand %vm4826_vm7, %vm6632_vm8  ;;  %v6627_v37 = vpop.xlane.xlu1 %6626 }
0x13de   : > { %v6636_v53 = vsel %vm6634_vm0, 1.0, %v12525_v52  ;;  %vm6631_vm13 = vcmp.lt.f32.partialorder %v6627_v37, %v6505_v15  ;;  %vm12563_vm8 = vmmov %vm12562_vm4 }
0x13df   : > { %v6659_v17 = vmul.f32 %v8134_v8, %v6636_v53  ;;  %vm6633_vm11 = vmand %vm12555_vm10, %vm6631_vm13  ;;  %v6755_v57 = vmul.f32 %v11369_v13, %v6636_v53 }
0x13e0   : > { %v6635_v62 = vsel %vm6633_vm11, 1.0, %v12525_v52  ;;  %vm12564_vm10 = vmmov %vm12562_vm4 }
0x13e1   : > { %v8040_v36 = vpack.i.bf16 %v6636_v53, %v6635_v62  ;;  %6667 = vperm.xlu1 %8039, %v6659_v17   ;;  %v6658_v25 = vmul.f32 %v8136_v61, %v6635_v62  ;;  %v6754_v0 = vmul.f32 %v11386_v14, %v6635_v62  ;;  %vm6757_vm12 = vcmp.gt.f32.partialorder %v6755_v57, 0.0  ;;  %vm12565_vm11 = vmmov %vm12562_vm4 }
0x13e2   : > { %v6759_v60 = vsel %vm6757_vm12, 1, %v12556_v1  ;;  %vm6814_vm12 = vcmp.eq.s32.totalorder %v12505_v11, 1 }
0x13e3   : > { %8041 = vperm.xlu0 %8037, %v8040_v36   ;;  %vm6756_vm7 = vcmp.gt.f32.partialorder %v6754_v0, 0.0 }
0x13e4   : > { %v6758_v31 = vsel %vm6756_vm7, 1, %v12556_v1  ;;  %vm6779_vm7 = vcmp.eq.s32.totalorder %v12505_v11, 0 }
0x13e5   : > { %6662 = vperm.xlu1 %8039, %v6658_v25  }
0x13e7   : > { %8046 = vrot.lane.b32.xlu0 %v8040_v36, %s8283_s3  ;;  %s7249_s3 = sshll.u32 %s8475_s0, 5 }
0x13e8   : > { %s11486_s4 = scalar_lea.hbm %s8452_s6, %s7249_s3 }
0x13eb   : > { %6761 = vperm.xlu0 %8037, %v6758_v31  }
0x13ef   : > { %6764 = vperm.xlu0 %8037, %v6759_v60  }
0x13f3   : > { %8050 = vset.pattern.permute.xlu0 %v12557_v26 }
0x145c   : > { %v6668_v39 = vpop.permute.xlu1 %6667 }
0x145d   : > { %v6671_v24 = vmul.f32 %v6668_v39, %v11355_v55  ;;  %v6780_v39 = vsel %vm6779_vm7, 1.0, %v12525_v52 }
0x145e   : > { %v8042_v32 = vpop.permute.xlu0 %8041 }
0x145f   : > { %v11437_v46 = vmax.f32 %v6671_v24, 0.0  ;;  %v8044_v18 = vunpack.i.h.bf16 %v8042_v32  ;;  %v8043_v9 = vunpack.i.l.bf16 %v8042_v32  ;;  %v6815_v24 = vsel %vm6814_vm12, 1.0, %v12525_v52 }
0x1460   : > { %v6663_v2 = vpop.permute.xlu1 %6662 }
0x1461   : > { %v6648_v27 = vmul.f32 %v8044_v18, %v12475_v30  ;;  %v6647_v34 = vmul.f32 %v8043_v9, %v12476_v21  ;;  %v6670_v38 = vmul.f32 %v6663_v2, %v11351_v4  ;;  %7554 = vmatpush3.msra.mxu1 %v11437_v46 }
0x1462   : > { %v8047_v5 = vpop.permute.xlu0 %8046  ;;  %7555 = vmatprep.subr.mxu1 %v12525_v52 }
0x1463   : > { %v6650_v58 = vsel %vm12558_vm6, %v6648_v27, 0.0  ;;  %v6649_v55 = vsel %vm12559_vm15, %v6647_v34, 0.0  ;;  %v6672_v33 = vmax.f32 %v6670_v38, 0.0  ;;  %v8049_v22 = vunpack.i.h.bf16 %v8047_v5  ;;  %vm12566_vm15 = vmmov %vm12562_vm4 }
0x1464   : > { %v6651_v41 = vadd.f32 %v6650_v58, %v6649_v55  ;;  %v8048_v8 = vunpack.i.l.bf16 %v8047_v5  ;;  %vm6979_vm6 = vcmask 254976  }
0x1465   : > { %7556 = vmatpush3.msra.mxu1 %v6672_v33  ;;  %v6790_v30 = vmul.f32 %v11369_v13, %v8049_v22 }
0x1466   : > { %v6652_v61 = vrot.slane %v6651_v41, 4  ;;  %v6789_v21 = vmul.f32 %v11386_v14, %v8048_v8  ;;  %7571 = vmatprep.subr.mxu1 %v12525_v52  ;;  %v6762_v28 = vpop.permute.xlu0 %6761 }
0x1467   : > { %vm6792_vm3 = vcmp.gt.f32.partialorder %v6790_v30, 0.0  ;;  %vm6766_vm1 = vcmp.eq.s32.totalorder %v6762_v28, 1 }
0x1468   : > { %v6653_v4 = vadd.f32 %v6652_v61, %v6651_v41  ;;  %vm6791_vm5 = vcmp.gt.f32.partialorder %v6789_v21, 0.0  ;;  %v6794_v50 = vsel %vm6792_vm3, 1, %v12556_v1  ;;  %v6768_v3 = vsel %vm6766_vm1, %v6672_v33, 0.0 }
0x1469   : > { %v6793_v44 = vsel %vm6791_vm5, 1, %v12556_v1  ;;  %v6770_v6 = vsel %vm12563_vm8, %v6768_v3, -inf  ;;  %vm12567_vm5 = vmmov %vm12562_vm4  ;;  %vm6984_vm3 = vcmask 517376  }
0x146a   : > { %v6654_v45 = vrot.slane %v6653_v4, 2  ;;  %6796 = vperm.xlu0 %8050, %v6793_v44   ;;  %v6765_v29 = vpop.permute.xlu0 %6764 }
0x146c   : > { %v6655_v43 = vadd.f32 %v6654_v45, %v6653_v4 }
0x146e   : > { %v6656_v40 = vrot.slane %v6655_v43, 1  ;;  %6799 = vperm.xlu0 %8050, %v6794_v50  }
0x1470   : > { %v6657_v13 = vadd.f32 %v6656_v40, %v6655_v43 }
0x1472   : > { %v6674_v14 = vmul.f32 %v11381_v7, %v6657_v13  ;;  %v1108_v7 = vld [vmem:[%s12560_s9 + $0x8] sm:$0xff]  ;;  %s6991_s9 = scalar_lea.sflag [#allocation4], %s12568_s16 }
0x1474   : > { %7558 = vmatmul.mubr.msk.f32.vlgmr.msra.gmra.mxu1 %vm12561_vm9, %v6674_v14  ;;  %v6749_v42 = vsel %vm6748_vm14, %v6674_v14, 0.0 }
0x1475   : > { %6750 = vadd.xlane.f32.xlu1 %v6749_v42  ;;  %7579 = vmatprep.mubr.msk.f32.mxu1 %vm12272_vm2, %v12525_v52  ;;  %vm6767_vm2 = vcmp.eq.s32.totalorder %v6765_v29, 1 }
0x1476   : > { %7572 = vmatpush3.msra.mxu1 %v1110_v23  ;;  %v6769_v51 = vsel %vm6767_vm2, %v11437_v46, 0.0 }
0x1477   : > { %7573 = vmatprep.subr.mxu1 %v12525_v52  ;;  %v6771_v19 = vsel %vm12562_vm4, %v6769_v51, -inf }
0x1478   : > { %7574 = vmatpush3.msra.mxu1 %v1109_v63  ;;  %v6772_v54 = vmax.f32 %v6770_v6, %v6771_v19 }
0x1479   : > { %7575 = vmatprep.subr.mxu1 %v12525_v52 }
0x147a   : > { %7576 = vmatpush3.msra.mxu1 %v1108_v7  ;;  %v6773_v59 = vrot.slane %v6772_v54, 4 }
0x147b   : > { %7577 = vmatprep.subr.mxu1 %v12525_v52 }
0x147c   : > { %7578 = vmatpush3.msra.mxu1 %v1107_v48  ;;  %v6774_v12 = vmax.f32 %v6772_v54, %v6773_v59 }
0x147e   : > { %v6775_v37 = vrot.slane %v6774_v12, 2 }
0x1480   : > { %v6776_v36 = vmax.f32 %v6774_v12, %v6775_v37 }
0x1482   : > { %v6777_v57 = vrot.slane %v6776_v36, 1 }
0x1484   : > { %v6778_v60 = vmax.f32 %v6776_v36, %v6777_v57 }
0x14e5   : > { %v6797_v49 = vpop.permute.xlu0 %6796 }
0x14e6   : > { %vm6801_vm0 = vcmp.eq.s32.totalorder %v6797_v49, 1 }
0x14e7   : > { %v6803_v15 = vsel %vm6801_vm0, %v6672_v33, 0.0 }
0x14e8   : > { %v6805_v17 = vsel %vm12564_vm10, %v6803_v15, -inf }
0x14e9   : > { %v6800_v10 = vpop.permute.xlu0 %6799 }
0x14ea   : > { %vm6802_vm13 = vcmp.eq.s32.totalorder %v6800_v10, 1 }
0x14eb   : > { %v6804_v53 = vsel %vm6802_vm13, %v11437_v46, 0.0  ;;  %v6781_v46 = vmul.f32 %v6780_v39, %v6778_v60 }
0x14ec   : > { %v6806_v47 = vsel %vm12565_vm11, %v6804_v53, -inf }
0x14ed   : > { %v6807_v62 = vmax.f32 %v6805_v17, %v6806_v47 }
0x14ef   : > { %v6808_v25 = vrot.slane %v6807_v62, 4 }
0x14f1   : > { %v6809_v0 = vmax.f32 %v6807_v62, %v6808_v25 }
0x14f3   : > { %v6810_v1 = vrot.slane %v6809_v0, 2 }
0x14f5   : > { %v6811_v31 = vmax.f32 %v6809_v0, %v6810_v1 }
0x14f7   : > { %v6812_v26 = vrot.slane %v6811_v31, 1 }
0x14f9   : > { %v6813_v32 = vmax.f32 %v6811_v31, %v6812_v26 }
0x14fb   : > { %v6816_v18 = vmul.f32 %v6815_v24, %v6813_v32 }
0x14fd   : > { %v6817_v9 = vadd.f32 %v6816_v18, %v6781_v46 }
0x14fe   : > { %v6751_v11 = vpop.xlane.xlu1 %6750 }
0x14ff   : > { %7580 = vmatmul.mubr.msk.f32.vlgmr.msra.gmra.mxu1 %vm12566_vm15, %v6817_v9  ;;  %6980 = vst.msk [vmem:[%s1031_s5] sm:$0x3] %vm6979_vm6, %v6817_v9  ;;  %8141 = vrcp.f32 %v6751_v11 }
0x150c   : > { %v8142_v2 = vpop.eup %8141 }
0x1534   : > { %v6744_v27 = vpop.f32.mrf.mxu1 }
0x1535   : > { %v6753_v52 = vmul.f32 %v8142_v2, %v6744_v27 }
0x1536   : > { %v7559_v34 = vpop.f32.mrf.mxu1 }
0x1537   : > { %6981 = vrot.lane.b32.xlu0 %v6753_v52, %s8284_s11  ;;  %7569 = vmatmul.mubr.msk.f32.vlgmr.msra.gmra.mxu0 %vm12567_vm5, %v6753_v52  ;;  %s8159_s11 = scalar_lea.vmem %s8158_s14, 64 }
0x1538   : > { %p8161_p1 = scmp.lt.s32.totalorder %s8159_s11, %s8153_s12 }
0x153a   : > { %p8162_p2 = por %p8161_p1, %p8160_p0 }
0x153c   : > { %p8163_p3 = pnand %p8162_p2, %p8156_p13 }
0x15a9   : > { %v6982_v38 = vpop.permute.xlu0 %6981 }
0x15aa   : > { %6985 = vst.msk [vmem:[%s1031_s5] sm:$0x3] %vm6984_vm3, %v6982_v38 }
0x15ab   : > { %8166 = shalt.err (!%p8163_p3)
}
0x15ac   : > { %s8167_s0 = scalar_lea.hbm %s11486_s4, 32  ;;  %s8171_s5 = scalar_lea.hbm %s8452_s6, 64 }
0x15ad   : > { %p8168_p4 = scmp.ne.s32.totalorder %s11486_s4, %s8167_s0  ;;  %p8172_p9 = scmp.lt.s32.totalorder %s11486_s4, %s8452_s6 }
0x15ae   : > { %p8173_p10 = scmp.lt.s32.totalorder %s8171_s5, %s8167_s0 }
0x15af   : > { %p8169_p7 = pnand %p8168_p4, %p8492_p5 }
0x15b0   : > { %p8174_p11 = por %p8173_p10, %p8172_p9 }
0x15b1   : > { %p8170_p8 = pneg %p8169_p7 }
0x15b3   : > { %p8175_p12 = pnand %p8174_p11, %p8170_p8 }
0x15b5   : > { %8178 = shalt.err (!%p8175_p12)
}
0x15b6   : > { %7597 = dma.vmem_to_hbm [thread:$0]  (%p8492_p5), %s7008_s8, 32, %s11486_s4, %s6991_s9   ;;  %v7247_v55 = vld [vmem:[#allocation2] ss:$0 sm:$0xff]  ;;  %vm6977_vm14 = vcmask 1024  }
0x15b7   : > { %s12569_s13 = sshll.u32 %s8518_s22, 1 }
0x15b8   : > { %s1054_s14 = scalar_lea.vmem %s8447_s20, %s12569_s13 }
0x15bf   : > { %v6960_v5 = vpop.f32.mrf.mxu1 }
0x15c1   : > { %v7581_v58 = vpop.f32.mrf.mxu1 }
0x15f7   : > { %v6887_v33 = vpop.f32.mrf.mxu0 }
0x15f8   : > { %v6961_v22 = vadd.f32 %v6960_v5, %v6887_v33 }
0x15f9   : > { %v7570_v41 = vpop.f32.mrf.mxu0 }
0x15fa   : > { %v6970_v8 = vadd.f32 %v7247_v55, %v6961_v22 }
0x15fc   : > { %v6971_v61 = vsub.f32 0.0, %v6970_v8 }
0x15fe   : > { %v6972_v30 = vmul.f32 1.442695, %v6971_v61 }
0x1600   : > { %8143 = vpow2.f32 %v6972_v30 }
0x160d   : > { %v8144_v21 = vpop.eup %8143 }
0x160e   : > { %v6974_v4 = vadd.f32 1.0, %v8144_v21 }
0x1610   : > { %8145 = vrcp.f32 %v6974_v4 }
0x161d   : > { %v8146_v44 = vpop.eup %8145 }
0x161e   : > { %6978 = vst.msk [vmem:[%s1054_s14] sm:$0x3] %vm6977_vm14, %v8146_v44 }
0x161f PF: > { %p7603_p5 = scmp.ge.s32.totalorder %s8213_s7, 2  ;;  %s7026_s4 = sand.u32 1, %s8201_s28  }
0x1620   : > { %s7027_s18 = scalar_lea.sflag [#allocation4], %s7026_s4 }
0x1621   : > { %p7600_p13 = pnand %p7603_p5, %p8496_p6 }
0x1623   : > { %p7601_p0 = pneg %p7600_p13 }
0x1625   : > { %8196 = dma.done.wait (%p7601_p0), %s7027_s18, 32  }
0x1626   : > { %8198 = vsyncadd (%p7601_p0), %s7027_s18, 4294967264  ;;  %p78_p1 = scmp.ge.s32.totalorder %s8479_s10, 4   ;;  %s12570_s28 = smov %s8205_s1 }
0x1627   : > { %s12571_s1 = smov %s8209_s2  ;;  %s12572_s2 = smov %s8490_s15 }
0x1628   : > { %s12573_s7 = smov %s8479_s10  ;;  %80 = sbr.rel (!%p78_p1) target bundleno = 64 (0x40), region = 232 }
0x162d   :  { %7032 = vsyncpa [#allocation4], 1 }
0x162e   :  { %7034 = vsyncpa [#allocation4 + $0x1], 1 }

</bundles_post_ra>
